<compile_context>
chip_gen: v6e
topology: v6e:2x2x1
jax: 0.10.0
libtpu: 0.0.40
codegen_flags: <defaults>
</compile_context>

<pallas_src>
import numpy as np
import jax
import jax.numpy as jnp
from jax.experimental import pallas as pl
from jax.experimental.pallas import tpu as pltpu


# ---------------------------------------------------------------------------
# in-kernel helpers
# ---------------------------------------------------------------------------
def _mish(x):
    """mish(x) = x * tanh(softplus(x)) = x * ((1+e^x)^2 - 1)/((1+e^x)^2 + 1).

    One exp + one exact divide.  exp argument clamped at 20 so the square
    never overflows f32; for x >= 20 the ratio is already 1.0 in f32.
    """
    t = jnp.exp(jnp.minimum(x, 20.0))
    u = (1.0 + t) * (1.0 + t)
    return x * ((u - 1.0) / (u + 1.0))


def _conv3x3_stride1(xflat, w_ref, h, w):
    """3x3 / stride-1 / pad-1 conv of a flattened (h*w, Cin) feature map.

    In-kernel im2col: the feature map is vertically zero-padded (pad rows are
    a multiple of 8 so the concat stays tile-aligned), each of the 9 taps is
    a constant row-shift of the padded buffer, left/right image edges are
    masked with iota-derived column masks, and each tap does one accumulating
    MXU matmul against its (Cin, Cout) weight slice.
    Returns the *linear* conv output (h*w, Cout); bias/BN/Mish applied later.
    """
    hw, cin = xflat.shape
    pad = w + 8                                   # multiple of 8 for h,w pow2
    zrows = jnp.zeros((pad, cin), jnp.float32)
    xp = jnp.concatenate([zrows, xflat, zrows], axis=0)   # ((h+2)*w + 16, cin)

    col = jax.lax.broadcasted_iota(jnp.int32, (hw, 1), 0) & (w - 1)
    mask_l = (col > 0).astype(jnp.float32)        # tap col-offset -1 invalid at c==0
    mask_r = (col < (w - 1)).astype(jnp.float32)  # tap col-offset +1 invalid at c==w-1

    acc = None
    for di in range(3):
        for dj in range(3):
            start = pad + (di - 1) * w + (dj - 1)          # static, >= 7
            slab = xp[start:start + hw, :]                 # (hw, cin)
            if dj == 0:
                slab = slab * mask_l
            elif dj == 2:
                slab = slab * mask_r
            part = jnp.dot(slab, w_ref[di * 3 + dj],
                           preferred_element_type=jnp.float32)
            acc = part if acc is None else acc + part
    return acc                                             # (hw, cout) f32


def _make_fused_kernel(img, h1, w1):
    """Full network for `img` images per grid step (statically unrolled)."""
    h2, w2 = h1 // 2, w1 // 2

    def kernel(x_ref, w1_ref, b1_ref, w2_ref, b2_ref, w3_ref, b3_ref,
               d2_ref, d3_ref, f1w_ref, f1b_ref, f2w_ref, f2b_ref, o_ref):
        pooled = []
        for i in range(img):
            x = x_ref[i]                                   # (h1*w1, 3)
            # conv1 (s=1,p=1) + folded BN + Mish
            y = _mish(_conv3x3_stride1(x, w1_ref, h1, w1) + b1_ref[...])
            # conv2 (s=2,p=1): full-res linear conv, stride-2 row selection,
            # then folded-BN bias + Mish (pointwise, so order is exact).
            y = _conv3x3_stride1(y, w2_ref, h1, w1)        # (h1*w1, 64)
            y = jnp.dot(d2_ref[...], y, preferred_element_type=jnp.float32)
            y = _mish(y + b2_ref[...])                     # (h2*w2, 64)
            # conv3 (s=2,p=1)
            y = _conv3x3_stride1(y, w3_ref, h2, w2)        # (h2*w2, 128)
            y = jnp.dot(d3_ref[...], y, preferred_element_type=jnp.float32)
            y = _mish(y + b3_ref[...])                     # (h3*w3, 128)
            # adaptive avg pool to (1,1)
            pooled.append(jnp.mean(y, axis=0, keepdims=True))   # (1, 128)
        feats = pooled[0] if img == 1 else jnp.concatenate(pooled, axis=0)
        # head, batched over the images of this grid step
        hid = _mish(jnp.dot(feats, f1w_ref[...],
                            preferred_element_type=jnp.float32) + f1b_ref[...])
        logits = jnp.dot(hid, f2w_ref[...],
                         preferred_element_type=jnp.float32) + f2b_ref[...]
        o_ref[0] = logits                                  # (img, 128) lane-dense

    return kernel


# ---------------------------------------------------------------------------
# wrapper-side constants / parameters
# ---------------------------------------------------------------------------
def _downsample_matrix(hi, wi):
    """0/1 matrix selecting the stride-2 rows of a flattened (hi*wi) grid."""
    ho, wo = hi // 2, wi // 2
    d = np.zeros((ho * wo, hi * wi), np.float32)
    for ro in range(ho):
        for co in range(wo):
            d[ro * wo + co, (2 * ro) * wi + 2 * co] = 1.0
    return jnp.asarray(d)


def make_params(key):
    """PyTorch-default-style init, BatchNorm (eval) folded into conv W/b."""
    eps = 1e-5
    ks = jax.random.split(key, 10)

    def uniform(k, shape, bound):
        return jax.random.uniform(k, shape, jnp.float32, -bound, bound)

    def conv_block(kw, kb, cin, cout):
        bound = 1.0 / float(np.sqrt(cin * 9))
        w = uniform(kw, (cout, cin, 3, 3), bound)          # PyTorch OIHW
        b = uniform(kb, (cout,), bound)
        # BatchNorm eval: gamma=1, beta=0, running_mean=0, running_var=1
        scale = 1.0 / jnp.sqrt(1.0 + eps)
        wk = jnp.transpose(w, (2, 3, 1, 0)).reshape(9, cin, cout) * scale
        bk = (b * scale).reshape(1, cout)
        return wk.astype(jnp.float32), bk.astype(jnp.float32)

    p = {}
    p["conv1"] = conv_block(ks[0], ks[1], 3, 32)
    p["conv2"] = conv_block(ks[2], ks[3], 32, 64)
    p["conv3"] = conv_block(ks[4], ks[5], 64, 128)

    b1 = 1.0 / float(np.sqrt(128.0))
    f1w = uniform(ks[6], (128, 64), b1)
    f1b = uniform(ks[7], (1, 64), b1)
    b2 = 1.0 / float(np.sqrt(64.0))
    f2w = uniform(ks[8], (64, 10), b2)
    f2b = uniform(ks[9], (1, 10), b2)
    # Lane-dense head store: pad fc2 output width 10 -> 128 with zero columns.
    p["fc1"] = (f1w, f1b)
    p["fc2"] = (jnp.pad(f2w, ((0, 0), (0, 118))),
                jnp.pad(f2b, ((0, 0), (0, 118))))
    return p


def _images_per_step(n):
    # Batch up to 8 images per grid step, but keep >=2 parallel grid steps
    # (v7x megacore) and require img | n.
    img = max(1, min(8, n // 2))
    while n % img:
        img -= 1
    return img


# ---------------------------------------------------------------------------
# forward
# ---------------------------------------------------------------------------
@jax.jit
def advanced_nn_forward(x_nchw, params):
    n, cin, h1, w1 = x_nchw.shape
    assert cin == 3, "AdvancedNN expects 3 input channels"
    assert h1 % 4 == 0 and w1 % 4 == 0, "spatial dims must be multiples of 4"
    assert (w1 & (w1 - 1)) == 0, "width must be a power of two (edge masks)"
    h2, w2 = h1 // 2, w1 // 2
    h3, w3 = h2 // 2, w2 // 2

    img = _images_per_step(n)
    n_steps = n // img

    # NCHW -> flattened NHWC rows; f32 end-to-end.
    x_flat = jnp.transpose(x_nchw, (0, 2, 3, 1)).reshape(n, h1 * w1, cin)
    x_flat = x_flat.astype(jnp.float32)

    d2 = _downsample_matrix(h1, w1)        # (h2*w2, h1*w1)
    d3 = _downsample_matrix(h2, w2)        # (h3*w3, h2*w2)

    w1k, b1k = params["conv1"]
    w2k, b2k = params["conv2"]
    w3k, b3k = params["conv3"]
    f1w, f1b = params["fc1"]
    f2w, f2b = params["fc2"]

    kernel = _make_fused_kernel(img, h1, w1)

    def _const_spec(a):
        if a.ndim == 3:
            return pl.BlockSpec(a.shape, lambda i: (0, 0, 0))
        return pl.BlockSpec(a.shape, lambda i: (0, 0))

    in_specs = [pl.BlockSpec((img, h1 * w1, cin), lambda i: (i, 0, 0))]
    consts = (w1k, b1k, w2k, b2k, w3k, b3k, d2, d3, f1w, f1b, f2w, f2b)
    in_specs += [_const_spec(a) for a in consts]
    out_specs = pl.BlockSpec((1, img, 128), lambda i: (i, 0, 0))

    flops_per_img = 2 * (h1 * w1 * 9 * 3 * 32
                         + h1 * w1 * 9 * 32 * 64
                         + h2 * w2 * h1 * w1 * 64
                         + h2 * w2 * 9 * 64 * 128
                         + h3 * w3 * h2 * w2 * 128
                         + 128 * 64 + 64 * 128)
    const_bytes = int(sum(a.size for a in consts)) * 4
    cost = pl.CostEstimate(
        flops=flops_per_img * n,
        transcendentals=n * (h1 * w1 * 32 + h2 * w2 * 64 + h3 * w3 * 128 + 64),
        bytes_accessed=int(x_flat.size) * 4 + const_bytes + n * 128 * 4,
    )

    out = pl.pallas_call(
        kernel,
        out_shape=jax.ShapeDtypeStruct((n_steps, img, 128), jnp.float32),
        grid_spec=pltpu.PrefetchScalarGridSpec(
            num_scalar_prefetch=0,
            grid=(n_steps,),
            in_specs=in_specs,
            out_specs=out_specs,
        ),
        compiler_params=pltpu.CompilerParams(
            dimension_semantics=("parallel",),
            vmem_limit_bytes=32 * 1024 * 1024,   # v7x-safe, ~10x headroom
        ),
        cost_estimate=cost,
    )(x_flat, *consts)

    return out.reshape(n, 128)[:, :10]


# ---------------------------------------------------------------------------
# pure-JAX (XLA) reference for correctness checking
# ---------------------------------------------------------------------------
def _reference_forward(x_nchw, params):
    x = jnp.transpose(x_nchw, (0, 2, 3, 1)).astype(jnp.float32)

    def mish(v):
        return v * jnp.tanh(jax.nn.softplus(v))

    def conv(v, wk, bk, stride):
        k = wk.reshape(3, 3, wk.shape[1], wk.shape[2])     # HWIO
        y = jax.lax.conv_general_dilated(
            v, k, (stride, stride), ((1, 1), (1, 1)),
            dimension_numbers=("NHWC", "HWIO", "NHWC"))
        return mish(y + bk.reshape(1, 1, 1, -1))

    v = conv(x, *params["conv1"], 1)
    v = conv(v, *params["conv2"], 2)
    v = conv(v, *params["conv3"], 2)
    feats = jnp.mean(v, axis=(1, 2))                       # adaptive pool (1,1)
    f1w, f1b = params["fc1"]
    f2w, f2b = params["fc2"]
    h = mish(feats @ f1w + f1b)
    return (h @ f2w + f2b)[:, :10]


if __name__ == "__main__":
    key = jax.random.PRNGKey(0)
    pkey, xkey = jax.random.split(key)
    params = make_params(pkey)

    # Small deterministic NCHW input, matching the PyTorch module's layout.
    x = jax.random.normal(xkey, (2, 3, 16, 16), jnp.float32)

    out = advanced_nn_forward(x, params)
    out = jax.block_until_ready(out)
    assert out.shape == (2, 10), out.shape
    assert bool(jnp.all(jnp.isfinite(out)))

    ref = jax.block_until_ready(_reference_forward(x, params))
    np.testing.assert_allclose(np.asarray(out), np.asarray(ref),
                               rtol=2e-3, atol=2e-3)
    print("KERNEL_OK")
</pallas_src>

<mosaic_0001>
module attributes {stable_mosaic.version = 11 : i64} {
  func.func @kernel(%arg0: i32, %arg1: memref<1x256x3xf32, #tpu.memory_space<vmem>>, %arg2: memref<9x3x32xf32, #tpu.memory_space<vmem>>, %arg3: memref<1x32xf32, #tpu.memory_space<vmem>>, %arg4: memref<9x32x64xf32, #tpu.memory_space<vmem>>, %arg5: memref<1x64xf32, #tpu.memory_space<vmem>>, %arg6: memref<9x64x128xf32, #tpu.memory_space<vmem>>, %arg7: memref<1x128xf32, #tpu.memory_space<vmem>>, %arg8: memref<64x256xf32, #tpu.memory_space<vmem>>, %arg9: memref<16x64xf32, #tpu.memory_space<vmem>>, %arg10: memref<128x64xf32, #tpu.memory_space<vmem>>, %arg11: memref<1x64xf32, #tpu.memory_space<vmem>>, %arg12: memref<64x128xf32, #tpu.memory_space<vmem>>, %arg13: memref<1x128xf32, #tpu.memory_space<vmem>>, %arg14: memref<1x1x128xf32, #tpu.memory_space<vmem>>) attributes {dimension_semantics = [#tpu.dimension_semantics<parallel>], iteration_bounds = array<i64: 2>, scalar_prefetch = 0 : i64, scratch_operands = 0 : i64, tpu.core_type = #tpu.core_type<tc>, window_params = [{transform_indices = @transform_0, window_bounds = array<i64: 1, 256, 3>}, {pipeline_mode = #tpu.pipeline_mode<synchronous>, transform_indices = @transform_1, window_bounds = array<i64: 9, 3, 32>}, {pipeline_mode = #tpu.pipeline_mode<synchronous>, transform_indices = @transform_2, window_bounds = array<i64: 1, 32>}, {pipeline_mode = #tpu.pipeline_mode<synchronous>, transform_indices = @transform_3, window_bounds = array<i64: 9, 32, 64>}, {pipeline_mode = #tpu.pipeline_mode<synchronous>, transform_indices = @transform_4, window_bounds = array<i64: 1, 64>}, {pipeline_mode = #tpu.pipeline_mode<synchronous>, transform_indices = @transform_5, window_bounds = array<i64: 9, 64, 128>}, {pipeline_mode = #tpu.pipeline_mode<synchronous>, transform_indices = @transform_6, window_bounds = array<i64: 1, 128>}, {pipeline_mode = #tpu.pipeline_mode<synchronous>, transform_indices = @transform_7, window_bounds = array<i64: 64, 256>}, {pipeline_mode = #tpu.pipeline_mode<synchronous>, transform_indices = @transform_8, window_bounds = array<i64: 16, 64>}, {pipeline_mode = #tpu.pipeline_mode<synchronous>, transform_indices = @transform_9, window_bounds = array<i64: 128, 64>}, {pipeline_mode = #tpu.pipeline_mode<synchronous>, transform_indices = @transform_10, window_bounds = array<i64: 1, 64>}, {pipeline_mode = #tpu.pipeline_mode<synchronous>, transform_indices = @transform_11, window_bounds = array<i64: 64, 128>}, {pipeline_mode = #tpu.pipeline_mode<synchronous>, transform_indices = @transform_12, window_bounds = array<i64: 1, 128>}, {transform_indices = @transform_13, window_bounds = array<i64: 1, 1, 128>}]} {
    %c0 = arith.constant 0 : index
    %c0_0 = arith.constant 0 : index
    %c0_1 = arith.constant 0 : index
    %0 = vector.load %arg1[%c0, %c0_0, %c0_1] : memref<1x256x3xf32, #tpu.memory_space<vmem>>, vector<1x256x3xf32>
    %1 = vector.shape_cast %0 : vector<1x256x3xf32> to vector<256x3xf32>
    %cst = arith.constant 0.000000e+00 : f32
    %2 = vector.broadcast %cst : f32 to vector<24x3xf32>
    %3 = tpu.concatenate %2, %1, %2 in 0 : vector<24x3xf32>, vector<256x3xf32>, vector<24x3xf32> -> vector<304x3xf32>
    %4 = tpu.iota {dimensions = array<i32: 0>} : vector<256x1xi32>
    %c15_i32 = arith.constant 15 : i32
    %5 = vector.broadcast %c15_i32 : i32 to vector<256x1xi32>
    %6 = arith.andi %4, %5 : vector<256x1xi32>
    %c0_i32 = arith.constant 0 : i32
    %7 = vector.broadcast %c0_i32 : i32 to vector<256x1xi32>
    %8 = arith.cmpi sgt, %6, %7 : vector<256x1xi32>
    %9 = arith.extui %8 : vector<256x1xi1> to vector<256x1xi32>
    %10 = arith.sitofp %9 : vector<256x1xi32> to vector<256x1xf32>
    %c15_i32_2 = arith.constant 15 : i32
    %11 = vector.broadcast %c15_i32_2 : i32 to vector<256x1xi32>
    %12 = arith.cmpi slt, %6, %11 : vector<256x1xi32>
    %13 = arith.extui %12 : vector<256x1xi1> to vector<256x1xi32>
    %14 = arith.sitofp %13 : vector<256x1xi32> to vector<256x1xf32>
    %15 = vector.extract_strided_slice %3 {offsets = [7, 0], sizes = [256, 3], strides = [1, 1]} : vector<304x3xf32> to vector<256x3xf32>
    %16 = vector.broadcast %10 : vector<256x1xf32> to vector<256x3xf32>
    %17 = arith.mulf %15, %16 : vector<256x3xf32>
    %c0_3 = arith.constant 0 : index
    %c0_4 = arith.constant 0 : index
    %c0_5 = arith.constant 0 : index
    %18 = vector.load %arg2[%c0_3, %c0_4, %c0_5] : memref<9x3x32xf32, #tpu.memory_space<vmem>>, vector<1x3x32xf32>
    %19 = vector.shape_cast %18 : vector<1x3x32xf32> to vector<3x32xf32>
    %cst_6 = arith.constant dense<0.000000e+00> : vector<256x32xf32>
    %20 = tpu.matmul %17, %19, %cst_6 {dimension_numbers = #tpu.dot_dimension_numbers<[1], [0], [0], [1], [0, 0, 1, 1], [], []>} : vector<256x3xf32>, vector<3x32xf32>, vector<256x32xf32> -> vector<256x32xf32>
    %21 = vector.extract_strided_slice %3 {offsets = [8, 0], sizes = [256, 3], strides = [1, 1]} : vector<304x3xf32> to vector<256x3xf32>
    %c1 = arith.constant 1 : index
    %c0_7 = arith.constant 0 : index
    %c0_8 = arith.constant 0 : index
    %22 = vector.load %arg2[%c1, %c0_7, %c0_8] : memref<9x3x32xf32, #tpu.memory_space<vmem>>, vector<1x3x32xf32>
    %23 = vector.shape_cast %22 : vector<1x3x32xf32> to vector<3x32xf32>
    %cst_9 = arith.constant dense<0.000000e+00> : vector<256x32xf32>
    %24 = tpu.matmul %21, %23, %cst_9 {dimension_numbers = #tpu.dot_dimension_numbers<[1], [0], [0], [1], [0, 0, 1, 1], [], []>} : vector<256x3xf32>, vector<3x32xf32>, vector<256x32xf32> -> vector<256x32xf32>
    %25 = arith.addf %20, %24 : vector<256x32xf32>
    %26 = vector.extract_strided_slice %3 {offsets = [9, 0], sizes = [256, 3], strides = [1, 1]} : vector<304x3xf32> to vector<256x3xf32>
    %27 = vector.broadcast %14 : vector<256x1xf32> to vector<256x3xf32>
    %28 = arith.mulf %26, %27 : vector<256x3xf32>
    %c2 = arith.constant 2 : index
    %c0_10 = arith.constant 0 : index
    %c0_11 = arith.constant 0 : index
    %29 = vector.load %arg2[%c2, %c0_10, %c0_11] : memref<9x3x32xf32, #tpu.memory_space<vmem>>, vector<1x3x32xf32>
    %30 = vector.shape_cast %29 : vector<1x3x32xf32> to vector<3x32xf32>
    %cst_12 = arith.constant dense<0.000000e+00> : vector<256x32xf32>
    %31 = tpu.matmul %28, %30, %cst_12 {dimension_numbers = #tpu.dot_dimension_numbers<[1], [0], [0], [1], [0, 0, 1, 1], [], []>} : vector<256x3xf32>, vector<3x32xf32>, vector<256x32xf32> -> vector<256x32xf32>
    %32 = arith.addf %25, %31 : vector<256x32xf32>
    %33 = vector.extract_strided_slice %3 {offsets = [23, 0], sizes = [256, 3], strides = [1, 1]} : vector<304x3xf32> to vector<256x3xf32>
    %34 = vector.broadcast %10 : vector<256x1xf32> to vector<256x3xf32>
    %35 = arith.mulf %33, %34 : vector<256x3xf32>
    %c3 = arith.constant 3 : index
    %c0_13 = arith.constant 0 : index
    %c0_14 = arith.constant 0 : index
    %36 = vector.load %arg2[%c3, %c0_13, %c0_14] : memref<9x3x32xf32, #tpu.memory_space<vmem>>, vector<1x3x32xf32>
    %37 = vector.shape_cast %36 : vector<1x3x32xf32> to vector<3x32xf32>
    %cst_15 = arith.constant dense<0.000000e+00> : vector<256x32xf32>
    %38 = tpu.matmul %35, %37, %cst_15 {dimension_numbers = #tpu.dot_dimension_numbers<[1], [0], [0], [1], [0, 0, 1, 1], [], []>} : vector<256x3xf32>, vector<3x32xf32>, vector<256x32xf32> -> vector<256x32xf32>
    %39 = arith.addf %32, %38 : vector<256x32xf32>
    %40 = vector.extract_strided_slice %3 {offsets = [24, 0], sizes = [256, 3], strides = [1, 1]} : vector<304x3xf32> to vector<256x3xf32>
    %c4 = arith.constant 4 : index
    %c0_16 = arith.constant 0 : index
    %c0_17 = arith.constant 0 : index
    %41 = vector.load %arg2[%c4, %c0_16, %c0_17] : memref<9x3x32xf32, #tpu.memory_space<vmem>>, vector<1x3x32xf32>
    %42 = vector.shape_cast %41 : vector<1x3x32xf32> to vector<3x32xf32>
    %cst_18 = arith.constant dense<0.000000e+00> : vector<256x32xf32>
    %43 = tpu.matmul %40, %42, %cst_18 {dimension_numbers = #tpu.dot_dimension_numbers<[1], [0], [0], [1], [0, 0, 1, 1], [], []>} : vector<256x3xf32>, vector<3x32xf32>, vector<256x32xf32> -> vector<256x32xf32>
    %44 = arith.addf %39, %43 : vector<256x32xf32>
    %45 = vector.extract_strided_slice %3 {offsets = [25, 0], sizes = [256, 3], strides = [1, 1]} : vector<304x3xf32> to vector<256x3xf32>
    %46 = vector.broadcast %14 : vector<256x1xf32> to vector<256x3xf32>
    %47 = arith.mulf %45, %46 : vector<256x3xf32>
    %c5 = arith.constant 5 : index
    %c0_19 = arith.constant 0 : index
    %c0_20 = arith.constant 0 : index
    %48 = vector.load %arg2[%c5, %c0_19, %c0_20] : memref<9x3x32xf32, #tpu.memory_space<vmem>>, vector<1x3x32xf32>
    %49 = vector.shape_cast %48 : vector<1x3x32xf32> to vector<3x32xf32>
    %cst_21 = arith.constant dense<0.000000e+00> : vector<256x32xf32>
    %50 = tpu.matmul %47, %49, %cst_21 {dimension_numbers = #tpu.dot_dimension_numbers<[1], [0], [0], [1], [0, 0, 1, 1], [], []>} : vector<256x3xf32>, vector<3x32xf32>, vector<256x32xf32> -> vector<256x32xf32>
    %51 = arith.addf %44, %50 : vector<256x32xf32>
    %52 = vector.extract_strided_slice %3 {offsets = [39, 0], sizes = [256, 3], strides = [1, 1]} : vector<304x3xf32> to vector<256x3xf32>
    %53 = vector.broadcast %10 : vector<256x1xf32> to vector<256x3xf32>
    %54 = arith.mulf %52, %53 : vector<256x3xf32>
    %c6 = arith.constant 6 : index
    %c0_22 = arith.constant 0 : index
    %c0_23 = arith.constant 0 : index
    %55 = vector.load %arg2[%c6, %c0_22, %c0_23] : memref<9x3x32xf32, #tpu.memory_space<vmem>>, vector<1x3x32xf32>
    %56 = vector.shape_cast %55 : vector<1x3x32xf32> to vector<3x32xf32>
    %cst_24 = arith.constant dense<0.000000e+00> : vector<256x32xf32>
    %57 = tpu.matmul %54, %56, %cst_24 {dimension_numbers = #tpu.dot_dimension_numbers<[1], [0], [0], [1], [0, 0, 1, 1], [], []>} : vector<256x3xf32>, vector<3x32xf32>, vector<256x32xf32> -> vector<256x32xf32>
    %58 = arith.addf %51, %57 : vector<256x32xf32>
    %59 = vector.extract_strided_slice %3 {offsets = [40, 0], sizes = [256, 3], strides = [1, 1]} : vector<304x3xf32> to vector<256x3xf32>
    %c7 = arith.constant 7 : index
    %c0_25 = arith.constant 0 : index
    %c0_26 = arith.constant 0 : index
    %60 = vector.load %arg2[%c7, %c0_25, %c0_26] : memref<9x3x32xf32, #tpu.memory_space<vmem>>, vector<1x3x32xf32>
    %61 = vector.shape_cast %60 : vector<1x3x32xf32> to vector<3x32xf32>
    %cst_27 = arith.constant dense<0.000000e+00> : vector<256x32xf32>
    %62 = tpu.matmul %59, %61, %cst_27 {dimension_numbers = #tpu.dot_dimension_numbers<[1], [0], [0], [1], [0, 0, 1, 1], [], []>} : vector<256x3xf32>, vector<3x32xf32>, vector<256x32xf32> -> vector<256x32xf32>
    %63 = arith.addf %58, %62 : vector<256x32xf32>
    %64 = vector.extract_strided_slice %3 {offsets = [41, 0], sizes = [256, 3], strides = [1, 1]} : vector<304x3xf32> to vector<256x3xf32>
    %65 = vector.broadcast %14 : vector<256x1xf32> to vector<256x3xf32>
    %66 = arith.mulf %64, %65 : vector<256x3xf32>
    %c8 = arith.constant 8 : index
    %c0_28 = arith.constant 0 : index
    %c0_29 = arith.constant 0 : index
    %67 = vector.load %arg2[%c8, %c0_28, %c0_29] : memref<9x3x32xf32, #tpu.memory_space<vmem>>, vector<1x3x32xf32>
    %68 = vector.shape_cast %67 : vector<1x3x32xf32> to vector<3x32xf32>
    %cst_30 = arith.constant dense<0.000000e+00> : vector<256x32xf32>
    %69 = tpu.matmul %66, %68, %cst_30 {dimension_numbers = #tpu.dot_dimension_numbers<[1], [0], [0], [1], [0, 0, 1, 1], [], []>} : vector<256x3xf32>, vector<3x32xf32>, vector<256x32xf32> -> vector<256x32xf32>
    %70 = arith.addf %63, %69 : vector<256x32xf32>
    %c0_31 = arith.constant 0 : index
    %c0_32 = arith.constant 0 : index
    %71 = vector.load %arg3[%c0_31, %c0_32] : memref<1x32xf32, #tpu.memory_space<vmem>>, vector<1x32xf32>
    %72 = vector.broadcast %71 : vector<1x32xf32> to vector<256x32xf32>
    %73 = arith.addf %70, %72 : vector<256x32xf32>
    %cst_33 = arith.constant 2.000000e+01 : f32
    %74 = vector.broadcast %cst_33 : f32 to vector<256x32xf32>
    %75 = arith.minimumf %73, %74 : vector<256x32xf32>
    %76 = math.exp %75 : vector<256x32xf32>
    %cst_34 = arith.constant 1.000000e+00 : f32
    %77 = vector.broadcast %cst_34 : f32 to vector<256x32xf32>
    %78 = arith.addf %77, %76 : vector<256x32xf32>
    %cst_35 = arith.constant 1.000000e+00 : f32
    %79 = vector.broadcast %cst_35 : f32 to vector<256x32xf32>
    %80 = arith.addf %79, %76 : vector<256x32xf32>
    %81 = arith.mulf %78, %80 : vector<256x32xf32>
    %cst_36 = arith.constant 1.000000e+00 : f32
    %82 = vector.broadcast %cst_36 : f32 to vector<256x32xf32>
    %83 = arith.subf %81, %82 : vector<256x32xf32>
    %cst_37 = arith.constant 1.000000e+00 : f32
    %84 = vector.broadcast %cst_37 : f32 to vector<256x32xf32>
    %85 = arith.addf %81, %84 : vector<256x32xf32>
    %86 = arith.divf %83, %85 : vector<256x32xf32>
    %87 = arith.mulf %73, %86 : vector<256x32xf32>
    %cst_38 = arith.constant 0.000000e+00 : f32
    %88 = vector.broadcast %cst_38 : f32 to vector<24x32xf32>
    %89 = tpu.concatenate %88, %87, %88 in 0 : vector<24x32xf32>, vector<256x32xf32>, vector<24x32xf32> -> vector<304x32xf32>
    %90 = tpu.iota {dimensions = array<i32: 0>} : vector<256x1xi32>
    %c15_i32_39 = arith.constant 15 : i32
    %91 = vector.broadcast %c15_i32_39 : i32 to vector<256x1xi32>
    %92 = arith.andi %90, %91 : vector<256x1xi32>
    %c0_i32_40 = arith.constant 0 : i32
    %93 = vector.broadcast %c0_i32_40 : i32 to vector<256x1xi32>
    %94 = arith.cmpi sgt, %92, %93 : vector<256x1xi32>
    %95 = arith.extui %94 : vector<256x1xi1> to vector<256x1xi32>
    %96 = arith.sitofp %95 : vector<256x1xi32> to vector<256x1xf32>
    %c15_i32_41 = arith.constant 15 : i32
    %97 = vector.broadcast %c15_i32_41 : i32 to vector<256x1xi32>
    %98 = arith.cmpi slt, %92, %97 : vector<256x1xi32>
    %99 = arith.extui %98 : vector<256x1xi1> to vector<256x1xi32>
    %100 = arith.sitofp %99 : vector<256x1xi32> to vector<256x1xf32>
    %101 = vector.extract_strided_slice %89 {offsets = [7, 0], sizes = [256, 32], strides = [1, 1]} : vector<304x32xf32> to vector<256x32xf32>
    %102 = vector.broadcast %96 : vector<256x1xf32> to vector<256x32xf32>
    %103 = arith.mulf %101, %102 : vector<256x32xf32>
    %c0_42 = arith.constant 0 : index
    %c0_43 = arith.constant 0 : index
    %c0_44 = arith.constant 0 : index
    %104 = vector.load %arg4[%c0_42, %c0_43, %c0_44] : memref<9x32x64xf32, #tpu.memory_space<vmem>>, vector<1x32x64xf32>
    %105 = vector.shape_cast %104 : vector<1x32x64xf32> to vector<32x64xf32>
    %cst_45 = arith.constant dense<0.000000e+00> : vector<256x64xf32>
    %106 = tpu.matmul %103, %105, %cst_45 {dimension_numbers = #tpu.dot_dimension_numbers<[1], [0], [0], [1], [0, 0, 1, 1], [], []>} : vector<256x32xf32>, vector<32x64xf32>, vector<256x64xf32> -> vector<256x64xf32>
    %107 = vector.extract_strided_slice %89 {offsets = [8, 0], sizes = [256, 32], strides = [1, 1]} : vector<304x32xf32> to vector<256x32xf32>
    %c1_46 = arith.constant 1 : index
    %c0_47 = arith.constant 0 : index
    %c0_48 = arith.constant 0 : index
    %108 = vector.load %arg4[%c1_46, %c0_47, %c0_48] : memref<9x32x64xf32, #tpu.memory_space<vmem>>, vector<1x32x64xf32>
    %109 = vector.shape_cast %108 : vector<1x32x64xf32> to vector<32x64xf32>
    %cst_49 = arith.constant dense<0.000000e+00> : vector<256x64xf32>
    %110 = tpu.matmul %107, %109, %cst_49 {dimension_numbers = #tpu.dot_dimension_numbers<[1], [0], [0], [1], [0, 0, 1, 1], [], []>} : vector<256x32xf32>, vector<32x64xf32>, vector<256x64xf32> -> vector<256x64xf32>
    %111 = arith.addf %106, %110 : vector<256x64xf32>
    %112 = vector.extract_strided_slice %89 {offsets = [9, 0], sizes = [256, 32], strides = [1, 1]} : vector<304x32xf32> to vector<256x32xf32>
    %113 = vector.broadcast %100 : vector<256x1xf32> to vector<256x32xf32>
    %114 = arith.mulf %112, %113 : vector<256x32xf32>
    %c2_50 = arith.constant 2 : index
    %c0_51 = arith.constant 0 : index
    %c0_52 = arith.constant 0 : index
    %115 = vector.load %arg4[%c2_50, %c0_51, %c0_52] : memref<9x32x64xf32, #tpu.memory_space<vmem>>, vector<1x32x64xf32>
    %116 = vector.shape_cast %115 : vector<1x32x64xf32> to vector<32x64xf32>
    %cst_53 = arith.constant dense<0.000000e+00> : vector<256x64xf32>
    %117 = tpu.matmul %114, %116, %cst_53 {dimension_numbers = #tpu.dot_dimension_numbers<[1], [0], [0], [1], [0, 0, 1, 1], [], []>} : vector<256x32xf32>, vector<32x64xf32>, vector<256x64xf32> -> vector<256x64xf32>
    %118 = arith.addf %111, %117 : vector<256x64xf32>
    %119 = vector.extract_strided_slice %89 {offsets = [23, 0], sizes = [256, 32], strides = [1, 1]} : vector<304x32xf32> to vector<256x32xf32>
    %120 = vector.broadcast %96 : vector<256x1xf32> to vector<256x32xf32>
    %121 = arith.mulf %119, %120 : vector<256x32xf32>
    %c3_54 = arith.constant 3 : index
    %c0_55 = arith.constant 0 : index
    %c0_56 = arith.constant 0 : index
    %122 = vector.load %arg4[%c3_54, %c0_55, %c0_56] : memref<9x32x64xf32, #tpu.memory_space<vmem>>, vector<1x32x64xf32>
    %123 = vector.shape_cast %122 : vector<1x32x64xf32> to vector<32x64xf32>
    %cst_57 = arith.constant dense<0.000000e+00> : vector<256x64xf32>
    %124 = tpu.matmul %121, %123, %cst_57 {dimension_numbers = #tpu.dot_dimension_numbers<[1], [0], [0], [1], [0, 0, 1, 1], [], []>} : vector<256x32xf32>, vector<32x64xf32>, vector<256x64xf32> -> vector<256x64xf32>
    %125 = arith.addf %118, %124 : vector<256x64xf32>
    %126 = vector.extract_strided_slice %89 {offsets = [24, 0], sizes = [256, 32], strides = [1, 1]} : vector<304x32xf32> to vector<256x32xf32>
    %c4_58 = arith.constant 4 : index
    %c0_59 = arith.constant 0 : index
    %c0_60 = arith.constant 0 : index
    %127 = vector.load %arg4[%c4_58, %c0_59, %c0_60] : memref<9x32x64xf32, #tpu.memory_space<vmem>>, vector<1x32x64xf32>
    %128 = vector.shape_cast %127 : vector<1x32x64xf32> to vector<32x64xf32>
    %cst_61 = arith.constant dense<0.000000e+00> : vector<256x64xf32>
    %129 = tpu.matmul %126, %128, %cst_61 {dimension_numbers = #tpu.dot_dimension_numbers<[1], [0], [0], [1], [0, 0, 1, 1], [], []>} : vector<256x32xf32>, vector<32x64xf32>, vector<256x64xf32> -> vector<256x64xf32>
    %130 = arith.addf %125, %129 : vector<256x64xf32>
    %131 = vector.extract_strided_slice %89 {offsets = [25, 0], sizes = [256, 32], strides = [1, 1]} : vector<304x32xf32> to vector<256x32xf32>
    %132 = vector.broadcast %100 : vector<256x1xf32> to vector<256x32xf32>
    %133 = arith.mulf %131, %132 : vector<256x32xf32>
    %c5_62 = arith.constant 5 : index
    %c0_63 = arith.constant 0 : index
    %c0_64 = arith.constant 0 : index
    %134 = vector.load %arg4[%c5_62, %c0_63, %c0_64] : memref<9x32x64xf32, #tpu.memory_space<vmem>>, vector<1x32x64xf32>
    %135 = vector.shape_cast %134 : vector<1x32x64xf32> to vector<32x64xf32>
    %cst_65 = arith.constant dense<0.000000e+00> : vector<256x64xf32>
    %136 = tpu.matmul %133, %135, %cst_65 {dimension_numbers = #tpu.dot_dimension_numbers<[1], [0], [0], [1], [0, 0, 1, 1], [], []>} : vector<256x32xf32>, vector<32x64xf32>, vector<256x64xf32> -> vector<256x64xf32>
    %137 = arith.addf %130, %136 : vector<256x64xf32>
    %138 = vector.extract_strided_slice %89 {offsets = [39, 0], sizes = [256, 32], strides = [1, 1]} : vector<304x32xf32> to vector<256x32xf32>
    %139 = vector.broadcast %96 : vector<256x1xf32> to vector<256x32xf32>
    %140 = arith.mulf %138, %139 : vector<256x32xf32>
    %c6_66 = arith.constant 6 : index
    %c0_67 = arith.constant 0 : index
    %c0_68 = arith.constant 0 : index
    %141 = vector.load %arg4[%c6_66, %c0_67, %c0_68] : memref<9x32x64xf32, #tpu.memory_space<vmem>>, vector<1x32x64xf32>
    %142 = vector.shape_cast %141 : vector<1x32x64xf32> to vector<32x64xf32>
    %cst_69 = arith.constant dense<0.000000e+00> : vector<256x64xf32>
    %143 = tpu.matmul %140, %142, %cst_69 {dimension_numbers = #tpu.dot_dimension_numbers<[1], [0], [0], [1], [0, 0, 1, 1], [], []>} : vector<256x32xf32>, vector<32x64xf32>, vector<256x64xf32> -> vector<256x64xf32>
    %144 = arith.addf %137, %143 : vector<256x64xf32>
    %145 = vector.extract_strided_slice %89 {offsets = [40, 0], sizes = [256, 32], strides = [1, 1]} : vector<304x32xf32> to vector<256x32xf32>
    %c7_70 = arith.constant 7 : index
    %c0_71 = arith.constant 0 : index
    %c0_72 = arith.constant 0 : index
    %146 = vector.load %arg4[%c7_70, %c0_71, %c0_72] : memref<9x32x64xf32, #tpu.memory_space<vmem>>, vector<1x32x64xf32>
    %147 = vector.shape_cast %146 : vector<1x32x64xf32> to vector<32x64xf32>
    %cst_73 = arith.constant dense<0.000000e+00> : vector<256x64xf32>
    %148 = tpu.matmul %145, %147, %cst_73 {dimension_numbers = #tpu.dot_dimension_numbers<[1], [0], [0], [1], [0, 0, 1, 1], [], []>} : vector<256x32xf32>, vector<32x64xf32>, vector<256x64xf32> -> vector<256x64xf32>
    %149 = arith.addf %144, %148 : vector<256x64xf32>
    %150 = vector.extract_strided_slice %89 {offsets = [41, 0], sizes = [256, 32], strides = [1, 1]} : vector<304x32xf32> to vector<256x32xf32>
    %151 = vector.broadcast %100 : vector<256x1xf32> to vector<256x32xf32>
    %152 = arith.mulf %150, %151 : vector<256x32xf32>
    %c8_74 = arith.constant 8 : index
    %c0_75 = arith.constant 0 : index
    %c0_76 = arith.constant 0 : index
    %153 = vector.load %arg4[%c8_74, %c0_75, %c0_76] : memref<9x32x64xf32, #tpu.memory_space<vmem>>, vector<1x32x64xf32>
    %154 = vector.shape_cast %153 : vector<1x32x64xf32> to vector<32x64xf32>
    %cst_77 = arith.constant dense<0.000000e+00> : vector<256x64xf32>
    %155 = tpu.matmul %152, %154, %cst_77 {dimension_numbers = #tpu.dot_dimension_numbers<[1], [0], [0], [1], [0, 0, 1, 1], [], []>} : vector<256x32xf32>, vector<32x64xf32>, vector<256x64xf32> -> vector<256x64xf32>
    %156 = arith.addf %149, %155 : vector<256x64xf32>
    %c0_78 = arith.constant 0 : index
    %c0_79 = arith.constant 0 : index
    %157 = vector.load %arg8[%c0_78, %c0_79] : memref<64x256xf32, #tpu.memory_space<vmem>>, vector<64x256xf32>
    %cst_80 = arith.constant dense<0.000000e+00> : vector<64x64xf32>
    %158 = tpu.matmul %157, %156, %cst_80 {dimension_numbers = #tpu.dot_dimension_numbers<[1], [0], [0], [1], [0, 0, 1, 1], [], []>} : vector<64x256xf32>, vector<256x64xf32>, vector<64x64xf32> -> vector<64x64xf32>
    %c0_81 = arith.constant 0 : index
    %c0_82 = arith.constant 0 : index
    %159 = vector.load %arg5[%c0_81, %c0_82] : memref<1x64xf32, #tpu.memory_space<vmem>>, vector<1x64xf32>
    %160 = vector.broadcast %159 : vector<1x64xf32> to vector<64x64xf32>
    %161 = arith.addf %158, %160 : vector<64x64xf32>
    %cst_83 = arith.constant 2.000000e+01 : f32
    %162 = vector.broadcast %cst_83 : f32 to vector<64x64xf32>
    %163 = arith.minimumf %161, %162 : vector<64x64xf32>
    %164 = math.exp %163 : vector<64x64xf32>
    %cst_84 = arith.constant 1.000000e+00 : f32
    %165 = vector.broadcast %cst_84 : f32 to vector<64x64xf32>
    %166 = arith.addf %165, %164 : vector<64x64xf32>
    %cst_85 = arith.constant 1.000000e+00 : f32
    %167 = vector.broadcast %cst_85 : f32 to vector<64x64xf32>
    %168 = arith.addf %167, %164 : vector<64x64xf32>
    %169 = arith.mulf %166, %168 : vector<64x64xf32>
    %cst_86 = arith.constant 1.000000e+00 : f32
    %170 = vector.broadcast %cst_86 : f32 to vector<64x64xf32>
    %171 = arith.subf %169, %170 : vector<64x64xf32>
    %cst_87 = arith.constant 1.000000e+00 : f32
    %172 = vector.broadcast %cst_87 : f32 to vector<64x64xf32>
    %173 = arith.addf %169, %172 : vector<64x64xf32>
    %174 = arith.divf %171, %173 : vector<64x64xf32>
    %175 = arith.mulf %161, %174 : vector<64x64xf32>
    %cst_88 = arith.constant 0.000000e+00 : f32
    %176 = vector.broadcast %cst_88 : f32 to vector<16x64xf32>
    %177 = tpu.concatenate %176, %175, %176 in 0 : vector<16x64xf32>, vector<64x64xf32>, vector<16x64xf32> -> vector<96x64xf32>
    %178 = tpu.iota {dimensions = array<i32: 0>} : vector<64x1xi32>
    %c7_i32 = arith.constant 7 : i32
    %179 = vector.broadcast %c7_i32 : i32 to vector<64x1xi32>
    %180 = arith.andi %178, %179 : vector<64x1xi32>
    %c0_i32_89 = arith.constant 0 : i32
    %181 = vector.broadcast %c0_i32_89 : i32 to vector<64x1xi32>
    %182 = arith.cmpi sgt, %180, %181 : vector<64x1xi32>
    %183 = arith.extui %182 : vector<64x1xi1> to vector<64x1xi32>
    %184 = arith.sitofp %183 : vector<64x1xi32> to vector<64x1xf32>
    %c7_i32_90 = arith.constant 7 : i32
    %185 = vector.broadcast %c7_i32_90 : i32 to vector<64x1xi32>
    %186 = arith.cmpi slt, %180, %185 : vector<64x1xi32>
    %187 = arith.extui %186 : vector<64x1xi1> to vector<64x1xi32>
    %188 = arith.sitofp %187 : vector<64x1xi32> to vector<64x1xf32>
    %189 = vector.extract_strided_slice %177 {offsets = [7, 0], sizes = [64, 64], strides = [1, 1]} : vector<96x64xf32> to vector<64x64xf32>
    %190 = vector.broadcast %184 : vector<64x1xf32> to vector<64x64xf32>
    %191 = arith.mulf %189, %190 : vector<64x64xf32>
    %c0_91 = arith.constant 0 : index
    %c0_92 = arith.constant 0 : index
    %c0_93 = arith.constant 0 : index
    %192 = vector.load %arg6[%c0_91, %c0_92, %c0_93] : memref<9x64x128xf32, #tpu.memory_space<vmem>>, vector<1x64x128xf32>
    %193 = vector.shape_cast %192 : vector<1x64x128xf32> to vector<64x128xf32>
    %cst_94 = arith.constant dense<0.000000e+00> : vector<64x128xf32>
    %194 = tpu.matmul %191, %193, %cst_94 {dimension_numbers = #tpu.dot_dimension_numbers<[1], [0], [0], [1], [0, 0, 1, 1], [], []>} : vector<64x64xf32>, vector<64x128xf32>, vector<64x128xf32> -> vector<64x128xf32>
    %195 = vector.extract_strided_slice %177 {offsets = [8, 0], sizes = [64, 64], strides = [1, 1]} : vector<96x64xf32> to vector<64x64xf32>
    %c1_95 = arith.constant 1 : index
    %c0_96 = arith.constant 0 : index
    %c0_97 = arith.constant 0 : index
    %196 = vector.load %arg6[%c1_95, %c0_96, %c0_97] : memref<9x64x128xf32, #tpu.memory_space<vmem>>, vector<1x64x128xf32>
    %197 = vector.shape_cast %196 : vector<1x64x128xf32> to vector<64x128xf32>
    %cst_98 = arith.constant dense<0.000000e+00> : vector<64x128xf32>
    %198 = tpu.matmul %195, %197, %cst_98 {dimension_numbers = #tpu.dot_dimension_numbers<[1], [0], [0], [1], [0, 0, 1, 1], [], []>} : vector<64x64xf32>, vector<64x128xf32>, vector<64x128xf32> -> vector<64x128xf32>
    %199 = arith.addf %194, %198 : vector<64x128xf32>
    %200 = vector.extract_strided_slice %177 {offsets = [9, 0], sizes = [64, 64], strides = [1, 1]} : vector<96x64xf32> to vector<64x64xf32>
    %201 = vector.broadcast %188 : vector<64x1xf32> to vector<64x64xf32>
    %202 = arith.mulf %200, %201 : vector<64x64xf32>
    %c2_99 = arith.constant 2 : index
    %c0_100 = arith.constant 0 : index
    %c0_101 = arith.constant 0 : index
    %203 = vector.load %arg6[%c2_99, %c0_100, %c0_101] : memref<9x64x128xf32, #tpu.memory_space<vmem>>, vector<1x64x128xf32>
    %204 = vector.shape_cast %203 : vector<1x64x128xf32> to vector<64x128xf32>
    %cst_102 = arith.constant dense<0.000000e+00> : vector<64x128xf32>
    %205 = tpu.matmul %202, %204, %cst_102 {dimension_numbers = #tpu.dot_dimension_numbers<[1], [0], [0], [1], [0, 0, 1, 1], [], []>} : vector<64x64xf32>, vector<64x128xf32>, vector<64x128xf32> -> vector<64x128xf32>
    %206 = arith.addf %199, %205 : vector<64x128xf32>
    %207 = vector.extract_strided_slice %177 {offsets = [15, 0], sizes = [64, 64], strides = [1, 1]} : vector<96x64xf32> to vector<64x64xf32>
    %208 = vector.broadcast %184 : vector<64x1xf32> to vector<64x64xf32>
    %209 = arith.mulf %207, %208 : vector<64x64xf32>
    %c3_103 = arith.constant 3 : index
    %c0_104 = arith.constant 0 : index
    %c0_105 = arith.constant 0 : index
    %210 = vector.load %arg6[%c3_103, %c0_104, %c0_105] : memref<9x64x128xf32, #tpu.memory_space<vmem>>, vector<1x64x128xf32>
    %211 = vector.shape_cast %210 : vector<1x64x128xf32> to vector<64x128xf32>
    %cst_106 = arith.constant dense<0.000000e+00> : vector<64x128xf32>
    %212 = tpu.matmul %209, %211, %cst_106 {dimension_numbers = #tpu.dot_dimension_numbers<[1], [0], [0], [1], [0, 0, 1, 1], [], []>} : vector<64x64xf32>, vector<64x128xf32>, vector<64x128xf32> -> vector<64x128xf32>
    %213 = arith.addf %206, %212 : vector<64x128xf32>
    %214 = vector.extract_strided_slice %177 {offsets = [16, 0], sizes = [64, 64], strides = [1, 1]} : vector<96x64xf32> to vector<64x64xf32>
    %c4_107 = arith.constant 4 : index
    %c0_108 = arith.constant 0 : index
    %c0_109 = arith.constant 0 : index
    %215 = vector.load %arg6[%c4_107, %c0_108, %c0_109] : memref<9x64x128xf32, #tpu.memory_space<vmem>>, vector<1x64x128xf32>
    %216 = vector.shape_cast %215 : vector<1x64x128xf32> to vector<64x128xf32>
    %cst_110 = arith.constant dense<0.000000e+00> : vector<64x128xf32>
    %217 = tpu.matmul %214, %216, %cst_110 {dimension_numbers = #tpu.dot_dimension_numbers<[1], [0], [0], [1], [0, 0, 1, 1], [], []>} : vector<64x64xf32>, vector<64x128xf32>, vector<64x128xf32> -> vector<64x128xf32>
    %218 = arith.addf %213, %217 : vector<64x128xf32>
    %219 = vector.extract_strided_slice %177 {offsets = [17, 0], sizes = [64, 64], strides = [1, 1]} : vector<96x64xf32> to vector<64x64xf32>
    %220 = vector.broadcast %188 : vector<64x1xf32> to vector<64x64xf32>
    %221 = arith.mulf %219, %220 : vector<64x64xf32>
    %c5_111 = arith.constant 5 : index
    %c0_112 = arith.constant 0 : index
    %c0_113 = arith.constant 0 : index
    %222 = vector.load %arg6[%c5_111, %c0_112, %c0_113] : memref<9x64x128xf32, #tpu.memory_space<vmem>>, vector<1x64x128xf32>
    %223 = vector.shape_cast %222 : vector<1x64x128xf32> to vector<64x128xf32>
    %cst_114 = arith.constant dense<0.000000e+00> : vector<64x128xf32>
    %224 = tpu.matmul %221, %223, %cst_114 {dimension_numbers = #tpu.dot_dimension_numbers<[1], [0], [0], [1], [0, 0, 1, 1], [], []>} : vector<64x64xf32>, vector<64x128xf32>, vector<64x128xf32> -> vector<64x128xf32>
    %225 = arith.addf %218, %224 : vector<64x128xf32>
    %226 = vector.extract_strided_slice %177 {offsets = [23, 0], sizes = [64, 64], strides = [1, 1]} : vector<96x64xf32> to vector<64x64xf32>
    %227 = vector.broadcast %184 : vector<64x1xf32> to vector<64x64xf32>
    %228 = arith.mulf %226, %227 : vector<64x64xf32>
    %c6_115 = arith.constant 6 : index
    %c0_116 = arith.constant 0 : index
    %c0_117 = arith.constant 0 : index
    %229 = vector.load %arg6[%c6_115, %c0_116, %c0_117] : memref<9x64x128xf32, #tpu.memory_space<vmem>>, vector<1x64x128xf32>
    %230 = vector.shape_cast %229 : vector<1x64x128xf32> to vector<64x128xf32>
    %cst_118 = arith.constant dense<0.000000e+00> : vector<64x128xf32>
    %231 = tpu.matmul %228, %230, %cst_118 {dimension_numbers = #tpu.dot_dimension_numbers<[1], [0], [0], [1], [0, 0, 1, 1], [], []>} : vector<64x64xf32>, vector<64x128xf32>, vector<64x128xf32> -> vector<64x128xf32>
    %232 = arith.addf %225, %231 : vector<64x128xf32>
    %233 = vector.extract_strided_slice %177 {offsets = [24, 0], sizes = [64, 64], strides = [1, 1]} : vector<96x64xf32> to vector<64x64xf32>
    %c7_119 = arith.constant 7 : index
    %c0_120 = arith.constant 0 : index
    %c0_121 = arith.constant 0 : index
    %234 = vector.load %arg6[%c7_119, %c0_120, %c0_121] : memref<9x64x128xf32, #tpu.memory_space<vmem>>, vector<1x64x128xf32>
    %235 = vector.shape_cast %234 : vector<1x64x128xf32> to vector<64x128xf32>
    %cst_122 = arith.constant dense<0.000000e+00> : vector<64x128xf32>
    %236 = tpu.matmul %233, %235, %cst_122 {dimension_numbers = #tpu.dot_dimension_numbers<[1], [0], [0], [1], [0, 0, 1, 1], [], []>} : vector<64x64xf32>, vector<64x128xf32>, vector<64x128xf32> -> vector<64x128xf32>
    %237 = arith.addf %232, %236 : vector<64x128xf32>
    %238 = vector.extract_strided_slice %177 {offsets = [25, 0], sizes = [64, 64], strides = [1, 1]} : vector<96x64xf32> to vector<64x64xf32>
    %239 = vector.broadcast %188 : vector<64x1xf32> to vector<64x64xf32>
    %240 = arith.mulf %238, %239 : vector<64x64xf32>
    %c8_123 = arith.constant 8 : index
    %c0_124 = arith.constant 0 : index
    %c0_125 = arith.constant 0 : index
    %241 = vector.load %arg6[%c8_123, %c0_124, %c0_125] : memref<9x64x128xf32, #tpu.memory_space<vmem>>, vector<1x64x128xf32>
    %242 = vector.shape_cast %241 : vector<1x64x128xf32> to vector<64x128xf32>
    %cst_126 = arith.constant dense<0.000000e+00> : vector<64x128xf32>
    %243 = tpu.matmul %240, %242, %cst_126 {dimension_numbers = #tpu.dot_dimension_numbers<[1], [0], [0], [1], [0, 0, 1, 1], [], []>} : vector<64x64xf32>, vector<64x128xf32>, vector<64x128xf32> -> vector<64x128xf32>
    %244 = arith.addf %237, %243 : vector<64x128xf32>
    %c0_127 = arith.constant 0 : index
    %c0_128 = arith.constant 0 : index
    %245 = vector.load %arg9[%c0_127, %c0_128] : memref<16x64xf32, #tpu.memory_space<vmem>>, vector<16x64xf32>
    %cst_129 = arith.constant dense<0.000000e+00> : vector<16x128xf32>
    %246 = tpu.matmul %245, %244, %cst_129 {dimension_numbers = #tpu.dot_dimension_numbers<[1], [0], [0], [1], [0, 0, 1, 1], [], []>} : vector<16x64xf32>, vector<64x128xf32>, vector<16x128xf32> -> vector<16x128xf32>
    %c0_130 = arith.constant 0 : index
    %c0_131 = arith.constant 0 : index
    %247 = vector.load %arg7[%c0_130, %c0_131] : memref<1x128xf32, #tpu.memory_space<vmem>>, vector<1x128xf32>
    %248 = vector.broadcast %247 : vector<1x128xf32> to vector<16x128xf32>
    %249 = arith.addf %246, %248 : vector<16x128xf32>
    %cst_132 = arith.constant 2.000000e+01 : f32
    %250 = vector.broadcast %cst_132 : f32 to vector<16x128xf32>
    %251 = arith.minimumf %249, %250 : vector<16x128xf32>
    %252 = math.exp %251 : vector<16x128xf32>
    %cst_133 = arith.constant 1.000000e+00 : f32
    %253 = vector.broadcast %cst_133 : f32 to vector<16x128xf32>
    %254 = arith.addf %253, %252 : vector<16x128xf32>
    %cst_134 = arith.constant 1.000000e+00 : f32
    %255 = vector.broadcast %cst_134 : f32 to vector<16x128xf32>
    %256 = arith.addf %255, %252 : vector<16x128xf32>
    %257 = arith.mulf %254, %256 : vector<16x128xf32>
    %cst_135 = arith.constant 1.000000e+00 : f32
    %258 = vector.broadcast %cst_135 : f32 to vector<16x128xf32>
    %259 = arith.subf %257, %258 : vector<16x128xf32>
    %cst_136 = arith.constant 1.000000e+00 : f32
    %260 = vector.broadcast %cst_136 : f32 to vector<16x128xf32>
    %261 = arith.addf %257, %260 : vector<16x128xf32>
    %262 = arith.divf %259, %261 : vector<16x128xf32>
    %263 = arith.mulf %249, %262 : vector<16x128xf32>
    %cst_137 = arith.constant dense<0.000000e+00> : vector<128xf32>
    %264 = vector.multi_reduction <add>, %263, %cst_137 [0] : vector<16x128xf32> to vector<128xf32>
    %265 = vector.shape_cast %264 : vector<128xf32> to vector<1x128xf32>
    %cst_138 = arith.constant 1.600000e+01 : f32
    %266 = vector.broadcast %cst_138 : f32 to vector<1x128xf32>
    %267 = arith.divf %265, %266 : vector<1x128xf32>
    %c0_139 = arith.constant 0 : index
    %c0_140 = arith.constant 0 : index
    %268 = vector.load %arg10[%c0_139, %c0_140] : memref<128x64xf32, #tpu.memory_space<vmem>>, vector<128x64xf32>
    %cst_141 = arith.constant dense<0.000000e+00> : vector<1x64xf32>
    %269 = tpu.matmul %267, %268, %cst_141 {dimension_numbers = #tpu.dot_dimension_numbers<[1], [0], [0], [1], [0, 0, 1, 1], [], []>} : vector<1x128xf32>, vector<128x64xf32>, vector<1x64xf32> -> vector<1x64xf32>
    %c0_142 = arith.constant 0 : index
    %c0_143 = arith.constant 0 : index
    %270 = vector.load %arg11[%c0_142, %c0_143] : memref<1x64xf32, #tpu.memory_space<vmem>>, vector<1x64xf32>
    %271 = arith.addf %269, %270 : vector<1x64xf32>
    %cst_144 = arith.constant 2.000000e+01 : f32
    %272 = vector.broadcast %cst_144 : f32 to vector<1x64xf32>
    %273 = arith.minimumf %271, %272 : vector<1x64xf32>
    %274 = math.exp %273 : vector<1x64xf32>
    %cst_145 = arith.constant 1.000000e+00 : f32
    %275 = vector.broadcast %cst_145 : f32 to vector<1x64xf32>
    %276 = arith.addf %275, %274 : vector<1x64xf32>
    %cst_146 = arith.constant 1.000000e+00 : f32
    %277 = vector.broadcast %cst_146 : f32 to vector<1x64xf32>
    %278 = arith.addf %277, %274 : vector<1x64xf32>
    %279 = arith.mulf %276, %278 : vector<1x64xf32>
    %cst_147 = arith.constant 1.000000e+00 : f32
    %280 = vector.broadcast %cst_147 : f32 to vector<1x64xf32>
    %281 = arith.subf %279, %280 : vector<1x64xf32>
    %cst_148 = arith.constant 1.000000e+00 : f32
    %282 = vector.broadcast %cst_148 : f32 to vector<1x64xf32>
    %283 = arith.addf %279, %282 : vector<1x64xf32>
    %284 = arith.divf %281, %283 : vector<1x64xf32>
    %285 = arith.mulf %271, %284 : vector<1x64xf32>
    %c0_149 = arith.constant 0 : index
    %c0_150 = arith.constant 0 : index
    %286 = vector.load %arg12[%c0_149, %c0_150] : memref<64x128xf32, #tpu.memory_space<vmem>>, vector<64x128xf32>
    %cst_151 = arith.constant dense<0.000000e+00> : vector<1x128xf32>
    %287 = tpu.matmul %285, %286, %cst_151 {dimension_numbers = #tpu.dot_dimension_numbers<[1], [0], [0], [1], [0, 0, 1, 1], [], []>} : vector<1x64xf32>, vector<64x128xf32>, vector<1x128xf32> -> vector<1x128xf32>
    %c0_152 = arith.constant 0 : index
    %c0_153 = arith.constant 0 : index
    %288 = vector.load %arg13[%c0_152, %c0_153] : memref<1x128xf32, #tpu.memory_space<vmem>>, vector<1x128xf32>
    %289 = arith.addf %287, %288 : vector<1x128xf32>
    %c0_154 = arith.constant 0 : index
    %c0_155 = arith.constant 0 : index
    %c0_156 = arith.constant 0 : index
    %290 = vector.load %arg14[%c0_154, %c0_155, %c0_156] : memref<1x1x128xf32, #tpu.memory_space<vmem>>, vector<1x1x128xf32>
    %291 = vector.shape_cast %290 : vector<1x1x128xf32> to vector<1x128xf32>
    %292 = vector.shape_cast %289 : vector<1x128xf32> to vector<1x1x128xf32>
    tpu.vector_store %arg14[%c0_154, %c0_155, %c0_156], %292 {strides = array<i32>} : memref<1x1x128xf32, #tpu.memory_space<vmem>>, vector<1x1x128xf32>,
    return
  }
  func.func @transform_0(%arg0: i32) -> (i32, i32, i32) {
    %c0_i32 = arith.constant 0 : i32
    %c0_i32_0 = arith.constant 0 : i32
    %c0_i32_1 = arith.constant 0 : i32
    return %arg0, %c0_i32, %c0_i32_0 : i32, i32, i32
  }
  func.func @transform_1(%arg0: i32) -> (i32, i32, i32) {
    %c0_i32 = arith.constant 0 : i32
    %c0_i32_0 = arith.constant 0 : i32
    %c0_i32_1 = arith.constant 0 : i32
    %c0_i32_2 = arith.constant 0 : i32
    return %c0_i32, %c0_i32_0, %c0_i32_1 : i32, i32, i32
  }
  func.func @transform_2(%arg0: i32) -> (i32, i32) {
    %c0_i32 = arith.constant 0 : i32
    %c0_i32_0 = arith.constant 0 : i32
    %c0_i32_1 = arith.constant 0 : i32
    return %c0_i32, %c0_i32_0 : i32, i32
  }
  func.func @transform_3(%arg0: i32) -> (i32, i32, i32) {
    %c0_i32 = arith.constant 0 : i32
    %c0_i32_0 = arith.constant 0 : i32
    %c0_i32_1 = arith.constant 0 : i32
    %c0_i32_2 = arith.constant 0 : i32
    return %c0_i32, %c0_i32_0, %c0_i32_1 : i32, i32, i32
  }
  func.func @transform_4(%arg0: i32) -> (i32, i32) {
    %c0_i32 = arith.constant 0 : i32
    %c0_i32_0 = arith.constant 0 : i32
    %c0_i32_1 = arith.constant 0 : i32
    return %c0_i32, %c0_i32_0 : i32, i32
  }
  func.func @transform_5(%arg0: i32) -> (i32, i32, i32) {
    %c0_i32 = arith.constant 0 : i32
    %c0_i32_0 = arith.constant 0 : i32
    %c0_i32_1 = arith.constant 0 : i32
    %c0_i32_2 = arith.constant 0 : i32
    return %c0_i32, %c0_i32_0, %c0_i32_1 : i32, i32, i32
  }
  func.func @transform_6(%arg0: i32) -> (i32, i32) {
    %c0_i32 = arith.constant 0 : i32
    %c0_i32_0 = arith.constant 0 : i32
    %c0_i32_1 = arith.constant 0 : i32
    return %c0_i32, %c0_i32_0 : i32, i32
  }
  func.func @transform_7(%arg0: i32) -> (i32, i32) {
    %c0_i32 = arith.constant 0 : i32
    %c0_i32_0 = arith.constant 0 : i32
    %c0_i32_1 = arith.constant 0 : i32
    return %c0_i32, %c0_i32_0 : i32, i32
  }
  func.func @transform_8(%arg0: i32) -> (i32, i32) {
    %c0_i32 = arith.constant 0 : i32
    %c0_i32_0 = arith.constant 0 : i32
    %c0_i32_1 = arith.constant 0 : i32
    return %c0_i32, %c0_i32_0 : i32, i32
  }
  func.func @transform_9(%arg0: i32) -> (i32, i32) {
    %c0_i32 = arith.constant 0 : i32
    %c0_i32_0 = arith.constant 0 : i32
    %c0_i32_1 = arith.constant 0 : i32
    return %c0_i32, %c0_i32_0 : i32, i32
  }
  func.func @transform_10(%arg0: i32) -> (i32, i32) {
    %c0_i32 = arith.constant 0 : i32
    %c0_i32_0 = arith.constant 0 : i32
    %c0_i32_1 = arith.constant 0 : i32
    return %c0_i32, %c0_i32_0 : i32, i32
  }
  func.func @transform_11(%arg0: i32) -> (i32, i32) {
    %c0_i32 = arith.constant 0 : i32
    %c0_i32_0 = arith.constant 0 : i32
    %c0_i32_1 = arith.constant 0 : i32
    return %c0_i32, %c0_i32_0 : i32, i32
  }
  func.func @transform_12(%arg0: i32) -> (i32, i32) {
    %c0_i32 = arith.constant 0 : i32
    %c0_i32_0 = arith.constant 0 : i32
    %c0_i32_1 = arith.constant 0 : i32
    return %c0_i32, %c0_i32_0 : i32, i32
  }
  func.func @transform_13(%arg0: i32) -> (i32, i32, i32) {
    %c0_i32 = arith.constant 0 : i32
    %c0_i32_0 = arith.constant 0 : i32
    %c0_i32_1 = arith.constant 0 : i32
    return %arg0, %c0_i32, %c0_i32_0 : i32, i32, i32
  }
}

</mosaic_0001>

<bundles_post_ra>
// kernel: advanced_nn_forward.1
= control target key start
LH: loop header
LB: loop body
LE: loop exit
PB: predicated region body
PF: predicated region fallthrough
CT: control target
= control target key end

     0   :  { %18 = vsyncpa [#allocation3], 0  ;;  %s19785_s0 = inlined_call_operand.vmem [shape: f32[2,256,3], index: 0, kind: input, shape index: {}]   ;;  %s19786_s1 = inlined_call_operand.vmem [shape: f32[9,3,32], index: 1, kind: input, shape index: {}]   ;;  %s19787_s2 = inlined_call_operand.hbm [shape: f32[1,32], index: 2, kind: input, shape index: {}]   ;;  %s19788_s3 = inlined_call_operand.hbm [shape: f32[9,32,64], index: 3, kind: input, shape index: {}]   ;;  %s19789_s4 = inlined_call_operand.hbm [shape: f32[1,64], index: 4, kind: input, shape index: {}]   ;;  %s19790_s5 = inlined_call_operand.vmem [shape: f32[9,64,128], index: 5, kind: input, shape index: {}]   ;;  %s19791_s6 = inlined_call_operand.hbm [shape: f32[1,128], index: 6, kind: input, shape index: {}]   ;;  %s19792_s7 = inlined_call_operand.vmem [shape: f32[64,256], index: 7, kind: input, shape index: {}]   ;;  %s19793_s8 = inlined_call_operand.vmem [shape: f32[16,64], index: 8, kind: input, shape index: {}]   ;;  %s19794_s9 = inlined_call_operand.vmem [shape: f32[128,64], index: 9, kind: input, shape index: {}]   ;;  %s19795_s10 = inlined_call_operand.hbm [shape: f32[1,64], index: 10, kind: input, shape index: {}]   ;;  %s19796_s11 = inlined_call_operand.vmem [shape: f32[64,128], index: 11, kind: input, shape index: {}]   ;;  %s19797_s12 = inlined_call_operand.hbm [shape: f32[1,128], index: 12, kind: input, shape index: {}]   ;;  %s19798_s13 = inlined_call_operand.hbm [shape: f32[2,1,128], index: 13, kind: output, shape index: {}]  }
   0x1   :  { %19 = vsyncpa [#allocation6], 0 }
   0x2   :  { %20 = vsyncpa [#allocation9], 0 }
   0x3   :  { %21 = vsyncpa [#allocation12], 0 }
   0x4   :  { %22 = vsyncpa [#allocation4], 0 }
   0x5   :  { %24 = vsyncpa [#allocation4 + $0x1], 0  ;;  %s14269_s25 = smov 0   ;;  %s14271_s26 = smov 0  }
   0x6   :  { %s14273_s27 = smov 0   ;;  %s14275_s28 = smov 0  }
   0x7 LB: > { %20004 = sst [smem:[#allocation19_spill]] %s14173_s25  ;;  %s14290_s29 = sadd.s32 4294967295, %s14185_s28   ;;  %s14185_s28 = sphi %s14275_s28, %s20744_s28   ;;  %s14181_s27 = sphi %s14273_s27, %s20746_s27   ;;  %s14177_s26 = sphi %s14271_s26, %s20748_s26   ;;  %s14173_s25 = sphi %s14269_s25, %s20747_s25  }
   0x8   : > { %20005 = sst [smem:[#allocation20_spill]] %s14181_s27  ;;  %s10663_s30 = sadd.s32 4294967294, %s14185_s28  }
   0x9   : > { %20006 = sst [smem:[#allocation21_spill]] %s14185_s28  ;;  %s14294_s14 = sadd.s32 1, %s14185_s28  }
   0xa   : > { %20007 = sst [smem:[#allocation22_spill]] %s14294_s14  ;;  %s315_s15 = sadd.s32 1, %s14181_s27 }
   0xb   : > { %s312_s16 = ssub.s32 %s14185_s28, %s14294_s14  ;;  %p325_p0 = scmp.ne.s32.totalorder %s14181_s27, %s14177_s26 }
   0xc   : > { %p313_p1 = scmp.eq.s32.totalorder %s312_s16, 0  ;;  %p326_p2 = scmp.eq.s32.totalorder %s14290_s29, 1 }
   0xd   : > { %p331_p3 = scmp.ne.s32.totalorder %s14177_s26, %s14173_s25  ;;  %p332_p4 = scmp.eq.s32.totalorder %s10663_s30, 1 }
   0xe   : > { %s14305_s17 = scalar_select %p313_p1, %s14181_s27, %s315_s15  }
   0xf   : > { %p14307_p5 = por %p326_p2, %p325_p0  ;;  %p14311_p6 = por %p332_p4, %p331_p3 }
  0x10   : > { %20008 = sst [smem:[#allocation23_spill]] %s14305_s17  ;;  %p10664_p7 = scmp.ge.s32.totalorder %s14185_s28, 1 }
  0x11   : > { %s20009_s18 = scalar_select %p14307_p5, 1, 0 }
  0x12   : > { %s20010_s19 = scalar_select %p14311_p6, 1, 0 }
  0x13   : > { %p339_p8 = scmp.lt.s32.totalorder %s14185_s28, 3  ;;  %p19803_p9 = scmp.eq.s32.totalorder %s14290_s29, 0 }
  0x14   : > { %20011 = sst [smem:[#allocation24_spill]] %s20010_s19  ;;  %s14187_s21 = smov [#allocation5]  }
  0x15   : > { %p14318_p10 = pnand %p10664_p7, %p339_p8  ;;  %s365_s22 = sshll.u32 %s14187_s21, 4  ;;  %s366_s22 = int_to_ptr.vmem [resolvable:$true] %s365_s22 }
  0x16   : > { %s14188_s24 = smov [#allocation8]   ;;  %s14189_s15 = smov [#allocation2]  }
  0x17   : > { %p13665_p11 = pneg %p14318_p10  ;;  %s393_s30 = sshll.u32 %s14188_s24, 4  ;;  %s394_s30 = int_to_ptr.vmem [resolvable:$true] %s393_s30 }
  0x18   : > { %s355_s16 = sshll.u32 %s14189_s15, 4  ;;  %s13964_s21 = scalar_lea.vmem %s366_s22, 4608  ;;  %s356_s16 = int_to_ptr.vmem [resolvable:$true] %s355_s16 }
  0x19   : > { %p14326_p12 = pnand %p19803_p9, %p13665_p11  ;;  %p13965_p0 = scmp.ne.s32.totalorder %s366_s22, %s13964_s21 }
  0x1a   : > { %p13972_p3 = scmp.lt.s32.totalorder %s366_s22, %s366_s22  ;;  %p13973_p4 = scmp.lt.s32.totalorder %s13964_s21, %s13964_s21 }
  0x1b   : > { %p14332_p13 = pneg %p14326_p12 }
  0x1c   : > { %p13974_p7 = por %p13973_p4, %p13972_p3 }
  0x1d   : > { %p13967_p1 = pnand %p13965_p0, %p14332_p13 }
  0x1f   : > { %p13968_p2 = pneg %p13967_p1 }
  0x21   : > { %p13975_p8 = pnand %p13974_p7, %p13968_p2 }
  0x23   : > { %13978 = shalt.err (!%p13975_p8)
}
  0x24   : > { %s14190_s24 = smov 128   ;;  %s14191_s15 = smov 8  }
  0x25   : > { %13671 = dma.hbm_to_vmem [thread:$0]  (!%p14326_p12), %s19788_s3, 4608, %s366_s22, [#allocation6], %s14190_s24, %s14190_s24, %s14191_s15  }
  0x26   : > { %s13990_s19 = scalar_lea.vmem %s394_s30, 16  ;;  %s13997_s25 = scalar_lea.vmem %s394_s30, 32 }
  0x27   : > { %p13991_p11 = scmp.ne.s32.totalorder %s394_s30, %s13990_s19  ;;  %p13998_p1 = scmp.lt.s32.totalorder %s394_s30, %s394_s30 }
  0x28   : > { %p13999_p6 = scmp.lt.s32.totalorder %s13997_s25, %s13990_s19 }
  0x29   : > { %p13993_p9 = pnand %p13991_p11, %p14332_p13 }
  0x2a   : > { %p14000_p3 = por %p13999_p6, %p13998_p1 }
  0x2b   : > { %p13994_p0 = pneg %p13993_p9 }
  0x2d   : > { %p14001_p2 = pnand %p14000_p3, %p13994_p0 }
  0x2f   : > { %14004 = shalt.err (!%p14001_p2)
}
  0x30   : > { %13677 = dma.hbm_to_vmem [thread:$0]  (!%p14326_p12), %s19791_s6, 16, %s394_s30, [#allocation9]  }
  0x31   : > { %s14016_s27 = scalar_lea.vmem %s356_s16, 16  ;;  %s14023_s14 = scalar_lea.vmem %s356_s16, 32 }
  0x32   : > { %p14017_p4 = scmp.ne.s32.totalorder %s356_s16, %s14016_s27  ;;  %p14024_p9 = scmp.lt.s32.totalorder %s356_s16, %s356_s16 }
  0x33   : > { %p14025_p11 = scmp.lt.s32.totalorder %s14023_s14, %s14016_s27 }
  0x34   : > { %p14019_p7 = pnand %p14017_p4, %p14332_p13 }
  0x35   : > { %p14026_p5 = por %p14025_p11, %p14024_p9 }
  0x36   : > { %p14020_p8 = pneg %p14019_p7 }
  0x38   : > { %p14027_p6 = pnand %p14026_p5, %p14020_p8 }
  0x3a   : > { %14030 = shalt.err (!%p14027_p6)
}
  0x3b   : > { %13668 = dma.hbm_to_vmem [thread:$0]  (!%p14326_p12), %s19787_s2, 16, %s356_s16, [#allocation3]  }
  0x3c   : > { %s14192_s28 = smov [#allocation7]   ;;  %s14193_s30 = smov [#allocation10]  }
  0x3d   : > { %s379_s22 = sshll.u32 %s14192_s28, 4  ;;  %s413_s24 = sshll.u32 %s14193_s30, 4  ;;  %s380_s22 = int_to_ptr.vmem [resolvable:$true] %s379_s22  ;;  %s414_s24 = int_to_ptr.vmem [resolvable:$true] %s413_s24 }
  0x3e   : > { %s14042_s15 = scalar_lea.vmem %s380_s22, 16  ;;  %s14049_s21 = scalar_lea.vmem %s380_s22, 32 }
  0x3f   : > { %p14043_p0 = scmp.ne.s32.totalorder %s380_s22, %s14042_s15  ;;  %p14050_p5 = scmp.lt.s32.totalorder %s380_s22, %s380_s22 }
  0x40   : > { %p14051_p2 = scmp.lt.s32.totalorder %s14049_s21, %s14042_s15 }
  0x41   : > { %p14045_p1 = pnand %p14043_p0, %p14332_p13 }
  0x42   : > { %p14052_p4 = por %p14051_p2, %p14050_p5 }
  0x43   : > { %p14046_p3 = pneg %p14045_p1 }
  0x45   : > { %p14053_p7 = pnand %p14052_p4, %p14046_p3 }
  0x47   : > { %14056 = shalt.err (!%p14053_p7)
}
  0x48   : > { %13674 = dma.hbm_to_vmem [thread:$0]  (!%p14326_p12), %s19789_s4, 16, %s380_s22, [#allocation6]  }
  0x49   : > { %s14068_s14 = scalar_lea.vmem %s414_s24, 16  ;;  %s14075_s25 = scalar_lea.vmem %s414_s24, 32 }
  0x4a   : > { %p14069_p8 = scmp.ne.s32.totalorder %s414_s24, %s14068_s14  ;;  %p14076_p6 = scmp.lt.s32.totalorder %s414_s24, %s414_s24 }
  0x4b   : > { %p14077_p0 = scmp.lt.s32.totalorder %s14075_s25, %s14068_s14 }
  0x4c   : > { %p14071_p9 = pnand %p14069_p8, %p14332_p13 }
  0x4d   : > { %p14078_p1 = por %p14077_p0, %p14076_p6 }
  0x4e   : > { %p14072_p11 = pneg %p14071_p9 }
  0x50   : > { %p14079_p5 = pnand %p14078_p1, %p14072_p11 }
  0x52   : > { %14082 = shalt.err (!%p14079_p5)
}
  0x53   : > { %13680 = dma.hbm_to_vmem [thread:$0]  (!%p14326_p12), %s19795_s10, 16, %s414_s24, [#allocation9]  }
  0x54   : > { %s14194_s22 = smov [#allocation11]  }
  0x55   : > { %s427_s30 = sshll.u32 %s14194_s22, 4  ;;  %s428_s30 = int_to_ptr.vmem [resolvable:$true] %s427_s30 }
  0x56   : > { %s14094_s15 = scalar_lea.vmem %s428_s30, 16  ;;  %s14101_s21 = scalar_lea.vmem %s428_s30, 32 }
  0x57   : > { %p14095_p3 = scmp.ne.s32.totalorder %s428_s30, %s14094_s15  ;;  %p14102_p7 = scmp.lt.s32.totalorder %s428_s30, %s428_s30 }
  0x58   : > { %p14103_p8 = scmp.lt.s32.totalorder %s14101_s21, %s14094_s15 }
  0x59   : > { %p14097_p2 = pnand %p14095_p3, %p14332_p13 }
  0x5a   : > { %p14104_p9 = por %p14103_p8, %p14102_p7 }
  0x5b   : > { %p14098_p4 = pneg %p14097_p2 }
  0x5d   : > { %p14105_p11 = pnand %p14104_p9, %p14098_p4 }
  0x5f   : > { %14108 = shalt.err (!%p14105_p11)
}
  0x60   : > { %13683 = dma.hbm_to_vmem [thread:$0]  (!%p14326_p12), %s19797_s12, 16, %s428_s30, [#allocation12]  }
  0x61   : > { %448 = sbr.rel (%p14318_p10) target bundleno = 2448 (0x990), region = 72 }
  0x66   : > { %p20015_p6 = scmp.eq.s32.totalorder %s14290_s29, 0 }
  0x68   : > { %14152 = dma.done.wait (%p20015_p6), [#allocation3], 16   ;;  %p20016_p13 = pmov %p20015_p6 }
  0x69   : > { %p20017_p0 = pmov %p20015_p6 }
  0x6a   : > { %14154 = vsyncadd (%p20016_p13), [#allocation3], 4294967280 }
  0x6b   : > { %14156 = dma.done.wait (%p20017_p0), [#allocation6], 4624   ;;  %p20018_p1 = pmov %p20017_p0 }
  0x6c   : > { %p20019_p5 = pmov %p20017_p0 }
  0x6d   : > { %14158 = vsyncadd (%p20018_p1), [#allocation6], 4294962672 }
  0x6e   : > { %14160 = dma.done.wait (%p20019_p5), [#allocation9], 32   ;;  %p20020_p12 = pmov %p20017_p0 }
  0x6f   : > { %p20021_p10 = pmov %p20017_p0 }
  0x70   : > { %14162 = vsyncadd (%p20020_p12), [#allocation9], 4294967264 }
  0x71   : > { %14164 = dma.done.wait (%p20021_p10), [#allocation12], 16   ;;  %p20022_p3 = pmov %p20017_p0 }
  0x72   : > { %p511_p2 = scmp.lt.s32.totalorder %s14290_s29, 1  ;;  %v548_v0 = vlaneseq  ;;  %v19818_v1 = vmov 0.0   ;;  %vm1064_vm0 = vcmask 1042432   ;;  %vm970_vm1 = vcmask 23552   ;;  %v10713_v14 = vld [vmem:[%s19786_s1 + $0x4] sm:$0x7] }
  0x73   : > { %14166 = vsyncadd (%p20022_p3), [#allocation12], 4294967280  ;;  %12360 = vmatprep.mubr.f32.mxu0 %v19818_v1  ;;  %vm837_vm2 = vcmask 1046528   ;;  %v14196_v7 = vmov 1.0   ;;  %vm1326_vm3 = vcmask 1040384   ;;  %12358 = vmatprep.subr.msk.mxu0 %vm1064_vm0, %v10713_v14  ;;  %s509_s16 = sand.u32 1, %s14177_s26  }
  0x74   : > { %s512_s17 = scalar_select %p511_p2, %s14290_s29, 1  ;;  %v14399_v2 = vshrl.u32 %v548_v0, 7  ;;  %v14416_v8 = vrot.slane %v14196_v7, 1  ;;  %v14419_v10 = vrot.slane %v14196_v7, 7  ;;  %13637 = vmatprep.subr.msk.mxu1 %vm1064_vm0, %v10713_v14  ;;  %12359 = vmatpush3.msk.msra.mxu0 %vm1064_vm0, %v10713_v14  ;;  %v967_v24 = vld [vmem:[%s19786_s1] sm:$0x7] }
  0x75   : > { %13638 = vmatpush3.msk.msra.mxu1 %vm1064_vm0, %v10713_v14  ;;  %12361 = vmatmul.mubr.f32.vlgmr.msra.gmra.mxu0 %v19818_v1  ;;  %v10778_v51 = vld [vmem:[%s19786_s1 + $0x8] sm:$0x7]  ;;  %v14583_v14 = vld [vmem:[%s19786_s1 + $0x10] sm:$0x7]  ;;  %s10536_s28 = scalar_lea.sflag [#allocation4], %s509_s16  ;;  %p20739_p7 = scmp.ne.s32.totalorder %s20009_s18, 0 }
  0x76   : > { %20023 = vst [vmem:[#allocation25_spill] sm:$0xff] %v14399_v2  ;;  %s11500_s20 = sshll.u32 %s512_s17, 8  ;;  %v581_v3 = vand.u32 15, %v14399_v2  ;;  %v14403_v4 = vadd.s32 16, %v14399_v2  ;;  %v14406_v5 = vadd.s32 32, %v14399_v2  ;;  %v14409_v6 = vadd.s32 48, %v14399_v2  ;;  %12408 = vmatprep.subr.msk.mxu1 %vm1064_vm0, %v967_v24  ;;  %12458 = vmatprep.subr.msk.mxu0 %vm1064_vm0, %v10778_v51 }
  0x77   : > { %s14414_s14 = scalar_lea.vmem %s19785_s0, %s11500_s20  ;;  %20027 = vst [vmem:[#allocation29_spill] sm:$0xff] %v14416_v8  ;;  %v557_v9 = vadd.s32 64, %v14399_v2  ;;  %20028 = vst [vmem:[#allocation30_spill] sm:$0xff] %v14419_v10  ;;  %v14424_v13 = vadd.s32 80, %v14399_v2  ;;  %v14445_v22 = vadd.s32 96, %v14399_v2  ;;  %v14458_v27 = vadd.s32 112, %v14399_v2  ;;  %12459 = vmatpush3.msk.msra.mxu0 %vm1064_vm0, %v10778_v51 }
  0x78   : > { %20024 = vst [vmem:[#allocation26_spill] sm:$0xff] %v14403_v4  ;;  %20025 = vst [vmem:[#allocation27_spill] sm:$0xff] %v14406_v5  ;;  %vm613_vm4 = vcmp.gt.s32.totalorder %v581_v3, 0  ;;  %v583_v11 = vand.u32 15, %v14403_v4  ;;  %v585_v12 = vand.u32 15, %v14406_v5  ;;  %v14430_v15 = vld [vmem:[%s14414_s14 + $0xd0] sm:$0xff]  ;;  %12558 = vmatprep.subr.msk.mxu0 %vm1064_vm0, %v14583_v14 }
  0x79   : > { %20026 = vst [vmem:[#allocation28_spill] sm:$0xff] %v14409_v6  ;;  %v10681_v16 = vsel %vm613_vm4, 1.0, %v19818_v1  ;;  %v587_v17 = vand.u32 15, %v14409_v6  ;;  %v589_v18 = vand.u32 15, %v557_v9  ;;  %v14437_v19 = vld [vmem:[%s14414_s14 + $0xd8] sm:$0xff]  ;;  %v14440_v20 = vld [vmem:[%s14414_s14] sm:$0xff]  ;;  %12402 = vmatprep.mubr.msk.f32.mxu1 %vm970_vm1, %v14430_v15 }
  0x7a   : > { %v14442_v21 = vrot.slane %v10681_v16, 1  ;;  %vm615_vm5 = vcmp.gt.s32.totalorder %v583_v11, 0  ;;  %vm617_vm6 = vcmp.gt.s32.totalorder %v585_v12, 0  ;;  %v14450_v23 = vld [vmem:[%s14414_s14 + $0xe0] sm:$0xff]  ;;  %v545_v28 = vld [vmem:[%s14414_s14 + $0xe8] sm:$0xff]  ;;  %12403 = vmatmul.mubr.msk.f32.vlgmr.msra.gmra.mxu1 %vm970_vm1, %v14437_v19  ;;  %12363 = vmatprep.mubr.msk.f32.mxu0 %vm970_vm1, %v14440_v20  ;;  %v14493_v38 = vld [vmem:[%s14414_s14 + $0x10] sm:$0xff] }
  0x7b   : > { %v10682_v25 = vsel %vm615_vm5, 1.0, %v19818_v1  ;;  %v10683_v26 = vsel %vm617_vm6, 1.0, %v19818_v1  ;;  %v14475_v33 = vld [vmem:[%s14414_s14 + $0x8] sm:$0xff]  ;;  %vm14478_vm7 = vcmp.gt.s32.totalorder %v587_v17, 0  ;;  %vm14482_vm8 = vcmp.gt.s32.totalorder %v589_v18, 0  ;;  %12405 = vmatprep.mubr.msk.f32.mxu1 %vm970_vm1, %v14450_v23  ;;  %12409 = vmatpush3.msk.msra.mxu1 %vm1064_vm0, %v967_v24  ;;  %v14539_v53 = vld [vmem:[%s14414_s14 + $0x18] sm:$0xff] }
  0x7c   : > { %20029 = vst [vmem:[#allocation31_spill] sm:$0xff] %v14442_v21  ;;  %v14467_v29 = vsel %vm837_vm2, %v14442_v21, %v14416_v8  ;;  %v934_v30 = vmul.f32 0.0, %v14442_v21  ;;  %v841_v31 = vrot.slane %v10682_v25, 1  ;;  %v845_v32 = vrot.slane %v10683_v26, 1  ;;  %12364 = vmatmul.mubr.msk.f32.gmra.mxu0 %vm970_vm1, %v14475_v33  ;;  %v14546_v57 = vld [vmem:[%s14414_s14 + $0x20] sm:$0xff]  ;;  %v14563_v3 = vld [vmem:[%s14414_s14 + $0x28] sm:$0xff] }
  0x7d   : > { %20030 = vst [vmem:[#allocation32_spill] sm:$0xff] %v14467_v29  ;;  %v935_v34 = vmul.f32 0.0, %v14467_v29  ;;  %v14487_v37 = vmul.f32 %v14416_v8, %v545_v28  ;;  %v10684_v48 = vsel %vm14478_vm7, 1.0, %v19818_v1  ;;  %v10685_v49 = vsel %vm14482_vm8, 1.0, %v19818_v1  ;;  %12366 = vmatprep.mubr.msk.f32.mxu0 %vm970_vm1, %v14493_v38  ;;  %v14597_v25 = vld [vmem:[%s14414_s14 + $0x30] sm:$0xff]  ;;  %v14707_v5 = vld [vmem:[%s14414_s14 + $0x68] sm:$0xff] }
  0x7e   : > { %v14495_v39 = vrot.slane %v934_v30, 7  ;;  %v14499_v40 = vsel %vm837_vm2, %v14416_v8, %v841_v31  ;;  %v14503_v41 = vsel %vm837_vm2, %v841_v31, %v14416_v8  ;;  %v14507_v42 = vsel %vm837_vm2, %v14416_v8, %v845_v32  ;;  %12406 = vmatmul.mubr.msk.f32.gmra.mxu1 %vm970_vm1, %v545_v28  ;;  %s11497_s17 = sshll.u32 %s14290_s29, 4  ;;  %s510_s20 = scalar_lea.vmem [#allocation13], %s509_s16 }
  0x7f   : > { %20036 = vst [vmem:[#allocation34_spill] sm:$0xff] %v14499_v40  ;;  %20037 = vst [vmem:[#allocation35_spill] sm:$0xff] %v14503_v41  ;;  %v1328_v43 = vrot.slane %v935_v34, 7  ;;  %v936_v44 = vmul.f32 0.0, %v14499_v40  ;;  %v937_v45 = vmul.f32 %v14503_v41, %v14440_v20  ;;  %v938_v46 = vmul.f32 %v14507_v42, %v14475_v33  ;;  %s10548_s23 = sshll.u32 %s510_s20, 4  ;;  %s19750_s19 = scalar_lea.hbm %s19798_s13, %s11497_s17  ;;  %s10549_s23 = int_to_ptr.vmem [resolvable:$true] %s10548_s23 }
  0x80   : > { %20035 = vst [vmem:[#allocation33_spill] sm:$0xff] %v14495_v39  ;;  %20038 = vst [vmem:[#allocation36_spill] sm:$0xff] %v14507_v42  ;;  %v14519_v47 = vsel %vm837_vm2, %v845_v32, %v14416_v8  ;;  %v591_v50 = vand.u32 15, %v14424_v13  ;;  %v849_v59 = vrot.slane %v10684_v48, 1  ;;  %v853_v60 = vrot.slane %v10685_v49, 1  ;;  %12367 = vmatmul.mubr.msk.f32.gmra.mxu0 %vm970_vm1, %v14539_v53  ;;  %s14109_s22 = scalar_lea.vmem %s10549_s23, 16 }
  0x81   : > { %20039 = vst [vmem:[#allocation37_spill] sm:$0xff] %v14519_v47  ;;  %v14536_v52 = vsel %vm1326_vm3, %v14495_v39, %v1328_v43  ;;  %v14541_v54 = vrot.slane %v936_v44, 7  ;;  %v1332_v55 = vrot.slane %v937_v45, 7  ;;  %v1334_v56 = vrot.slane %v938_v46, 7  ;;  %v10812_v13 = vld [vmem:[%s19786_s1 + $0xc] sm:$0x7]  ;;  %12369 = vmatprep.mubr.msk.f32.mxu0 %vm970_vm1, %v14546_v57  ;;  %p14110_p4 = scmp.ne.s32.totalorder %s10549_s23, %s14109_s22 }
  0x82   : > { %20040 = vst [vmem:[#allocation38_spill] sm:$0xff] %v14536_v52  ;;  %12410 = vmatprep.mubr.msk.f32.mxu1 %vm970_vm1, %v14536_v52  ;;  %v939_v58 = vmul.f32 %v14519_v47, %v14493_v38  ;;  %vm623_vm9 = vcmp.gt.s32.totalorder %v591_v50, 0  ;;  %v14567_v9 = vsel %vm837_vm2, %v14416_v8, %v849_v59  ;;  %v14571_v11 = vsel %vm837_vm2, %v849_v59, %v14416_v8  ;;  %v14631_v44 = vld [vmem:[%s14414_s14 + $0x38] sm:$0xff]  ;;  %v14635_v46 = vld [vmem:[%s14414_s14 + $0x40] sm:$0xff]  ;;  %s14198_s30 = smov [#allocation13]  }
  0x83   : > { %20041 = vst [vmem:[#allocation39_spill] sm:$0xff] %v14541_v54  ;;  %v14553_v61 = vsel %vm1326_vm3, %v1328_v43, %v14541_v54  ;;  %v1333_v62 = vsel %vm1326_vm3, %v14541_v54, %v1332_v55  ;;  %v1335_v63 = vsel %vm1326_vm3, %v1332_v55, %v1334_v56  ;;  %v10686_v0 = vsel %vm623_vm9, 1.0, %v19818_v1  ;;  %20043 = vst [vmem:[#allocation41_spill] sm:$0xff] %v14567_v9  ;;  %v14625_v43 = vld [vmem:[%s19786_s1 + $0x14] sm:$0x7]  ;;  %p14111_p8 = pnand %p14110_p4, %p20739_p7  ;;  %s14113_s29 = sshll.u32 %s14198_s30, 4  ;;  %s14114_s29 = int_to_ptr.vmem [resolvable:$false] %s14113_s29 }
  0x84   : > { %20042 = vst [vmem:[#allocation40_spill] sm:$0xff] %v14553_v61  ;;  %v1336_v7 = vrot.slane %v939_v58, 7  ;;  %20044 = vst [vmem:[#allocation42_spill] sm:$0xff] %v14571_v11  ;;  %v14575_v12 = vsel %vm837_vm2, %v14416_v8, %v853_v60  ;;  %12411 = vmatmul.mubr.msk.f32.vlgmr.msra.gmra.mxu1 %vm970_vm1, %v14553_v61  ;;  %v940_v16 = vmul.f32 %v14567_v9, %v14539_v53  ;;  %v857_v24 = vrot.slane %v10686_v0, 1  ;;  %p14116_p11 = scmp.lt.s32.totalorder %s10549_s23, %s14114_s29 }
  0x85   : > { %20045 = vst [vmem:[#allocation43_spill] sm:$0xff] %v14575_v12  ;;  %v941_v17 = vmul.f32 %v14571_v11, %v14546_v57  ;;  %v942_v18 = vmul.f32 %v14575_v12, %v14563_v3  ;;  %12413 = vmatprep.mubr.msk.f32.mxu1 %vm970_vm1, %v1333_v62  ;;  %v14602_v28 = vsel %vm837_vm2, %v853_v60, %v14416_v8  ;;  %v593_v30 = vand.u32 15, %v14445_v22  ;;  %p14112_p9 = pneg %p14111_p8 }
  0x86   : > { %v1337_v26 = vsel %vm1326_vm3, %v1334_v56, %v1336_v7  ;;  %20046 = vst [vmem:[#allocation44_spill] sm:$0xff] %v14602_v28  ;;  %v595_v31 = vand.u32 15, %v14458_v27  ;;  %12508 = vmatprep.subr.msk.mxu1 %vm1064_vm0, %v10812_v13  ;;  %v1338_v32 = vrot.slane %v940_v16, 7  ;;  %v943_v36 = vmul.f32 %v14602_v28, %v14597_v25  ;;  %12370 = vmatmul.mubr.msk.f32.gmra.mxu0 %vm970_vm1, %v14563_v3 }
  0x87   : > { %v1340_v34 = vrot.slane %v941_v17, 7  ;;  %v1342_v35 = vrot.slane %v942_v18, 7  ;;  %12509 = vmatpush3.msk.msra.mxu1 %vm1064_vm0, %v10812_v13  ;;  %v14616_v22 = vsel %vm837_vm2, %v14416_v8, %v857_v24  ;;  %v14620_v27 = vsel %vm837_vm2, %v857_v24, %v14416_v8  ;;  %12372 = vmatprep.mubr.msk.f32.mxu0 %vm970_vm1, %v14597_v25  ;;  %v14658_v17 = vld [vmem:[%s14414_s14 + $0x48] sm:$0xff]  ;;  %v14661_v18 = vld [vmem:[%s14414_s14 + $0x50] sm:$0xff] }
  0x88   : > { %20047 = vst [vmem:[#allocation45_spill] sm:$0xff] %v14616_v22  ;;  %20048 = vst [vmem:[#allocation46_spill] sm:$0xff] %v14620_v27  ;;  %vm625_vm10 = vcmp.gt.s32.totalorder %v593_v30, 0  ;;  %vm627_vm11 = vcmp.gt.s32.totalorder %v595_v31, 0  ;;  %12414 = vmatmul.mubr.msk.f32.gmra.mxu1 %vm970_vm1, %v1335_v63  ;;  %v1339_v45 = vsel %vm1326_vm3, %v1336_v7, %v1338_v32  ;;  %v1344_v50 = vrot.slane %v943_v36, 7  ;;  %12608 = vmatprep.subr.msk.mxu1 %vm1064_vm0, %v14625_v43 }
  0x89   : > { %v1341_v48 = vsel %vm1326_vm3, %v1338_v32, %v1340_v34  ;;  %v1343_v49 = vsel %vm1326_vm3, %v1340_v34, %v1342_v35  ;;  %12416 = vmatprep.mubr.msk.f32.mxu1 %vm970_vm1, %v1337_v26  ;;  %v944_v51 = vmul.f32 %v14616_v22, %v14631_v44  ;;  %v945_v55 = vmul.f32 %v14620_v27, %v14635_v46  ;;  %v14677_v32 = vld [vmem:[%s14414_s14 + $0x58] sm:$0xff] }
  0x8a   : > { %v10687_v56 = vsel %vm625_vm10, 1.0, %v19818_v1  ;;  %v10688_v58 = vsel %vm627_vm11, 1.0, %v19818_v1  ;;  %v1345_v59 = vsel %vm1326_vm3, %v1342_v35, %v1344_v50  ;;  %v565_v63 = vadd.s32 128, %v14399_v2  ;;  %12373 = vmatmul.mubr.msk.f32.gmra.mxu0 %vm970_vm1, %v14631_v44 }
  0x8b   : > { %v861_v60 = vrot.slane %v10687_v56, 1  ;;  %v865_v62 = vrot.slane %v10688_v58, 1  ;;  %v1346_v0 = vrot.slane %v944_v51, 7  ;;  %v1348_v7 = vrot.slane %v945_v55, 7  ;;  %12375 = vmatprep.mubr.msk.f32.mxu0 %vm970_vm1, %v14635_v46  ;;  %v14686_v51 = vld [vmem:[%s14414_s14 + $0x60] sm:$0xff] }
  0x8c   : > { %v567_v13 = vadd.s32 144, %v14399_v2  ;;  %v569_v16 = vadd.s32 160, %v14399_v2  ;;  %12417 = vmatmul.mubr.msk.f32.gmra.mxu1 %vm970_vm1, %v1339_v45  ;;  %v597_v31 = vand.u32 15, %v565_v63 }
  0x8d   : > { %v14665_v24 = vsel %vm837_vm2, %v14416_v8, %v861_v60  ;;  %v14669_v26 = vsel %vm837_vm2, %v861_v60, %v14416_v8  ;;  %v14673_v30 = vsel %vm837_vm2, %v14416_v8, %v865_v62  ;;  %12419 = vmatprep.mubr.msk.f32.mxu1 %vm970_vm1, %v1341_v48  ;;  %v1347_v34 = vsel %vm1326_vm3, %v1344_v50, %v1346_v0 }
  0x8e   : > { %20049 = vst [vmem:[#allocation47_spill] sm:$0xff] %v14665_v24  ;;  %20050 = vst [vmem:[#allocation48_spill] sm:$0xff] %v14669_v26  ;;  %v1349_v35 = vsel %vm1326_vm3, %v1346_v0, %v1348_v7  ;;  %v946_v36 = vmul.f32 %v14665_v24, %v14658_v17  ;;  %v947_v45 = vmul.f32 %v14669_v26, %v14661_v18  ;;  %vm629_vm12 = vcmp.gt.s32.totalorder %v597_v31, 0 }
  0x8f   : > { %20051 = vst [vmem:[#allocation49_spill] sm:$0xff] %v14673_v30  ;;  %v948_v55 = vmul.f32 %v14673_v30, %v14677_v32  ;;  %v14692_v48 = vsel %vm837_vm2, %v865_v62, %v14416_v8  ;;  %v599_v56 = vand.u32 15, %v567_v13  ;;  %12376 = vmatmul.mubr.msk.f32.gmra.mxu0 %vm970_vm1, %v14658_v17  ;;  %v10689_v63 = vsel %vm629_vm12, 1.0, %v19818_v1  ;;  %v14822_v30 = vld [vmem:[%s14414_s14 + $0xb0] sm:$0xff] }
  0x90   : > { %20052 = vst [vmem:[#allocation50_spill] sm:$0xff] %v14692_v48  ;;  %v1350_v50 = vrot.slane %v946_v36, 7  ;;  %v1352_v58 = vrot.slane %v947_v45, 7  ;;  %v949_v60 = vmul.f32 %v14692_v48, %v14686_v51  ;;  %12420 = vmatmul.mubr.msk.f32.gmra.mxu1 %vm970_vm1, %v1343_v49  ;;  %12378 = vmatprep.mubr.msk.f32.mxu0 %vm970_vm1, %v14661_v18  ;;  %v869_v0 = vrot.slane %v10689_v63, 1  ;;  %v14710_v49 = vld [vmem:[%s14414_s14 + $0x70] sm:$0xff]  ;;  %20072 = vst [vmem:[#allocation67_spill] sm:$0xff] %v14822_v30 }
  0x91   : > { %v1354_v62 = vrot.slane %v948_v55, 7  ;;  %vm631_vm13 = vcmp.gt.s32.totalorder %v599_v56, 0  ;;  %v601_v13 = vand.u32 15, %v569_v16  ;;  %12422 = vmatprep.mubr.msk.f32.mxu1 %vm970_vm1, %v1345_v59 }
  0x92   : > { %v1351_v31 = vsel %vm1326_vm3, %v1348_v7, %v1350_v50  ;;  %v1353_v36 = vsel %vm1326_vm3, %v1350_v50, %v1352_v58  ;;  %v1356_v45 = vrot.slane %v949_v60, 7  ;;  %v10690_v6 = vsel %vm631_vm13, 1.0, %v19818_v1  ;;  %v14732_v60 = vld [vmem:[%s14414_s14 + $0x78] sm:$0xff] }
  0x93   : > { %v1355_v55 = vsel %vm1326_vm3, %v1352_v58, %v1354_v62  ;;  %v14715_v16 = vsel %vm837_vm2, %v14416_v8, %v869_v0  ;;  %v14719_v59 = vsel %vm837_vm2, %v869_v0, %v14416_v8  ;;  %v873_v7 = vrot.slane %v10690_v6, 1  ;;  %12379 = vmatmul.mubr.msk.f32.gmra.mxu0 %vm970_vm1, %v14677_v32  ;;  %20055 = vst [vmem:[#allocation53_spill] sm:$0xff] %v14732_v60  ;;  %v14735_v6 = vld [vmem:[%s14414_s14 + $0x80] sm:$0xff] }
  0x94   : > { %20053 = vst [vmem:[#allocation51_spill] sm:$0xff] %v14715_v16  ;;  %20054 = vst [vmem:[#allocation52_spill] sm:$0xff] %v14719_v59  ;;  %v1357_v56 = vsel %vm1326_vm3, %v1354_v62, %v1356_v45  ;;  %v950_v50 = vmul.f32 %v14715_v16, %v14707_v5  ;;  %v951_v58 = vmul.f32 %v14719_v59, %v14710_v49  ;;  %vm633_vm14 = vcmp.gt.s32.totalorder %v601_v13, 0 }
  0x95   : > { %12423 = vmatmul.mubr.msk.f32.gmra.mxu1 %vm970_vm1, %v1347_v34  ;;  %12381 = vmatprep.mubr.msk.f32.mxu0 %vm970_vm1, %v14686_v51  ;;  %20056 = vst [vmem:[#allocation54_spill] sm:$0xff] %v14735_v6  ;;  %v14739_v63 = vsel %vm837_vm2, %v14416_v8, %v873_v7  ;;  %v14743_v62 = vsel %vm837_vm2, %v873_v7, %v14416_v8  ;;  %v10691_v0 = vsel %vm633_vm14, 1.0, %v19818_v1  ;;  %v571_v13 = vadd.s32 176, %v14399_v2 }
  0x96   : > { %20057 = vst [vmem:[#allocation55_spill] sm:$0xff] %v14739_v63  ;;  %20058 = vst [vmem:[#allocation56_spill] sm:$0xff] %v14743_v62  ;;  %12425 = vmatprep.mubr.msk.f32.mxu1 %vm970_vm1, %v1349_v35  ;;  %v1358_v34 = vrot.slane %v950_v50, 7  ;;  %v1360_v4 = vrot.slane %v951_v58, 7  ;;  %v952_v54 = vmul.f32 %v14739_v63, %v14732_v60  ;;  %v953_v61 = vmul.f32 %v14743_v62, %v14735_v6 }
  0x97   : > { %v877_v52 = vrot.slane %v10691_v0, 1  ;;  %v603_v21 = vand.u32 15, %v571_v13  ;;  %v573_v7 = vadd.s32 192, %v14399_v2  ;;  %v14754_v1 = vadd.s32 8, %v14399_v2  ;;  %12382 = vmatmul.mubr.msk.f32.gmra.mxu0 %vm970_vm1, %v14707_v5  ;;  %v14764_v0 = vld [vmem:[%s14414_s14 + $0x88] sm:$0xff]  ;;  %v14767_v13 = vld [vmem:[%s14414_s14 + $0x90] sm:$0xff] }
  0x98   : > { %v1359_v35 = vsel %vm1326_vm3, %v1356_v45, %v1358_v34  ;;  %v1361_v50 = vsel %vm1326_vm3, %v1358_v34, %v1360_v4  ;;  %v1362_v58 = vrot.slane %v952_v54, 7  ;;  %v1364_v59 = vrot.slane %v953_v61, 7  ;;  %12384 = vmatprep.mubr.msk.f32.mxu0 %vm970_vm1, %v14710_v49  ;;  %20060 = vst [vmem:[#allocation58_spill] sm:$0xff] %v14764_v0  ;;  %20061 = vst [vmem:[#allocation59_spill] sm:$0xff] %v14767_v13 }
  0x99   : > { %20059 = vst [vmem:[#allocation57_spill] sm:$0xff] %v14754_v1  ;;  %12426 = vmatmul.mubr.msk.f32.gmra.mxu1 %vm970_vm1, %v1351_v31  ;;  %v14771_v62 = vsel %vm837_vm2, %v14416_v8, %v877_v52  ;;  %v14775_v45 = vsel %vm837_vm2, %v877_v52, %v14416_v8  ;;  %vm635_vm15 = vcmp.gt.s32.totalorder %v603_v21, 0  ;;  %v605_v54 = vand.u32 15, %v573_v7 }
  0x9a   : > { %20062 = vst [vmem:[#allocation60_spill] sm:$0xff] %v14771_v62  ;;  %20063 = vst [vmem:[#allocation61_spill] sm:$0xff] %v14775_v45  ;;  %12428 = vmatprep.mubr.msk.f32.mxu1 %vm970_vm1, %v1353_v36  ;;  %v1363_v61 = vsel %vm1326_vm3, %v1360_v4, %v1362_v58  ;;  %v1365_v31 = vsel %vm1326_vm3, %v1362_v58, %v1364_v59  ;;  %v954_v34 = vmul.f32 %v14771_v62, %v14764_v0  ;;  %v20064_v16 = vmov 0.0  }
  0x9b   : > { %v955_v63 = vmul.f32 %v14775_v45, %v14767_v13  ;;  %v10692_v48 = vsel %vm635_vm15, 1.0, %v20064_v16  ;;  %vm637_vm4 = vcmp.gt.s32.totalorder %v605_v54, 0  ;;  %v582_v21 = vand.u32 15, %v14754_v1  ;;  %12385 = vmatmul.mubr.msk.f32.gmra.mxu0 %vm970_vm1, %v14732_v60 }
  0x9c   : > { %v14787_v52 = vmul.f32 0.0, %v14419_v10  ;;  %v1366_v4 = vrot.slane %v954_v34, 7  ;;  %v881_v7 = vrot.slane %v10692_v48, 1  ;;  %v10693_v58 = vsel %vm637_vm4, 1.0, %v20064_v16  ;;  %12387 = vmatprep.mubr.msk.f32.mxu0 %vm970_vm1, %v14735_v6  ;;  %v14803_v48 = vld [vmem:[%s14414_s14 + $0x98] sm:$0xff] }
  0x9d   : > { %v1368_v36 = vrot.slane %v955_v63, 7  ;;  %12429 = vmatmul.mubr.msk.f32.gmra.mxu1 %vm970_vm1, %v1355_v55  ;;  %v885_v54 = vrot.slane %v10693_v58, 1  ;;  %vm14795_vm5 = vcmp.lt.s32.totalorder %v582_v21, 15  ;;  %v575_v34 = vadd.s32 208, %v14399_v2  ;;  %20067 = vst [vmem:[#allocation62_spill] sm:$0xff] %v14803_v48  ;;  %v14806_v63 = vld [vmem:[%s14414_s14 + $0xa0] sm:$0xff] }
  0x9e   : > { %v1880_v45 = vrot.slane %v14787_v52, 1  ;;  %12431 = vmatprep.mubr.msk.f32.mxu1 %vm970_vm1, %v1357_v56  ;;  %20068 = vst [vmem:[#allocation63_spill] sm:$0xff] %v14806_v63  ;;  %v1367_v55 = vsel %vm1326_vm3, %v1364_v59, %v1366_v4  ;;  %v14812_v21 = vsel %vm837_vm2, %v14416_v8, %v881_v7  ;;  %v14816_v58 = vsel %vm837_vm2, %v881_v7, %v14416_v8  ;;  %v14819_v52 = vld [vmem:[%s14414_s14 + $0xa8] sm:$0xff] }
  0x9f   : > { %v1369_v62 = vsel %vm1326_vm3, %v1366_v4, %v1368_v36  ;;  %20069 = vst [vmem:[#allocation64_spill] sm:$0xff] %v14812_v21  ;;  %20070 = vst [vmem:[#allocation65_spill] sm:$0xff] %v14816_v58  ;;  %v956_v56 = vmul.f32 %v14812_v21, %v14803_v48  ;;  %v957_v59 = vmul.f32 %v14816_v58, %v14806_v63  ;;  %12388 = vmatmul.mubr.msk.f32.gmra.mxu0 %vm970_vm1, %v14764_v0 }
  0xa0   : > { %20071 = vst [vmem:[#allocation66_spill] sm:$0xff] %v14819_v52  ;;  %v14830_v4 = vsel %vm837_vm2, %v14416_v8, %v885_v54  ;;  %v14834_v26 = vsel %vm837_vm2, %v885_v54, %v14416_v8  ;;  %v10697_v58 = vsel %vm14795_vm5, 1.0, %v20064_v16  ;;  %v607_v6 = vand.u32 15, %v575_v34  ;;  %12390 = vmatprep.mubr.msk.f32.mxu0 %vm970_vm1, %v14767_v13 }
  0xa1   : > { %20073 = vst [vmem:[#allocation68_spill] sm:$0xff] %v14830_v4  ;;  %20074 = vst [vmem:[#allocation69_spill] sm:$0xff] %v14834_v26  ;;  %v958_v7 = vmul.f32 %v14830_v4, %v14819_v52  ;;  %v959_v21 = vmul.f32 %v14834_v26, %v14822_v30  ;;  %12432 = vmatmul.mubr.msk.f32.gmra.mxu1 %vm970_vm1, %v1359_v35  ;;  %v1370_v54 = vrot.slane %v956_v56, 7  ;;  %v1372_v60 = vrot.slane %v957_v59, 7 }
  0xa2   : > { %v1717_v24 = vrot.slane %v10697_v58, 7  ;;  %v14849_v0 = vadd.s32 24, %v14399_v2  ;;  %12434 = vmatprep.mubr.msk.f32.mxu1 %vm970_vm1, %v1361_v50  ;;  %vm639_vm6 = vcmp.gt.s32.totalorder %v607_v6, 0  ;;  %v577_v1 = vadd.s32 224, %v14399_v2 }
  0xa3   : > { %v1374_v4 = vrot.slane %v958_v7, 7  ;;  %v1376_v26 = vrot.slane %v959_v21, 7  ;;  %v1371_v34 = vsel %vm1326_vm3, %v1368_v36, %v1370_v54  ;;  %v1373_v35 = vsel %vm1326_vm3, %v1370_v54, %v1372_v60  ;;  %12391 = vmatmul.mubr.msk.f32.gmra.mxu0 %vm970_vm1, %v14803_v48 }
  0xa4   : > { %20075 = vst [vmem:[#allocation70_spill] sm:$0xff] %v14849_v0  ;;  %v14857_v56 = vsel %vm1326_vm3, %v14419_v10, %v1717_v24  ;;  %v10694_v58 = vsel %vm639_vm6, 1.0, %v20064_v16  ;;  %12393 = vmatprep.mubr.msk.f32.mxu0 %vm970_vm1, %v14806_v63  ;;  %v14874_v59 = vsel %vm1326_vm3, %v1717_v24, %v14419_v10  ;;  %v584_v7 = vand.u32 15, %v14849_v0 }
  0xa5   : > { %20076 = vst [vmem:[#allocation71_spill] sm:$0xff] %v14857_v56  ;;  %v14863_v50 = vsel %vm1326_vm3, %v1372_v60, %v1374_v4  ;;  %v14866_v6 = vsel %vm1326_vm3, %v1374_v4, %v1376_v26  ;;  %v1813_v36 = vmul.f32 0.0, %v14857_v56  ;;  %v889_v21 = vrot.slane %v10694_v58, 1  ;;  %12435 = vmatmul.mubr.msk.f32.gmra.mxu1 %vm970_vm1, %v1363_v61  ;;  %20077 = vst [vmem:[#allocation72_spill] sm:$0xff] %v14874_v59  ;;  %v14882_v4 = vld [vmem:[%s14414_s14 + $0xb8] sm:$0xff]  ;;  %v14885_v58 = vld [vmem:[%s14414_s14 + $0xc0] sm:$0xff] }
  0xa6   : > { %v609_v54 = vand.u32 15, %v577_v1  ;;  %v14878_v60 = vadd.s32 40, %v14399_v2  ;;  %12437 = vmatprep.mubr.msk.f32.mxu1 %vm970_vm1, %v1365_v31  ;;  %20079 = vst [vmem:[#allocation74_spill] sm:$0xff] %v14882_v4  ;;  %v1814_v24 = vmul.f32 %v14874_v59, %v14440_v20  ;;  %vm712_vm7 = vcmp.lt.s32.totalorder %v584_v7, 15 }
  0xa7   : > { %v14887_v61 = vrot.slane %v1813_v36, 1  ;;  %v14891_v56 = vsel %vm837_vm2, %v14416_v8, %v889_v21  ;;  %v14897_v1 = vsel %vm837_vm2, %v889_v21, %v14416_v8  ;;  %12394 = vmatmul.mubr.msk.f32.gmra.mxu0 %vm970_vm1, %v14819_v52  ;;  %v10698_v21 = vsel %vm712_vm7, 1.0, %v20064_v16 }
  0xa8   : > { %20078 = vst [vmem:[#allocation73_spill] sm:$0xff] %v14878_v60  ;;  %20081 = vst [vmem:[#allocation76_spill] sm:$0xff] %v14891_v56  ;;  %v960_v31 = vmul.f32 %v14891_v56, %v14882_v4  ;;  %v961_v0 = vmul.f32 %v14897_v1, %v14885_v58  ;;  %vm641_vm8 = vcmp.gt.s32.totalorder %v609_v54, 0  ;;  %v1883_v59 = vrot.slane %v1814_v24, 1  ;;  %12396 = vmatprep.mubr.msk.f32.mxu0 %vm970_vm1, %v14822_v30 }
  0xa9   : > { %20080 = vst [vmem:[#allocation75_spill] sm:$0xff] %v14887_v61  ;;  %20082 = vst [vmem:[#allocation77_spill] sm:$0xff] %v14897_v1  ;;  %v14907_v36 = vsel %vm837_vm2, %v1880_v45, %v14887_v61  ;;  %v10695_v63 = vsel %vm641_vm8, 1.0, %v20064_v16  ;;  %12438 = vmatmul.mubr.msk.f32.gmra.mxu1 %vm970_vm1, %v1367_v55  ;;  %v1721_v1 = vrot.slane %v10698_v21, 7  ;;  %v586_v24 = vand.u32 15, %v14878_v60  ;;  %v14923_v55 = vld [vmem:[%s14414_s14 + $0xc8] sm:$0xff] }
  0xaa   : > { %20083 = vst [vmem:[#allocation78_spill] sm:$0xff] %v14907_v36  ;;  %v1378_v7 = vrot.slane %v960_v31, 7  ;;  %v1380_v54 = vrot.slane %v961_v0, 7  ;;  %v893_v56 = vrot.slane %v10695_v63, 1  ;;  %12440 = vmatprep.mubr.msk.f32.mxu1 %vm970_vm1, %v1369_v62  ;;  %v1884_v45 = vsel %vm837_vm2, %v14887_v61, %v1883_v59 }
  0xab   : > { %v579_v52 = vadd.s32 240, %v14399_v2  ;;  %v14920_v48 = vadd.s32 56, %v14399_v2  ;;  %v14929_v63 = vsel %vm1326_vm3, %v14419_v10, %v1721_v1  ;;  %12397 = vmatmul.mubr.msk.f32.gmra.mxu0 %vm970_vm1, %v14882_v4  ;;  %vm714_vm9 = vcmp.lt.s32.totalorder %v586_v24, 15 }
  0xac   : > { %v1379_v30 = vsel %vm1326_vm3, %v1376_v26, %v1378_v7  ;;  %v1381_v0 = vsel %vm1326_vm3, %v1378_v7, %v1380_v54  ;;  %20085 = vst [vmem:[#allocation80_spill] sm:$0xff] %v14929_v63  ;;  %v14933_v62 = vsel %vm837_vm2, %v14416_v8, %v893_v56  ;;  %v1815_v31 = vmul.f32 %v14929_v63, %v14475_v33 }
  0xad   : > { %20084 = vst [vmem:[#allocation79_spill] sm:$0xff] %v14920_v48  ;;  %20086 = vst [vmem:[#allocation81_spill] sm:$0xff] %v14933_v62  ;;  %v962_v21 = vmul.f32 %v14933_v62, %v14923_v55  ;;  %v14943_v26 = vsel %vm1326_vm3, %v1721_v1, %v14419_v10  ;;  %v14947_v7 = vsel %vm837_vm2, %v893_v56, %v14416_v8  ;;  %12441 = vmatmul.mubr.msk.f32.gmra.mxu1 %vm970_vm1, %v1371_v34 }
  0xae   : > { %20087 = vst [vmem:[#allocation82_spill] sm:$0xff] %v14943_v26  ;;  %20088 = vst [vmem:[#allocation83_spill] sm:$0xff] %v14947_v7  ;;  %12399 = vmatprep.mubr.msk.f32.mxu0 %vm970_vm1, %v14885_v58  ;;  %v1816_v60 = vmul.f32 %v14943_v26, %v14493_v38  ;;  %v963_v61 = vmul.f32 %v14947_v7, %v14430_v15  ;;  %v611_v63 = vand.u32 15, %v579_v52  ;;  %12443 = vmatprep.mubr.msk.f32.mxu1 %vm970_vm1, %v1373_v35 }
  0xaf   : > { %v1885_v1 = vrot.slane %v1815_v31, 1  ;;  %v1382_v62 = vrot.slane %v962_v21, 7  ;;  %v10699_v56 = vsel %vm714_vm9, 1.0, %v20064_v16  ;;  %v588_v4 = vand.u32 15, %v14920_v48  ;;  %12400 = vmatmul.mubr.msk.f32.gmra.mxu0 %vm970_vm1, %v14923_v55 }
  0xb0   : > { %v1887_v34 = vrot.slane %v1816_v60, 1  ;;  %v1384_v13 = vrot.slane %v963_v61, 7  ;;  %v1725_v27 = vrot.slane %v10699_v56, 7  ;;  %vm643_vm10 = vcmp.gt.s32.totalorder %v611_v63, 0  ;;  %12460 = vmatprep.mubr.msk.f32.mxu0 %vm970_vm1, %v14907_v36  ;;  %v15003_v56 = vld [vmem:[%s19786_s1 + $0x18] sm:$0x7] }
  0xb1   : > { %v1886_v26 = vsel %vm837_vm2, %v1883_v59, %v1885_v1  ;;  %v1383_v15 = vsel %vm1326_vm3, %v1380_v54, %v1382_v62  ;;  %v10696_v52 = vsel %vm643_vm10, 1.0, %v20064_v16  ;;  %vm716_vm11 = vcmp.lt.s32.totalorder %v588_v4, 15  ;;  %12444 = vmatmul.mubr.msk.f32.gmra.mxu1 %vm970_vm1, %v14863_v50 }
  0xb2   : > { %v1888_v35 = vsel %vm837_vm2, %v1885_v1, %v1887_v34  ;;  %v1385_v60 = vsel %vm1326_vm3, %v1382_v62, %v1384_v13  ;;  %v14972_v61 = vsel %vm1326_vm3, %v14419_v10, %v1725_v27  ;;  %v897_v59 = vrot.slane %v10696_v52, 1  ;;  %12446 = vmatprep.mubr.msk.f32.mxu1 %vm970_vm1, %v14866_v6 }
  0xb3   : > { %20089 = vst [vmem:[#allocation84_spill] sm:$0xff] %v14972_v61  ;;  %v1817_v4 = vmul.f32 %v14972_v61, %v14539_v53  ;;  %v14980_v50 = vsel %vm1326_vm3, %v1725_v27, %v14419_v10  ;;  %v10700_v54 = vsel %vm716_vm11, 1.0, %v20064_v16  ;;  %v1390_v24 = vrot.slane %v14487_v37, 7  ;;  %12461 = vmatmul.mubr.msk.f32.vlgmr.msra.gmra.mxu0 %vm970_vm1, %v1884_v45 }
  0xb4   : > { %20090 = vst [vmem:[#allocation85_spill] sm:$0xff] %v14980_v50  ;;  %v14986_v63 = vsel %vm837_vm2, %v14416_v8, %v897_v59  ;;  %v1818_v62 = vmul.f32 %v14980_v50, %v14546_v57  ;;  %v14992_v6 = vsel %vm837_vm2, %v897_v59, %v14416_v8  ;;  %v1729_v31 = vrot.slane %v10700_v54, 7  ;;  %12463 = vmatprep.mubr.msk.f32.mxu0 %vm970_vm1, %v1886_v26 }
  0xb5   : > { %20091 = vst [vmem:[#allocation86_spill] sm:$0xff] %v14986_v63  ;;  %20092 = vst [vmem:[#allocation87_spill] sm:$0xff] %v14992_v6  ;;  %v1889_v27 = vrot.slane %v1817_v4, 1  ;;  %v964_v21 = vmul.f32 %v14986_v63, %v14437_v19  ;;  %v965_v37 = vmul.f32 %v14992_v6, %v14450_v23  ;;  %v558_v1 = vadd.s32 72, %v14399_v2  ;;  %12447 = vmatmul.mubr.msk.f32.gmra.mxu1 %vm970_vm1, %v1379_v30 }
  0xb6   : > { %v1891_v52 = vrot.slane %v1818_v62, 1  ;;  %v15009_v45 = vsel %vm1326_vm3, %v14419_v10, %v1729_v31  ;;  %v15013_v19 = vsel %vm1326_vm3, %v1729_v31, %v14419_v10  ;;  %v2269_v23 = vmul.f32 %v14467_v29, %v14440_v20  ;;  %12449 = vmatprep.mubr.msk.f32.mxu1 %vm970_vm1, %v1381_v0  ;;  %12559 = vmatpush3.msk.msra.mxu0 %vm1064_vm0, %v14583_v14 }
  0xb7   : > { %20093 = vst [vmem:[#allocation88_spill] sm:$0xff] %v15009_v45  ;;  %20094 = vst [vmem:[#allocation89_spill] sm:$0xff] %v15013_v19  ;;  %v1890_v59 = vsel %vm837_vm2, %v1887_v34, %v1889_v27  ;;  %v1386_v4 = vrot.slane %v964_v21, 7  ;;  %v1388_v30 = vrot.slane %v965_v37, 7  ;;  %v1819_v26 = vmul.f32 %v15009_v45, %v14563_v3  ;;  %12658 = vmatprep.subr.msk.mxu0 %vm1064_vm0, %v15003_v56 }
  0xb8   : > { %v1892_v54 = vsel %vm837_vm2, %v1889_v27, %v1891_v52  ;;  %v1820_v62 = vmul.f32 %v15013_v19, %v14597_v25  ;;  %v590_v31 = vand.u32 15, %v558_v1  ;;  %v2335_v48 = vrot.slane %v2269_v23, 7  ;;  %12464 = vmatmul.mubr.msk.f32.gmra.mxu0 %vm970_vm1, %v1888_v35 }
  0xb9   : > { %v1387_v20 = vsel %vm1326_vm3, %v1384_v13, %v1386_v4  ;;  %v1389_v0 = vsel %vm1326_vm3, %v1386_v4, %v1388_v30  ;;  %v1893_v34 = vrot.slane %v1819_v26, 1  ;;  %v1391_v21 = vsel %vm1326_vm3, %v1388_v30, %v1390_v24  ;;  %12450 = vmatmul.mubr.msk.f32.gmra.mxu1 %vm970_vm1, %v1383_v15  ;;  %12466 = vmatprep.mubr.msk.f32.mxu0 %vm970_vm1, %v1890_v59 }
  0xba   : > { %v1895_v14 = vrot.slane %v1820_v62, 1  ;;  %vm718_vm12 = vcmp.lt.s32.totalorder %v590_v31, 15  ;;  %v2336_v27 = vsel %vm1326_vm3, %v14495_v39, %v2335_v48  ;;  %v2270_v37 = vmul.f32 %v14499_v40, %v14475_v33  ;;  %12452 = vmatprep.mubr.msk.f32.mxu1 %vm970_vm1, %v1385_v60 }
  0xbb   : > { %v1894_v13 = vsel %vm837_vm2, %v1891_v52, %v1893_v34  ;;  %v10701_v35 = vsel %vm718_vm12, 1.0, %v20064_v16  ;;  %v560_v24 = vadd.s32 88, %v14399_v2  ;;  %v2271_v15 = vmul.f32 %v14503_v41, %v14493_v38 }
  0xbc   : > { %v1896_v1 = vsel %vm837_vm2, %v1893_v34, %v1895_v14  ;;  %v1733_v23 = vrot.slane %v10701_v35, 7  ;;  %v2337_v59 = vrot.slane %v2270_v37, 7  ;;  %v2272_v4 = vmul.f32 %v14507_v42, %v14539_v53  ;;  %12467 = vmatmul.mubr.msk.f32.gmra.mxu0 %vm970_vm1, %v1892_v54 }
  0xbd   : > { %v592_v33 = vand.u32 15, %v560_v24  ;;  %v2339_v60 = vrot.slane %v2271_v15, 7  ;;  %v562_v52 = vadd.s32 104, %v14399_v2  ;;  %v2273_v30 = vmul.f32 %v14519_v47, %v14546_v57  ;;  %12453 = vmatmul.mubr.msk.f32.gmra.mxu1 %vm970_vm1, %v1387_v20  ;;  %12469 = vmatprep.mubr.msk.f32.mxu0 %vm970_vm1, %v1894_v13 }
  0xbe   : > { %v15055_v38 = vsel %vm1326_vm3, %v14419_v10, %v1733_v23  ;;  %v15059_v53 = vsel %vm1326_vm3, %v1733_v23, %v14419_v10  ;;  %v2338_v26 = vsel %vm1326_vm3, %v2335_v48, %v2337_v59  ;;  %v2341_v54 = vrot.slane %v2272_v4, 7  ;;  %12455 = vmatprep.mubr.msk.f32.mxu1 %vm970_vm1, %v1389_v0 }
  0xbf   : > { %20095 = vst [vmem:[#allocation90_spill] sm:$0xff] %v15055_v38  ;;  %20096 = vst [vmem:[#allocation91_spill] sm:$0xff] %v15059_v53  ;;  %v1821_v57 = vmul.f32 %v15055_v38, %v14631_v44  ;;  %v1822_v62 = vmul.f32 %v15059_v53, %v14635_v46  ;;  %vm720_vm13 = vcmp.lt.s32.totalorder %v592_v33, 15  ;;  %v2340_v31 = vsel %vm1326_vm3, %v2337_v59, %v2339_v60 }
  0xc0   : > { %v10702_v20 = vsel %vm720_vm13, 1.0, %v20064_v16  ;;  %v2342_v34 = vsel %vm1326_vm3, %v2339_v60, %v2341_v54  ;;  %v594_v37 = vand.u32 15, %v562_v52  ;;  %v2343_v13 = vrot.slane %v2273_v30, 7  ;;  %12470 = vmatmul.mubr.msk.f32.gmra.mxu0 %vm970_vm1, %v1896_v1 }
  0xc1   : > { %v1897_v48 = vrot.slane %v1821_v57, 1  ;;  %v1899_v35 = vrot.slane %v1822_v62, 1  ;;  %v1737_v0 = vrot.slane %v10702_v20, 7  ;;  %v2274_v24 = vmul.f32 %v14567_v9, %v14563_v3  ;;  %12456 = vmatmul.mubr.msk.f32.gmra.mxu1 %vm970_vm1, %v1391_v21 }
  0xc2   : > { %vm722_vm14 = vcmp.lt.s32.totalorder %v594_v37, 15  ;;  %v2344_v15 = vsel %vm1326_vm3, %v2341_v54, %v2343_v13  ;;  %v564_v23 = vadd.s32 120, %v14399_v2  ;;  %v2275_v59 = vmul.f32 %v14571_v11, %v14597_v25  ;;  %12510 = vmatprep.mubr.msk.f32.mxu1 %vm970_vm1, %v2336_v27  ;;  %v20141_v11 = vld [vmem:[#allocation76_spill] sm:$0xff] }
  0xc3   : > { %v1898_v4 = vsel %vm837_vm2, %v1895_v14, %v1897_v48  ;;  %v1900_v1 = vsel %vm837_vm2, %v1897_v48, %v1899_v35  ;;  %v15083_v33 = vsel %vm1326_vm3, %v14419_v10, %v1737_v0  ;;  %v15087_v3 = vsel %vm1326_vm3, %v1737_v0, %v14419_v10 }
  0xc4   : > { %20097 = vst [vmem:[#allocation92_spill] sm:$0xff] %v15083_v33  ;;  %20098 = vst [vmem:[#allocation93_spill] sm:$0xff] %v15087_v3  ;;  %12472 = vmatprep.mubr.msk.f32.mxu0 %vm970_vm1, %v1898_v4  ;;  %v1823_v21 = vmul.f32 %v15083_v33, %v14658_v17  ;;  %v1824_v25 = vmul.f32 %v15087_v3, %v14661_v18  ;;  %v10703_v14 = vsel %vm722_vm14, 1.0, %v20064_v16  ;;  %v2345_v27 = vrot.slane %v2274_v24, 7 }
  0xc5   : > { %12473 = vmatmul.mubr.msk.f32.gmra.mxu0 %vm970_vm1, %v1900_v1  ;;  %v1741_v60 = vrot.slane %v10703_v14, 7  ;;  %v596_v52 = vand.u32 15, %v564_v23  ;;  %v2347_v30 = vrot.slane %v2275_v59, 7  ;;  %v2276_v54 = vmul.f32 %v14575_v12, %v14631_v44  ;;  %12511 = vmatmul.mubr.msk.f32.vlgmr.msra.gmra.mxu1 %vm970_vm1, %v2338_v26 }
  0xc6   : > { %v1901_v57 = vrot.slane %v1823_v21, 1  ;;  %v1903_v62 = vrot.slane %v1824_v25, 1  ;;  %v2346_v20 = vsel %vm1326_vm3, %v2343_v13, %v2345_v27  ;;  %v566_v37 = vadd.s32 136, %v14399_v2  ;;  %12513 = vmatprep.mubr.msk.f32.mxu1 %vm970_vm1, %v2340_v31  ;;  %12609 = vmatpush3.msk.msra.mxu1 %vm1064_vm0, %v14625_v43  ;;  %v15126_v43 = vld [vmem:[%s19786_s1 + $0x1c] sm:$0x7] }
  0xc7   : > { %v15104_v48 = vsel %vm1326_vm3, %v14419_v10, %v1741_v60  ;;  %v15108_v0 = vsel %vm1326_vm3, %v1741_v60, %v14419_v10  ;;  %vm724_vm15 = vcmp.lt.s32.totalorder %v596_v52, 15  ;;  %v2348_v44 = vsel %vm1326_vm3, %v2345_v27, %v2347_v30  ;;  %12708 = vmatprep.subr.msk.mxu1 %vm1064_vm0, %v15126_v43 }
  0xc8   : > { %20099 = vst [vmem:[#allocation94_spill] sm:$0xff] %v15104_v48  ;;  %20100 = vst [vmem:[#allocation95_spill] sm:$0xff] %v15108_v0  ;;  %v1902_v26 = vsel %vm837_vm2, %v1899_v35, %v1901_v57  ;;  %v1904_v13 = vsel %vm837_vm2, %v1901_v57, %v1903_v62  ;;  %v1825_v31 = vmul.f32 %v15104_v48, %v14677_v32  ;;  %v10704_v23 = vsel %vm724_vm15, 1.0, %v20064_v16 }
  0xc9   : > { %v1826_v24 = vmul.f32 %v15108_v0, %v14686_v51  ;;  %12475 = vmatprep.mubr.msk.f32.mxu0 %vm970_vm1, %v1902_v26  ;;  %v2349_v59 = vrot.slane %v2276_v54, 7  ;;  %v598_v4 = vand.u32 15, %v566_v37  ;;  %v2277_v1 = vmul.f32 %v14602_v28, %v14635_v46  ;;  %12514 = vmatmul.mubr.msk.f32.gmra.mxu1 %vm970_vm1, %v2342_v34 }
  0xca   : > { %12476 = vmatmul.mubr.msk.f32.gmra.mxu0 %vm970_vm1, %v1904_v13  ;;  %v1905_v35 = vrot.slane %v1825_v31, 1  ;;  %v1745_v25 = vrot.slane %v10704_v23, 7  ;;  %v2278_v14 = vmul.f32 %v14616_v22, %v14658_v17  ;;  %12516 = vmatprep.mubr.msk.f32.mxu1 %vm970_vm1, %v2344_v15  ;;  %v568_v60 = vadd.s32 152, %v14399_v2  ;;  %v20103_v31 = vld [vmem:[#allocation46_spill] sm:$0xff] }
  0xcb   : > { %v1907_v21 = vrot.slane %v1826_v24, 1  ;;  %v2350_v27 = vsel %vm1326_vm3, %v2347_v30, %v2349_v59  ;;  %vm726_vm4 = vcmp.lt.s32.totalorder %v598_v4, 15  ;;  %v2351_v46 = vrot.slane %v2277_v1, 7  ;;  %v20104_v1 = vld [vmem:[#allocation47_spill] sm:$0xff] }
  0xcc   : > { %v1906_v52 = vsel %vm837_vm2, %v1903_v62, %v1905_v35  ;;  %v15141_v54 = vsel %vm1326_vm3, %v14419_v10, %v1745_v25  ;;  %v15145_v17 = vsel %vm1326_vm3, %v1745_v25, %v14419_v10  ;;  %v10705_v57 = vsel %vm726_vm4, 1.0, %v20064_v16 }
  0xcd   : > { %v1908_v34 = vsel %vm837_vm2, %v1905_v35, %v1907_v21  ;;  %20101 = vst [vmem:[#allocation96_spill] sm:$0xff] %v15141_v54  ;;  %20102 = vst [vmem:[#allocation97_spill] sm:$0xff] %v15145_v17  ;;  %12478 = vmatprep.mubr.msk.f32.mxu0 %vm970_vm1, %v1906_v52  ;;  %v1827_v15 = vmul.f32 %v15141_v54, %v14707_v5  ;;  %v1828_v30 = vmul.f32 %v15145_v17, %v14710_v49  ;;  %v20108_v52 = vld [vmem:[#allocation54_spill] sm:$0xff]  ;;  %vm8822_vm4 = vcmask 523264  }
  0xce   : > { %v2352_v62 = vsel %vm1326_vm3, %v2349_v59, %v2351_v46  ;;  %12479 = vmatmul.mubr.msk.f32.gmra.mxu0 %vm970_vm1, %v1908_v34  ;;  %12517 = vmatmul.mubr.msk.f32.gmra.mxu1 %vm970_vm1, %v2346_v20  ;;  %v1749_v37 = vrot.slane %v10705_v57, 7  ;;  %v2353_v26 = vrot.slane %v2278_v14, 7  ;;  %v600_v13 = vand.u32 15, %v568_v60  ;;  %v20107_v60 = vld [vmem:[#allocation53_spill] sm:$0xff] }
  0xcf   : > { %v2279_v24 = vmul.f32 %v20103_v31, %v14661_v18  ;;  %v1909_v23 = vrot.slane %v1827_v15, 1  ;;  %12519 = vmatprep.mubr.msk.f32.mxu1 %vm970_vm1, %v2348_v44  ;;  %v1911_v4 = vrot.slane %v1828_v30, 1  ;;  %v2280_v35 = vmul.f32 %v20104_v1, %v14677_v32 }
  0xd0   : > { %v570_v25 = vadd.s32 168, %v14399_v2  ;;  %v15164_v59 = vsel %vm1326_vm3, %v14419_v10, %v1749_v37  ;;  %v15168_v20 = vsel %vm1326_vm3, %v1749_v37, %v14419_v10  ;;  %v2354_v14 = vsel %vm1326_vm3, %v2351_v46, %v2353_v26 }
  0xd1   : > { %20105 = vst [vmem:[#allocation98_spill] sm:$0xff] %v15164_v59  ;;  %20106 = vst [vmem:[#allocation99_spill] sm:$0xff] %v15168_v20  ;;  %vm728_vm5 = vcmp.lt.s32.totalorder %v600_v13, 15  ;;  %v1910_v18 = vsel %vm837_vm2, %v1907_v21, %v1909_v23  ;;  %v1912_v44 = vsel %vm837_vm2, %v1909_v23, %v1911_v4  ;;  %v1829_v32 = vmul.f32 %v15164_v59, %v20107_v60  ;;  %v20109_v23 = vld [vmem:[#allocation48_spill] sm:$0xff] }
  0xd2   : > { %v1830_v34 = vmul.f32 %v15168_v20, %v20108_v52  ;;  %12481 = vmatprep.mubr.msk.f32.mxu0 %vm970_vm1, %v1910_v18  ;;  %12520 = vmatmul.mubr.msk.f32.gmra.mxu1 %vm970_vm1, %v2350_v27  ;;  %v10706_v15 = vsel %vm728_vm5, 1.0, %v20064_v16  ;;  %v2355_v30 = vrot.slane %v2279_v24, 7  ;;  %v2357_v57 = vrot.slane %v2280_v35, 7  ;;  %v20110_v27 = vld [vmem:[#allocation49_spill] sm:$0xff] }
  0xd3   : > { %v602_v46 = vand.u32 15, %v570_v25  ;;  %12482 = vmatmul.mubr.msk.f32.gmra.mxu0 %vm970_vm1, %v1912_v44  ;;  %v1913_v21 = vrot.slane %v1829_v32, 1  ;;  %12522 = vmatprep.mubr.msk.f32.mxu1 %vm970_vm1, %v2352_v62  ;;  %v1753_v13 = vrot.slane %v10706_v15, 7  ;;  %v2281_v39 = vmul.f32 %v20109_v23, %v14686_v51  ;;  %v20113_v51 = vld [vmem:[#allocation58_spill] sm:$0xff]  ;;  %v20116_v23 = vld [vmem:[#allocation51_spill] sm:$0xff] }
  0xd4   : > { %v1915_v37 = vrot.slane %v1830_v34, 1  ;;  %v2356_v36 = vsel %vm1326_vm3, %v2353_v26, %v2355_v30  ;;  %v2358_v18 = vsel %vm1326_vm3, %v2355_v30, %v2357_v57  ;;  %v2282_v24 = vmul.f32 %v20110_v27, %v14707_v5  ;;  %v20114_v5 = vld [vmem:[#allocation59_spill] sm:$0xff] }
  0xd5   : > { %vm730_vm6 = vcmp.lt.s32.totalorder %v602_v46, 15  ;;  %v1914_v35 = vsel %vm837_vm2, %v1911_v4, %v1913_v21  ;;  %v15192_v62 = vsel %vm1326_vm3, %v14419_v10, %v1753_v13  ;;  %v15196_v44 = vsel %vm1326_vm3, %v1753_v13, %v14419_v10 }
  0xd6   : > { %v1916_v25 = vsel %vm837_vm2, %v1913_v21, %v1915_v37  ;;  %20111 = vst [vmem:[#allocation53_spill] sm:$0xff] %v15192_v62  ;;  %20112 = vst [vmem:[#allocation54_spill] sm:$0xff] %v15196_v44  ;;  %12484 = vmatprep.mubr.msk.f32.mxu0 %vm970_vm1, %v1914_v35  ;;  %12523 = vmatmul.mubr.msk.f32.gmra.mxu1 %vm970_vm1, %v2354_v14  ;;  %v1831_v26 = vmul.f32 %v15192_v62, %v20113_v51  ;;  %v10707_v32 = vsel %vm730_vm6, 1.0, %v20064_v16  ;;  %v20115_v21 = vld [vmem:[#allocation50_spill] sm:$0xff] }
  0xd7   : > { %v1832_v4 = vmul.f32 %v15196_v44, %v20114_v5  ;;  %v2359_v34 = vrot.slane %v2281_v39, 7  ;;  %12485 = vmatmul.mubr.msk.f32.gmra.mxu0 %vm970_vm1, %v1916_v25  ;;  %12525 = vmatprep.mubr.msk.f32.mxu1 %vm970_vm1, %v2356_v36  ;;  %v1757_v15 = vrot.slane %v10707_v32, 7  ;;  %v2361_v30 = vrot.slane %v2282_v24, 7 }
  0xd8   : > { %v572_v46 = vadd.s32 184, %v14399_v2  ;;  %v2283_v14 = vmul.f32 %v20115_v21, %v14710_v49  ;;  %v1917_v13 = vrot.slane %v1831_v26, 1  ;;  %v2284_v1 = vmul.f32 %v20116_v23, %v20107_v60  ;;  %v20121_v23 = vld [vmem:[#allocation52_spill] sm:$0xff] }
  0xd9   : > { %v1919_v35 = vrot.slane %v1832_v4, 1  ;;  %v2360_v27 = vsel %vm1326_vm3, %v2357_v57, %v2359_v34  ;;  %v15215_v39 = vsel %vm1326_vm3, %v14419_v10, %v1757_v15  ;;  %v15219_v36 = vsel %vm1326_vm3, %v1757_v15, %v14419_v10  ;;  %v20119_v57 = vld [vmem:[#allocation62_spill] sm:$0xff]  ;;  %v20120_v4 = vld [vmem:[#allocation63_spill] sm:$0xff] }
  0xda   : > { %20117 = vst [vmem:[#allocation58_spill] sm:$0xff] %v15215_v39  ;;  %20118 = vst [vmem:[#allocation59_spill] sm:$0xff] %v15219_v36  ;;  %v2362_v24 = vsel %vm1326_vm3, %v2359_v34, %v2361_v30  ;;  %v604_v25 = vand.u32 15, %v572_v46  ;;  %v1918_v49 = vsel %vm837_vm2, %v1915_v37, %v1917_v13  ;;  %12526 = vmatmul.mubr.msk.f32.gmra.mxu1 %vm970_vm1, %v2358_v18  ;;  %v2363_v15 = vrot.slane %v2283_v14, 7 }
  0xdb   : > { %v1920_v26 = vsel %vm837_vm2, %v1917_v13, %v1919_v35  ;;  %v1833_v60 = vmul.f32 %v15215_v39, %v20119_v57  ;;  %v1834_v32 = vmul.f32 %v15219_v36, %v20120_v4  ;;  %12487 = vmatprep.mubr.msk.f32.mxu0 %vm970_vm1, %v1918_v49  ;;  %12528 = vmatprep.mubr.msk.f32.mxu1 %vm970_vm1, %v2360_v27  ;;  %v2365_v34 = vrot.slane %v2284_v1, 7 }
  0xdc   : > { %vm732_vm7 = vcmp.lt.s32.totalorder %v604_v25, 15  ;;  %v574_v46 = vadd.s32 200, %v14399_v2  ;;  %12488 = vmatmul.mubr.msk.f32.gmra.mxu0 %vm970_vm1, %v1920_v26  ;;  %v2285_v21 = vmul.f32 %v20121_v23, %v20108_v52  ;;  %v2364_v22 = vsel %vm1326_vm3, %v2361_v30, %v2363_v15  ;;  %v20122_v26 = vld [vmem:[#allocation55_spill] sm:$0xff] }
  0xdd   : > { %v1921_v37 = vrot.slane %v1833_v60, 1  ;;  %v1923_v13 = vrot.slane %v1834_v32, 1  ;;  %v10708_v18 = vsel %vm732_vm7, 1.0, %v20064_v16  ;;  %v2366_v49 = vsel %vm1326_vm3, %v2363_v15, %v2365_v34 }
  0xde   : > { %v1761_v31 = vrot.slane %v10708_v18, 7  ;;  %v606_v27 = vand.u32 15, %v574_v46  ;;  %12529 = vmatmul.mubr.msk.f32.gmra.mxu1 %vm970_vm1, %v2362_v24  ;;  %v2367_v25 = vrot.slane %v2285_v21, 7  ;;  %v2286_v60 = vmul.f32 %v20122_v26, %v20113_v51  ;;  %v20125_v21 = vld [vmem:[#allocation66_spill] sm:$0xff]  ;;  %v20126_v24 = vld [vmem:[#allocation67_spill] sm:$0xff] }
  0xdf   : > { %v1922_v14 = vsel %vm837_vm2, %v1919_v35, %v1921_v37  ;;  %v1924_v1 = vsel %vm837_vm2, %v1921_v37, %v1923_v13  ;;  %12531 = vmatprep.mubr.msk.f32.mxu1 %vm970_vm1, %v2364_v22  ;;  %v576_v35 = vadd.s32 216, %v14399_v2  ;;  %v578_v28 = vadd.s32 232, %v14399_v2 }
  0xe0   : > { %12490 = vmatprep.mubr.msk.f32.mxu0 %vm970_vm1, %v1922_v14  ;;  %v15246_v52 = vsel %vm1326_vm3, %v14419_v10, %v1761_v31  ;;  %v15251_v30 = vsel %vm1326_vm3, %v1761_v31, %v14419_v10  ;;  %vm734_vm8 = vcmp.lt.s32.totalorder %v606_v27, 15  ;;  %v2368_v46 = vsel %vm1326_vm3, %v2365_v34, %v2367_v25  ;;  %v20127_v31 = vld [vmem:[#allocation56_spill] sm:$0xff] }
  0xe1   : > { %20123 = vst [vmem:[#allocation62_spill] sm:$0xff] %v15246_v52  ;;  %20124 = vst [vmem:[#allocation63_spill] sm:$0xff] %v15251_v30  ;;  %12491 = vmatmul.mubr.msk.f32.gmra.mxu0 %vm970_vm1, %v1924_v1  ;;  %v1835_v51 = vmul.f32 %v15246_v52, %v20125_v21  ;;  %v1836_v32 = vmul.f32 %v15251_v30, %v20126_v24  ;;  %v10709_v15 = vsel %vm734_vm8, 1.0, %v20064_v16  ;;  %v2369_v37 = vrot.slane %v2286_v60, 7  ;;  %v20128_v1 = vld [vmem:[#allocation60_spill] sm:$0xff] }
  0xe2   : > { %v1765_v22 = vrot.slane %v10709_v15, 7  ;;  %v608_v18 = vand.u32 15, %v576_v35  ;;  %v2287_v27 = vmul.f32 %v20127_v31, %v20114_v5  ;;  %12532 = vmatmul.mubr.msk.f32.gmra.mxu1 %vm970_vm1, %v2366_v49  ;;  %v2288_v23 = vmul.f32 %v20128_v1, %v20119_v57  ;;  %v20131_v57 = vld [vmem:[#allocation74_spill] sm:$0xff] }
  0xe3   : > { %v1925_v14 = vrot.slane %v1835_v51, 1  ;;  %v1927_v26 = vrot.slane %v1836_v32, 1  ;;  %12534 = vmatprep.mubr.msk.f32.mxu1 %vm970_vm1, %v2368_v46  ;;  %v2370_v5 = vsel %vm1326_vm3, %v2367_v25, %v2369_v37  ;;  %v2294_v9 = vmul.f32 %v20141_v11, %v14923_v55 }
  0xe4   : > { %v15269_v12 = vsel %vm1326_vm3, %v14419_v10, %v1765_v22  ;;  %v15274_v34 = vsel %vm1326_vm3, %v1765_v22, %v14419_v10  ;;  %vm736_vm9 = vcmp.lt.s32.totalorder %v608_v18, 15  ;;  %v2371_v15 = vrot.slane %v2287_v27, 7  ;;  %v20133_v27 = vld [vmem:[#allocation64_spill] sm:$0xff] }
  0xe5   : > { %20129 = vst [vmem:[#allocation66_spill] sm:$0xff] %v15269_v12  ;;  %20130 = vst [vmem:[#allocation67_spill] sm:$0xff] %v15274_v34  ;;  %v1926_v49 = vsel %vm837_vm2, %v1923_v13, %v1925_v14  ;;  %v1928_v60 = vsel %vm837_vm2, %v1925_v14, %v1927_v26  ;;  %v1837_v35 = vmul.f32 %v15269_v12, %v20131_v57  ;;  %v10710_v32 = vsel %vm736_vm9, 1.0, %v20064_v16  ;;  %v20132_v14 = vld [vmem:[#allocation61_spill] sm:$0xff] }
  0xe6   : > { %v1838_v51 = vmul.f32 %v15274_v34, %v14885_v58  ;;  %12493 = vmatprep.mubr.msk.f32.mxu0 %vm970_vm1, %v1926_v49  ;;  %v2373_v46 = vrot.slane %v2288_v23, 7  ;;  %v610_v22 = vand.u32 15, %v578_v28  ;;  %12535 = vmatmul.mubr.msk.f32.gmra.mxu1 %vm970_vm1, %v2370_v5  ;;  %v1769_v18 = vrot.slane %v10710_v32, 7 }
  0xe7   : > { %12494 = vmatmul.mubr.msk.f32.gmra.mxu0 %vm970_vm1, %v1928_v60  ;;  %v1929_v25 = vrot.slane %v1837_v35, 1  ;;  %v2289_v1 = vmul.f32 %v20132_v14, %v20120_v4  ;;  %v2372_v31 = vsel %vm1326_vm3, %v2369_v37, %v2371_v15  ;;  %v2290_v23 = vmul.f32 %v20133_v27, %v20125_v21  ;;  %v15308_v21 = vld [vmem:[%s14414_s14 + $0xd0] sm:$0xff]  ;;  %v20137_v14 = vld [vmem:[#allocation68_spill] sm:$0xff] }
  0xe8   : > { %v1931_v13 = vrot.slane %v1838_v51, 1  ;;  %v2374_v49 = vsel %vm1326_vm3, %v2371_v15, %v2373_v46  ;;  %vm738_vm10 = vcmp.lt.s32.totalorder %v610_v22, 15  ;;  %v15297_v35 = vsel %vm1326_vm3, %v14419_v10, %v1769_v18  ;;  %12537 = vmatprep.mubr.msk.f32.mxu1 %vm970_vm1, %v2372_v31  ;;  %v20136_v22 = vld [vmem:[#allocation65_spill] sm:$0xff] }
  0xe9   : > { %v1930_v28 = vsel %vm837_vm2, %v1927_v26, %v1929_v25  ;;  %20134 = vst [vmem:[#allocation74_spill] sm:$0xff] %v15297_v35  ;;  %v15302_v4 = vsel %vm1326_vm3, %v1769_v18, %v14419_v10  ;;  %v1839_v37 = vmul.f32 %v15297_v35, %v14923_v55  ;;  %v10711_v5 = vsel %vm738_vm10, 1.0, %v20064_v16 }
  0xea   : > { %v1932_v60 = vsel %vm837_vm2, %v1929_v25, %v1931_v13  ;;  %20135 = vst [vmem:[#allocation100_spill] sm:$0xff] %v15302_v4  ;;  %12496 = vmatprep.mubr.msk.f32.mxu0 %vm970_vm1, %v1930_v28  ;;  %v1840_v26 = vmul.f32 %v15308_v21, %v15302_v4  ;;  %v2375_v51 = vrot.slane %v2289_v1, 7  ;;  %12538 = vmatmul.mubr.msk.f32.gmra.mxu1 %vm970_vm1, %v2374_v49  ;;  %v1773_v31 = vrot.slane %v10711_v5, 7  ;;  %v15339_v5 = vld [vmem:[%s14414_s14 + $0xe0] sm:$0xff] }
  0xeb   : > { %12497 = vmatmul.mubr.msk.f32.gmra.mxu0 %vm970_vm1, %v1932_v60  ;;  %v2377_v32 = vrot.slane %v2290_v23, 7  ;;  %v580_v15 = vadd.s32 248, %v14399_v2  ;;  %v2291_v25 = vmul.f32 %v20136_v22, %v20126_v24  ;;  %v1933_v18 = vrot.slane %v1839_v37, 1  ;;  %v15350_v22 = vld [vmem:[%s14414_s14 + $0xf0] sm:$0xff] }
  0xec   : > { %v1935_v28 = vrot.slane %v1840_v26, 1  ;;  %v2376_v27 = vsel %vm1326_vm3, %v2373_v46, %v2375_v51  ;;  %v2292_v1 = vmul.f32 %v20137_v14, %v20131_v57  ;;  %v15323_v60 = vsel %vm1326_vm3, %v14419_v10, %v1773_v31  ;;  %v15334_v26 = vld [vmem:[%s14414_s14 + $0xd8] sm:$0xff] }
  0xed   : > { %20138 = vst [vmem:[#allocation101_spill] sm:$0xff] %v15323_v60  ;;  %12540 = vmatprep.mubr.msk.f32.mxu1 %vm970_vm1, %v2376_v27  ;;  %v15328_v49 = vsel %vm1326_vm3, %v1773_v31, %v14419_v10  ;;  %v2378_v23 = vsel %vm1326_vm3, %v2375_v51, %v2377_v32  ;;  %v612_v24 = vand.u32 15, %v580_v15  ;;  %v1934_v37 = vsel %vm837_vm2, %v1931_v13, %v1933_v18  ;;  %v20140_v31 = vld [vmem:[#allocation69_spill] sm:$0xff] }
  0xee   : > { %20139 = vst [vmem:[#allocation102_spill] sm:$0xff] %v15328_v49  ;;  %v1936_v46 = vsel %vm837_vm2, %v1933_v18, %v1935_v28  ;;  %v1841_v57 = vmul.f32 %v15334_v26, %v15323_v60  ;;  %v1842_v27 = vmul.f32 %v15339_v5, %v15328_v49  ;;  %12499 = vmatprep.mubr.msk.f32.mxu0 %vm970_vm1, %v1934_v37  ;;  %v2379_v51 = vrot.slane %v2291_v25, 7 }
  0xef   : > { %12541 = vmatmul.mubr.msk.f32.gmra.mxu1 %vm970_vm1, %v2378_v23  ;;  %vm740_vm11 = vcmp.lt.s32.totalorder %v612_v24, 15  ;;  %v2381_v13 = vrot.slane %v2292_v1, 7  ;;  %v2293_v15 = vmul.f32 %v20140_v31, %v14885_v58  ;;  %12500 = vmatmul.mubr.msk.f32.gmra.mxu0 %vm970_vm1, %v1936_v46  ;;  %v2385_v46 = vrot.slane %v2294_v9, 7  ;;  %v15375_v9 = vld [vmem:[%s14414_s14 + $0xe8] sm:$0xff] }
  0xf0   : > { %v1937_v18 = vrot.slane %v1841_v57, 1  ;;  %v1939_v2 = vrot.slane %v1842_v27, 1  ;;  %v10712_v14 = vsel %vm740_vm11, 1.0, %v20064_v16  ;;  %v2380_v25 = vsel %vm1326_vm3, %v2377_v32, %v2379_v51  ;;  %v20143_v57 = vld [vmem:[#allocation77_spill] sm:$0xff]  ;;  %v15384_v16 = vld [vmem:[%s14414_s14 + $0xf8] sm:$0xff] }
  0xf1   : > { %v15354_v37 = vrot.slane %v10712_v14, 7  ;;  %v2382_v1 = vsel %vm1326_vm3, %v2379_v51, %v2381_v13  ;;  %v2383_v23 = vrot.slane %v2293_v15, 7  ;;  %12543 = vmatprep.mubr.msk.f32.mxu1 %vm970_vm1, %v2380_v25  ;;  %v2295_v27 = vmul.f32 %v15308_v21, %v20143_v57  ;;  %v20145_v25 = vld [vmem:[#allocation81_spill] sm:$0xff] }
  0xf2   : > { %v1938_v58 = vsel %vm837_vm2, %v1935_v28, %v1937_v18  ;;  %v1940_v24 = vsel %vm837_vm2, %v1937_v18, %v1939_v2  ;;  %v2299_v57 = vmul.f32 %v14992_v6, %v15350_v22 }
  0xf3   : > { %20142 = vst [vmem:[#allocation103_spill] sm:$0xff] %v15354_v37  ;;  %12502 = vmatprep.mubr.msk.f32.mxu0 %vm970_vm1, %v1938_v58  ;;  %v15367_v14 = vsel %vm1326_vm3, %v14419_v10, %v15354_v37  ;;  %v1844_v32 = vmul.f32 %v15354_v37, %v15350_v22  ;;  %12544 = vmatmul.mubr.msk.f32.gmra.mxu1 %vm970_vm1, %v2382_v1  ;;  %v2387_v18 = vrot.slane %v2295_v27, 7 }
  0xf4   : > { %20144 = vst [vmem:[#allocation104_spill] sm:$0xff] %v15367_v14  ;;  %v2384_v28 = vsel %vm1326_vm3, %v2381_v13, %v2383_v23  ;;  %12503 = vmatmul.mubr.msk.f32.gmra.mxu0 %vm970_vm1, %v1940_v24  ;;  %v1843_v51 = vmul.f32 %v15375_v9, %v15367_v14  ;;  %v2386_v15 = vsel %vm1326_vm3, %v2383_v23, %v2385_v46 }
  0xf5   : > { %12546 = vmatprep.mubr.msk.f32.mxu1 %vm970_vm1, %v2384_v28  ;;  %v2296_v58 = vmul.f32 %v15334_v26, %v20145_v25  ;;  %v1943_v1 = vrot.slane %v1844_v32, 1  ;;  %v2297_v13 = vmul.f32 %v15339_v5, %v14947_v7  ;;  %v2298_v24 = vmul.f32 %v15375_v9, %v14986_v63 }
  0xf6   : > { %v1941_v28 = vrot.slane %v1843_v51, 1  ;;  %v2388_v23 = vsel %vm1326_vm3, %v2385_v46, %v2387_v18  ;;  %v2300_v32 = vmul.f32 %v14416_v8, %v15384_v16  ;;  %v15405_v8 = vld [vmem:[%s14414_s14 + $0x8] sm:$0xff] }
  0xf7   : > { %v2389_v27 = vrot.slane %v2296_v58, 7  ;;  %12547 = vmatmul.mubr.msk.f32.gmra.mxu1 %vm970_vm1, %v2386_v15  ;;  %v2391_v25 = vrot.slane %v2297_v13, 7  ;;  %v2393_v51 = vrot.slane %v2298_v24, 7  ;;  %v2395_v58 = vrot.slane %v2299_v57, 7  ;;  %v13920_v15 = vld [vmem:[%s14414_s14] sm:$0xff] }
  0xf8   : > { %v1942_v7 = vsel %vm837_vm2, %v1939_v2, %v1941_v28  ;;  %v1944_v11 = vsel %vm837_vm2, %v1941_v28, %v1943_v1  ;;  %12549 = vmatprep.mubr.msk.f32.mxu1 %vm970_vm1, %v2388_v23  ;;  %v2991_v13 = vmul.f32 %v13920_v15, %v14419_v10  ;;  %v20146_v2 = vld [vmem:[#allocation71_spill] sm:$0xff]  ;;  %v2397_v57 = vrot.slane %v2300_v32, 7  ;;  %v20147_v24 = vld [vmem:[#allocation72_spill] sm:$0xff] }
  0xf9   : > { %v2390_v6 = vsel %vm1326_vm3, %v2387_v18, %v2389_v27  ;;  %12505 = vmatprep.mubr.msk.f32.mxu0 %vm970_vm1, %v1942_v7  ;;  %v2392_v46 = vsel %vm1326_vm3, %v2389_v27, %v2391_v25  ;;  %v2992_v1 = vmul.f32 %v15405_v8, %v20146_v2  ;;  %v2394_v7 = vsel %vm1326_vm3, %v2391_v25, %v2393_v51  ;;  %v15415_v18 = vld [vmem:[%s14414_s14 + $0x10] sm:$0xff]  ;;  %v15421_v2 = vld [vmem:[%s14414_s14 + $0x18] sm:$0xff]  ;;  %v15433_v25 = vld [vmem:[%s19786_s1 + $0x20] sm:$0x7] }
  0xfa   : > { %12506 = vmatmul.mubr.msk.f32.gmra.mxu0 %vm970_vm1, %v1944_v11  ;;  %v2993_v28 = vmul.f32 %v15415_v18, %v20147_v24  ;;  %v2396_v23 = vsel %vm1326_vm3, %v2393_v51, %v2395_v58  ;;  %v3059_v27 = vrot.slane %v2991_v13, 1  ;;  %v2398_v32 = vsel %vm1326_vm3, %v2395_v58, %v2397_v57  ;;  %v20149_v13 = vld [vmem:[#allocation82_spill] sm:$0xff]  ;;  %v15444_v24 = vld [vmem:[%s14414_s14 + $0x28] sm:$0xff] }
  0xfb   : > { %12560 = vmatprep.mubr.msk.f32.mxu0 %vm970_vm1, %v13920_v15  ;;  %12550 = vmatmul.mubr.msk.f32.gmra.mxu1 %vm970_vm1, %v2390_v6  ;;  %v3060_v11 = vrot.slane %v2992_v1, 1  ;;  %v20148_v15 = vld [vmem:[#allocation80_spill] sm:$0xff]  ;;  %v2996_v10 = vmul.f32 %v15444_v24, %v14972_v61 }
  0xfc   : > { %12552 = vmatprep.mubr.msk.f32.mxu1 %vm970_vm1, %v2392_v46  ;;  %v2994_v6 = vmul.f32 %v15421_v2, %v20148_v15  ;;  %v3062_v51 = vrot.slane %v2993_v28, 1  ;;  %v15438_v46 = vld [vmem:[%s14414_s14 + $0x20] sm:$0xff]  ;;  %v15460_v28 = vld [vmem:[%s14414_s14 + $0x30] sm:$0xff] }
  0xfd   : > { %v2995_v1 = vmul.f32 %v15438_v46, %v20149_v13  ;;  %v3061_v15 = vsel %vm837_vm2, %v3059_v27, %v3060_v11  ;;  %v3068_v27 = vrot.slane %v2996_v10, 1  ;;  %v15478_v10 = vld [vmem:[%s14414_s14 + $0x40] sm:$0xff] }
  0xfe   : > { %12561 = vmatmul.mubr.msk.f32.vlgmr.msra.gmra.mxu0 %vm970_vm1, %v15405_v8  ;;  %v3063_v58 = vsel %vm837_vm2, %v3060_v11, %v3062_v51 }
  0xff   : > { %12563 = vmatprep.mubr.msk.f32.mxu0 %vm970_vm1, %v15415_v18  ;;  %12553 = vmatmul.mubr.msk.f32.gmra.mxu1 %vm970_vm1, %v2394_v7  ;;  %v3064_v7 = vrot.slane %v2994_v6, 1  ;;  %v3066_v57 = vrot.slane %v2995_v1, 1  ;;  %v15466_v6 = vld [vmem:[%s14414_s14 + $0x38] sm:$0xff] }
 0x100   : > { %12555 = vmatprep.mubr.msk.f32.mxu1 %vm970_vm1, %v2396_v23  ;;  %12659 = vmatpush3.msk.msra.mxu0 %vm1064_vm0, %v15003_v56  ;;  %v2997_v56 = vmul.f32 %v15460_v28, %v14980_v50  ;;  %v15486_v50 = vld [vmem:[%s14414_s14 + $0x48] sm:$0xff] }
 0x101   : > { %12758 = vmatprep.subr.msk.mxu0 %vm1064_vm0, %v15433_v25  ;;  %v3065_v23 = vsel %vm837_vm2, %v3062_v51, %v3064_v7  ;;  %v3067_v11 = vsel %vm837_vm2, %v3064_v7, %v3066_v57  ;;  %v2999_v51 = vmul.f32 %v15478_v10, %v15013_v19  ;;  %v3069_v1 = vsel %vm837_vm2, %v3066_v57, %v3068_v27  ;;  %v15498_v57 = vld [vmem:[%s14414_s14 + $0x50] sm:$0xff] }
 0x102   : > { %12564 = vmatmul.mubr.msk.f32.gmra.mxu0 %vm970_vm1, %v15421_v2 }
 0x103   : > { %12566 = vmatprep.mubr.msk.f32.mxu0 %vm970_vm1, %v15438_v46  ;;  %12556 = vmatmul.mubr.msk.f32.gmra.mxu1 %vm970_vm1, %v2398_v32  ;;  %v2998_v32 = vmul.f32 %v15466_v6, %v15009_v45  ;;  %v3074_v7 = vrot.slane %v2999_v51, 1  ;;  %v15516_v51 = vld [vmem:[%s14414_s14 + $0x60] sm:$0xff] }
 0x104   : > { %12610 = vmatprep.mubr.msk.f32.mxu1 %vm970_vm1, %v3061_v15  ;;  %v3070_v15 = vrot.slane %v2997_v56, 1  ;;  %v3001_v56 = vmul.f32 %v15498_v57, %v15059_v53  ;;  %v15522_v53 = vld [vmem:[%s14414_s14 + $0x68] sm:$0xff] }
 0x105   : > { %v3072_v45 = vrot.slane %v2998_v32, 1 }
 0x106   : > { %12567 = vmatmul.mubr.msk.f32.gmra.mxu0 %vm970_vm1, %v15444_v24 }
 0x107   : > { %12569 = vmatprep.mubr.msk.f32.mxu0 %vm970_vm1, %v15460_v28  ;;  %12611 = vmatmul.mubr.msk.f32.vlgmr.msra.gmra.mxu1 %vm970_vm1, %v3063_v58  ;;  %v3000_v58 = vmul.f32 %v15486_v50, %v15055_v38  ;;  %v15504_v38 = vld [vmem:[%s14414_s14 + $0x58] sm:$0xff] }
 0x108   : > { %12613 = vmatprep.mubr.msk.f32.mxu1 %vm970_vm1, %v3065_v23  ;;  %12709 = vmatpush3.msk.msra.mxu1 %vm1064_vm0, %v15126_v43  ;;  %v3071_v43 = vsel %vm837_vm2, %v3068_v27, %v3070_v15  ;;  %v3073_v23 = vsel %vm837_vm2, %v3070_v15, %v3072_v45  ;;  %v3075_v27 = vsel %vm837_vm2, %v3072_v45, %v3074_v7  ;;  %v3078_v15 = vrot.slane %v3001_v56, 1  ;;  %v15534_v56 = vld [vmem:[%s14414_s14 + $0x70] sm:$0xff] }
 0x109   : > { %v3076_v32 = vrot.slane %v3000_v58, 1 }
 0x10a   : > { %12570 = vmatmul.mubr.msk.f32.gmra.mxu0 %vm970_vm1, %v15466_v6 }
 0x10b   : > { %12572 = vmatprep.mubr.msk.f32.mxu0 %vm970_vm1, %v15478_v10  ;;  %12614 = vmatmul.mubr.msk.f32.gmra.mxu1 %vm970_vm1, %v3067_v11  ;;  %v3002_v11 = vmul.f32 %v15504_v38, %v15083_v33  ;;  %v3077_v58 = vsel %vm837_vm2, %v3074_v7, %v3076_v32  ;;  %v3079_v45 = vsel %vm837_vm2, %v3076_v32, %v3078_v15 }
 0x10c   : > { %12616 = vmatprep.mubr.msk.f32.mxu1 %vm970_vm1, %v3069_v1  ;;  %v3003_v1 = vmul.f32 %v15516_v51, %v15087_v3  ;;  %v15540_v3 = vld [vmem:[%s14414_s14 + $0x78] sm:$0xff] }
 0x10d   : > { %v3080_v33 = vrot.slane %v3002_v11, 1 }
 0x10e   : > { %12573 = vmatmul.mubr.msk.f32.gmra.mxu0 %vm970_vm1, %v15486_v50  ;;  %v3082_v7 = vrot.slane %v3003_v1, 1  ;;  %v15552_v1 = vld [vmem:[%s14414_s14 + $0x80] sm:$0xff] }
 0x10f   : > { %12575 = vmatprep.mubr.msk.f32.mxu0 %vm970_vm1, %v15498_v57  ;;  %12617 = vmatmul.mubr.msk.f32.gmra.mxu1 %vm970_vm1, %v3071_v43  ;;  %v3004_v43 = vmul.f32 %v15522_v53, %v15104_v48  ;;  %v3081_v11 = vsel %vm837_vm2, %v3078_v15, %v3080_v33 }
 0x110   : > { %12619 = vmatprep.mubr.msk.f32.mxu1 %vm970_vm1, %v3073_v23  ;;  %v3005_v23 = vmul.f32 %v15534_v56, %v15108_v0  ;;  %v3083_v32 = vsel %vm837_vm2, %v3080_v33, %v3082_v7  ;;  %v15558_v0 = vld [vmem:[%s14414_s14 + $0x88] sm:$0xff] }
 0x111   : > { %v3084_v48 = vrot.slane %v3004_v43, 1 }
 0x112   : > { %12576 = vmatmul.mubr.msk.f32.gmra.mxu0 %vm970_vm1, %v15504_v38  ;;  %v3086_v15 = vrot.slane %v3005_v23, 1  ;;  %v15570_v23 = vld [vmem:[%s14414_s14 + $0x90] sm:$0xff] }
 0x113   : > { %12578 = vmatprep.mubr.msk.f32.mxu0 %vm970_vm1, %v15516_v51  ;;  %12620 = vmatmul.mubr.msk.f32.gmra.mxu1 %vm970_vm1, %v3075_v27  ;;  %v3006_v27 = vmul.f32 %v15540_v3, %v15141_v54  ;;  %v3085_v43 = vsel %vm837_vm2, %v3082_v7, %v3084_v48 }
 0x114   : > { %12622 = vmatprep.mubr.msk.f32.mxu1 %vm970_vm1, %v3077_v58  ;;  %v3007_v58 = vmul.f32 %v15552_v1, %v15145_v17  ;;  %v3087_v33 = vsel %vm837_vm2, %v3084_v48, %v3086_v15  ;;  %v15576_v17 = vld [vmem:[%s14414_s14 + $0x98] sm:$0xff] }
 0x115   : > { %v3088_v54 = vrot.slane %v3006_v27, 1 }
 0x116   : > { %12579 = vmatmul.mubr.msk.f32.gmra.mxu0 %vm970_vm1, %v15522_v53  ;;  %v3090_v7 = vrot.slane %v3007_v58, 1  ;;  %v15588_v58 = vld [vmem:[%s14414_s14 + $0xa0] sm:$0xff] }
 0x117   : > { %12581 = vmatprep.mubr.msk.f32.mxu0 %vm970_vm1, %v15534_v56  ;;  %12623 = vmatmul.mubr.msk.f32.gmra.mxu1 %vm970_vm1, %v3079_v45  ;;  %v3008_v45 = vmul.f32 %v15558_v0, %v15164_v59  ;;  %v3089_v27 = vsel %vm837_vm2, %v3086_v15, %v3088_v54 }
 0x118   : > { %12625 = vmatprep.mubr.msk.f32.mxu1 %vm970_vm1, %v3081_v11  ;;  %v3009_v11 = vmul.f32 %v15570_v23, %v15168_v20  ;;  %v3091_v48 = vsel %vm837_vm2, %v3088_v54, %v3090_v7  ;;  %v15594_v20 = vld [vmem:[%s14414_s14 + $0xa8] sm:$0xff] }
 0x119   : > { %v3092_v59 = vrot.slane %v3008_v45, 1 }
 0x11a   : > { %12582 = vmatmul.mubr.msk.f32.gmra.mxu0 %vm970_vm1, %v15540_v3  ;;  %v3094_v15 = vrot.slane %v3009_v11, 1  ;;  %v15606_v11 = vld [vmem:[%s14414_s14 + $0xb0] sm:$0xff] }
 0x11b   : > { %12584 = vmatprep.mubr.msk.f32.mxu0 %vm970_vm1, %v15552_v1  ;;  %12626 = vmatmul.mubr.msk.f32.gmra.mxu1 %vm970_vm1, %v3083_v32  ;;  %v3010_v32 = vmul.f32 %v15576_v17, %v15192_v62  ;;  %v3093_v45 = vsel %vm837_vm2, %v3090_v7, %v3092_v59 }
 0x11c   : > { %12628 = vmatprep.mubr.msk.f32.mxu1 %vm970_vm1, %v3085_v43  ;;  %v3011_v43 = vmul.f32 %v15588_v58, %v15196_v44  ;;  %v3095_v54 = vsel %vm837_vm2, %v3092_v59, %v3094_v15  ;;  %v15612_v44 = vld [vmem:[%s14414_s14 + $0xb8] sm:$0xff] }
 0x11d   : > { %v3096_v62 = vrot.slane %v3010_v32, 1  ;;  %v3014_v19 = vmul.f32 %v15612_v44, %v15246_v52  ;;  %v3016_v52 = vmul.f32 %v15269_v12, %v14923_v55  ;;  %v3018_v55 = vmul.f32 %v15334_v26, %v15297_v35 }
 0x11e   : > { %12585 = vmatmul.mubr.msk.f32.gmra.mxu0 %vm970_vm1, %v15558_v0  ;;  %v3098_v7 = vrot.slane %v3011_v43, 1 }
 0x11f   : > { %12587 = vmatprep.mubr.msk.f32.mxu0 %vm970_vm1, %v15570_v23  ;;  %12629 = vmatmul.mubr.msk.f32.gmra.mxu1 %vm970_vm1, %v3087_v33  ;;  %v3012_v33 = vmul.f32 %v15594_v20, %v15215_v39  ;;  %v3097_v32 = vsel %vm837_vm2, %v3094_v15, %v3096_v62  ;;  %v15624_v15 = vld [vmem:[%s14414_s14 + $0xc0] sm:$0xff] }
 0x120   : > { %12631 = vmatprep.mubr.msk.f32.mxu1 %vm970_vm1, %v3089_v27  ;;  %v3013_v27 = vmul.f32 %v15606_v11, %v15219_v36  ;;  %v3099_v59 = vsel %vm837_vm2, %v3096_v62, %v3098_v7  ;;  %v3015_v43 = vmul.f32 %v15624_v15, %v15251_v30 }
 0x121   : > { %v3100_v39 = vrot.slane %v3012_v33, 1  ;;  %v3104_v33 = vrot.slane %v3014_v19, 1 }
 0x122   : > { %12588 = vmatmul.mubr.msk.f32.gmra.mxu0 %vm970_vm1, %v15576_v17 }
 0x123   : > { %12590 = vmatprep.mubr.msk.f32.mxu0 %vm970_vm1, %v15588_v58  ;;  %12632 = vmatmul.mubr.msk.f32.gmra.mxu1 %vm970_vm1, %v3091_v48  ;;  %v3102_v48 = vrot.slane %v3013_v27, 1  ;;  %v3108_v27 = vrot.slane %v3016_v52, 1 }
 0x124   : > { %12634 = vmatprep.mubr.msk.f32.mxu1 %vm970_vm1, %v3093_v45  ;;  %v3101_v45 = vsel %vm837_vm2, %v3098_v7, %v3100_v39  ;;  %v3017_v7 = vmul.f32 %v15308_v21, %v15274_v34  ;;  %v3112_v34 = vrot.slane %v3018_v55, 1 }
 0x125   : > { %v3103_v62 = vsel %vm837_vm2, %v3100_v39, %v3102_v48  ;;  %v3105_v19 = vsel %vm837_vm2, %v3102_v48, %v3104_v33  ;;  %v20150_v39 = vld [vmem:[#allocation31_spill] sm:$0xff]  ;;  %v3449_v48 = vmul.f32 %v15415_v18, %v14467_v29 }
 0x126   : > { %12591 = vmatmul.mubr.msk.f32.gmra.mxu0 %vm970_vm1, %v15594_v20 }
 0x127   : > { %12593 = vmatprep.mubr.msk.f32.mxu0 %vm970_vm1, %v15606_v11  ;;  %12635 = vmatmul.mubr.msk.f32.gmra.mxu1 %vm970_vm1, %v3095_v54  ;;  %v3106_v54 = vrot.slane %v3015_v43, 1  ;;  %v3110_v43 = vrot.slane %v3017_v7, 1  ;;  %v3451_v7 = vmul.f32 %v15438_v46, %v14503_v41 }
 0x128   : > { %12637 = vmatprep.mubr.msk.f32.mxu1 %vm970_vm1, %v3097_v32  ;;  %v15644_v32 = vld [vmem:[%s14414_s14 + $0xc8] sm:$0xff] }
 0x129   : > { %v3107_v52 = vsel %vm837_vm2, %v3104_v33, %v3106_v54  ;;  %v3109_v35 = vsel %vm837_vm2, %v3106_v54, %v3108_v27  ;;  %v3450_v33 = vmul.f32 %v15421_v2, %v14499_v40  ;;  %v3517_v54 = vrot.slane %v3449_v48, 7 }
 0x12a   : > { %12594 = vmatmul.mubr.msk.f32.gmra.mxu0 %vm970_vm1, %v15612_v44  ;;  %v3113_v29 = vsel %vm837_vm2, %v3110_v43, %v3112_v34  ;;  %v3023_v48 = vmul.f32 0.0, %v15354_v37  ;;  %v20153_v37 = vld [vmem:[#allocation42_spill] sm:$0xff] }
 0x12b   : > { %12596 = vmatprep.mubr.msk.f32.mxu0 %vm970_vm1, %v15624_v15  ;;  %12638 = vmatmul.mubr.msk.f32.gmra.mxu1 %vm970_vm1, %v3099_v59  ;;  %v3448_v59 = vmul.f32 %v15405_v8, %v20150_v39  ;;  %v3021_v39 = vmul.f32 %v15328_v49, %v15350_v22 }
 0x12c   : > { %12640 = vmatprep.mubr.msk.f32.mxu1 %vm970_vm1, %v3101_v45  ;;  %v3019_v45 = vmul.f32 %v15339_v5, %v15302_v4 }
 0x12d   : > { %v3516_v8 = vrot.slane %v3448_v59, 7  ;;  %v3022_v59 = vmul.f32 %v15367_v14, %v15384_v16  ;;  %v3118_v40 = vrot.slane %v3021_v39, 1 }
 0x12e   : > { %12597 = vmatmul.mubr.msk.f32.gmra.mxu0 %vm970_vm1, %v15644_v32  ;;  %v3114_v55 = vrot.slane %v3019_v45, 1 }
 0x12f   : > { %12599 = vmatprep.mubr.msk.f32.mxu0 %vm970_vm1, %v15308_v21  ;;  %12641 = vmatmul.mubr.msk.f32.gmra.mxu1 %vm970_vm1, %v3103_v62  ;;  %v3020_v62 = vmul.f32 %v15375_v9, %v15323_v60 }
 0x130   : > { %12643 = vmatprep.mubr.msk.f32.mxu1 %vm970_vm1, %v3105_v19  ;;  %v3111_v19 = vsel %vm837_vm2, %v3108_v27, %v3110_v43  ;;  %v3521_v27 = vrot.slane %v3451_v7, 7  ;;  %v3518_v43 = vsel %vm1326_vm3, %v3516_v8, %v3517_v54  ;;  %v3115_v45 = vsel %vm837_vm2, %v3112_v34, %v3114_v55 }
 0x131   : > { %v3116_v60 = vrot.slane %v3020_v62, 1  ;;  %v3453_v62 = vmul.f32 %v15460_v28, %v14519_v47  ;;  %v15699_v7 = vrot.slane %v3023_v48, 1 }
 0x132   : > { %12600 = vmatmul.mubr.msk.f32.gmra.mxu0 %vm970_vm1, %v15334_v26 }
 0x133   : > { %12602 = vmatprep.mubr.msk.f32.mxu0 %vm970_vm1, %v15339_v5  ;;  %12644 = vmatmul.mubr.msk.f32.gmra.mxu1 %vm970_vm1, %v3107_v52  ;;  %v3452_v52 = vmul.f32 %v15444_v24, %v14507_v42  ;;  %v3117_v41 = vsel %vm837_vm2, %v3114_v55, %v3116_v60  ;;  %20152 = vst [vmem:[#allocation105_spill] sm:$0xff] %v15699_v7  ;;  %v3525_v55 = vrot.slane %v3453_v62, 7 }
 0x134   : > { %12646 = vmatprep.mubr.msk.f32.mxu1 %vm970_vm1, %v3109_v35  ;;  %v3519_v35 = vrot.slane %v3450_v33, 7 }
 0x135   : > { %v3523_v8 = vrot.slane %v3452_v52, 7  ;;  %v12362_v52 = vpop.f32.mrf.mxu0 }
 0x136   : > { %12603 = vmatmul.mubr.msk.f32.gmra.mxu0 %vm970_vm1, %v15375_v9  ;;  %v3520_v33 = vsel %vm1326_vm3, %v3517_v54, %v3519_v35  ;;  %v3522_v39 = vsel %vm1326_vm3, %v3519_v35, %v3521_v27  ;;  %v20154_v35 = vld [vmem:[#allocation43_spill] sm:$0xff] }
 0x137   : > { %12605 = vmatprep.mubr.msk.f32.mxu0 %vm970_vm1, %v15350_v22  ;;  %12647 = vmatmul.mubr.msk.f32.gmra.mxu1 %vm970_vm1, %v3111_v19  ;;  %v3120_v19 = vrot.slane %v3022_v59, 1  ;;  %v3119_v59 = vsel %vm837_vm2, %v3116_v60, %v3118_v40  ;;  %v3524_v48 = vsel %vm1326_vm3, %v3521_v27, %v3523_v8  ;;  %v3456_v60 = vmul.f32 %v15486_v50, %v20154_v35 }
 0x138   : > { %12649 = vmatprep.mubr.msk.f32.mxu1 %vm970_vm1, %v3113_v29  ;;  %v20151_v29 = vld [vmem:[#allocation41_spill] sm:$0xff]  ;;  %v3526_v62 = vsel %vm1326_vm3, %v3523_v8, %v3525_v55 }
 0x139   : > { %v3454_v34 = vmul.f32 %v15466_v6, %v20151_v29  ;;  %v3121_v54 = vsel %vm837_vm2, %v3118_v40, %v3120_v19 }
 0x13a   : > { %12606 = vmatmul.mubr.msk.f32.gmra.mxu0 %vm970_vm1, %v15384_v16 }
 0x13b   : > { %12660 = vmatprep.mubr.msk.f32.mxu0 %vm970_vm1, %v3518_v43  ;;  %12650 = vmatmul.mubr.msk.f32.gmra.mxu1 %vm970_vm1, %v3115_v45  ;;  %v3455_v43 = vmul.f32 %v15478_v10, %v20153_v37  ;;  %v15710_v45 = vpop.f32.mrf.mxu1  ;;  %v1134_v37 = vpop.f32.mrf.mxu0 }
 0x13c   : > { %12652 = vmatprep.mubr.msk.f32.mxu1 %vm970_vm1, %v3117_v41  ;;  %v3527_v41 = vrot.slane %v3454_v34, 7 }
 0x13d   : > { %v3529_v40 = vrot.slane %v3455_v43, 7  ;;  %v12365_v34 = vpop.f32.mrf.mxu0  ;;  %v20158_v43 = vld [vmem:[#allocation45_spill] sm:$0xff] }
 0x13e   : > { %12661 = vmatmul.mubr.msk.f32.vlgmr.msra.gmra.mxu0 %vm970_vm1, %v3520_v33  ;;  %v3123_v33 = vsel %vm837_vm2, %v3120_v19, %v15699_v7  ;;  %v3528_v8 = vsel %vm1326_vm3, %v3525_v55, %v3527_v41  ;;  %v3531_v19 = vrot.slane %v3456_v60, 7 }
 0x13f   : > { %12663 = vmatprep.mubr.msk.f32.mxu0 %vm970_vm1, %v3522_v39  ;;  %12653 = vmatmul.mubr.msk.f32.gmra.mxu1 %vm970_vm1, %v3119_v59  ;;  %v20155_v39 = vld [vmem:[#allocation44_spill] sm:$0xff]  ;;  %v15723_v59 = vpop.f32.mrf.mxu1  ;;  %v3530_v35 = vsel %vm1326_vm3, %v3527_v41, %v3529_v40  ;;  %v20161_v41 = vld [vmem:[#allocation47_spill] sm:$0xff] }
 0x140   : > { %12655 = vmatprep.mubr.msk.f32.mxu1 %vm970_vm1, %v3121_v54  ;;  %v3457_v27 = vmul.f32 %v15498_v57, %v20155_v39  ;;  %12759 = vmatpush3.msk.msra.mxu0 %vm1064_vm0, %v15433_v25  ;;  %20156 = vst [vmem:[#allocation106_spill] sm:$0xff] %v15723_v59  ;;  %v3458_v39 = vmul.f32 %v15504_v38, %v20158_v43  ;;  %v1144_v25 = vpop.f32.mrf.mxu0  ;;  %vm5019_vm0 = vcmask 261120  }
 0x141   : > { %v15728_v54 = vpop.f32.mrf.mxu1  ;;  %v3532_v60 = vsel %vm1326_vm3, %v3529_v40, %v3531_v19 }
 0x142   : > { %12664 = vmatmul.mubr.msk.f32.gmra.mxu0 %vm970_vm1, %v3524_v48  ;;  %20157 = vst [vmem:[#allocation107_spill] sm:$0xff] %v15728_v54  ;;  %v3533_v29 = vrot.slane %v3457_v27, 7  ;;  %v20159_v48 = vld [vmem:[#allocation46_spill] sm:$0xff]  ;;  %v12368_v55 = vpop.f32.mrf.mxu0  ;;  %v3535_v43 = vrot.slane %v3458_v39, 7  ;;  %v3460_v27 = vmul.f32 %v15522_v53, %v20161_v41 }
 0x143   : > { %12666 = vmatprep.mubr.msk.f32.mxu0 %vm970_vm1, %v3526_v62  ;;  %12656 = vmatmul.mubr.msk.f32.gmra.mxu1 %vm970_vm1, %v3123_v33  ;;  %v3459_v62 = vmul.f32 %v15516_v51, %v20159_v48  ;;  %v15738_v47 = vpop.f32.mrf.mxu1 }
 0x144   : > { %12710 = vmatprep.mubr.msk.f32.mxu1 %vm970_vm1, %v15415_v18  ;;  %20160 = vst [vmem:[#allocation108_spill] sm:$0xff] %v15738_v47  ;;  %v3534_v42 = vsel %vm1326_vm3, %v3531_v19, %v3533_v29  ;;  %v1154_v47 = vpop.f32.mrf.mxu0  ;;  %v3536_v19 = vsel %vm1326_vm3, %v3533_v29, %v3535_v43 }
 0x145   : > { %v12412_v33 = vpop.f32.mrf.mxu1  ;;  %v3537_v59 = vrot.slane %v3459_v62, 7  ;;  %v20163_v62 = vld [vmem:[#allocation49_spill] sm:$0xff] }
 0x146   : > { %12667 = vmatmul.mubr.msk.f32.gmra.mxu0 %vm970_vm1, %v3528_v8  ;;  %v15748_v48 = vadd.f32 %v12412_v33, %v12362_v52  ;;  %v12371_v7 = vpop.f32.mrf.mxu0  ;;  %v3539_v33 = vrot.slane %v3460_v27, 7  ;;  %v3462_v41 = vmul.f32 %v15540_v3, %v20163_v62 }
 0x147   : > { %12669 = vmatprep.mubr.msk.f32.mxu0 %vm970_vm1, %v3530_v35  ;;  %12711 = vmatmul.mubr.msk.f32.vlgmr.msra.gmra.mxu1 %vm970_vm1, %v15421_v2  ;;  %v20162_v35 = vld [vmem:[#allocation48_spill] sm:$0xff]  ;;  %v1525_v8 = vpop.f32.mrf.mxu1 }
 0x148   : > { %12713 = vmatprep.mubr.msk.f32.mxu1 %vm970_vm1, %v15438_v46  ;;  %v3461_v40 = vmul.f32 %v15534_v56, %v20162_v35  ;;  %v15755_v39 = vadd.f32 %v1525_v8, %v1134_v37  ;;  %v3538_v35 = vsel %vm1326_vm3, %v3535_v43, %v3537_v59  ;;  %v3540_v43 = vsel %vm1326_vm3, %v3537_v59, %v3539_v33 }
 0x149   : > { %v12415_v52 = vpop.f32.mrf.mxu1 }
 0x14a   : > { %12670 = vmatmul.mubr.msk.f32.gmra.mxu0 %vm970_vm1, %v3532_v60  ;;  %v15764_v14 = vadd.f32 %v12415_v52, %v12365_v34  ;;  %v1164_v60 = vpop.f32.mrf.mxu0  ;;  %v3541_v37 = vrot.slane %v3461_v40, 7  ;;  %v3543_v52 = vrot.slane %v3462_v41, 7  ;;  %v20165_v40 = vld [vmem:[#allocation51_spill] sm:$0xff] }
 0x14b   : > { %12672 = vmatprep.mubr.msk.f32.mxu0 %vm970_vm1, %v3534_v42  ;;  %12714 = vmatmul.mubr.msk.f32.gmra.mxu1 %vm970_vm1, %v15444_v24  ;;  %v20164_v42 = vld [vmem:[#allocation50_spill] sm:$0xff]  ;;  %v1535_v8 = vpop.f32.mrf.mxu1  ;;  %v3464_v62 = vmul.f32 %v15558_v0, %v20165_v40 }
 0x14c   : > { %12716 = vmatprep.mubr.msk.f32.mxu1 %vm970_vm1, %v15460_v28  ;;  %v3463_v29 = vmul.f32 %v15552_v1, %v20164_v42  ;;  %v15771_v27 = vadd.f32 %v1535_v8, %v1144_v25  ;;  %v12374_v49 = vpop.f32.mrf.mxu0  ;;  %v3542_v42 = vsel %vm1326_vm3, %v3539_v33, %v3541_v37  ;;  %v3544_v33 = vsel %vm1326_vm3, %v3541_v37, %v3543_v52 }
 0x14d   : > { %v12418_v34 = vpop.f32.mrf.mxu1 }
 0x14e   : > { %12673 = vmatmul.mubr.msk.f32.gmra.mxu0 %vm970_vm1, %v3536_v19  ;;  %v15780_v4 = vadd.f32 %v12418_v34, %v12368_v55  ;;  %v1174_v19 = vpop.f32.mrf.mxu0  ;;  %v3545_v25 = vrot.slane %v3463_v29, 7  ;;  %v3547_v34 = vrot.slane %v3464_v62, 7  ;;  %v20167_v29 = vld [vmem:[#allocation55_spill] sm:$0xff] }
 0x14f   : > { %12675 = vmatprep.mubr.msk.f32.mxu0 %vm970_vm1, %v3538_v35  ;;  %12717 = vmatmul.mubr.msk.f32.gmra.mxu1 %vm970_vm1, %v15466_v6  ;;  %v20166_v35 = vld [vmem:[#allocation52_spill] sm:$0xff]  ;;  %v1545_v8 = vpop.f32.mrf.mxu1  ;;  %v3466_v40 = vmul.f32 %v15576_v17, %v20167_v29 }
 0x150   : > { %12719 = vmatprep.mubr.msk.f32.mxu1 %vm970_vm1, %v15478_v10  ;;  %v3465_v59 = vmul.f32 %v15570_v23, %v20166_v35  ;;  %v15787_v41 = vadd.f32 %v1545_v8, %v1154_v47  ;;  %v12377_v12 = vpop.f32.mrf.mxu0  ;;  %v3546_v35 = vsel %vm1326_vm3, %v3543_v52, %v3545_v25  ;;  %v3548_v52 = vsel %vm1326_vm3, %v3545_v25, %v3547_v34 }
 0x151   : > { %v12421_v55 = vpop.f32.mrf.mxu1 }
 0x152   : > { %12676 = vmatmul.mubr.msk.f32.gmra.mxu0 %vm970_vm1, %v3540_v43  ;;  %v15796_v30 = vadd.f32 %v12421_v55, %v12371_v7  ;;  %v1184_v43 = vpop.f32.mrf.mxu0  ;;  %v3549_v47 = vrot.slane %v3465_v59, 7  ;;  %v3551_v55 = vrot.slane %v3466_v40, 7  ;;  %v20170_v59 = vld [vmem:[#allocation60_spill] sm:$0xff] }
 0x153   : > { %12678 = vmatprep.mubr.msk.f32.mxu0 %vm970_vm1, %v3542_v42  ;;  %12720 = vmatmul.mubr.msk.f32.gmra.mxu1 %vm970_vm1, %v15486_v50  ;;  %v20168_v42 = vld [vmem:[#allocation56_spill] sm:$0xff]  ;;  %v1555_v8 = vpop.f32.mrf.mxu1  ;;  %v3468_v29 = vmul.f32 %v15594_v20, %v20170_v59 }
 0x154   : > { %12722 = vmatprep.mubr.msk.f32.mxu1 %vm970_vm1, %v15498_v57  ;;  %v3467_v37 = vmul.f32 %v15588_v58, %v20168_v42  ;;  %v15803_v62 = vadd.f32 %v1555_v8, %v1164_v60  ;;  %v12380_v36 = vpop.f32.mrf.mxu0  ;;  %v3550_v42 = vsel %vm1326_vm3, %v3547_v34, %v3549_v47  ;;  %v3552_v34 = vsel %vm1326_vm3, %v3549_v47, %v3551_v55 }
 0x155   : > { %v12424_v7 = vpop.f32.mrf.mxu1 }
 0x156   : > { %12679 = vmatmul.mubr.msk.f32.gmra.mxu0 %vm970_vm1, %v3544_v33  ;;  %20169 = vst [vmem:[#allocation109_spill] sm:$0xff] %v15803_v62  ;;  %v15812_v54 = vadd.f32 %v12424_v7, %v12374_v49  ;;  %v1194_v33 = vpop.f32.mrf.mxu0  ;;  %v3553_v60 = vrot.slane %v3467_v37, 7  ;;  %v3555_v7 = vrot.slane %v3468_v29, 7  ;;  %v20174_v37 = vld [vmem:[#allocation64_spill] sm:$0xff] }
 0x157   : > { %12681 = vmatprep.mubr.msk.f32.mxu0 %vm970_vm1, %v3546_v35  ;;  %12723 = vmatmul.mubr.msk.f32.gmra.mxu1 %vm970_vm1, %v15504_v38  ;;  %v20172_v35 = vld [vmem:[#allocation61_spill] sm:$0xff]  ;;  %v1565_v8 = vpop.f32.mrf.mxu1  ;;  %v3470_v59 = vmul.f32 %v15612_v44, %v20174_v37 }
 0x158   : > { %20171 = vst [vmem:[#allocation110_spill] sm:$0xff] %v15812_v54  ;;  %12725 = vmatprep.mubr.msk.f32.mxu1 %vm970_vm1, %v15516_v51  ;;  %v3469_v25 = vmul.f32 %v15606_v11, %v20172_v35  ;;  %v15819_v40 = vadd.f32 %v1565_v8, %v1174_v19  ;;  %v12383_v62 = vpop.f32.mrf.mxu0  ;;  %v3554_v35 = vsel %vm1326_vm3, %v3551_v55, %v3553_v60 }
 0x159   : > { %v12427_v49 = vpop.f32.mrf.mxu1  ;;  %v3556_v55 = vsel %vm1326_vm3, %v3553_v60, %v3555_v7  ;;  %v3473_v60 = vmul.f32 %v15308_v21, %v20140_v31 }
 0x15a   : > { %12682 = vmatmul.mubr.msk.f32.gmra.mxu0 %vm970_vm1, %v3548_v52  ;;  %20173 = vst [vmem:[#allocation111_spill] sm:$0xff] %v15819_v40  ;;  %v15828_v54 = vadd.f32 %v12427_v49, %v12377_v12  ;;  %v1204_v52 = vpop.f32.mrf.mxu0  ;;  %v3557_v19 = vrot.slane %v3469_v25, 7  ;;  %v3559_v49 = vrot.slane %v3470_v59, 7  ;;  %v20177_v25 = vld [vmem:[#allocation68_spill] sm:$0xff] }
 0x15b   : > { %12684 = vmatprep.mubr.msk.f32.mxu0 %vm970_vm1, %v3550_v42  ;;  %12726 = vmatmul.mubr.msk.f32.gmra.mxu1 %vm970_vm1, %v15522_v53  ;;  %v20176_v42 = vld [vmem:[#allocation65_spill] sm:$0xff]  ;;  %v1575_v8 = vpop.f32.mrf.mxu1  ;;  %v3472_v37 = vmul.f32 %v15644_v32, %v20177_v25 }
 0x15c   : > { %20175 = vst [vmem:[#allocation112_spill] sm:$0xff] %v15828_v54  ;;  %12728 = vmatprep.mubr.msk.f32.mxu1 %vm970_vm1, %v15534_v56  ;;  %v3471_v47 = vmul.f32 %v15624_v15, %v20176_v42  ;;  %v15835_v29 = vadd.f32 %v1575_v8, %v1184_v43  ;;  %v12386_v40 = vpop.f32.mrf.mxu0  ;;  %v3558_v42 = vsel %vm1326_vm3, %v3555_v7, %v3557_v19 }
 0x15d   : > { %v12430_v12 = vpop.f32.mrf.mxu1 }
 0x15e   : > { %12685 = vmatmul.mubr.msk.f32.gmra.mxu0 %vm970_vm1, %v3552_v34  ;;  %v15844_v54 = vadd.f32 %v12430_v12, %v12380_v36  ;;  %v15846_v34 = vpop.f32.mrf.mxu0  ;;  %v3561_v43 = vrot.slane %v3471_v47, 7  ;;  %v3560_v36 = vsel %vm1326_vm3, %v3557_v19, %v3559_v49  ;;  %v3563_v12 = vrot.slane %v3472_v37, 7  ;;  %v20180_v47 = vld [vmem:[#allocation76_spill] sm:$0xff] }
 0x15f   : > { %12687 = vmatprep.mubr.msk.f32.mxu0 %vm970_vm1, %v3554_v35  ;;  %12729 = vmatmul.mubr.msk.f32.gmra.mxu1 %vm970_vm1, %v15540_v3  ;;  %20178 = vst [vmem:[#allocation113_spill] sm:$0xff] %v15846_v34  ;;  %v1585_v59 = vpop.f32.mrf.mxu1  ;;  %v3474_v25 = vmul.f32 %v15334_v26, %v20180_v47 }
 0x160   : > { %12731 = vmatprep.mubr.msk.f32.mxu1 %vm970_vm1, %v15552_v1  ;;  %v15853_v35 = vadd.f32 %v1585_v59, %v1194_v33  ;;  %v12389_v8 = vpop.f32.mrf.mxu0  ;;  %v3562_v31 = vsel %vm1326_vm3, %v3559_v49, %v3561_v43  ;;  %v3565_v33 = vrot.slane %v3473_v60, 7  ;;  %v20183_v60 = vld [vmem:[#allocation81_spill] sm:$0xff] }
 0x161   : > { %v12433_v7 = vpop.f32.mrf.mxu1  ;;  %v3476_v47 = vmul.f32 %v15375_v9, %v20183_v60 }
 0x162   : > { %12688 = vmatmul.mubr.msk.f32.gmra.mxu0 %vm970_vm1, %v3556_v55  ;;  %20179 = vst [vmem:[#allocation114_spill] sm:$0xff] %v15853_v35  ;;  %v15862_v34 = vadd.f32 %v12433_v7, %v12383_v62  ;;  %v15864_v55 = vpop.f32.mrf.mxu0  ;;  %v3564_v62 = vsel %vm1326_vm3, %v3561_v43, %v3563_v12  ;;  %v3567_v7 = vrot.slane %v3474_v25, 7 }
 0x163   : > { %12690 = vmatprep.mubr.msk.f32.mxu0 %vm970_vm1, %v3558_v42  ;;  %12732 = vmatmul.mubr.msk.f32.gmra.mxu1 %vm970_vm1, %v15558_v0  ;;  %20181 = vst [vmem:[#allocation115_spill] sm:$0xff] %v15864_v55  ;;  %v20182_v42 = vld [vmem:[#allocation77_spill] sm:$0xff]  ;;  %v1595_v37 = vpop.f32.mrf.mxu1 }
 0x164   : > { %12734 = vmatprep.mubr.msk.f32.mxu1 %vm970_vm1, %v15570_v23  ;;  %v3475_v19 = vmul.f32 %v15339_v5, %v20182_v42  ;;  %v15871_v59 = vadd.f32 %v1595_v37, %v1204_v52  ;;  %v12392_v35 = vpop.f32.mrf.mxu0  ;;  %v3566_v42 = vsel %vm1326_vm3, %v3563_v12, %v3565_v33  ;;  %v3568_v12 = vsel %vm1326_vm3, %v3565_v33, %v3567_v7 }
 0x165   : > { %v12436_v49 = vpop.f32.mrf.mxu1 }
 0x166   : > { %12691 = vmatmul.mubr.msk.f32.gmra.mxu0 %vm970_vm1, %v3560_v36  ;;  %v15880_v55 = vadd.f32 %v12436_v49, %v12386_v40  ;;  %v15882_v36 = vpop.f32.mrf.mxu0  ;;  %v3569_v52 = vrot.slane %v3475_v19, 7  ;;  %v3571_v49 = vrot.slane %v3476_v47, 7  ;;  %v3478_v19 = vmul.f32 %v14986_v63, %v15384_v16 }
 0x167   : > { %12693 = vmatprep.mubr.msk.f32.mxu0 %vm970_vm1, %v3562_v31  ;;  %12735 = vmatmul.mubr.msk.f32.gmra.mxu1 %vm970_vm1, %v15576_v17  ;;  %20185 = vst [vmem:[#allocation117_spill] sm:$0xff] %v15882_v36  ;;  %v20186_v31 = vld [vmem:[#allocation83_spill] sm:$0xff]  ;;  %v15888_v25 = vpop.f32.mrf.mxu1 }
 0x168   : > { %20184 = vst [vmem:[#allocation116_spill] sm:$0xff] %v15880_v55  ;;  %12737 = vmatprep.mubr.msk.f32.mxu1 %vm970_vm1, %v15588_v58  ;;  %v3477_v43 = vmul.f32 %v20186_v31, %v15350_v22  ;;  %20187 = vst [vmem:[#allocation118_spill] sm:$0xff] %v15888_v25  ;;  %v12395_v37 = vpop.f32.mrf.mxu0  ;;  %v3570_v60 = vsel %vm1326_vm3, %v3567_v7, %v3569_v52  ;;  %v3572_v63 = vsel %vm1326_vm3, %v3569_v52, %v3571_v49 }
 0x169   : > { %v12439_v40 = vpop.f32.mrf.mxu1 }
 0x16a   : > { %12694 = vmatmul.mubr.msk.f32.gmra.mxu0 %vm970_vm1, %v3564_v62  ;;  %v15898_v31 = vadd.f32 %v12439_v40, %v12389_v8  ;;  %v15900_v36 = vpop.f32.mrf.mxu0  ;;  %v3573_v62 = vrot.slane %v3477_v43, 7  ;;  %v3575_v8 = vrot.slane %v3478_v19, 7  ;;  %v20192_v43 = vld [vmem:[#allocation29_spill] sm:$0xff] }
 0x16b   : > { %12696 = vmatprep.mubr.msk.f32.mxu0 %vm970_vm1, %v3566_v42  ;;  %12738 = vmatmul.mubr.msk.f32.gmra.mxu1 %vm970_vm1, %v15594_v20  ;;  %20189 = vst [vmem:[#allocation120_spill] sm:$0xff] %v15900_v36  ;;  %v20190_v42 = vld [vmem:[#allocation87_spill] sm:$0xff]  ;;  %v15905_v25 = vpop.f32.mrf.mxu1  ;;  %v3480_v40 = vmul.f32 0.0, %v20192_v43  ;;  %v20193_v36 = vld [vmem:[#allocation30_spill] sm:$0xff] }
 0x16c   : > { %20188 = vst [vmem:[#allocation119_spill] sm:$0xff] %v15898_v31  ;;  %12740 = vmatprep.mubr.msk.f32.mxu1 %vm970_vm1, %v15606_v11  ;;  %v3479_v33 = vmul.f32 0.0, %v20190_v42  ;;  %20191 = vst [vmem:[#allocation121_spill] sm:$0xff] %v15905_v25  ;;  %v12398_v47 = vpop.f32.mrf.mxu0  ;;  %v4167_v31 = vmul.f32 %v15415_v18, %v20193_v36  ;;  %v3574_v42 = vsel %vm1326_vm3, %v3571_v49, %v3573_v62 }
 0x16d   : > { %v12442_v7 = vpop.f32.mrf.mxu1  ;;  %v3576_v18 = vsel %vm1326_vm3, %v3573_v62, %v3575_v8  ;;  %v3579_v49 = vrot.slane %v3480_v40, 7 }
 0x16e   : > { %12697 = vmatmul.mubr.msk.f32.gmra.mxu0 %vm970_vm1, %v3568_v12  ;;  %v15916_v25 = vadd.f32 %v12442_v7, %v12392_v35  ;;  %v15918_v12 = vpop.f32.mrf.mxu0  ;;  %v15920_v55 = vrot.slane %v3479_v33, 7  ;;  %v4233_v33 = vrot.slane %v4167_v31, 1  ;;  %v20197_v7 = vld [vmem:[#allocation72_spill] sm:$0xff] }
 0x16f   : > { %12699 = vmatprep.mubr.msk.f32.mxu0 %vm970_vm1, %v3570_v60  ;;  %12741 = vmatmul.mubr.msk.f32.gmra.mxu1 %vm970_vm1, %v15612_v44  ;;  %20194 = vst [vmem:[#allocation122_spill] sm:$0xff] %v15918_v12  ;;  %v20196_v60 = vld [vmem:[#allocation71_spill] sm:$0xff]  ;;  %v15926_v19 = vpop.f32.mrf.mxu1  ;;  %v4169_v36 = vmul.f32 %v15438_v46, %v20197_v7 }
 0x170   : > { %20195 = vst [vmem:[#allocation123_spill] sm:$0xff] %v15920_v55  ;;  %12743 = vmatprep.mubr.msk.f32.mxu1 %vm970_vm1, %v15624_v15  ;;  %v4168_v52 = vmul.f32 %v15421_v2, %v20196_v60  ;;  %v12401_v43 = vpop.f32.mrf.mxu0  ;;  %v3578_v2 = vsel %vm1326_vm3, %v3575_v8, %v15920_v55  ;;  %v15951_v46 = vsel %vm1326_vm3, %v15920_v55, %v3579_v49 }
 0x171   : > { %v12445_v35 = vpop.f32.mrf.mxu1  ;;  %20199 = vst [vmem:[#allocation124_spill] sm:$0xff] %v15951_v46 }
 0x172   : > { %12700 = vmatmul.mubr.msk.f32.gmra.mxu0 %vm970_vm1, %v3572_v63  ;;  %v15937_v60 = vadd.f32 %v12445_v35, %v12395_v37  ;;  %v15939_v63 = vpop.f32.mrf.mxu0  ;;  %v4234_v62 = vrot.slane %v4168_v52, 1 }
 0x173   : > { %12702 = vmatprep.mubr.msk.f32.mxu0 %vm970_vm1, %v3574_v42  ;;  %12744 = vmatmul.mubr.msk.f32.gmra.mxu1 %vm970_vm1, %v15644_v32  ;;  %v20198_v42 = vld [vmem:[#allocation80_spill] sm:$0xff]  ;;  %v15945_v12 = vpop.f32.mrf.mxu1 }
 0x174   : > { %12746 = vmatprep.mubr.msk.f32.mxu1 %vm970_vm1, %v15308_v21  ;;  %v4170_v40 = vmul.f32 %v15444_v24, %v20198_v42  ;;  %v12462_v31 = vpop.f32.mrf.mxu0  ;;  %v4236_v21 = vrot.slane %v4169_v36, 1  ;;  %v4171_v24 = vmul.f32 %v15460_v28, %v20149_v13  ;;  %v4235_v52 = vsel %vm837_vm2, %v4233_v33, %v4234_v62  ;;  %v20200_v33 = vld [vmem:[#allocation85_spill] sm:$0xff] }
 0x175   : > { %v12448_v37 = vpop.f32.mrf.mxu1  ;;  %v15954_v8 = vadd.f32 %v12462_v31, %v15748_v48  ;;  %v4172_v48 = vmul.f32 %v15466_v6, %v14972_v61  ;;  %v20232_v42 = vld [vmem:[#allocation101_spill] sm:$0xff] }
 0x176   : > { %12703 = vmatmul.mubr.msk.f32.gmra.mxu0 %vm970_vm1, %v3576_v18  ;;  %v15961_v18 = vadd.f32 %v12448_v37, %v12398_v47  ;;  %v2078_v35 = vpop.f32.mrf.mxu0  ;;  %v4238_v49 = vrot.slane %v4170_v40, 1  ;;  %v4237_v36 = vsel %vm837_vm2, %v4234_v62, %v4236_v21  ;;  %v4240_v6 = vrot.slane %v4171_v24, 1 }
 0x177   : > { %12705 = vmatprep.mubr.msk.f32.mxu0 %vm970_vm1, %v3578_v2  ;;  %12747 = vmatmul.mubr.msk.f32.gmra.mxu1 %vm970_vm1, %v15334_v26  ;;  %v15967_v2 = vpop.f32.mrf.mxu1  ;;  %v15970_v26 = vadd.f32 %v2078_v35, %v15755_v39  ;;  %v4173_v39 = vmul.f32 %v15478_v10, %v20200_v33  ;;  %v4242_v62 = vrot.slane %v4172_v48, 1 }
 0x178   : > { %12749 = vmatprep.mubr.msk.f32.mxu1 %vm970_vm1, %v15339_v5  ;;  %v12465_v28 = vpop.f32.mrf.mxu0  ;;  %v4239_v40 = vsel %vm837_vm2, %v4236_v21, %v4238_v49 }
 0x179   : > { %v12451_v47 = vpop.f32.mrf.mxu1  ;;  %v15977_v5 = vadd.f32 %v12465_v28, %v15764_v14 }
 0x17a   : > { %12706 = vmatmul.mubr.msk.f32.gmra.mxu0 %vm970_vm1, %v15951_v46  ;;  %v15984_v31 = vadd.f32 %v12451_v47, %v12401_v43  ;;  %v2088_v37 = vpop.f32.mrf.mxu0  ;;  %v4241_v43 = vsel %vm837_vm2, %v4238_v49, %v4240_v6  ;;  %v20203_v47 = vmov 0.0  }
 0x17b   : > { %12760 = vmatprep.mubr.msk.f32.mxu0 %vm970_vm1, %v4235_v52  ;;  %12750 = vmatmul.mubr.msk.f32.gmra.mxu1 %vm970_vm1, %v15375_v9  ;;  %v20201_v52 = vld [vmem:[#allocation88_spill] sm:$0xff]  ;;  %v15990_v35 = vpop.f32.mrf.mxu1  ;;  %v15993_v9 = vadd.f32 %v2088_v37, %v15771_v27  ;;  %v4243_v27 = vsel %vm837_vm2, %v4240_v6, %v4242_v62 }
 0x17c   : > { %12752 = vmatprep.mubr.msk.f32.mxu1 %vm970_vm1, %v15350_v22  ;;  %v4174_v14 = vmul.f32 %v15486_v50, %v20201_v52  ;;  %v12468_v10 = vpop.f32.mrf.mxu0  ;;  %v4244_v50 = vrot.slane %v4173_v39, 1  ;;  %v20202_v22 = vld [vmem:[#allocation89_spill] sm:$0xff] }
 0x17d   : > { %v12454_v21 = vpop.f32.mrf.mxu1  ;;  %v15999_v24 = vadd.f32 %v12468_v10, %v15780_v4  ;;  %v4175_v48 = vmul.f32 %v15498_v57, %v20202_v22  ;;  %v20212_v22 = vld [vmem:[#allocation111_spill] sm:$0xff] }
 0x17e   : > { %12761 = vmatmul.mubr.msk.f32.vlgmr.msra.gmra.mxu0 %vm970_vm1, %v4237_v36  ;;  %v16007_v28 = vadd.f32 %v12454_v21, %v15710_v45  ;;  %v2098_v36 = vpop.f32.mrf.mxu0  ;;  %v4246_v49 = vrot.slane %v4174_v14, 1  ;;  %v4245_v45 = vsel %vm837_vm2, %v4242_v62, %v4244_v50  ;;  %v20206_v21 = vld [vmem:[#allocation107_spill] sm:$0xff] }
 0x17f   : > { %12763 = vmatprep.mubr.msk.f32.mxu0 %vm970_vm1, %v4239_v40  ;;  %12753 = vmatmul.mubr.msk.f32.gmra.mxu1 %vm970_vm1, %v15384_v16  ;;  %v20204_v40 = vld [vmem:[#allocation90_spill] sm:$0xff]  ;;  %v16012_v37 = vpop.f32.mrf.mxu1  ;;  %v16015_v16 = vadd.f32 %v2098_v36, %v15787_v41  ;;  %v4248_v14 = vrot.slane %v4175_v48, 1 }
 0x180   : > { %12755 = vmatprep.mubr.f32.mxu1 %v20203_v47  ;;  %v4176_v4 = vmul.f32 %v15504_v38, %v20204_v40  ;;  %v12471_v57 = vpop.f32.mrf.mxu0  ;;  %v20205_v38 = vld [vmem:[#allocation91_spill] sm:$0xff]  ;;  %v4247_v41 = vsel %vm837_vm2, %v4244_v50, %v4246_v49  ;;  %v20209_v48 = vld [vmem:[#allocation110_spill] sm:$0xff] }
 0x181   : > { %v12457_v6 = vpop.f32.mrf.mxu1  ;;  %v16021_v39 = vadd.f32 %v12471_v57, %v15796_v30  ;;  %v4177_v10 = vmul.f32 %v15516_v51, %v20205_v38  ;;  %v20208_v57 = vld [vmem:[#allocation109_spill] sm:$0xff]  ;;  %v4249_v50 = vsel %vm837_vm2, %v4246_v49, %v4248_v14  ;;  %v20211_v40 = vld [vmem:[#allocation94_spill] sm:$0xff] }
 0x182   : > { %12764 = vmatmul.mubr.msk.f32.gmra.mxu0 %vm970_vm1, %v4241_v43  ;;  %v16028_v36 = vadd.f32 %v12457_v6, %v20206_v21  ;;  %v2108_v43 = vpop.f32.mrf.mxu0  ;;  %v4250_v46 = vrot.slane %v4176_v4, 1 }
 0x183   : > { %12766 = vmatprep.mubr.msk.f32.mxu0 %vm970_vm1, %v4243_v27  ;;  %12756 = vmatmul.mubr.f32.gmra.mxu1 %v20203_v47  ;;  %v20207_v27 = vld [vmem:[#allocation92_spill] sm:$0xff]  ;;  %v16033_v30 = vpop.f32.mrf.mxu1  ;;  %v16036_v55 = vadd.f32 %v2108_v43, %v20208_v57  ;;  %v4252_v21 = vrot.slane %v4177_v10, 1 }
 0x184   : > { %v4178_v62 = vmul.f32 %v15522_v53, %v20207_v27  ;;  %12816 = vmatprep.mubr.f32.mxu1 %v20203_v47  ;;  %v20210_v53 = vld [vmem:[#allocation93_spill] sm:$0xff]  ;;  %v4251_v38 = vsel %vm837_vm2, %v4248_v14, %v4250_v46 }
 0x185   : > { %v12474_v51 = vpop.f32.mrf.mxu0  ;;  %v12512_v4 = vpop.f32.mrf.mxu1  ;;  %v4179_v27 = vmul.f32 %v15534_v56, %v20210_v53  ;;  %v4253_v56 = vsel %vm837_vm2, %v4250_v46, %v4252_v21 }
 0x186   : > { %12767 = vmatmul.mubr.msk.f32.gmra.mxu0 %vm970_vm1, %v4245_v45  ;;  %v16042_v6 = vadd.f32 %v12474_v51, %v20209_v48  ;;  %v16048_v43 = vadd.f32 %v12512_v4, %v15954_v8  ;;  %v4254_v45 = vrot.slane %v4178_v62, 1  ;;  %v20213_v48 = vld [vmem:[#allocation95_spill] sm:$0xff]  ;;  %v20214_v4 = vld [vmem:[#allocation96_spill] sm:$0xff] }
 0x187   : > { %12769 = vmatprep.mubr.msk.f32.mxu0 %vm970_vm1, %v4247_v41  ;;  %v2118_v57 = vpop.f32.mrf.mxu0  ;;  %v4180_v41 = vmul.f32 %v15540_v3, %v20211_v40  ;;  %v16055_v51 = vpop.f32.mrf.mxu1  ;;  %v4256_v8 = vrot.slane %v4179_v27, 1  ;;  %v4181_v62 = vmul.f32 %v15552_v1, %v20213_v48  ;;  %v4182_v3 = vmul.f32 %v15558_v0, %v20214_v4 }
 0x188   : > { %v16053_v49 = vadd.f32 %v2118_v57, %v20212_v22  ;;  %v4255_v22 = vsel %vm837_vm2, %v4252_v21, %v4254_v45  ;;  %v20215_v57 = vld [vmem:[#allocation112_spill] sm:$0xff] }
 0x189   : > { %v12515_v10 = vpop.f32.mrf.mxu1  ;;  %v4257_v0 = vsel %vm837_vm2, %v4254_v45, %v4256_v8  ;;  %v4260_v21 = vrot.slane %v4181_v62, 1  ;;  %v20218_v45 = vld [vmem:[#allocation114_spill] sm:$0xff] }
 0x18a   : > { %12770 = vmatmul.mubr.msk.f32.gmra.mxu0 %vm970_vm1, %v4249_v50  ;;  %v12477_v14 = vpop.f32.mrf.mxu0  ;;  %v16067_v53 = vadd.f32 %v12515_v10, %v15977_v5  ;;  %v4258_v50 = vrot.slane %v4180_v41, 1  ;;  %v20217_v10 = vld [vmem:[#allocation98_spill] sm:$0xff] }
 0x18b   : > { %12772 = vmatprep.mubr.msk.f32.mxu0 %vm970_vm1, %v4251_v38  ;;  %v2248_v40 = vadd.f32 %v12477_v14, %v20215_v57  ;;  %v16069_v52 = vpop.f32.mrf.mxu1  ;;  %v20216_v14 = vld [vmem:[#allocation97_spill] sm:$0xff]  ;;  %v4184_v41 = vmul.f32 %v15576_v17, %v20217_v10  ;;  %v20219_v10 = vld [vmem:[#allocation99_spill] sm:$0xff] }
 0x18c   : > { %v2128_v38 = vpop.f32.mrf.mxu0  ;;  %v4183_v5 = vmul.f32 %v15570_v23, %v20216_v14  ;;  %v4259_v57 = vsel %vm837_vm2, %v4256_v8, %v4258_v50  ;;  %v4261_v17 = vsel %vm837_vm2, %v4258_v50, %v4260_v21 }
 0x18d   : > { %v16073_v46 = vadd.f32 %v2128_v38, %v15835_v29  ;;  %v4262_v38 = vrot.slane %v4182_v3, 1 }
 0x18e   : > { %12773 = vmatmul.mubr.msk.f32.gmra.mxu0 %vm970_vm1, %v4253_v56  ;;  %v12480_v1 = vpop.f32.mrf.mxu0  ;;  %v12518_v27 = vpop.f32.mrf.mxu1  ;;  %v4264_v8 = vrot.slane %v4183_v5, 1 }
 0x18f   : > { %12775 = vmatprep.mubr.msk.f32.mxu0 %vm970_vm1, %v4255_v22  ;;  %v2250_v56 = vadd.f32 %v12480_v1, %v15844_v54  ;;  %v16084_v29 = vadd.f32 %v12518_v27, %v15999_v24  ;;  %v4185_v54 = vmul.f32 %v15588_v58, %v20219_v10  ;;  %v4263_v24 = vsel %vm837_vm2, %v4260_v21, %v4262_v38  ;;  %v20223_v10 = vld [vmem:[#allocation116_spill] sm:$0xff] }
 0x190   : > { %v2138_v22 = vpop.f32.mrf.mxu0  ;;  %v16086_v4 = vpop.f32.mrf.mxu1  ;;  %v4266_v27 = vrot.slane %v4184_v41, 1  ;;  %v4265_v58 = vsel %vm837_vm2, %v4262_v38, %v4264_v8  ;;  %v20221_v41 = vld [vmem:[#allocation54_spill] sm:$0xff] }
 0x191   : > { %v16090_v62 = vadd.f32 %v2138_v22, %v20218_v45  ;;  %v4268_v5 = vrot.slane %v4185_v54, 1  ;;  %v20224_v54 = vld [vmem:[#allocation59_spill] sm:$0xff] }
 0x192   : > { %12776 = vmatmul.mubr.msk.f32.gmra.mxu0 %vm970_vm1, %v4257_v0  ;;  %v12521_v23 = vpop.f32.mrf.mxu1  ;;  %v20220_v0 = vld [vmem:[#allocation53_spill] sm:$0xff] }
 0x193   : > { %12778 = vmatprep.mubr.msk.f32.mxu0 %vm970_vm1, %v4259_v57  ;;  %v12483_v3 = vpop.f32.mrf.mxu0  ;;  %v16098_v1 = vadd.f32 %v12521_v23, %v16021_v39  ;;  %v4186_v22 = vmul.f32 %v15594_v20, %v20220_v0  ;;  %v4187_v23 = vmul.f32 %v15606_v11, %v20221_v41  ;;  %v4267_v20 = vsel %vm837_vm2, %v4264_v8, %v4266_v27  ;;  %v20222_v0 = vld [vmem:[#allocation58_spill] sm:$0xff] }
 0x194   : > { %v2252_v45 = vadd.f32 %v12483_v3, %v15862_v34  ;;  %v16103_v57 = vpop.f32.mrf.mxu1  ;;  %v4269_v11 = vsel %vm837_vm2, %v4266_v27, %v4268_v5  ;;  %v20226_v27 = vld [vmem:[#allocation119_spill] sm:$0xff] }
 0x195   : > { %v2148_v50 = vpop.f32.mrf.mxu0 }
 0x196   : > { %12779 = vmatmul.mubr.msk.f32.gmra.mxu0 %vm970_vm1, %v4261_v17  ;;  %v16109_v21 = vadd.f32 %v2148_v50, %v15871_v59  ;;  %v12524_v39 = vpop.f32.mrf.mxu1  ;;  %v4270_v17 = vrot.slane %v4186_v22, 1  ;;  %v4189_v22 = vmul.f32 %v15624_v15, %v20224_v54 }
 0x197   : > { %12781 = vmatprep.mubr.msk.f32.mxu0 %vm970_vm1, %v4263_v24  ;;  %v12486_v34 = vpop.f32.mrf.mxu0  ;;  %v16115_v3 = vadd.f32 %v12524_v39, %v16042_v6  ;;  %v4188_v24 = vmul.f32 %v15612_v44, %v20222_v0  ;;  %v4272_v6 = vrot.slane %v4187_v23, 1  ;;  %v20225_v39 = vld [vmem:[#allocation62_spill] sm:$0xff] }
 0x198   : > { %v2254_v38 = vadd.f32 %v12486_v34, %v20223_v10  ;;  %v16120_v14 = vpop.f32.mrf.mxu1  ;;  %v4271_v44 = vsel %vm837_vm2, %v4268_v5, %v4270_v17 }
 0x199   : > { %v16123_v59 = vpop.f32.mrf.mxu0  ;;  %v4274_v50 = vrot.slane %v4188_v24, 1  ;;  %v4273_v15 = vsel %vm837_vm2, %v4270_v17, %v4272_v6  ;;  %v20227_v24 = vld [vmem:[#allocation63_spill] sm:$0xff] }
 0x19a   : > { %12782 = vmatmul.mubr.msk.f32.gmra.mxu0 %vm970_vm1, %v4265_v58  ;;  %v12527_v8 = vpop.f32.mrf.mxu1  ;;  %v4190_v58 = vmul.f32 %v15644_v32, %v20225_v39  ;;  %v13947_v32 = vld [vmem:[%s14414_s14 + $0xd8] sm:$0xff] }
 0x19b   : > { %12784 = vmatprep.mubr.msk.f32.mxu0 %vm970_vm1, %v4267_v20  ;;  %v16130_v10 = vadd.f32 %v12527_v8, %v2248_v40  ;;  %v4276_v40 = vrot.slane %v4189_v22, 1  ;;  %v13946_v8 = vld [vmem:[%s14414_s14 + $0xd0] sm:$0xff]  ;;  %v4275_v48 = vsel %vm837_vm2, %v4272_v6, %v4274_v50  ;;  %v13948_v6 = vld [vmem:[%s14414_s14 + $0xe0] sm:$0xff] }
 0x19c   : > { %v12489_v34 = vpop.f32.mrf.mxu0  ;;  %v16134_v0 = vpop.f32.mrf.mxu1  ;;  %v4191_v54 = vmul.f32 %v13946_v8, %v20227_v24  ;;  %v20228_v39 = vld [vmem:[#allocation66_spill] sm:$0xff] }
 0x19d   : > { %v2256_v20 = vadd.f32 %v12489_v34, %v20226_v27  ;;  %v4192_v41 = vmul.f32 %v13947_v32, %v20228_v39  ;;  %v4278_v34 = vrot.slane %v4190_v58, 1  ;;  %v4277_v22 = vsel %vm837_vm2, %v4274_v50, %v4276_v40 }
 0x19e   : > { %12785 = vmatmul.mubr.msk.f32.gmra.mxu0 %vm970_vm1, %v4269_v11  ;;  %v16140_v23 = vpop.f32.mrf.mxu0  ;;  %v12530_v5 = vpop.f32.mrf.mxu1  ;;  %v4280_v39 = vrot.slane %v4191_v54, 1 }
 0x19f   : > { %12787 = vmatprep.mubr.msk.f32.mxu0 %vm970_vm1, %v4271_v44  ;;  %v16147_v11 = vadd.f32 %v12530_v5, %v2250_v56  ;;  %v4282_v56 = vrot.slane %v4192_v41, 1  ;;  %v20229_v5 = vld [vmem:[#allocation67_spill] sm:$0xff]  ;;  %v4279_v24 = vsel %vm837_vm2, %v4276_v40, %v4278_v34  ;;  %v13950_v40 = vld [vmem:[%s14414_s14 + $0xf0] sm:$0xff] }
 0x1a0   : > { %v16149_v27 = vpop.f32.mrf.mxu1  ;;  %v4193_v58 = vmul.f32 %v13948_v6, %v20229_v5  ;;  %v4281_v41 = vsel %vm837_vm2, %v4278_v34, %v4280_v39 }
 0x1a1   : > { %v12492_v44 = vpop.f32.mrf.mxu0  ;;  %v4283_v50 = vsel %vm837_vm2, %v4280_v39, %v4282_v56 }
 0x1a2   : > { %12788 = vmatmul.mubr.msk.f32.gmra.mxu0 %vm970_vm1, %v4273_v15  ;;  %v2258_v17 = vadd.f32 %v12492_v44, %v15916_v25  ;;  %v12533_v32 = vpop.f32.mrf.mxu1  ;;  %v13949_v15 = vld [vmem:[%s14414_s14 + $0xe8] sm:$0xff]  ;;  %v20230_v25 = vld [vmem:[#allocation74_spill] sm:$0xff]  ;;  %v4284_v5 = vrot.slane %v4193_v58, 1 }
 0x1a3   : > { %12790 = vmatprep.mubr.msk.f32.mxu0 %vm970_vm1, %v4275_v48  ;;  %v16155_v8 = vpop.f32.mrf.mxu0  ;;  %v16160_v33 = vadd.f32 %v12533_v32, %v2252_v45  ;;  %v4194_v44 = vmul.f32 %v13949_v15, %v20230_v25  ;;  %v20231_v45 = vld [vmem:[#allocation100_spill] sm:$0xff]  ;;  %v13951_v25 = vld [vmem:[%s14414_s14 + $0xf8] sm:$0xff]  ;;  %s14115_s14 = scalar_lea.vmem %s14114_s29, 32 }
 0x1a4   : > { %v16164_v48 = vpop.f32.mrf.mxu1  ;;  %v4195_v32 = vmul.f32 %v13950_v40, %v20231_v45  ;;  %v4285_v34 = vsel %vm837_vm2, %v4282_v56, %v4284_v5  ;;  %p14117_p6 = scmp.lt.s32.totalorder %s14115_s14, %s14109_s22 }
 0x1a5   : > { %v4286_v15 = vrot.slane %v4194_v44, 1 }
 0x1a6   : > { %12791 = vmatmul.mubr.msk.f32.gmra.mxu0 %vm970_vm1, %v4277_v22  ;;  %v12536_v6 = vpop.f32.mrf.mxu1  ;;  %v4196_v22 = vmul.f32 %v13951_v25, %v20232_v42  ;;  %v4288_v40 = vrot.slane %v4195_v32, 1  ;;  %p14118_p13 = por %p14117_p6, %p14116_p11 }
 0x1a7   : > { %12793 = vmatprep.mubr.msk.f32.mxu0 %vm970_vm1, %v4279_v24  ;;  %v12495_v54 = vpop.f32.mrf.mxu0  ;;  %v16173_v13 = vadd.f32 %v12536_v6, %v2254_v38  ;;  %v4287_v25 = vsel %vm837_vm2, %v4284_v5, %v4286_v15 }
 0x1a8   : > { %v2260_v61 = vadd.f32 %v12495_v54, %v15937_v60  ;;  %v16179_v24 = vpop.f32.mrf.mxu1  ;;  %v20234_v60 = vld [vmem:[#allocation102_spill] sm:$0xff]  ;;  %v20235_v54 = vld [vmem:[#allocation104_spill] sm:$0xff]  ;;  %v4290_v45 = vrot.slane %v4196_v22, 1  ;;  %v4289_v56 = vsel %vm837_vm2, %v4286_v15, %v4288_v40  ;;  %p14119_p0 = pnand %p14118_p13, %p14112_p9 }
 0x1a9   : > { %v16177_v7 = vpop.f32.mrf.mxu0  ;;  %20233 = vst [vmem:[#allocation107_spill] sm:$0xff] %v16179_v24  ;;  %v4197_v38 = vmul.f32 0.0, %v20234_v60  ;;  %v4198_v44 = vmul.f32 0.0, %v20235_v54 }
 0x1aa   : > { %12794 = vmatmul.mubr.msk.f32.gmra.mxu0 %vm970_vm1, %v4281_v41  ;;  %v12539_v58 = vpop.f32.mrf.mxu1 }
 0x1ab   : > { %12796 = vmatprep.mubr.msk.f32.mxu0 %vm970_vm1, %v4283_v50  ;;  %v12498_v39 = vpop.f32.mrf.mxu0  ;;  %v16188_v42 = vadd.f32 %v12539_v58, %v2256_v20  ;;  %v16197_v32 = vrot.slane %v4197_v38, 1  ;;  %v4294_v20 = vrot.slane %v4198_v44, 1 }
 0x1ac   : > { %v2262_v6 = vadd.f32 %v12498_v39, %v15961_v18  ;;  %v16192_v41 = vpop.f32.mrf.mxu1  ;;  %v4291_v18 = vsel %vm837_vm2, %v4288_v40, %v4290_v45 }
 0x1ad   : > { %v16190_v24 = vpop.f32.mrf.mxu0  ;;  %20236 = vst [vmem:[#allocation109_spill] sm:$0xff] %v16197_v32  ;;  %v4293_v15 = vsel %vm837_vm2, %v4290_v45, %v16197_v32  ;;  %v20238_v45 = vld [vmem:[#allocation105_spill] sm:$0xff] }
 0x1ae   : > { %12797 = vmatmul.mubr.msk.f32.gmra.mxu0 %vm970_vm1, %v4285_v34 }
 0x1af   : > { %12799 = vmatprep.mubr.msk.f32.mxu0 %vm970_vm1, %v4287_v25  ;;  %v12542_v50 = vpop.f32.mrf.mxu1  ;;  %v12501_v54 = vpop.f32.mrf.mxu0  ;;  %v16227_v25 = vsel %vm837_vm2, %v4294_v20, %v20238_v45 }
 0x1b0   : > { %v16200_v5 = vadd.f32 %v12542_v50, %v2258_v17  ;;  %v2264_v22 = vadd.f32 %v12501_v54, %v15984_v31  ;;  %v16213_v17 = vsel %vm837_vm2, %v16197_v32, %v4294_v20  ;;  %20239 = vst [vmem:[#allocation111_spill] sm:$0xff] %v16227_v25 }
 0x1b1   : > { %v16203_v39 = vpop.f32.mrf.mxu1  ;;  %v16206_v34 = vpop.f32.mrf.mxu0  ;;  %20237 = vst [vmem:[#allocation110_spill] sm:$0xff] %v16213_v17 }
 0x1b2   : > { %12800 = vmatmul.mubr.msk.f32.gmra.mxu0 %vm970_vm1, %v4289_v56 }
 0x1b3   : > { %12802 = vmatprep.mubr.msk.f32.mxu0 %vm970_vm1, %v4291_v18  ;;  %v12545_v58 = vpop.f32.mrf.mxu1 }
 0x1b4   : > { %v12504_v38 = vpop.f32.mrf.mxu0  ;;  %v16215_v40 = vadd.f32 %v12545_v58, %v2260_v61 }
 0x1b5   : > { %v2266_v31 = vadd.f32 %v12504_v38, %v16007_v28  ;;  %v16218_v54 = vpop.f32.mrf.mxu1 }
 0x1b6   : > { %12803 = vmatmul.mubr.msk.f32.gmra.mxu0 %vm970_vm1, %v4293_v15  ;;  %v16221_v44 = vpop.f32.mrf.mxu0 }
 0x1b7   : > { %12805 = vmatprep.mubr.msk.f32.mxu0 %vm970_vm1, %v16213_v17  ;;  %v12548_v56 = vpop.f32.mrf.mxu1 }
 0x1b8   : > { %v16229_v50 = vadd.f32 %v12548_v56, %v2262_v6 }
 0x1b9   : > { %v16231_v61 = vpop.f32.mrf.mxu1 }
 0x1ba   : > { %v12507_v18 = vpop.f32.mrf.mxu0  ;;  %12806 = vmatmul.mubr.msk.f32.gmra.mxu0 %vm970_vm1, %v16227_v25 }
 0x1bb   : > { %v2268_v28 = vadd.f32 %v12507_v18, %v16028_v36  ;;  %v12551_v15 = vpop.f32.mrf.mxu1 }
 0x1bc   : > { %v16236_v58 = vpop.f32.mrf.mxu0  ;;  %v16238_v38 = vadd.f32 %v12551_v15, %v2264_v22 }
 0x1bd   : > { %20240 = vst [vmem:[#allocation112_spill] sm:$0xff] %v16236_v58  ;;  %v16240_v17 = vpop.f32.mrf.mxu1 }
 0x1be   : > { %20241 = vst [vmem:[#allocation114_spill] sm:$0xff] %v16240_v17  ;;  %v12562_v20 = vpop.f32.mrf.mxu0 }
 0x1bf   : > { %v16243_v32 = vadd.f32 %v12562_v20, %v16048_v43  ;;  %v12554_v6 = vpop.f32.mrf.mxu1 }
 0x1c0   : > { %v16245_v56 = vpop.f32.mrf.mxu0  ;;  %v16247_v45 = vadd.f32 %v12554_v6, %v2266_v31 }
 0x1c1   : > { %20242 = vst [vmem:[#allocation116_spill] sm:$0xff] %v16243_v32  ;;  %20243 = vst [vmem:[#allocation119_spill] sm:$0xff] %v16245_v56  ;;  %v16249_v60 = vpop.f32.mrf.mxu1 }
 0x1c2   : > { %20244 = vst [vmem:[#allocation125_spill] sm:$0xff] %v16249_v60  ;;  %v12565_v25 = vpop.f32.mrf.mxu0 }
 0x1c3   : > { %v2962_v36 = vadd.f32 %v12565_v25, %v16067_v53  ;;  %v12557_v18 = vpop.f32.mrf.mxu1 }
 0x1c4   : > { %v16252_v58 = vpop.f32.mrf.mxu0  ;;  %v16254_v22 = vadd.f32 %v12557_v18, %v2268_v28 }
 0x1c5   : > { %20245 = vst [vmem:[#allocation126_spill] sm:$0xff] %v16252_v58  ;;  %v16256_v15 = vpop.f32.mrf.mxu1 }
 0x1c6   : > { %20246 = vst [vmem:[#allocation127_spill] sm:$0xff] %v16256_v15  ;;  %v12568_v17 = vpop.f32.mrf.mxu0 }
 0x1c7   : > { %v2964_v43 = vadd.f32 %v12568_v17, %v16084_v29  ;;  %v16259_v20 = vpop.f32.mrf.mxu1 }
 0x1c8   : > { %20247 = vst [vmem:[#allocation128_spill] sm:$0xff] %v16259_v20  ;;  %v16261_v32 = vpop.f32.mrf.mxu0 }
 0x1c9   : > { %20248 = vst [vmem:[#allocation129_spill] sm:$0xff] %v16261_v32  ;;  %v16263_v31 = vpop.f32.mrf.mxu1 }
 0x1ca   : > { %20249 = vst [vmem:[#allocation130_spill] sm:$0xff] %v16263_v31  ;;  %v12571_v6 = vpop.f32.mrf.mxu0 }
 0x1cb   : > { %v2966_v60 = vadd.f32 %v12571_v6, %v16098_v1  ;;  %v12615_v53 = vpop.f32.mrf.mxu1 }
 0x1cc   : > { %v16266_v25 = vpop.f32.mrf.mxu0  ;;  %v16268_v58 = vadd.f32 %v12615_v53, %v2962_v36 }
 0x1cd   : > { %20250 = vst [vmem:[#allocation131_spill] sm:$0xff] %v16266_v25  ;;  %v16270_v28 = vpop.f32.mrf.mxu1 }
 0x1ce   : > { %20251 = vst [vmem:[#allocation132_spill] sm:$0xff] %v16270_v28  ;;  %v12574_v18 = vpop.f32.mrf.mxu0 }
 0x1cf   : > { %v2968_v15 = vadd.f32 %v12574_v18, %v16115_v3  ;;  %v12618_v29 = vpop.f32.mrf.mxu1 }
 0x1d0   : > { %v16273_v17 = vpop.f32.mrf.mxu0  ;;  %v16275_v20 = vadd.f32 %v12618_v29, %v2964_v43 }
 0x1d1   : > { %20252 = vst [vmem:[#allocation133_spill] sm:$0xff] %v16273_v17  ;;  %v16277_v32 = vpop.f32.mrf.mxu1 }
 0x1d2   : > { %20253 = vst [vmem:[#allocation134_spill] sm:$0xff] %v16277_v32  ;;  %v12577_v31 = vpop.f32.mrf.mxu0 }
 0x1d3   : > { %v2970_v1 = vadd.f32 %v12577_v31, %v16130_v10  ;;  %v12621_v6 = vpop.f32.mrf.mxu1 }
 0x1d4   : > { %v16280_v56 = vpop.f32.mrf.mxu0  ;;  %v16282_v36 = vadd.f32 %v12621_v6, %v2966_v60 }
 0x1d5   : > { %20254 = vst [vmem:[#allocation135_spill] sm:$0xff] %v16280_v56  ;;  %v16284_v53 = vpop.f32.mrf.mxu1 }
 0x1d6   : > { %20255 = vst [vmem:[#allocation136_spill] sm:$0xff] %v16284_v53  ;;  %v12580_v28 = vpop.f32.mrf.mxu0 }
 0x1d7   : > { %v2972_v3 = vadd.f32 %v12580_v28, %v16147_v11  ;;  %v12624_v18 = vpop.f32.mrf.mxu1 }
 0x1d8   : > { %v16287_v25 = vpop.f32.mrf.mxu0  ;;  %v16289_v43 = vadd.f32 %v12624_v18, %v2968_v15 }
 0x1d9   : > { %20256 = vst [vmem:[#allocation137_spill] sm:$0xff] %v16287_v25  ;;  %v16291_v29 = vpop.f32.mrf.mxu1  ;;  %v5018_v25 = vld [vmem:[#allocation5 + $0x38] sm:$0xff] }
 0x1da   : > { %20257 = vst [vmem:[#allocation138_spill] sm:$0xff] %v16291_v29  ;;  %v12583_v32 = vpop.f32.mrf.mxu0  ;;  %12808 = vmatprep.subr.mxu1 %v5018_v25 }
 0x1db   : > { %v2974_v10 = vadd.f32 %v12583_v32, %v16160_v33  ;;  %v12627_v31 = vpop.f32.mrf.mxu1  ;;  %12809 = vmatpush3.msra.mxu1 %v5018_v25 }
 0x1dc   : > { %v16294_v17 = vpop.f32.mrf.mxu0  ;;  %v16296_v60 = vadd.f32 %v12627_v31, %v2970_v1 }
 0x1dd   : > { %20258 = vst [vmem:[#allocation139_spill] sm:$0xff] %v16294_v17  ;;  %v16298_v6 = vpop.f32.mrf.mxu1 }
 0x1de   : > { %20259 = vst [vmem:[#allocation140_spill] sm:$0xff] %v16298_v6  ;;  %v12586_v53 = vpop.f32.mrf.mxu0 }
 0x1df   : > { %v2976_v11 = vadd.f32 %v12586_v53, %v16173_v13  ;;  %v12630_v28 = vpop.f32.mrf.mxu1 }
 0x1e0   : > { %v16301_v56 = vpop.f32.mrf.mxu0  ;;  %v16303_v15 = vadd.f32 %v12630_v28, %v2972_v3 }
 0x1e1   : > { %20260 = vst [vmem:[#allocation141_spill] sm:$0xff] %v16301_v56  ;;  %v16305_v18 = vpop.f32.mrf.mxu1 }
 0x1e2   : > { %20261 = vst [vmem:[#allocation142_spill] sm:$0xff] %v16305_v18  ;;  %v12589_v29 = vpop.f32.mrf.mxu0 }
 0x1e3   : > { %v2978_v33 = vadd.f32 %v12589_v29, %v16188_v42  ;;  %v12633_v32 = vpop.f32.mrf.mxu1  ;;  %v5017_v42 = vld [vmem:[#allocation5 + $0x30] sm:$0xff] }
 0x1e4   : > { %v16308_v1 = vpop.f32.mrf.mxu0  ;;  %v16310_v31 = vadd.f32 %v12633_v32, %v2974_v10  ;;  %12810 = vmatprep.subr.mxu1 %v5017_v42 }
 0x1e5   : > { %20262 = vst [vmem:[#allocation143_spill] sm:$0xff] %v16308_v1  ;;  %v16312_v6 = vpop.f32.mrf.mxu1  ;;  %12811 = vmatpush3.msra.mxu1 %v5017_v42 }
 0x1e6   : > { %20263 = vst [vmem:[#allocation144_spill] sm:$0xff] %v16312_v6  ;;  %v12592_v13 = vpop.f32.mrf.mxu0 }
 0x1e7   : > { %v2980_v53 = vadd.f32 %v12592_v13, %v16200_v5  ;;  %v12636_v3 = vpop.f32.mrf.mxu1 }
 0x1e8   : > { %v16315_v28 = vpop.f32.mrf.mxu0  ;;  %v16317_v18 = vadd.f32 %v12636_v3, %v2976_v11  ;;  %v5013_v3 = vld [vmem:[#allocation5 + $0x18] sm:$0xff] }
 0x1e9   : > { %20264 = vst [vmem:[#allocation145_spill] sm:$0xff] %v16315_v28  ;;  %v16319_v56 = vpop.f32.mrf.mxu1  ;;  %12864 = vmatprep.subr.mxu0 %v5013_v3 }
 0x1ea   : > { %20265 = vst [vmem:[#allocation146_spill] sm:$0xff] %v16319_v56  ;;  %v12595_v29 = vpop.f32.mrf.mxu0  ;;  %12865 = vmatpush3.msra.mxu0 %v5013_v3 }
 0x1eb   : > { %v2982_v1 = vadd.f32 %v12595_v29, %v16215_v40  ;;  %v12639_v10 = vpop.f32.mrf.mxu1  ;;  %v5012_v40 = vld [vmem:[#allocation5 + $0x10] sm:$0xff] }
 0x1ec   : > { %v16322_v25 = vpop.f32.mrf.mxu0  ;;  %v16324_v32 = vadd.f32 %v12639_v10, %v2978_v33  ;;  %12866 = vmatprep.subr.mxu0 %v5012_v40 }
 0x1ed   : > { %20266 = vst [vmem:[#allocation147_spill] sm:$0xff] %v16322_v25  ;;  %v16326_v6 = vpop.f32.mrf.mxu1  ;;  %12867 = vmatpush3.msra.mxu0 %v5012_v40  ;;  %v5010_v40 = vld [vmem:[#allocation5] sm:$0xff] }
 0x1ee   : > { %20267 = vst [vmem:[#allocation148_spill] sm:$0xff] %v16326_v6  ;;  %v12598_v5 = vpop.f32.mrf.mxu0 }
 0x1ef   : > { %v2984_v13 = vadd.f32 %v12598_v5, %v16229_v50  ;;  %v12642_v11 = vpop.f32.mrf.mxu1 }
 0x1f0   : > { %v16329_v28 = vpop.f32.mrf.mxu0  ;;  %v16331_v56 = vadd.f32 %v12642_v11, %v2980_v53  ;;  %v5016_v53 = vld [vmem:[#allocation5 + $0x28] sm:$0xff] }
 0x1f1   : > { %20268 = vst [vmem:[#allocation149_spill] sm:$0xff] %v16329_v28  ;;  %v16333_v17 = vpop.f32.mrf.mxu1  ;;  %v5011_v11 = vld [vmem:[#allocation5 + $0x8] sm:$0xff]  ;;  %12812 = vmatprep.subr.mxu1 %v5016_v53 }
 0x1f2   : > { %20269 = vst [vmem:[#allocation150_spill] sm:$0xff] %v16333_v17  ;;  %v12601_v42 = vpop.f32.mrf.mxu0  ;;  %12868 = vmatprep.subr.mxu0 %v5011_v11  ;;  %12813 = vmatpush3.msra.mxu1 %v5016_v53  ;;  %v20275_v53 = vld [vmem:[#allocation40_spill] sm:$0xff] }
 0x1f3   : > { %v2986_v33 = vadd.f32 %v12601_v42, %v16238_v38  ;;  %v12645_v29 = vpop.f32.mrf.mxu1  ;;  %12869 = vmatpush3.msra.mxu0 %v5011_v11  ;;  %v5015_v38 = vld [vmem:[#allocation5 + $0x20] sm:$0xff] }
 0x1f4   : > { %v16336_v10 = vpop.f32.mrf.mxu0  ;;  %v16338_v50 = vadd.f32 %v12645_v29, %v2982_v1  ;;  %12814 = vmatprep.subr.mxu1 %v5015_v38  ;;  %12870 = vmatprep.subr.mxu0 %v5010_v40  ;;  %v20273_v29 = vld [vmem:[#allocation38_spill] sm:$0xff] }
 0x1f5   : > { %v16340_v5 = vpop.f32.mrf.mxu1  ;;  %12815 = vmatpush3.msra.mxu1 %v5015_v38  ;;  %12871 = vmatpush3.msra.mxu0 %v5010_v40 }
 0x1f6   : > { %20270 = vst [vmem:[#allocation151_spill] sm:$0xff] %v16340_v5  ;;  %v12604_v6 = vpop.f32.mrf.mxu0  ;;  %12872 = vmatprep.mubr.msk.f32.mxu0 %vm5019_vm0, %v20273_v29  ;;  %12817 = vmatmul.mubr.f32.vlgmr.msra.gmra.mxu1 %v20203_v47 }
 0x1f7   : > { %v2988_v28 = vadd.f32 %v12604_v6, %v16247_v45  ;;  %v12648_v17 = vpop.f32.mrf.mxu1  ;;  %12873 = vmatmul.mubr.msk.f32.vlgmr.msra.gmra.mxu0 %vm5019_vm0, %v20275_v53 }
 0x1f8   : > { %v16343_v3 = vpop.f32.mrf.mxu0  ;;  %v16345_v25 = vadd.f32 %v12648_v17, %v2984_v13 }
 0x1f9   : > { %20271 = vst [vmem:[#allocation152_spill] sm:$0xff] %v16343_v3  ;;  %v16347_v1 = vpop.f32.mrf.mxu1 }
 0x1fa   : > { %20272 = vst [vmem:[#allocation153_spill] sm:$0xff] %v16347_v1  ;;  %v12607_v42 = vpop.f32.mrf.mxu0 }
 0x1fb   : > { %v2990_v45 = vadd.f32 %v12607_v42, %v16254_v22  ;;  %v12651_v6 = vpop.f32.mrf.mxu1 }
 0x1fc   : > { %v16353_v17 = vpop.f32.mrf.mxu0  ;;  %v16355_v13 = vadd.f32 %v12651_v6, %v2986_v33 }
 0x1fd   : > { %20274 = vst [vmem:[#allocation38_spill] sm:$0xff] %v16353_v17  ;;  %v16359_v11 = vpop.f32.mrf.mxu1 }
 0x1fe   : > { %20276 = vst [vmem:[#allocation40_spill] sm:$0xff] %v16359_v11  ;;  %v16361_v1 = vpop.f32.mrf.mxu0 }
 0x1ff   : > { %v12654_v38 = vpop.f32.mrf.mxu1 }
 0x200   : > { %v16363_v40 = vpop.f32.mrf.mxu0  ;;  %v16365_v22 = vadd.f32 %v12654_v38, %v2988_v28 }
 0x201   : > { %v16367_v42 = vpop.f32.mrf.mxu1 }
 0x202   : > { %20277 = vst [vmem:[#allocation154_spill] sm:$0xff] %v16367_v42  ;;  %v12665_v29 = vpop.f32.mrf.mxu0 }
 0x203   : > { %v16370_v47 = vadd.f32 %v12665_v29, %v16268_v58  ;;  %v12657_v33 = vpop.f32.mrf.mxu1 }
 0x204   : > { %v16372_v6 = vpop.f32.mrf.mxu0  ;;  %v16374_v17 = vadd.f32 %v12657_v33, %v2990_v45 }
 0x205   : > { %20278 = vst [vmem:[#allocation155_spill] sm:$0xff] %v16370_v47  ;;  %v16376_v53 = vpop.f32.mrf.mxu1 }
 0x206   : > { %20279 = vst [vmem:[#allocation156_spill] sm:$0xff] %v16376_v53  ;;  %v12668_v11 = vpop.f32.mrf.mxu0 }
 0x207   : > { %v16379_v5 = vadd.f32 %v12668_v11, %v16275_v20  ;;  %v16381_v3 = vpop.f32.mrf.mxu1 }
 0x208   : > { %v16383_v28 = vpop.f32.mrf.mxu0 }
 0x209   : > { %20280 = vst [vmem:[#allocation157_spill] sm:$0xff] %v16379_v5  ;;  %20281 = vst [vmem:[#allocation158_spill] sm:$0xff] %v16383_v28  ;;  %v16385_v38 = vpop.f32.mrf.mxu1 }
 0x20a   : > { %v12671_v42 = vpop.f32.mrf.mxu0 }
 0x20b   : > { %v16388_v58 = vadd.f32 %v12671_v42, %v16282_v36  ;;  %v16390_v29 = vpop.f32.mrf.mxu1 }
 0x20c   : > { %v16392_v45 = vpop.f32.mrf.mxu0 }
 0x20d   : > { %20282 = vst [vmem:[#allocation159_spill] sm:$0xff] %v16388_v58  ;;  %20283 = vst [vmem:[#allocation160_spill] sm:$0xff] %v16392_v45  ;;  %v16394_v33 = vpop.f32.mrf.mxu1 }
 0x20e   : > { %20284 = vst [vmem:[#allocation161_spill] sm:$0xff] %v16394_v33  ;;  %v12674_v53 = vpop.f32.mrf.mxu0 }
 0x20f   : > { %v16397_v20 = vadd.f32 %v12674_v53, %v16289_v43  ;;  %v16399_v11 = vpop.f32.mrf.mxu1 }
 0x210   : > { %v16401_v5 = vpop.f32.mrf.mxu0 }
 0x211   : > { %20285 = vst [vmem:[#allocation162_spill] sm:$0xff] %v16397_v20  ;;  %20286 = vst [vmem:[#allocation163_spill] sm:$0xff] %v16401_v5  ;;  %v16403_v28 = vpop.f32.mrf.mxu1 }
 0x212   : > { %20287 = vst [vmem:[#allocation164_spill] sm:$0xff] %v16403_v28  ;;  %v12677_v47 = vpop.f32.mrf.mxu0 }
 0x213   : > { %v16406_v36 = vadd.f32 %v12677_v47, %v16296_v60  ;;  %v16408_v42 = vpop.f32.mrf.mxu1 }
 0x214   : > { %20289 = vst [vmem:[#allocation166_spill] sm:$0xff] %v16408_v42  ;;  %v16410_v58 = vpop.f32.mrf.mxu0 }
 0x215   : > { %20288 = vst [vmem:[#allocation165_spill] sm:$0xff] %v16406_v36  ;;  %v16412_v45 = vpop.f32.mrf.mxu1 }
 0x216   : > { %20290 = vst [vmem:[#allocation167_spill] sm:$0xff] %v16412_v45  ;;  %v12680_v33 = vpop.f32.mrf.mxu0 }
 0x217   : > { %v16415_v43 = vadd.f32 %v12680_v33, %v16303_v15  ;;  %v16417_v53 = vpop.f32.mrf.mxu1 }
 0x218   : > { %20292 = vst [vmem:[#allocation169_spill] sm:$0xff] %v16417_v53  ;;  %v16419_v20 = vpop.f32.mrf.mxu0 }
 0x219   : > { %20291 = vst [vmem:[#allocation168_spill] sm:$0xff] %v16415_v43  ;;  %v16421_v5 = vpop.f32.mrf.mxu1 }
 0x21a   : > { %20293 = vst [vmem:[#allocation170_spill] sm:$0xff] %v16421_v5  ;;  %v12683_v28 = vpop.f32.mrf.mxu0 }
 0x21b   : > { %v16424_v47 = vadd.f32 %v12683_v28, %v16310_v31  ;;  %v16426_v60 = vpop.f32.mrf.mxu1 }
 0x21c   : > { %20295 = vst [vmem:[#allocation172_spill] sm:$0xff] %v16426_v60  ;;  %v16428_v36 = vpop.f32.mrf.mxu0  ;;  %v20316_v60 = vld [vmem:[#allocation120_spill] sm:$0xff] }
 0x21d   : > { %20294 = vst [vmem:[#allocation171_spill] sm:$0xff] %v16424_v47  ;;  %20296 = vst [vmem:[#allocation173_spill] sm:$0xff] %v16428_v36  ;;  %v16430_v42 = vpop.f32.mrf.mxu1 }
 0x21e   : > { %20297 = vst [vmem:[#allocation174_spill] sm:$0xff] %v16430_v42  ;;  %v12686_v45 = vpop.f32.mrf.mxu0 }
 0x21f   : > { %v16433_v15 = vadd.f32 %v12686_v45, %v16317_v18  ;;  %v16435_v33 = vpop.f32.mrf.mxu1 }
 0x220   : > { %20299 = vst [vmem:[#allocation176_spill] sm:$0xff] %v16435_v33  ;;  %v16437_v43 = vpop.f32.mrf.mxu0 }
 0x221   : > { %20298 = vst [vmem:[#allocation175_spill] sm:$0xff] %v16433_v15  ;;  %20300 = vst [vmem:[#allocation177_spill] sm:$0xff] %v16437_v43  ;;  %v16439_v53 = vpop.f32.mrf.mxu1 }
 0x222   : > { %20301 = vst [vmem:[#allocation178_spill] sm:$0xff] %v16439_v53  ;;  %v12689_v5 = vpop.f32.mrf.mxu0 }
 0x223   : > { %v16442_v31 = vadd.f32 %v12689_v5, %v16324_v32  ;;  %v16444_v28 = vpop.f32.mrf.mxu1 }
 0x224   : > { %20303 = vst [vmem:[#allocation180_spill] sm:$0xff] %v16444_v28  ;;  %v16446_v47 = vpop.f32.mrf.mxu0  ;;  %v20312_v28 = vld [vmem:[#allocation118_spill] sm:$0xff] }
 0x225   : > { %20302 = vst [vmem:[#allocation179_spill] sm:$0xff] %v16442_v31  ;;  %20304 = vst [vmem:[#allocation181_spill] sm:$0xff] %v16446_v47  ;;  %v16448_v42 = vpop.f32.mrf.mxu1  ;;  %v20311_v47 = vld [vmem:[#allocation113_spill] sm:$0xff] }
 0x226   : > { %v12692_v36 = vpop.f32.mrf.mxu0  ;;  %20305 = vst [vmem:[#allocation182_spill] sm:$0xff] %v16448_v42  ;;  %v1606_v33 = vadd.f32 %v20312_v28, %v20311_v47  ;;  %v1656_v47 = vadd.f32 %v15990_v35, %v15939_v63  ;;  %v20318_v28 = vld [vmem:[#allocation106_spill] sm:$0xff]  ;;  %v2699_v63 = vadd.f32 %v16120_v14, %v16053_v49  ;;  %v20321_v14 = vld [vmem:[#allocation107_spill] sm:$0xff] }
 0x227   : > { %v16451_v18 = vadd.f32 %v12692_v36, %v16331_v56  ;;  %v16455_v43 = vpop.f32.mrf.mxu1  ;;  %v20313_v56 = vld [vmem:[#allocation115_spill] sm:$0xff]  ;;  %v20314_v36 = vld [vmem:[#allocation121_spill] sm:$0xff] }
 0x228   : > { %v16453_v45 = vpop.f32.mrf.mxu0  ;;  %20308 = vst [vmem:[#allocation185_spill] sm:$0xff] %v16455_v43 }
 0x229   : > { %20306 = vst [vmem:[#allocation183_spill] sm:$0xff] %v16451_v18  ;;  %20307 = vst [vmem:[#allocation184_spill] sm:$0xff] %v16453_v45  ;;  %v16462_v31 = vpop.f32.mrf.mxu1  ;;  %v1616_v18 = vadd.f32 %v20314_v36, %v20313_v56  ;;  %v20315_v45 = vld [vmem:[#allocation117_spill] sm:$0xff]  ;;  %v20328_v36 = vld [vmem:[#allocation116_spill] sm:$0xff] }
 0x22a   : > { %v12695_v15 = vpop.f32.mrf.mxu0  ;;  %v1626_v43 = vadd.f32 %v15926_v19, %v20315_v45  ;;  %v2691_v19 = vadd.f32 %v16055_v51, %v15970_v26 }
 0x22b   : > { %v16458_v53 = vadd.f32 %v12695_v15, %v16338_v50  ;;  %v1636_v50 = vadd.f32 %v15945_v12, %v20316_v60  ;;  %v20317_v15 = vld [vmem:[#allocation122_spill] sm:$0xff]  ;;  %v2693_v12 = vadd.f32 %v16069_v52, %v15993_v9  ;;  %v2697_v60 = vadd.f32 %v16103_v57, %v16036_v55 }
 0x22c   : > { %v16460_v32 = vpop.f32.mrf.mxu0  ;;  %v2255_v45 = vadd.f32 %v16140_v23, %v1616_v18  ;;  %v2257_v26 = vadd.f32 %v16155_v8, %v1626_v43  ;;  %v2701_v9 = vadd.f32 %v16134_v0, %v16073_v46  ;;  %v2703_v55 = vadd.f32 %v16149_v27, %v16090_v62  ;;  %v20324_v43 = vld [vmem:[#allocation129_spill] sm:$0xff]  ;;  %v20327_v18 = vld [vmem:[#allocation131_spill] sm:$0xff] }
 0x22d   : > { %20309 = vst [vmem:[#allocation186_spill] sm:$0xff] %v16458_v53  ;;  %20310 = vst [vmem:[#allocation187_spill] sm:$0xff] %v16460_v32  ;;  %v1646_v53 = vadd.f32 %v15967_v2, %v20317_v15  ;;  %v2695_v2 = vadd.f32 %v16086_v4, %v16015_v16  ;;  %v2259_v16 = vadd.f32 %v16177_v7, %v1636_v50 }
 0x22e   : > { %v12698_v5 = vpop.f32.mrf.mxu0  ;;  %v2705_v4 = vadd.f32 %v16164_v48, %v16109_v21  ;;  %v2711_v23 = vadd.f32 %v16203_v39, %v2257_v26  ;;  %v2263_v46 = vadd.f32 %v16206_v34, %v1656_v47  ;;  %v20323_v21 = vld [vmem:[#allocation126_spill] sm:$0xff]  ;;  %v20330_v47 = vld [vmem:[#allocation133_spill] sm:$0xff] }
 0x22f   : > { %v16467_v42 = vadd.f32 %v12698_v5, %v16345_v25  ;;  %v1666_v25 = vadd.f32 %v16012_v37, %v20318_v28  ;;  %v20319_v5 = vld [vmem:[#allocation108_spill] sm:$0xff]  ;;  %v16497_v37 = vpop.f32.mrf.mxu1  ;;  %v2261_v49 = vadd.f32 %v16190_v24, %v1646_v53  ;;  %v2713_v62 = vadd.f32 %v16218_v54, %v2259_v16  ;;  %v20322_v24 = vld [vmem:[#allocation119_spill] sm:$0xff]  ;;  %v20325_v39 = vld [vmem:[#allocation114_spill] sm:$0xff] }
 0x230   : > { %v16477_v32 = vpop.f32.mrf.mxu0  ;;  %v16485_v56 = vadd.f32 %v16033_v30, %v20319_v5  ;;  %v2253_v30 = vadd.f32 %v16123_v59, %v1606_v33  ;;  %v2709_v59 = vadd.f32 %v16192_v41, %v2255_v45  ;;  %v2961_v48 = vadd.f32 %v20323_v21, %v2693_v12  ;;  %v20326_v33 = vld [vmem:[#allocation125_spill] sm:$0xff]  ;;  %v20336_v16 = vld [vmem:[#allocation139_spill] sm:$0xff] }
 0x231   : > { %v2265_v0 = vadd.f32 %v16221_v44, %v1666_v25  ;;  %v2715_v7 = vadd.f32 %v16231_v61, %v2261_v49  ;;  %v16522_v27 = vpop.f32.mrf.mxu1  ;;  %v2963_v53 = vadd.f32 %v20324_v43, %v2695_v2  ;;  %v2717_v34 = vadd.f32 %v20325_v39, %v2263_v46  ;;  %v20329_v61 = vld [vmem:[#allocation128_spill] sm:$0xff]  ;;  %v20331_v25 = vld [vmem:[#allocation130_spill] sm:$0xff]  ;;  %v20335_v45 = vld [vmem:[#allocation137_spill] sm:$0xff] }
 0x232   : > { %20320 = vst [vmem:[#allocation113_spill] sm:$0xff] %v16485_v56  ;;  %v12701_v35 = vpop.f32.mrf.mxu0  ;;  %v2707_v57 = vadd.f32 %v20321_v14, %v2253_v30  ;;  %v2965_v54 = vadd.f32 %v20327_v18, %v2697_v60  ;;  %v3417_v50 = vadd.f32 %v20329_v61, %v20328_v36  ;;  %v2967_v28 = vadd.f32 %v20330_v47, %v2699_v63  ;;  %v20333_v2 = vld [vmem:[#allocation134_spill] sm:$0xff]  ;;  %v20337_v60 = vld [vmem:[#allocation136_spill] sm:$0xff]  ;;  %v20341_v43 = vld [vmem:[#allocation143_spill] sm:$0xff] }
 0x233   : > { %v16503_v52 = vadd.f32 %v12701_v35, %v16355_v13  ;;  %v2959_v13 = vadd.f32 %v20322_v24, %v2691_v19  ;;  %v2719_v44 = vadd.f32 %v20326_v33, %v2265_v0  ;;  %v20332_v19 = vld [vmem:[#allocation132_spill] sm:$0xff]  ;;  %v20334_v35 = vld [vmem:[#allocation135_spill] sm:$0xff]  ;;  %v2971_v26 = vadd.f32 %v20335_v45, %v2703_v55  ;;  %v16545_v46 = vpop.f32.mrf.mxu1  ;;  %v20339_v63 = vld [vmem:[#allocation138_spill] sm:$0xff] }
 0x234   : > { %v16511_v51 = vpop.f32.mrf.mxu0  ;;  %v3418_v12 = vadd.f32 %v20332_v19, %v2961_v48  ;;  %v2969_v30 = vadd.f32 %v20334_v35, %v2701_v9  ;;  %v2973_v49 = vadd.f32 %v20336_v16, %v2705_v4  ;;  %v3422_v14 = vadd.f32 %v20337_v60, %v2965_v54  ;;  %v20343_v39 = vld [vmem:[#allocation142_spill] sm:$0xff]  ;;  %v20344_v33 = vld [vmem:[#allocation144_spill] sm:$0xff]  ;;  %v20346_v36 = vld [vmem:[#allocation145_spill] sm:$0xff] }
 0x235   : > { %v3416_v5 = vadd.f32 %v20331_v25, %v2959_v13  ;;  %v3424_v21 = vadd.f32 %v20339_v63, %v2967_v28  ;;  %v3874_v13 = vadd.f32 %v16361_v1, %v3417_v50  ;;  %v2977_v9 = vadd.f32 %v20341_v43, %v2709_v59  ;;  %v20348_v50 = vld [vmem:[#allocation147_spill] sm:$0xff]  ;;  %v20349_v59 = vld [vmem:[#allocation149_spill] sm:$0xff]  ;;  %v20355_v60 = vld [vmem:[#allocation40_spill] sm:$0xff] }
 0x236   : > { %v12704_v8 = vpop.f32.mrf.mxu0  ;;  %v3428_v4 = vadd.f32 %v20343_v39, %v2971_v26  ;;  %v3430_v18 = vadd.f32 %v20344_v33, %v2973_v49  ;;  %v2979_v61 = vadd.f32 %v20346_v36, %v2711_v23  ;;  %v2981_v28 = vadd.f32 %v20348_v50, %v2713_v62  ;;  %v16573_v23 = vld [vmem:[#allocation2] ss:$0 sm:$0xff]  ;;  %v20351_v26 = vld [vmem:[#allocation152_spill] sm:$0xff]  ;;  %v20352_v49 = vld [vmem:[#allocation150_spill] sm:$0xff] }
 0x237   : > { %v16528_v41 = vadd.f32 %v12704_v8, %v16365_v22  ;;  %v3420_v22 = vadd.f32 %v20333_v2, %v2963_v53  ;;  %v20338_v8 = vld [vmem:[#allocation141_spill] sm:$0xff]  ;;  %v20342_v53 = vld [vmem:[#allocation140_spill] sm:$0xff]  ;;  %v3873_v1 = vadd.f32 %v16363_v40, %v3416_v5  ;;  %v2983_v25 = vadd.f32 %v20349_v59, %v2715_v7  ;;  %v20353_v5 = vld [vmem:[#allocation151_spill] sm:$0xff] }
 0x238   : > { %v16535_v15 = vpop.f32.mrf.mxu0  ;;  %v2975_v24 = vadd.f32 %v20338_v8, %v2707_v57  ;;  %v3426_v55 = vadd.f32 %v20342_v53, %v2969_v30  ;;  %v20347_v57 = vld [vmem:[#allocation146_spill] sm:$0xff]  ;;  %v2985_v19 = vadd.f32 %v16336_v10, %v2717_v34  ;;  %v20350_v2 = vld [vmem:[#allocation148_spill] sm:$0xff]  ;;  %v16571_v30 = vpop.f32.mrf.mxu1  ;;  %v2987_v16 = vadd.f32 %v20351_v26, %v2719_v44  ;;  %v20354_v10 = vld [vmem:[#allocation153_spill] sm:$0xff] }
 0x239   : > { %v16569_v35 = vadd.f32 %v20350_v2, %v2977_v9  ;;  %v16577_v40 = vadd.f32 %v20352_v49, %v2979_v61  ;;  %v16581_v7 = vadd.f32 %v20353_v5, %v2981_v28  ;;  %v16584_v34 = vadd.f32 %v20354_v10, %v2983_v25  ;;  %v20356_v63 = vld [vmem:[#allocation154_spill] sm:$0xff]  ;;  %v20359_v33 = vld [vmem:[#allocation160_spill] sm:$0xff]  ;;  %v20360_v61 = vld [vmem:[#allocation161_spill] sm:$0xff] }
 0x23a   : > { %v12707_v0 = vpop.f32.mrf.mxu0  ;;  %v16561_v47 = vadd.f32 %v20347_v57, %v2975_v24  ;;  %v3875_v8 = vadd.f32 %v16372_v6, %v3418_v12  ;;  %v16591_v44 = vadd.f32 %v20356_v63, %v2987_v16  ;;  %v20358_v53 = vld [vmem:[#allocation158_spill] sm:$0xff]  ;;  %v3879_v36 = vadd.f32 %v20359_v33, %v3422_v14  ;;  %v16603_v12 = vpop.f32.mrf.mxu1  ;;  %v20362_v50 = vld [vmem:[#allocation163_spill] sm:$0xff]  ;;  %v20370_v63 = vld [vmem:[#allocation165_spill] sm:$0xff] }
 0x23b   : > { %v16551_v48 = vadd.f32 %v12707_v0, %v16374_v17  ;;  %v4136_v17 = vadd.f32 %v16381_v3, %v3874_v13  ;;  %v4135_v3 = vadd.f32 %v16385_v38, %v3873_v1  ;;  %v16587_v0 = vadd.f32 %v20355_v60, %v2985_v19  ;;  %v20357_v13 = vld [vmem:[#allocation155_spill] sm:$0xff]  ;;  %v20361_v1 = vld [vmem:[#allocation157_spill] sm:$0xff]  ;;  %v20363_v19 = vld [vmem:[#allocation164_spill] sm:$0xff] }
 0x23c   : > { %v16557_v54 = vpop.f32.mrf.mxu0  ;;  %v4138_v43 = vadd.f32 %v16390_v29, %v20357_v13  ;;  %v3877_v39 = vadd.f32 %v20358_v53, %v3420_v22  ;;  %v4137_v57 = vadd.f32 %v20360_v61, %v3875_v8  ;;  %v4140_v6 = vadd.f32 %v16399_v11, %v20361_v1  ;;  %v20364_v2 = vld [vmem:[#allocation159_spill] sm:$0xff]  ;;  %v20367_v60 = vld [vmem:[#allocation162_spill] sm:$0xff]  ;;  %v20368_v8 = vld [vmem:[#allocation169_spill] sm:$0xff] }
 0x23d   : > { %20340 = vst [vmem:[#allocation118_spill] sm:$0xff] %v16551_v48  ;;  %20345 = vst [vmem:[#allocation115_spill] sm:$0xff] %v16557_v54  ;;  %v3881_v28 = vadd.f32 %v20362_v50, %v3424_v21  ;;  %v3883_v22 = vadd.f32 %v16410_v58, %v3426_v55  ;;  %v20366_v16 = vld [vmem:[#allocation167_spill] sm:$0xff]  ;;  %v3885_v10 = vadd.f32 %v16419_v20, %v3428_v4  ;;  %v20369_v55 = vld [vmem:[#allocation170_spill] sm:$0xff] }
 0x23e   : > { %v12762_v45 = vpop.f32.mrf.mxu0  ;;  %v4139_v14 = vadd.f32 %v20363_v19, %v3877_v39  ;;  %v4141_v11 = vadd.f32 %v20366_v16, %v3879_v36  ;;  %v4144_v58 = vadd.f32 %v20368_v8, %v20367_v60  ;;  %v20371_v13 = vld [vmem:[#allocation172_spill] sm:$0xff]  ;;  %v5751_v20 = vld [vmem:[#allocation5 + $0x58] sm:$0xff]  ;;  %v5750_v4 = vld [vmem:[#allocation5 + $0x50] sm:$0xff] }
 0x23f   : > { %v4590_v62 = vadd.f32 %v12762_v45, %v4136_v17  ;;  %v20365_v45 = vld [vmem:[#allocation166_spill] sm:$0xff]  ;;  %v20372_v61 = vld [vmem:[#allocation173_spill] sm:$0xff]  ;;  %v20374_v50 = vld [vmem:[#allocation168_spill] sm:$0xff]  ;;  %12920 = vmatprep.subr.mxu1 %v5751_v20 }
 0x240   : > { %v4430_v24 = vpop.f32.mrf.mxu0  ;;  %v4142_v26 = vadd.f32 %v20365_v45, %v20364_v2  ;;  %v20373_v1 = vld [vmem:[#allocation174_spill] sm:$0xff]  ;;  %12921 = vmatpush3.msra.mxu1 %v5751_v20  ;;  %v20383_v20 = vld [vmem:[#allocation185_spill] sm:$0xff] }
 0x241   : > { %v16596_v38 = vadd.f32 %v16573_v23, %v4590_v62  ;;  %v4589_v9 = vadd.f32 %v4430_v24, %v4135_v3  ;;  %v16623_v24 = vadd.f32 %v20369_v55, %v3881_v28  ;;  %v20375_v28 = vld [vmem:[#allocation176_spill] sm:$0xff]  ;;  %12922 = vmatprep.subr.mxu1 %v5750_v4 }
 0x242   : > { %v12765_v17 = vpop.f32.mrf.mxu0  ;;  %12923 = vmatpush3.msra.mxu1 %v5750_v4  ;;  %v20384_v4 = vld [vmem:[#allocation184_spill] sm:$0xff] }
 0x243   : > { %v4661_v29 = vmin.f32 %v16596_v38, 20.0  ;;  %v16608_v59 = vadd.f32 %v16573_v23, %v4589_v9  ;;  %v4592_v25 = vadd.f32 %v12765_v17, %v4138_v43  ;;  %v16627_v43 = vadd.f32 %v20371_v13, %v20370_v63  ;;  %v16629_v9 = vpop.f32.mrf.mxu1 }
 0x244   : > { %v4440_v49 = vpop.f32.mrf.mxu0  ;;  %v16637_v17 = vadd.f32 %v20373_v1, %v3883_v22  ;;  %v20378_v22 = vld [vmem:[#allocation171_spill] sm:$0xff] }
 0x245   : > { %v4694_v3 = vmul.f32 1.442695, %v4661_v29  ;;  %v4660_v62 = vmin.f32 %v16608_v59, 20.0  ;;  %v16617_v21 = vadd.f32 %v16573_v23, %v4592_v25  ;;  %v4591_v5 = vadd.f32 %v4440_v49, %v4137_v57  ;;  %v20376_v49 = vld [vmem:[#allocation177_spill] sm:$0xff]  ;;  %v16653_v8 = vpop.f32.mrf.mxu1 }
 0x246   : > { %v12768_v53 = vpop.f32.mrf.mxu0  ;;  %v3887_v57 = vadd.f32 %v20372_v61, %v3430_v18  ;;  %v16641_v29 = vadd.f32 %v20375_v28, %v20374_v50  ;;  %v20377_v18 = vld [vmem:[#allocation178_spill] sm:$0xff] }
 0x247   : > { %13744 = vpow2.f32 %v4694_v3  ;;  %v4692_v39 = vmul.f32 1.442695, %v4660_v62  ;;  %v4663_v33 = vmin.f32 %v16617_v21, 20.0  ;;  %v16633_v36 = vadd.f32 %v16573_v23, %v4591_v5  ;;  %v20379_v5 = vld [vmem:[#allocation180_spill] sm:$0xff] }
 0x248   : > { %v4594_v25 = vadd.f32 %v12768_v53, %v4140_v6  ;;  %v4450_v19 = vpop.f32.mrf.mxu0  ;;  %v3889_v3 = vadd.f32 %v20376_v49, %v16561_v47  ;;  %v16647_v62 = vadd.f32 %v20377_v18, %v3885_v10  ;;  %v16651_v60 = vadd.f32 %v20379_v5, %v20378_v22  ;;  %v20380_v10 = vld [vmem:[#allocation181_spill] sm:$0xff]  ;;  %v20381_v53 = vld [vmem:[#allocation182_spill] sm:$0xff] }
 0x249   : > { %13746 = vpow2.f32 %v4692_v39  ;;  %v4698_v2 = vmul.f32 1.442695, %v4663_v33  ;;  %v4662_v45 = vmin.f32 %v16633_v36, 20.0  ;;  %v4593_v16 = vadd.f32 %v4450_v19, %v4139_v14  ;;  %v20382_v33 = vld [vmem:[#allocation175_spill] sm:$0xff] }
 0x24a   : > { %v16656_v6 = vadd.f32 %v16573_v23, %v4594_v25  ;;  %v12771_v55 = vpop.f32.mrf.mxu0  ;;  %v3891_v13 = vadd.f32 %v20380_v10, %v16569_v35  ;;  %v16664_v39 = vadd.f32 %v20381_v53, %v3887_v57  ;;  %v16668_v61 = vadd.f32 %v20383_v20, %v20382_v33  ;;  %v20385_v19 = vld [vmem:[#allocation179_spill] sm:$0xff] }
 0x24b   : > { %13748 = vpow2.f32 %v4698_v2  ;;  %v4696_v14 = vmul.f32 1.442695, %v4662_v45  ;;  %v16659_v63 = vadd.f32 %v16573_v23, %v4593_v16  ;;  %v4596_v47 = vadd.f32 %v12771_v55, %v4142_v26  ;;  %v4096_v45 = vpop.f32.mrf.mxu1  ;;  %v5749_v55 = vld [vmem:[#allocation5 + $0x48] sm:$0xff] }
 0x24c   : > { %v4665_v1 = vmin.f32 %v16656_v6, 20.0  ;;  %v4460_v50 = vpop.f32.mrf.mxu0  ;;  %v3893_v35 = vadd.f32 %v20384_v4, %v16577_v40  ;;  %v16678_v57 = vadd.f32 %v16462_v31, %v3889_v3  ;;  %v16682_v2 = vadd.f32 %v16497_v37, %v20385_v19  ;;  %v20386_v40 = vld [vmem:[#allocation187_spill] sm:$0xff]  ;;  %12924 = vmatprep.subr.mxu1 %v5749_v55 }
 0x24d   : > { %13750 = vpow2.f32 %v4696_v14  ;;  %v4664_v28 = vmin.f32 %v16659_v63, 20.0  ;;  %v16673_v25 = vadd.f32 %v16573_v23, %v4596_v47  ;;  %v4595_v26 = vadd.f32 %v4460_v50, %v4141_v11  ;;  %v20387_v3 = vld [vmem:[#allocation183_spill] sm:$0xff]  ;;  %12925 = vmatpush3.msra.mxu1 %v5749_v55  ;;  %v12751_v33 = vpop.f32.mrf.mxu1 }
 0x24e   : > { %v4702_v16 = vmul.f32 1.442695, %v4665_v1  ;;  %v12774_v49 = vpop.f32.mrf.mxu0  ;;  %v3895_v14 = vadd.f32 %v20386_v40, %v16581_v7  ;;  %v16691_v31 = vadd.f32 %v16522_v27, %v3891_v13  ;;  %v16695_v37 = vadd.f32 %v16545_v46, %v20387_v3  ;;  %v20388_v13 = vld [vmem:[#allocation186_spill] sm:$0xff]  ;;  %v6200_v40 = vld [vmem:[#allocation5 + $0x68] sm:$0xff] }
 0x24f   : > { %v4700_v18 = vmul.f32 1.442695, %v4664_v28  ;;  %v4667_v22 = vmin.f32 %v16673_v25, 20.0  ;;  %v16686_v5 = vadd.f32 %v16573_v23, %v4595_v26  ;;  %v4598_v11 = vadd.f32 %v12774_v49, %v4144_v58  ;;  %v6202_v50 = vld [vmem:[#allocation5 + $0x78] sm:$0xff]  ;;  %v5748_v28 = vld [vmem:[#allocation5 + $0x40] sm:$0xff]  ;;  %v6201_v26 = vld [vmem:[#allocation5 + $0x70] sm:$0xff] }
 0x250   : > { %13752 = vpow2.f32 %v4702_v16  ;;  %v4470_v47 = vpop.f32.mrf.mxu0  ;;  %v3897_v7 = vadd.f32 %v16477_v32, %v16584_v34  ;;  %v16704_v27 = vadd.f32 %v16571_v30, %v3893_v35  ;;  %v16708_v46 = vadd.f32 %v16603_v12, %v20388_v13  ;;  %12976 = vmatprep.subr.mxu0 %v6202_v50  ;;  %12926 = vmatprep.subr.mxu1 %v5748_v28 }
 0x251   : > { %13754 = vpow2.f32 %v4700_v18  ;;  %v4706_v10 = vmul.f32 1.442695, %v4667_v22  ;;  %v4666_v53 = vmin.f32 %v16686_v5, 20.0  ;;  %v16699_v58 = vadd.f32 %v16573_v23, %v4598_v11  ;;  %12977 = vmatpush3.msra.mxu0 %v6202_v50  ;;  %12927 = vmatpush3.msra.mxu1 %v5748_v28 }
 0x252   : > { %v4597_v20 = vadd.f32 %v4470_v47, %v16623_v24  ;;  %v12777_v1 = vpop.f32.mrf.mxu0  ;;  %v3899_v34 = vadd.f32 %v16511_v51, %v16587_v0  ;;  %v16716_v12 = vadd.f32 %v16629_v9, %v3895_v14  ;;  %12978 = vmatprep.subr.mxu0 %v6201_v26  ;;  %v16726_v51 = vadd.f32 %v16535_v15, %v16591_v44  ;;  %v4106_v9 = vpop.f32.mrf.mxu1  ;;  %v6199_v15 = vld [vmem:[#allocation5 + $0x60] sm:$0xff] }
 0x253   : > { %13756 = vpow2.f32 %v4706_v10  ;;  %v4704_v4 = vmul.f32 1.442695, %v4666_v53  ;;  %v4669_v19 = vmin.f32 %v16699_v58, 20.0  ;;  %v4600_v32 = vadd.f32 %v12777_v1, %v16627_v43  ;;  %12979 = vmatpush3.msra.mxu0 %v6201_v26 }
 0x254   : > { %v13745_v30 = vpop.eup %13744  ;;  %v16719_v24 = vadd.f32 %v16573_v23, %v4597_v20  ;;  %v4480_v35 = vpop.f32.mrf.mxu0  ;;  %v16730_v0 = vadd.f32 %v16653_v8, %v16467_v42  ;;  %12980 = vmatprep.subr.mxu0 %v6200_v40  ;;  %v16735_v10 = vadd.f32 %v4096_v45, %v3897_v7  ;;  %v16742_v1 = vadd.f32 %v12751_v33, %v16503_v52 }
 0x255   : > { %v4757_v16 = vadd.f32 1.0, %v13745_v30  ;;  %13758 = vpow2.f32 %v4704_v4  ;;  %v4710_v49 = vmul.f32 1.442695, %v4669_v19  ;;  %v16722_v43 = vadd.f32 %v16573_v23, %v4600_v32  ;;  %12981 = vmatpush3.msra.mxu0 %v6200_v40  ;;  %v12754_v26 = vpop.f32.mrf.mxu1 }
 0x256   : > { %v13747_v18 = vpop.eup %13746  ;;  %v4668_v22 = vmin.f32 %v16719_v24, 20.0  ;;  %v4599_v11 = vadd.f32 %v4480_v35, %v16637_v17  ;;  %v12780_v55 = vpop.f32.mrf.mxu0  ;;  %12982 = vmatprep.subr.mxu0 %v6199_v15  ;;  %v16748_v30 = vadd.f32 %v4106_v9, %v3899_v34 }
 0x257   : > { %v4789_v14 = vmul.f32 %v4757_v16, %v4757_v16  ;;  %v4756_v3 = vadd.f32 1.0, %v13747_v18  ;;  %13760 = vpow2.f32 %v4710_v49  ;;  %v4671_v47 = vmin.f32 %v16722_v43, 20.0  ;;  %12983 = vmatpush3.msra.mxu0 %v6199_v15 }
 0x258   : > { %v13749_v44 = vpop.eup %13748  ;;  %v4708_v42 = vmul.f32 1.442695, %v4668_v22  ;;  %v16738_v8 = vadd.f32 %v16573_v23, %v4599_v11  ;;  %v4602_v53 = vadd.f32 %v12780_v55, %v16641_v29  ;;  %v4490_v17 = vpop.f32.mrf.mxu0  ;;  %v16752_v22 = vadd.f32 %v12754_v26, %v16528_v41 }
 0x259   : > { %v4853_v13 = vadd.f32 1.0, %v4789_v14  ;;  %v4788_v20 = vmul.f32 %v4756_v3, %v4756_v3  ;;  %v4759_v50 = vadd.f32 1.0, %v13749_v44  ;;  %v4714_v45 = vmul.f32 1.442695, %v4671_v47 }
 0x25a   : > { %v13751_v28 = vpop.eup %13750  ;;  %13762 = vpow2.f32 %v4708_v42  ;;  %v4670_v7 = vmin.f32 %v16738_v8, 20.0  ;;  %v16746_v4 = vadd.f32 %v16573_v23, %v4602_v53  ;;  %v12783_v19 = vpop.f32.mrf.mxu0  ;;  %v4601_v11 = vadd.f32 %v4490_v17, %v16647_v62 }
 0x25b   : > { %13764 = vrcp.f32 %v4853_v13  ;;  %v4852_v29 = vadd.f32 1.0, %v4788_v20  ;;  %v4791_v32 = vmul.f32 %v4759_v50, %v4759_v50  ;;  %v4758_v52 = vadd.f32 1.0, %v13751_v28 }
 0x25c   : > { %13766 = vpow2.f32 %v4714_v45  ;;  %v4712_v33 = vmul.f32 1.442695, %v4670_v7  ;;  %v4673_v35 = vmin.f32 %v16746_v4, 20.0  ;;  %v4500_v16 = vpop.f32.mrf.mxu0  ;;  %v16756_v15 = vadd.f32 %v16573_v23, %v4601_v11 }
 0x25d   : > { %v13753_v49 = vpop.eup %13752  ;;  %13768 = vrcp.f32 %v4852_v29  ;;  %v4855_v18 = vadd.f32 1.0, %v4791_v32  ;;  %v4790_v40 = vmul.f32 %v4758_v52, %v4758_v52  ;;  %v4604_v44 = vadd.f32 %v12783_v19, %v16651_v60 }
 0x25e   : > { %v13755_v55 = vpop.eup %13754  ;;  %v4761_v3 = vadd.f32 1.0, %v13753_v49  ;;  %13770 = vpow2.f32 %v4712_v33  ;;  %v4718_v34 = vmul.f32 1.442695, %v4673_v35  ;;  %v12786_v9 = vpop.f32.mrf.mxu0  ;;  %v11016_v53 = vadd.f32 -1.0, %v4789_v14 }
 0x25f   : > { %13772 = vrcp.f32 %v4855_v18  ;;  %v4760_v47 = vadd.f32 1.0, %v13755_v55  ;;  %v4854_v13 = vadd.f32 1.0, %v4790_v40  ;;  %v4672_v28 = vmin.f32 %v16756_v15, 20.0 }
 0x260   : > { %v13757_v42 = vpop.eup %13756  ;;  %v4793_v41 = vmul.f32 %v4761_v3, %v4761_v3  ;;  %13774 = vpow2.f32 %v4718_v34  ;;  %v4510_v50 = vpop.f32.mrf.mxu0  ;;  %v16761_v26 = vadd.f32 %v16573_v23, %v4604_v44  ;;  %v11015_v7 = vadd.f32 -1.0, %v4788_v20 }
 0x261   : > { %v4792_v62 = vmul.f32 %v4760_v47, %v4760_v47  ;;  %v4763_v17 = vadd.f32 1.0, %v13757_v42  ;;  %13776 = vrcp.f32 %v4854_v13  ;;  %v4603_v52 = vadd.f32 %v4500_v16, %v16664_v39 }
 0x262   : > { %v13759_v45 = vpop.eup %13758  ;;  %v4857_v29 = vadd.f32 1.0, %v4793_v41  ;;  %v16764_v60 = vpop.f32.mrf.mxu0  ;;  %v11018_v14 = vadd.f32 -1.0, %v4791_v32  ;;  %v4716_v18 = vmul.f32 1.442695, %v4672_v28  ;;  %v4675_v11 = vmin.f32 %v16761_v26, 20.0 }
 0x263   : > { %v4856_v19 = vadd.f32 1.0, %v4792_v62  ;;  %v4795_v33 = vmul.f32 %v4763_v17, %v4763_v17  ;;  %v4762_v35 = vadd.f32 1.0, %v13759_v45  ;;  %v16768_v55 = vadd.f32 %v16573_v23, %v4603_v52 }
 0x264   : > { %v13761_v49 = vpop.eup %13760  ;;  %13778 = vrcp.f32 %v4857_v29  ;;  %v16770_v3 = vpop.f32.mrf.mxu0  ;;  %v11017_v20 = vadd.f32 -1.0, %v4790_v40  ;;  %v4722_v32 = vmul.f32 1.442695, %v4675_v11  ;;  %v11020_v13 = vadd.f32 -1.0, %v4793_v41 }
 0x265   : > { %13780 = vrcp.f32 %v4856_v19  ;;  %v4859_v34 = vadd.f32 1.0, %v4795_v33  ;;  %v4794_v39 = vmul.f32 %v4762_v35, %v4762_v35  ;;  %v4765_v16 = vadd.f32 1.0, %v13761_v49 }
 0x266   : > { %13782 = vpow2.f32 %v4716_v18  ;;  %v4674_v47 = vmin.f32 %v16768_v55, 20.0  ;;  %v16773_v44 = vpop.f32.mrf.mxu0  ;;  %v4606_v28 = vadd.f32 %v12786_v9, %v16668_v61  ;;  %v11019_v49 = vadd.f32 -1.0, %v4792_v62 }
 0x267   : > { %v13763_v42 = vpop.eup %13762  ;;  %13784 = vrcp.f32 %v4859_v34  ;;  %v4858_v17 = vadd.f32 1.0, %v4794_v39  ;;  %v4797_v29 = vmul.f32 %v4765_v16, %v4765_v16  ;;  %v11022_v48 = vadd.f32 -1.0, %v4795_v33 }
 0x268   : > { %v13765_v45 = vpop.eup %13764  ;;  %v4764_v52 = vadd.f32 1.0, %v13763_v42  ;;  %13786 = vpow2.f32 %v4722_v32  ;;  %v4720_v40 = vmul.f32 1.442695, %v4674_v47  ;;  %v16777_v18 = vadd.f32 %v16573_v23, %v4606_v28  ;;  %v16779_v56 = vpop.f32.mrf.mxu0 }
 0x269   : > { %v13767_v19 = vpop.eup %13766  ;;  %v4887_v35 = vmul.f32 %v13765_v45, %v11016_v53  ;;  %13788 = vrcp.f32 %v4858_v17  ;;  %v4861_v54 = vadd.f32 1.0, %v4797_v29  ;;  %v4605_v32 = vadd.f32 %v4510_v50, %v16678_v57 }
 0x26a   : > { %v13769_v11 = vpop.eup %13768  ;;  %v4796_v41 = vmul.f32 %v4764_v52, %v4764_v52  ;;  %v4767_v34 = vadd.f32 1.0, %v13767_v19  ;;  %13790 = vpow2.f32 %v4720_v40  ;;  %v4677_v16 = vmin.f32 %v16777_v18, 20.0 }
 0x26b   : > { %v13771_v61 = vpop.eup %13770  ;;  %v4885_v9 = vmul.f32 %v13769_v11, %v11015_v7  ;;  %v11021_v62 = vadd.f32 -1.0, %v4794_v39  ;;  %13792 = vrcp.f32 %v4861_v54  ;;  %v16784_v33 = vmul.f32 %v4887_v35, %v16596_v38  ;;  %v16789_v11 = vpop.f32.mrf.mxu0 }
 0x26c   : > { %v13773_v53 = vpop.eup %13772  ;;  %v4860_v47 = vadd.f32 1.0, %v4796_v41  ;;  %v4799_v42 = vmul.f32 %v4767_v34, %v4767_v34  ;;  %v4766_v45 = vadd.f32 1.0, %v13771_v61  ;;  %v4726_v52 = vmul.f32 1.442695, %v4677_v16 }
 0x26d   : > { %v13775_v17 = vpop.eup %13774  ;;  %v16787_v28 = vmul.f32 %v4885_v9, %v16608_v59  ;;  %v4891_v7 = vmul.f32 %v13773_v53, %v11018_v14  ;;  %v16791_v50 = vadd.f32 -1.0, %v4797_v29  ;;  %v16794_v39 = vadd.f32 %v16573_v23, %v4605_v32  ;;  %v16816_v53 = vpop.f32.mrf.mxu0 }
 0x26e   : > { %13794 = vrcp.f32 %v4860_v47  ;;  %v4863_v40 = vadd.f32 1.0, %v4799_v42  ;;  %v4769_v19 = vadd.f32 1.0, %v13775_v17  ;;  %v13777_v57 = vpop.eup %13776  ;;  %v4798_v54 = vmul.f32 %v4766_v45, %v4766_v45 }
 0x26f   : > { %13796 = vpow2.f32 %v4726_v52  ;;  %12819 = vmatprep.mubr.msk.f32.mxu1 %vm5019_vm0, %v16787_v28  ;;  %v4889_v38 = vmul.f32 %v13777_v57, %v11017_v20  ;;  %v4608_v14 = vadd.f32 %v16764_v60, %v16682_v2  ;;  %v16804_v35 = vadd.f32 -1.0, %v4796_v41 }
 0x270   : > { %13798 = vrcp.f32 %v4863_v40  ;;  %v16798_v59 = vmul.f32 %v4769_v19, %v4769_v19  ;;  %12820 = vmatmul.mubr.msk.f32.gmra.mxu1 %vm5019_vm0, %v16784_v33  ;;  %v4862_v34 = vadd.f32 1.0, %v4798_v54  ;;  %v4676_v61 = vmin.f32 %v16794_v39, 20.0 }
 0x271   : > { %v13779_v29 = vpop.eup %13778  ;;  %v4607_v9 = vadd.f32 %v16770_v3, %v16691_v31  ;;  %v16810_v20 = vmul.f32 %v4891_v7, %v16617_v21  ;;  %v16813_v32 = vmul.f32 %v4889_v38, %v16633_v36  ;;  %v16819_v45 = vadd.f32 %v16573_v23, %v4608_v14  ;;  %v16821_v31 = vld [vmem:[#allocation5 + $0x98] sm:$0xff] }
 0x272   : > { %v13781_v16 = vpop.eup %13780  ;;  %v4895_v2 = vmul.f32 %v13779_v29, %v11020_v13  ;;  %v4865_v60 = vadd.f32 1.0, %v16798_v59  ;;  %13800 = vrcp.f32 %v4862_v34  ;;  %v4724_v17 = vmul.f32 1.442695, %v4676_v61  ;;  %13032 = vmatprep.subr.mxu1 %v16821_v31  ;;  %v12798_v29 = vpop.f32.mrf.mxu0 }
 0x273   : > { %v13783_v41 = vpop.eup %13782  ;;  %v4893_v47 = vmul.f32 %v13781_v16, %v11019_v49  ;;  %v16823_v21 = vadd.f32 -1.0, %v4799_v42  ;;  %v16826_v13 = vadd.f32 %v16573_v23, %v4607_v9  ;;  %12822 = vmatprep.mubr.msk.f32.mxu1 %vm5019_vm0, %v16813_v32  ;;  %v4679_v40 = vmin.f32 %v16819_v45, 20.0 }
 0x274   : > { %v13785_v3 = vpop.eup %13784  ;;  %13802 = vrcp.f32 %v4865_v60  ;;  %v4768_v36 = vadd.f32 1.0, %v13783_v41  ;;  %12823 = vmatmul.mubr.msk.f32.gmra.mxu1 %vm5019_vm0, %v16810_v20  ;;  %v4610_v14 = vadd.f32 %v16773_v44, %v16695_v37  ;;  %v16841_v34 = vmul.f32 %v4895_v2, %v16656_v6 }
 0x275   : > { %v13787_v49 = vpop.eup %13786  ;;  %v16832_v52 = vmul.f32 %v4893_v47, %v16659_v63  ;;  %v4899_v7 = vmul.f32 %v13785_v3, %v11022_v48  ;;  %13804 = vpow2.f32 %v4724_v17  ;;  %v4678_v38 = vmin.f32 %v16826_v13, 20.0 }
 0x276   : > { %v13789_v42 = vpop.eup %13788  ;;  %v4800_v19 = vmul.f32 %v4768_v36, %v4768_v36  ;;  %v4771_v57 = vadd.f32 1.0, %v13787_v49  ;;  %v4730_v48 = vmul.f32 1.442695, %v4679_v40  ;;  %v4609_v61 = vadd.f32 %v16779_v56, %v16704_v27 }
 0x277   : > { %v4897_v63 = vmul.f32 %v13789_v42, %v11021_v62  ;;  %12825 = vmatprep.mubr.msk.f32.mxu1 %vm5019_vm0, %v16832_v52  ;;  %v13791_v9 = vpop.eup %13790  ;;  %v11025_v16 = vadd.f32 -1.0, %v4798_v54  ;;  %v4728_v47 = vmul.f32 1.442695, %v4678_v38  ;;  %v16851_v6 = vadd.f32 %v16573_v23, %v4610_v14  ;;  %v4550_v54 = vpop.f32.mrf.mxu0 }
 0x278   : > { %v4864_v60 = vadd.f32 1.0, %v4800_v19  ;;  %v4803_v41 = vmul.f32 %v4771_v57, %v4771_v57  ;;  %v13793_v17 = vpop.eup %13792  ;;  %v4770_v44 = vadd.f32 1.0, %v13791_v9  ;;  %13806 = vpow2.f32 %v4730_v48  ;;  %12826 = vmatmul.mubr.msk.f32.gmra.mxu1 %vm5019_vm0, %v16841_v34 }
 0x279   : > { %v16848_v37 = vmul.f32 %v4897_v63, %v16686_v5  ;;  %v16856_v56 = vmul.f32 %v4899_v7, %v16673_v25  ;;  %v4903_v27 = vmul.f32 %v13793_v17, %v16791_v50  ;;  %v4681_v5 = vmin.f32 %v16851_v6, 20.0 }
 0x27a   : > { %13808 = vrcp.f32 %v4864_v60  ;;  %v4867_v62 = vadd.f32 1.0, %v4803_v41  ;;  %v4802_v3 = vmul.f32 %v4770_v44, %v4770_v44  ;;  %v16861_v36 = vadd.f32 %v16573_v23, %v4609_v61 }
 0x27b   : > { %v13795_v2 = vpop.eup %13794  ;;  %13810 = vpow2.f32 %v4728_v47  ;;  %12828 = vmatprep.mubr.msk.f32.mxu1 %vm5019_vm0, %v16848_v37  ;;  %v11028_v7 = vadd.f32 -1.0, %v16798_v59  ;;  %v4612_v50 = vadd.f32 %v16789_v11, %v16708_v46  ;;  %v11027_v42 = vadd.f32 -1.0, %v4800_v19  ;;  %v12801_v46 = vpop.f32.mrf.mxu0 }
 0x27c   : > { %v13797_v49 = vpop.eup %13796  ;;  %v4901_v25 = vmul.f32 %v13795_v2, %v16804_v35  ;;  %13812 = vrcp.f32 %v4867_v62  ;;  %v4866_v57 = vadd.f32 1.0, %v4802_v3  ;;  %v4734_v14 = vmul.f32 1.442695, %v4681_v5  ;;  %12829 = vmatmul.mubr.msk.f32.gmra.mxu1 %vm5019_vm0, %v16856_v56 }
 0x27d   : > { %v13799_v40 = vpop.eup %13798  ;;  %v4773_v38 = vadd.f32 1.0, %v13797_v49  ;;  %v16872_v63 = vmul.f32 %v4903_v27, %v16699_v58  ;;  %v4680_v59 = vmin.f32 %v16861_v36, 20.0  ;;  %v16879_v35 = vadd.f32 %v16573_v23, %v4612_v50 }
 0x27e   : > { %v16875_v48 = vmul.f32 %v4901_v25, %v16719_v24  ;;  %13814 = vrcp.f32 %v4866_v57  ;;  %v4611_v19 = vadd.f32 %v16816_v53, %v16716_v12  ;;  %v4614_v61 = vadd.f32 %v12798_v29, %v16730_v0  ;;  %v4560_v29 = vpop.f32.mrf.mxu0 }
 0x27f   : > { %v16881_v11 = vmul.f32 %v4773_v38, %v4773_v38  ;;  %v13801_v9 = vpop.eup %13800  ;;  %v4907_v58 = vmul.f32 %v13799_v40, %v16823_v21  ;;  %13816 = vpow2.f32 %v4734_v14  ;;  %v4732_v24 = vmul.f32 1.442695, %v4680_v59 }
 0x280   : > { %v4683_v60 = vmin.f32 %v16879_v35, 20.0  ;;  %12831 = vmatprep.mubr.msk.f32.mxu1 %vm5019_vm0, %v16875_v48  ;;  %v4905_v17 = vmul.f32 %v13801_v9, %v11025_v16  ;;  %v11030_v44 = vadd.f32 -1.0, %v4803_v41  ;;  %v16892_v62 = vadd.f32 %v16573_v23, %v4611_v19 }
 0x281   : > { %v13803_v47 = vpop.eup %13802  ;;  %v4869_v27 = vadd.f32 1.0, %v16881_v11  ;;  %12832 = vmatmul.mubr.msk.f32.gmra.mxu1 %vm5019_vm0, %v16872_v63  ;;  %13818 = vpow2.f32 %v4732_v24  ;;  %v16897_v21 = vadd.f32 %v16573_v23, %v4614_v61  ;;  %v11029_v16 = vadd.f32 -1.0, %v4802_v3 }
 0x282   : > { %v13805_v12 = vpop.eup %13804  ;;  %v4911_v0 = vmul.f32 %v13803_v47, %v11028_v7  ;;  %v4738_v53 = vmul.f32 1.442695, %v4683_v60  ;;  %v16900_v2 = vmul.f32 %v4905_v17, %v16738_v8  ;;  %v4682_v5 = vmin.f32 %v16892_v62, 20.0  ;;  %v12804_v17 = vpop.f32.mrf.mxu0 }
 0x283   : > { %v4772_v41 = vadd.f32 1.0, %v13805_v12  ;;  %v16904_v49 = vmul.f32 %v4907_v58, %v16722_v43  ;;  %v4685_v25 = vmin.f32 %v16897_v21, 20.0  ;;  %v4613_v7 = vadd.f32 %v4550_v54, %v16735_v10  ;;  %v4116_v58 = vpop.f32.mrf.mxu1 }
 0x284   : > { %13820 = vpow2.f32 %v4738_v53  ;;  %v4736_v40 = vmul.f32 1.442695, %v4682_v5  ;;  %v4616_v57 = vadd.f32 %v12801_v46, %v16742_v1  ;;  %v4615_v8 = vadd.f32 %v4560_v29, %v16748_v30  ;;  %12834 = vmatprep.mubr.msk.f32.mxu1 %vm5019_vm0, %v16900_v2  ;;  %v20389_v30 = vld [vmem:[#allocation35_spill] sm:$0xff]  ;;  %v20390_v5 = vld [vmem:[#allocation36_spill] sm:$0xff] }
 0x285   : > { %v16908_v50 = vmul.f32 %v4772_v41, %v4772_v41  ;;  %v13807_v3 = vpop.eup %13806  ;;  %v16915_v38 = vmul.f32 %v4911_v0, %v16746_v4  ;;  %13822 = vrcp.f32 %v4869_v27  ;;  %v4742_v43 = vmul.f32 1.442695, %v4685_v25  ;;  %12835 = vmatmul.mubr.msk.f32.gmra.mxu1 %vm5019_vm0, %v16904_v49 }
 0x286   : > { %v16918_v14 = vadd.f32 %v16573_v23, %v4613_v7  ;;  %v4775_v54 = vadd.f32 1.0, %v13807_v3  ;;  %13824 = vpow2.f32 %v4736_v40  ;;  %v4980_v59 = vmul.f32 %v16787_v28, %v20389_v30 }
 0x287   : > { %v13809_v10 = vpop.eup %13808  ;;  %v4868_v1 = vadd.f32 1.0, %v16908_v50  ;;  %13826 = vpow2.f32 %v4742_v43  ;;  %v16927_v61 = vadd.f32 %v16573_v23, %v4616_v57  ;;  %v16932_v47 = vadd.f32 %v16573_v23, %v4615_v8 }
 0x288   : > { %v13811_v46 = vpop.eup %13810  ;;  %v4909_v19 = vmul.f32 %v13809_v10, %v11027_v42  ;;  %v4684_v4 = vmin.f32 %v16918_v14, 20.0  ;;  %v16929_v24 = vmul.f32 %v4775_v54, %v4775_v54  ;;  %v4981_v25 = vmul.f32 %v16784_v33, %v20390_v5  ;;  %v4570_v10 = vpop.f32.mrf.mxu0  ;;  %v20391_v54 = vld [vmem:[#allocation39_spill] sm:$0xff] }
 0x289   : > { %v13813_v9 = vpop.eup %13812  ;;  %13828 = vrcp.f32 %v4868_v1  ;;  %v4774_v60 = vadd.f32 1.0, %v13811_v46  ;;  %v4687_v0 = vmin.f32 %v16927_v61, 20.0  ;;  %v4686_v41 = vmin.f32 %v16932_v47, 20.0 }
 0x28a   : > { %v16935_v27 = vmul.f32 %v4909_v19, %v16756_v15  ;;  %v4915_v42 = vmul.f32 %v13813_v9, %v11030_v44  ;;  %v4740_v12 = vmul.f32 1.442695, %v4684_v4  ;;  %v4871_v53 = vadd.f32 1.0, %v16929_v24 }
 0x28b   : > { %v16939_v29 = vmul.f32 %v4774_v60, %v4774_v60  ;;  %v13815_v7 = vpop.eup %13814  ;;  %v4163_v40 = vadd.f32 %v4116_v58, %v16726_v51  ;;  %v4746_v57 = vmul.f32 1.442695, %v4687_v0  ;;  %v5367_v15 = vrot.slane %v4980_v59, 7  ;;  %v20392_v0 = vld [vmem:[#allocation37_spill] sm:$0xff] }
 0x28c   : > { %13830 = vpow2.f32 %v4740_v12  ;;  %12837 = vmatprep.mubr.msk.f32.mxu1 %vm5019_vm0, %v16935_v27  ;;  %v13817_v44 = vpop.eup %13816  ;;  %v16948_v8 = vmul.f32 %v4915_v42, %v16761_v26  ;;  %v4913_v3 = vmul.f32 %v13815_v7, %v11029_v16  ;;  %v4744_v51 = vmul.f32 1.442695, %v4686_v41  ;;  %v20394_v41 = vld [vmem:[#allocation112_spill] sm:$0xff] }
 0x28d   : > { %13832 = vrcp.f32 %v4871_v53  ;;  %v4870_v43 = vadd.f32 1.0, %v16939_v29  ;;  %12838 = vmatmul.mubr.msk.f32.gmra.mxu1 %vm5019_vm0, %v16915_v38  ;;  %v4777_v1 = vadd.f32 1.0, %v13817_v44  ;;  %v5368_v59 = vsel %vm1326_vm3, %v20391_v54, %v5367_v15  ;;  %v20393_v53 = vld [vmem:[#allocation113_spill] sm:$0xff] }
 0x28e   : > { %13834 = vpow2.f32 %v4746_v57  ;;  %v13819_v46 = vpop.eup %13818  ;;  %v16956_v19 = vmul.f32 %v4913_v3, %v16768_v55  ;;  %12875 = vmatprep.mubr.msk.f32.mxu0 %vm5019_vm0, %v5368_v59  ;;  %v5369_v26 = vrot.slane %v4981_v25, 7  ;;  %v4618_v16 = vadd.f32 %v12804_v17, %v16752_v22 }
 0x28f   : > { %13836 = vrcp.f32 %v4870_v43  ;;  %v16960_v4 = vmul.f32 %v4777_v1, %v4777_v1  ;;  %v4776_v9 = vadd.f32 1.0, %v13819_v46  ;;  %v4617_v58 = vadd.f32 %v4570_v10, %v4163_v40  ;;  %v16978_v40 = vld [vmem:[#allocation5 + $0xb8] sm:$0xff] }
 0x290   : > { %13838 = vpow2.f32 %v4744_v51  ;;  %v5370_v42 = vsel %vm1326_vm3, %v5367_v15, %v5369_v26  ;;  %v16964_v12 = vadd.f32 %v16573_v23, %v4618_v16  ;;  %v4982_v55 = vmul.f32 %v16813_v32, %v20392_v0  ;;  %12840 = vmatprep.mubr.msk.f32.mxu1 %vm5019_vm0, %v16956_v19  ;;  %20395 = vst [vmem:[#allocation121_spill] sm:$0xff] %v16978_v40 }
 0x291   : > { %v13821_v60 = vpop.eup %13820  ;;  %v2267_v22 = vadd.f32 %v20394_v41, %v20393_v53  ;;  %v4873_v17 = vadd.f32 1.0, %v16960_v4  ;;  %v16973_v25 = vmul.f32 %v4776_v9, %v4776_v9  ;;  %12876 = vmatmul.mubr.msk.f32.gmra.mxu0 %vm5019_vm0, %v5370_v42  ;;  %12841 = vmatmul.mubr.msk.f32.gmra.mxu1 %vm5019_vm0, %v16948_v8  ;;  %v11032_v15 = vadd.f32 -1.0, %v16881_v11  ;;  %v20396_v41 = vld [vmem:[#allocation127_spill] sm:$0xff] }
 0x292   : > { %v4779_v7 = vadd.f32 1.0, %v13821_v60  ;;  %v13823_v57 = vpop.eup %13822  ;;  %v4689_v44 = vmin.f32 %v16964_v12, 20.0  ;;  %v16983_v3 = vadd.f32 %v16573_v23, %v4617_v58  ;;  %v5371_v43 = vrot.slane %v4982_v55, 7  ;;  %13088 = vmatprep.subr.mxu0 %v16978_v40 }
 0x293   : > { %v13825_v10 = vpop.eup %13824  ;;  %v11031_v1 = vadd.f32 -1.0, %v16908_v50  ;;  %13840 = vrcp.f32 %v4873_v17  ;;  %v4872_v51 = vadd.f32 1.0, %v16973_v25  ;;  %v4919_v58 = vmul.f32 %v13823_v57, %v11032_v15 }
 0x294   : > { %v16988_v54 = vmul.f32 %v4779_v7, %v4779_v7  ;;  %v13827_v59 = vpop.eup %13826  ;;  %v4778_v46 = vadd.f32 1.0, %v13825_v10  ;;  %v4750_v16 = vmul.f32 1.442695, %v4689_v44  ;;  %v4688_v11 = vmin.f32 %v16983_v3, 20.0  ;;  %v20397_v44 = vld [vmem:[#allocation41_spill] sm:$0xff] }
 0x295   : > { %v5372_v9 = vsel %vm1326_vm3, %v5369_v26, %v5371_v43  ;;  %13842 = vrcp.f32 %v4872_v51  ;;  %v4781_v42 = vadd.f32 1.0, %v13827_v59  ;;  %v2721_v17 = vadd.f32 %v20396_v41, %v2267_v22  ;;  %v17006_v59 = vpop.f32.mrf.mxu1  ;;  %v20399_v41 = vld [vmem:[#allocation156_spill] sm:$0xff] }
 0x296   : > { %v13829_v23 = vpop.eup %13828  ;;  %v4875_v60 = vadd.f32 1.0, %v16988_v54  ;;  %12878 = vmatprep.mubr.msk.f32.mxu0 %vm5019_vm0, %v5372_v9  ;;  %v16994_v55 = vmul.f32 %v4778_v46, %v4778_v46  ;;  %13844 = vpow2.f32 %v4750_v16  ;;  %v4748_v53 = vmul.f32 1.442695, %v4688_v11 }
 0x297   : > { %v4917_v50 = vmul.f32 %v13829_v23, %v11031_v1  ;;  %v16997_v7 = vmul.f32 %v4781_v42, %v4781_v42  ;;  %v4983_v26 = vmul.f32 %v16810_v20, %v20397_v44  ;;  %v11034_v10 = vadd.f32 -1.0, %v16929_v24  ;;  %v20398_v23 = vld [vmem:[#allocation38_spill] sm:$0xff] }
 0x298   : > { %13846 = vrcp.f32 %v4875_v60  ;;  %v4874_v1 = vadd.f32 1.0, %v16994_v55  ;;  %v17009_v22 = vmul.f32 %v4919_v58, %v16777_v18  ;;  %v2989_v60 = vadd.f32 %v20398_v23, %v2721_v17  ;;  %v20401_v23 = vld [vmem:[#allocation42_spill] sm:$0xff] }
 0x299   : > { %v13831_v57 = vpop.eup %13830  ;;  %v17002_v15 = vmul.f32 %v4917_v50, %v16794_v39  ;;  %13848 = vpow2.f32 %v4748_v53  ;;  %v4877_v46 = vadd.f32 1.0, %v16997_v7  ;;  %v5373_v11 = vrot.slane %v4983_v26, 7 }
 0x29a   : > { %v13833_v51 = vpop.eup %13832  ;;  %v4780_v16 = vadd.f32 1.0, %v13831_v57  ;;  %v11033_v39 = vadd.f32 -1.0, %v16939_v29  ;;  %13850 = vrcp.f32 %v4874_v1  ;;  %v3446_v26 = vadd.f32 %v20399_v41, %v2989_v60  ;;  %v4126_v29 = vpop.f32.mrf.mxu1  ;;  %v20402_v41 = vld [vmem:[#allocation43_spill] sm:$0xff] }
 0x29b   : > { %v13835_v9 = vpop.eup %13834  ;;  %12843 = vmatprep.mubr.msk.f32.mxu1 %vm5019_vm0, %v17002_v15  ;;  %v4923_v42 = vmul.f32 %v13833_v51, %v11034_v10  ;;  %v5374_v18 = vsel %vm1326_vm3, %v5371_v43, %v5373_v11  ;;  %13852 = vrcp.f32 %v4877_v46  ;;  %v20400_v51 = vld [vmem:[#allocation115_spill] sm:$0xff]  ;;  %v4984_v60 = vmul.f32 %v16832_v52, %v20401_v23  ;;  %v17072_v23 = vpop.f32.mrf.mxu0 }
 0x29c   : > { %v13837_v24 = vpop.eup %13836  ;;  %v17016_v50 = vmul.f32 %v4780_v16, %v4780_v16  ;;  %v4783_v53 = vadd.f32 1.0, %v13835_v9  ;;  %12844 = vmatmul.mubr.msk.f32.gmra.mxu1 %vm5019_vm0, %v17009_v22  ;;  %12879 = vmatmul.mubr.msk.f32.gmra.mxu0 %vm5019_vm0, %v5374_v18  ;;  %v3903_v16 = vadd.f32 %v20400_v51, %v3446_v26  ;;  %v11036_v9 = vadd.f32 -1.0, %v16960_v4 }
 0x29d   : > { %v13839_v58 = vpop.eup %13838  ;;  %v4921_v17 = vmul.f32 %v13837_v24, %v11033_v39  ;;  %v17034_v46 = vmul.f32 %v4923_v42, %v16819_v45  ;;  %v11035_v26 = vadd.f32 -1.0, %v16973_v25  ;;  %v20404_v25 = vld [vmem:[#allocation45_spill] sm:$0xff] }
 0x29e   : > { %v4876_v57 = vadd.f32 1.0, %v17016_v50  ;;  %v17024_v1 = vmul.f32 %v4783_v53, %v4783_v53  ;;  %v4782_v10 = vadd.f32 1.0, %v13839_v58  ;;  %v17039_v18 = vadd.f32 %v4126_v29, %v3903_v16 }
 0x29f   : > { %v17028_v43 = vmul.f32 %v4921_v17, %v16826_v13  ;;  %v5375_v58 = vrot.slane %v4984_v60, 7  ;;  %v4985_v13 = vmul.f32 %v16841_v34, %v20402_v41  ;;  %v11038_v17 = vadd.f32 -1.0, %v16988_v54 }
 0x2a0   : > { %13854 = vrcp.f32 %v4876_v57  ;;  %v4879_v39 = vadd.f32 1.0, %v17024_v1  ;;  %v17037_v24 = vmul.f32 %v4782_v10, %v4782_v10  ;;  %v13841_v53 = vpop.eup %13840  ;;  %v20403_v10 = vld [vmem:[#allocation44_spill] sm:$0xff] }
 0x2a1   : > { %12846 = vmatprep.mubr.msk.f32.mxu1 %vm5019_vm0, %v17028_v43  ;;  %v4927_v4 = vmul.f32 %v13841_v53, %v11036_v9  ;;  %v5376_v29 = vsel %vm1326_vm3, %v5373_v11, %v5375_v58  ;;  %v5377_v57 = vrot.slane %v4985_v13, 7  ;;  %v4986_v51 = vmul.f32 %v16848_v37, %v20403_v10  ;;  %v20405_v11 = vld [vmem:[#allocation46_spill] sm:$0xff] }
 0x2a2   : > { %13856 = vrcp.f32 %v4879_v39  ;;  %v4878_v45 = vadd.f32 1.0, %v17037_v24  ;;  %12847 = vmatmul.mubr.msk.f32.gmra.mxu1 %vm5019_vm0, %v17034_v46  ;;  %v13843_v42 = vpop.eup %13842  ;;  %v11037_v9 = vadd.f32 -1.0, %v16994_v55  ;;  %12881 = vmatprep.mubr.msk.f32.mxu0 %vm5019_vm0, %v5376_v29  ;;  %v4987_v39 = vmul.f32 %v16856_v56, %v20404_v25 }
 0x2a3   : > { %v13845_v16 = vpop.eup %13844  ;;  %v4925_v60 = vmul.f32 %v13843_v42, %v11035_v26  ;;  %v5378_v54 = vsel %vm1326_vm3, %v5375_v58, %v5377_v57  ;;  %v5379_v40 = vrot.slane %v4986_v51, 7  ;;  %v4988_v13 = vmul.f32 %v16875_v48, %v20405_v11 }
 0x2a4   : > { %13858 = vrcp.f32 %v4878_v45  ;;  %v4785_v41 = vadd.f32 1.0, %v13845_v16  ;;  %v17061_v10 = vmul.f32 %v4927_v4, %v16851_v6  ;;  %12882 = vmatmul.mubr.msk.f32.gmra.mxu0 %vm5019_vm0, %v5378_v54  ;;  %v5381_v26 = vrot.slane %v4987_v39, 7  ;;  %v20406_v45 = vld [vmem:[#allocation47_spill] sm:$0xff] }
 0x2a5   : > { %v13847_v53 = vpop.eup %13846  ;;  %v17064_v55 = vmul.f32 %v4925_v60, %v16861_v36  ;;  %v4989_v42 = vmul.f32 %v16872_v63, %v20406_v45  ;;  %v5380_v51 = vsel %vm1326_vm3, %v5377_v57, %v5379_v40  ;;  %v5383_v16 = vrot.slane %v4988_v13, 7  ;;  %v20407_v36 = vld [vmem:[#allocation48_spill] sm:$0xff] }
 0x2a6   : > { %v13849_v44 = vpop.eup %13848  ;;  %v17069_v29 = vmul.f32 %v4785_v41, %v4785_v41  ;;  %v4931_v11 = vmul.f32 %v13847_v53, %v11038_v17  ;;  %12884 = vmatprep.mubr.msk.f32.mxu0 %vm5019_vm0, %v5380_v51  ;;  %v5382_v6 = vsel %vm1326_vm3, %v5379_v40, %v5381_v26  ;;  %v4990_v4 = vmul.f32 %v16900_v2, %v20407_v36  ;;  %v20409_v51 = vld [vmem:[#allocation50_spill] sm:$0xff] }
 0x2a7   : > { %v4784_v58 = vadd.f32 1.0, %v13849_v44  ;;  %v13851_v25 = vpop.eup %13850  ;;  %12849 = vmatprep.mubr.msk.f32.mxu1 %vm5019_vm0, %v17064_v55  ;;  %v5385_v57 = vrot.slane %v4989_v42, 7  ;;  %v11040_v39 = vadd.f32 -1.0, %v16997_v7  ;;  %v11039_v40 = vadd.f32 -1.0, %v17016_v50  ;;  %v4580_v7 = vpop.f32.mrf.mxu0 }
 0x2a8   : > { %v4929_v41 = vmul.f32 %v13851_v25, %v11037_v9  ;;  %v4881_v44 = vadd.f32 1.0, %v17069_v29  ;;  %12850 = vmatmul.mubr.msk.f32.gmra.mxu1 %vm5019_vm0, %v17061_v10  ;;  %v13853_v17 = vpop.eup %13852  ;;  %12885 = vmatmul.mubr.msk.f32.gmra.mxu0 %vm5019_vm0, %v5382_v6  ;;  %v5384_v53 = vsel %vm1326_vm3, %v5381_v26, %v5383_v16  ;;  %v5387_v54 = vrot.slane %v4990_v4, 7 }
 0x2a9   : > { %v17081_v60 = vmul.f32 %v4784_v58, %v4784_v58  ;;  %12887 = vmatprep.mubr.msk.f32.mxu0 %vm5019_vm0, %v5384_v53  ;;  %v5386_v13 = vsel %vm1326_vm3, %v5383_v16, %v5385_v57  ;;  %v17096_v42 = vmul.f32 %v4931_v11, %v16879_v35  ;;  %v20408_v58 = vld [vmem:[#allocation49_spill] sm:$0xff]  ;;  %v4935_v4 = vmul.f32 %v13853_v17, %v11040_v39  ;;  %v20411_v53 = vld [vmem:[#allocation52_spill] sm:$0xff] }
 0x2aa   : > { %v17090_v9 = vmul.f32 %v4929_v41, %v16892_v62  ;;  %13860 = vrcp.f32 %v4881_v44  ;;  %v5388_v50 = vsel %vm1326_vm3, %v5385_v57, %v5387_v54  ;;  %v4991_v26 = vmul.f32 %v16904_v49, %v20408_v58  ;;  %v20410_v41 = vld [vmem:[#allocation51_spill] sm:$0xff] }
 0x2ab   : > { %v4880_v25 = vadd.f32 1.0, %v17081_v60  ;;  %v4992_v62 = vmul.f32 %v16935_v27, %v20409_v51  ;;  %v4993_v44 = vmul.f32 %v16915_v38, %v20410_v41  ;;  %v4994_v16 = vmul.f32 %v16956_v19, %v20411_v53  ;;  %v20412_v41 = vld [vmem:[#allocation56_spill] sm:$0xff] }
 0x2ac   : > { %12852 = vmatprep.mubr.msk.f32.mxu1 %vm5019_vm0, %v17090_v9  ;;  %12888 = vmatmul.mubr.msk.f32.gmra.mxu0 %vm5019_vm0, %v5386_v13  ;;  %v5389_v11 = vrot.slane %v4991_v26, 7  ;;  %v11042_v17 = vadd.f32 -1.0, %v17024_v1  ;;  %v11041_v39 = vadd.f32 -1.0, %v17037_v24  ;;  %v4996_v53 = vmul.f32 %v17002_v15, %v20412_v41  ;;  %v20419_v41 = vld [vmem:[#allocation68_spill] sm:$0xff] }
 0x2ad   : > { %v13855_v6 = vpop.eup %13854  ;;  %13862 = vrcp.f32 %v4880_v25  ;;  %v5391_v57 = vrot.slane %v4992_v62, 7  ;;  %12853 = vmatmul.mubr.msk.f32.gmra.mxu1 %vm5019_vm0, %v17096_v42  ;;  %v4619_v25 = vadd.f32 %v4580_v7, %v17039_v18  ;;  %12890 = vmatprep.mubr.msk.f32.mxu0 %vm5019_vm0, %v5388_v50  ;;  %v5395_v62 = vrot.slane %v4994_v16, 7  ;;  %v20413_v18 = vld [vmem:[#allocation55_spill] sm:$0xff]  ;;  %v20414_v16 = vld [vmem:[#allocation61_spill] sm:$0xff] }
 0x2ae   : > { %v4933_v35 = vmul.f32 %v13855_v6, %v11039_v40  ;;  %v5390_v13 = vsel %vm1326_vm3, %v5387_v54, %v5389_v11  ;;  %v17124_v1 = vmul.f32 %v4935_v4, %v16897_v21  ;;  %v5393_v58 = vrot.slane %v4993_v44, 7 }
 0x2af   : > { %v13857_v51 = vpop.eup %13856  ;;  %v5392_v26 = vsel %vm1326_vm3, %v5389_v11, %v5391_v57  ;;  %v4995_v7 = vmul.f32 %v16948_v8, %v20413_v18  ;;  %v5399_v44 = vrot.slane %v4996_v53, 7  ;;  %v11044_v53 = vadd.f32 -1.0, %v17069_v29 }
 0x2b0   : > { %v17119_v40 = vmul.f32 %v4933_v35, %v16918_v14  ;;  %v4939_v24 = vmul.f32 %v13857_v51, %v11042_v17  ;;  %12891 = vmatmul.mubr.msk.f32.gmra.mxu0 %vm5019_vm0, %v5390_v13  ;;  %v17131_v14 = vld [vmem:[#allocation2] ss:$0 sm:$0xff]  ;;  %v5394_v21 = vsel %vm1326_vm3, %v5391_v57, %v5393_v58  ;;  %v5396_v4 = vsel %vm1326_vm3, %v5393_v58, %v5395_v62 }
 0x2b1   : > { %v13859_v6 = vpop.eup %13858  ;;  %v17134_v54 = vadd.f32 %v17131_v14, %v4619_v25  ;;  %12893 = vmatprep.mubr.msk.f32.mxu0 %vm5019_vm0, %v5392_v26  ;;  %v4998_v35 = vmul.f32 %v17028_v43, %v20414_v16  ;;  %v5397_v17 = vrot.slane %v4995_v7, 7  ;;  %v20416_v26 = vld [vmem:[#allocation65_spill] sm:$0xff] }
 0x2b2   : > { %v4937_v50 = vmul.f32 %v13859_v6, %v11041_v39  ;;  %12855 = vmatprep.mubr.msk.f32.mxu1 %vm5019_vm0, %v17119_v40  ;;  %v17147_v11 = vmul.f32 %v4939_v24, %v16927_v61  ;;  %v20415_v39 = vld [vmem:[#allocation60_spill] sm:$0xff]  ;;  %v5000_v6 = vmul.f32 %v17064_v55, %v20416_v26  ;;  %v11043_v24 = vadd.f32 -1.0, %v17081_v60  ;;  %v20418_v26 = vld [vmem:[#allocation69_spill] sm:$0xff] }
 0x2b3   : > { %12856 = vmatmul.mubr.msk.f32.gmra.mxu1 %vm5019_vm0, %v17124_v1  ;;  %v4997_v25 = vmul.f32 %v17009_v22, %v20415_v39  ;;  %v5398_v58 = vsel %vm1326_vm3, %v5395_v62, %v5397_v17  ;;  %v5400_v57 = vsel %vm1326_vm3, %v5397_v17, %v5399_v44  ;;  %v5403_v13 = vrot.slane %v4998_v35, 7 }
 0x2b4   : > { %v17141_v51 = vmul.f32 %v4937_v50, %v16932_v47  ;;  %12894 = vmatmul.mubr.msk.f32.gmra.mxu0 %vm5019_vm0, %v5394_v21  ;;  %v4690_v47 = vmin.f32 %v17134_v54, 20.0  ;;  %v20417_v50 = vld [vmem:[#allocation64_spill] sm:$0xff]  ;;  %v5407_v16 = vrot.slane %v5000_v6, 7  ;;  %v5002_v60 = vmul.f32 %v17090_v9, %v20418_v26 }
 0x2b5   : > { %12896 = vmatprep.mubr.msk.f32.mxu0 %vm5019_vm0, %v5396_v4  ;;  %v5401_v7 = vrot.slane %v4997_v25, 7  ;;  %v4999_v21 = vmul.f32 %v17034_v46, %v20417_v50 }
 0x2b6   : > { %12858 = vmatprep.mubr.msk.f32.mxu1 %vm5019_vm0, %v17141_v51  ;;  %v4752_v17 = vmul.f32 1.442695, %v4690_v47 }
 0x2b7   : > { %12859 = vmatmul.mubr.msk.f32.gmra.mxu1 %vm5019_vm0, %v17147_v11  ;;  %v13861_v61 = vpop.eup %13860  ;;  %v5402_v29 = vsel %vm1326_vm3, %v5399_v44, %v5401_v7  ;;  %v5404_v35 = vsel %vm1326_vm3, %v5401_v7, %v5403_v13  ;;  %v5405_v50 = vrot.slane %v4999_v21, 7  ;;  %v20421_v44 = vld [vmem:[#allocation80_spill] sm:$0xff]  ;;  %v20422_v7 = vld [vmem:[#allocation77_spill] sm:$0xff]  ;;  %v20423_v21 = vld [vmem:[#allocation82_spill] sm:$0xff] }
 0x2b8   : > { %v4943_v62 = vmul.f32 %v13861_v61, %v11044_v53  ;;  %12897 = vmatmul.mubr.msk.f32.gmra.mxu0 %vm5019_vm0, %v5398_v58  ;;  %v5001_v61 = vmul.f32 %v17061_v10, %v20419_v41  ;;  %v20420_v58 = vld [vmem:[#allocation72_spill] sm:$0xff]  ;;  %v5717_v47 = vmul.f32 %v16784_v33, %v20421_v44  ;;  %13864 = vpow2.f32 %v4752_v17  ;;  %v20427_v44 = vld [vmem:[#allocation118_spill] sm:$0xff]  ;;  %v20429_v41 = vld [vmem:[#allocation83_spill] sm:$0xff] }
 0x2b9   : > { %12899 = vmatprep.mubr.msk.f32.mxu0 %vm5019_vm0, %v5400_v57  ;;  %v5716_v53 = vmul.f32 %v16787_v28, %v20420_v58  ;;  %v5408_v6 = vsel %vm1326_vm3, %v5405_v50, %v5407_v16  ;;  %v4166_v58 = vadd.f32 %v17006_v59, %v20427_v44  ;;  %v20430_v59 = vld [vmem:[#allocation81_spill] sm:$0xff] }
 0x2ba   : > { %v13863_v4 = vpop.eup %13862  ;;  %v17180_v57 = vmul.f32 %v4943_v62, %v16964_v12  ;;  %v5004_v12 = vmul.f32 %v17119_v40, %v20422_v7  ;;  %v5409_v62 = vrot.slane %v5001_v61, 7  ;;  %v20428_v61 = vld [vmem:[#allocation75_spill] sm:$0xff]  ;;  %v5005_v44 = vmul.f32 %v17124_v1, %v20430_v59 }
 0x2bb   : > { %v4941_v39 = vmul.f32 %v13863_v4, %v11043_v24  ;;  %v5411_v24 = vrot.slane %v5002_v60, 7  ;;  %v5718_v4 = vmul.f32 %v16813_v32, %v20423_v21  ;;  %v20426_v60 = vld [vmem:[#allocation84_spill] sm:$0xff] }
 0x2bc   : > { %12900 = vmatmul.mubr.msk.f32.gmra.mxu0 %vm5019_vm0, %v5402_v29  ;;  %v20424_v29 = vld [vmem:[#allocation76_spill] sm:$0xff]  ;;  %v5410_v17 = vsel %vm1326_vm3, %v5407_v16, %v5409_v62  ;;  %v20431_v16 = vld [vmem:[#allocation85_spill] sm:$0xff] }
 0x2bd   : > { %v17173_v25 = vmul.f32 %v4941_v39, %v16983_v3  ;;  %12902 = vmatprep.mubr.msk.f32.mxu0 %vm5019_vm0, %v5404_v35  ;;  %v5406_v3 = vsel %vm1326_vm3, %v5403_v13, %v5405_v50  ;;  %v5783_v39 = vrot.slane %v5716_v53, 1  ;;  %v5003_v13 = vmul.f32 %v17096_v42, %v20424_v29  ;;  %v20425_v35 = vld [vmem:[#allocation78_spill] sm:$0xff] }
 0x2be   : > { %v5785_v50 = vrot.slane %v5717_v47, 1  ;;  %v5719_v53 = vmul.f32 %v16810_v20, %v20426_v60  ;;  %v5787_v29 = vrot.slane %v5718_v4, 1  ;;  %v5412_v7 = vsel %vm1326_vm3, %v5409_v62, %v5411_v24  ;;  %v6623_v4 = vld [vmem:[#allocation5 + $0x90] sm:$0xff] }
 0x2bf   : > { %12861 = vmatprep.mubr.msk.f32.mxu1 %vm5019_vm0, %v17173_v25  ;;  %v5784_v21 = vsel %vm837_vm2, %v20428_v61, %v5783_v39  ;;  %v5006_v47 = vmul.f32 %v17141_v51, %v20429_v41  ;;  %v5413_v60 = vrot.slane %v5003_v13, 7  ;;  %v4620_v62 = vadd.f32 %v17072_v23, %v4166_v58  ;;  %v20432_v61 = vld [vmem:[#allocation88_spill] sm:$0xff] }
 0x2c0   : > { %12862 = vmatmul.mubr.msk.f32.gmra.mxu1 %vm5019_vm0, %v17180_v57  ;;  %12903 = vmatmul.mubr.msk.f32.gmra.mxu0 %vm5019_vm0, %v5406_v3  ;;  %v5786_v3 = vsel %vm837_vm2, %v5783_v39, %v5785_v50  ;;  %v5788_v13 = vsel %vm837_vm2, %v5785_v50, %v5787_v29  ;;  %v20435_v50 = vld [vmem:[#allocation86_spill] sm:$0xff] }
 0x2c1   : > { %12928 = vmatprep.mubr.msk.f32.mxu1 %vm5019_vm0, %v20425_v35  ;;  %12905 = vmatprep.mubr.msk.f32.mxu0 %vm5019_vm0, %v5408_v6  ;;  %v5415_v35 = vrot.slane %v5004_v12, 7  ;;  %v5720_v6 = vmul.f32 %v16832_v52, %v20431_v16  ;;  %v5789_v12 = vrot.slane %v5719_v53, 1  ;;  %v5414_v39 = vsel %vm1326_vm3, %v5411_v24, %v5413_v60  ;;  %v6622_v16 = vld [vmem:[#allocation5 + $0x88] sm:$0xff]  ;;  %v20434_v53 = vld [vmem:[#allocation87_spill] sm:$0xff] }
 0x2c2   : > { %v5419_v58 = vrot.slane %v5006_v47, 7  ;;  %v5417_v24 = vrot.slane %v5005_v44, 7 }
 0x2c3   : > { %v5791_v59 = vrot.slane %v5720_v6, 1  ;;  %v5416_v23 = vsel %vm1326_vm3, %v5413_v60, %v5415_v35  ;;  %v5007_v6 = vmul.f32 %v17147_v11, %v20435_v50  ;;  %v20436_v60 = vld [vmem:[#allocation90_spill] sm:$0xff] }
 0x2c4   : > { %12929 = vmatmul.mubr.msk.f32.vlgmr.msra.gmra.mxu1 %vm5019_vm0, %v5784_v21  ;;  %12906 = vmatmul.mubr.msk.f32.gmra.mxu0 %vm5019_vm0, %v5410_v17  ;;  %v5721_v21 = vmul.f32 %v16841_v34, %v20432_v61  ;;  %v5008_v17 = vmul.f32 %v17173_v25, %v20434_v53  ;;  %v5723_v47 = vmul.f32 %v16856_v56, %v20436_v60  ;;  %v20437_v61 = vld [vmem:[#allocation91_spill] sm:$0xff]  ;;  %v20438_v60 = vld [vmem:[#allocation29_spill] sm:$0xff] }
 0x2c5   : > { %12931 = vmatprep.mubr.msk.f32.mxu1 %vm5019_vm0, %v5786_v3  ;;  %12908 = vmatprep.mubr.msk.f32.mxu0 %vm5019_vm0, %v5412_v7  ;;  %v20433_v3 = vld [vmem:[#allocation89_spill] sm:$0xff]  ;;  %v5790_v7 = vsel %vm837_vm2, %v5787_v29, %v5789_v12  ;;  %v5418_v29 = vsel %vm1326_vm3, %v5415_v35, %v5417_v24  ;;  %v5792_v44 = vsel %vm837_vm2, %v5789_v12, %v5791_v59  ;;  %v5421_v35 = vrot.slane %v5007_v6, 7 }
 0x2c6   : > { %v5722_v41 = vmul.f32 %v16848_v37, %v20433_v3  ;;  %13033 = vmatpush3.msra.mxu1 %v16821_v31  ;;  %v5793_v31 = vrot.slane %v5721_v21, 1  ;;  %v6621_v3 = vld [vmem:[#allocation5 + $0x80] sm:$0xff]  ;;  %v5724_v50 = vmul.f32 %v16875_v48, %v20437_v61  ;;  %v5420_v21 = vsel %vm1326_vm3, %v5417_v24, %v5419_v58 }
 0x2c7   : > { %13034 = vmatprep.subr.mxu1 %v6623_v4  ;;  %v5797_v12 = vrot.slane %v5723_v47, 1 }
 0x2c8   : > { %12932 = vmatmul.mubr.msk.f32.gmra.mxu1 %vm5019_vm0, %v5788_v13  ;;  %12909 = vmatmul.mubr.msk.f32.gmra.mxu0 %vm5019_vm0, %v5414_v39  ;;  %v5795_v13 = vrot.slane %v5722_v41, 1  ;;  %v5423_v39 = vrot.slane %v5008_v17, 7  ;;  %v5009_v41 = vmul.f32 %v17180_v57, %v20438_v60  ;;  %v20440_v17 = vld [vmem:[#allocation92_spill] sm:$0xff]  ;;  %v20443_v60 = vld [vmem:[#allocation94_spill] sm:$0xff] }
 0x2c9   : > { %12934 = vmatprep.mubr.msk.f32.mxu1 %vm5019_vm0, %v5790_v7  ;;  %13035 = vmatpush3.msra.mxu1 %v6623_v4  ;;  %v17246_v4 = vadd.f32 %v17131_v14, %v4620_v62  ;;  %v5794_v7 = vsel %vm837_vm2, %v5791_v59, %v5793_v31  ;;  %v20439_v14 = vld [vmem:[#allocation32_spill] sm:$0xff]  ;;  %v5725_v24 = vmul.f32 %v16872_v63, %v20440_v17  ;;  %v20442_v17 = vld [vmem:[#allocation34_spill] sm:$0xff] }
 0x2ca   : > { %13036 = vmatprep.subr.mxu1 %v6622_v16  ;;  %12911 = vmatprep.mubr.msk.f32.mxu0 %vm5019_vm0, %v5416_v23  ;;  %v17251_v23 = vld [vmem:[#allocation5 + $0xd8] sm:$0xff]  ;;  %v6166_v62 = vmul.f32 %v16787_v28, %v20439_v14  ;;  %v5422_v59 = vsel %vm1326_vm3, %v5419_v58, %v5421_v35  ;;  %v5796_v6 = vsel %vm837_vm2, %v5793_v31, %v5795_v13 }
 0x2cb   : > { %13037 = vmatpush3.msra.mxu1 %v6622_v16  ;;  %v13865_v16 = vpop.eup %13864  ;;  %v5424_v47 = vsel %vm1326_vm3, %v5421_v35, %v5423_v39  ;;  %v6167_v58 = vmul.f32 %v16784_v33, %v20442_v17  ;;  %v6168_v31 = vmul.f32 %v16813_v32, %v20389_v30  ;;  %v5727_v35 = vmul.f32 %v16904_v49, %v20443_v60 }
 0x2cc   : > { %12935 = vmatmul.mubr.msk.f32.gmra.mxu1 %vm5019_vm0, %v5792_v44  ;;  %13038 = vmatprep.subr.mxu1 %v6621_v3  ;;  %v5799_v44 = vrot.slane %v5724_v50, 1  ;;  %v4786_v14 = vadd.f32 1.0, %v13865_v16  ;;  %v6235_v50 = vrot.slane %v6166_v62, 7  ;;  %v6170_v30 = vmul.f32 %v16832_v52, %v20392_v0 }
 0x2cd   : > { %12937 = vmatprep.mubr.msk.f32.mxu1 %vm5019_vm0, %v5794_v7  ;;  %12912 = vmatmul.mubr.msk.f32.gmra.mxu0 %vm5019_vm0, %v5418_v29  ;;  %v20441_v7 = vld [vmem:[#allocation93_spill] sm:$0xff]  ;;  %v4691_v29 = vmin.f32 %v17246_v4, 20.0 }
 0x2ce   : > { %13039 = vmatpush3.msra.mxu1 %v6621_v3  ;;  %12914 = vmatprep.mubr.msk.f32.mxu0 %vm5019_vm0, %v5420_v21  ;;  %v5726_v61 = vmul.f32 %v16900_v2, %v20441_v7  ;;  %v5798_v3 = vsel %vm837_vm2, %v5795_v13, %v5797_v12  ;;  %v5425_v21 = vrot.slane %v5009_v41, 7  ;;  %v5801_v7 = vrot.slane %v5725_v24, 1 }
 0x2cf   : > { %13144 = vmatprep.subr.mxu1 %v17251_v23  ;;  %v5800_v41 = vsel %vm837_vm2, %v5797_v12, %v5799_v44  ;;  %v4754_v17 = vmul.f32 1.442695, %v4691_v29  ;;  %v6237_v24 = vrot.slane %v6167_v58, 7  ;;  %v6239_v12 = vrot.slane %v6168_v31, 7  ;;  %v20446_v29 = vld [vmem:[#allocation96_spill] sm:$0xff] }
 0x2d0   : > { %12938 = vmatmul.mubr.msk.f32.gmra.mxu1 %vm5019_vm0, %v5796_v6  ;;  %v5426_v13 = vsel %vm1326_vm3, %v5423_v39, %v5425_v21  ;;  %v5803_v16 = vrot.slane %v5726_v61, 1  ;;  %v20444_v6 = vld [vmem:[#allocation95_spill] sm:$0xff]  ;;  %v5802_v62 = vsel %vm837_vm2, %v5799_v44, %v5801_v7  ;;  %v20445_v39 = vld [vmem:[#allocation33_spill] sm:$0xff]  ;;  %v5729_v21 = vmul.f32 %v16915_v38, %v20446_v29 }
 0x2d1   : > { %12940 = vmatprep.mubr.msk.f32.mxu1 %vm5019_vm0, %v5798_v3  ;;  %12915 = vmatmul.mubr.msk.f32.gmra.mxu0 %vm5019_vm0, %v5422_v59  ;;  %v5728_v3 = vmul.f32 %v16935_v27, %v20444_v6  ;;  %v17286_v59 = vmul.f32 %v4786_v14, %v4786_v14  ;;  %v6236_v61 = vsel %vm1326_vm3, %v20445_v39, %v6235_v50  ;;  %13866 = vpow2.f32 %v4754_v17  ;;  %v20449_v17 = vld [vmem:[#allocation41_spill] sm:$0xff]  ;;  %v20451_v29 = vld [vmem:[#allocation99_spill] sm:$0xff] }
 0x2d2   : > { %12917 = vmatprep.mubr.msk.f32.mxu0 %vm5019_vm0, %v5424_v47  ;;  %v5805_v47 = vrot.slane %v5727_v35, 1  ;;  %v6169_v14 = vmul.f32 %v16810_v20, %v20390_v5  ;;  %v5804_v44 = vsel %vm837_vm2, %v5801_v7, %v5803_v16  ;;  %v6243_v39 = vrot.slane %v6170_v30, 7  ;;  %v6923_v7 = vld [vmem:[#allocation5 + $0xb0] sm:$0xff] }
 0x2d3   : > { %v5807_v58 = vrot.slane %v5728_v3, 1  ;;  %v4882_v35 = vadd.f32 1.0, %v17286_v59  ;;  %v6240_v3 = vsel %vm1326_vm3, %v6237_v24, %v6239_v12  ;;  %v5809_v5 = vrot.slane %v5729_v21, 1  ;;  %v20452_v6 = vld [vmem:[#allocation121_spill] sm:$0xff] }
 0x2d4   : > { %12941 = vmatmul.mubr.msk.f32.gmra.mxu1 %vm5019_vm0, %v5800_v41  ;;  %v20447_v41 = vld [vmem:[#allocation97_spill] sm:$0xff]  ;;  %v5806_v31 = vsel %vm837_vm2, %v5803_v16, %v5805_v47  ;;  %v20450_v16 = vld [vmem:[#allocation98_spill] sm:$0xff]  ;;  %v6241_v30 = vrot.slane %v6169_v14, 7 }
 0x2d5   : > { %12943 = vmatprep.mubr.msk.f32.mxu1 %vm5019_vm0, %v5802_v62  ;;  %12918 = vmatmul.mubr.msk.f32.gmra.mxu0 %vm5019_vm0, %v5426_v13  ;;  %v5730_v62 = vmul.f32 %v16956_v19, %v20447_v41  ;;  %v6238_v13 = vsel %vm1326_vm3, %v6235_v50, %v6237_v24  ;;  %v5731_v41 = vmul.f32 %v16948_v8, %v20450_v16  ;;  %v6922_v21 = vld [vmem:[#allocation5 + $0xa8] sm:$0xff]  ;;  %13868 = vrcp.f32 %v4882_v35 }
 0x2d6   : > { %12984 = vmatprep.mubr.msk.f32.mxu0 %vm5019_vm0, %v6236_v61  ;;  %v20448_v61 = vld [vmem:[#allocation42_spill] sm:$0xff]  ;;  %v5808_v50 = vsel %vm837_vm2, %v5805_v47, %v5807_v58  ;;  %v5810_v24 = vsel %vm837_vm2, %v5807_v58, %v5809_v5 }
 0x2d7   : > { %v6172_v0 = vmul.f32 %v16848_v37, %v20448_v61  ;;  %v5811_v61 = vrot.slane %v5730_v62, 1  ;;  %v20453_v62 = vld [vmem:[#allocation44_spill] sm:$0xff] }
 0x2d8   : > { %12944 = vmatmul.mubr.msk.f32.gmra.mxu1 %vm5019_vm0, %v5804_v44  ;;  %v6171_v44 = vmul.f32 %v16841_v34, %v20449_v17  ;;  %v20454_v17 = vld [vmem:[#allocation53_spill] sm:$0xff] }
 0x2d9   : > { %12946 = vmatprep.mubr.msk.f32.mxu1 %vm5019_vm0, %v5806_v31  ;;  %12985 = vmatmul.mubr.msk.f32.vlgmr.msra.gmra.mxu0 %vm5019_vm0, %v6238_v13  ;;  %v5732_v31 = vmul.f32 %v17002_v15, %v20451_v29  ;;  %v6242_v13 = vsel %vm1326_vm3, %v6239_v12, %v6241_v30  ;;  %v6247_v14 = vrot.slane %v6172_v0, 7  ;;  %v5733_v58 = vmul.f32 %v17009_v22, %v20454_v17  ;;  %v6921_v29 = vld [vmem:[#allocation5 + $0xa0] sm:$0xff] }
 0x2da   : > { %12987 = vmatprep.mubr.msk.f32.mxu0 %vm5019_vm0, %v6240_v3  ;;  %13089 = vmatpush3.msra.mxu0 %v20452_v6  ;;  %v6244_v3 = vsel %vm1326_vm3, %v6241_v30, %v6243_v39  ;;  %v6245_v47 = vrot.slane %v6171_v44, 7  ;;  %v6174_v6 = vmul.f32 %v16875_v48, %v20453_v62  ;;  %v20455_v12 = vld [vmem:[#allocation43_spill] sm:$0xff]  ;;  %v5812_v0 = vsel %vm837_vm2, %v5809_v5, %v5811_v61 }
 0x2db   : > { %13090 = vmatprep.subr.mxu0 %v6923_v7  ;;  %v6173_v35 = vmul.f32 %v16856_v56, %v20455_v12  ;;  %v5815_v30 = vrot.slane %v5732_v31, 1  ;;  %v20458_v31 = vld [vmem:[#allocation45_spill] sm:$0xff] }
 0x2dc   : > { %12947 = vmatmul.mubr.msk.f32.gmra.mxu1 %vm5019_vm0, %v5808_v50  ;;  %13091 = vmatpush3.msra.mxu0 %v6923_v7  ;;  %v5813_v50 = vrot.slane %v5731_v41, 1  ;;  %v20456_v7 = vld [vmem:[#allocation54_spill] sm:$0xff]  ;;  %v6246_v44 = vsel %vm1326_vm3, %v6243_v39, %v6245_v47  ;;  %v6251_v5 = vrot.slane %v6174_v6, 7  ;;  %v6175_v12 = vmul.f32 %v16872_v63, %v20458_v31 }
 0x2dd   : > { %12949 = vmatprep.mubr.msk.f32.mxu1 %vm5019_vm0, %v5810_v24  ;;  %12988 = vmatmul.mubr.msk.f32.gmra.mxu0 %vm5019_vm0, %v6242_v13  ;;  %v5734_v24 = vmul.f32 %v17028_v43, %v20456_v7  ;;  %v6248_v13 = vsel %vm1326_vm3, %v6245_v47, %v6247_v14  ;;  %v20459_v7 = vld [vmem:[#allocation58_spill] sm:$0xff]  ;;  %v6249_v39 = vrot.slane %v6173_v35, 7 }
 0x2de   : > { %12990 = vmatprep.mubr.msk.f32.mxu0 %vm5019_vm0, %v6244_v3  ;;  %13092 = vmatprep.subr.mxu0 %v6922_v21  ;;  %v5814_v41 = vsel %vm837_vm2, %v5811_v61, %v5813_v50  ;;  %v20457_v3 = vld [vmem:[#allocation46_spill] sm:$0xff]  ;;  %v5735_v61 = vmul.f32 %v17034_v46, %v20459_v7  ;;  %v5816_v47 = vsel %vm837_vm2, %v5813_v50, %v5815_v30 }
 0x2df   : > { %13093 = vmatpush3.msra.mxu0 %v6922_v21  ;;  %v6176_v62 = vmul.f32 %v16900_v2, %v20457_v3  ;;  %v17348_v21 = vld [vmem:[#allocation5 + $0xf8] sm:$0xff]  ;;  %v5819_v3 = vrot.slane %v5734_v24, 1  ;;  %v6178_v7 = vmul.f32 %v16935_v27, %v20407_v36  ;;  %v6252_v50 = vsel %vm1326_vm3, %v6249_v39, %v6251_v5 }
 0x2e0   : > { %12950 = vmatmul.mubr.msk.f32.gmra.mxu1 %vm5019_vm0, %v5812_v0  ;;  %13094 = vmatprep.subr.mxu0 %v6921_v29  ;;  %v5817_v0 = vrot.slane %v5733_v58, 1  ;;  %v13867_v58 = vpop.eup %13866  ;;  %v5821_v35 = vrot.slane %v5735_v61, 1  ;;  %v20461_v24 = vld [vmem:[#allocation62_spill] sm:$0xff]  ;;  %v11045_v61 = vadd.f32 -1.0, %v17286_v59 }
 0x2e1   : > { %12952 = vmatprep.mubr.msk.f32.mxu1 %vm5019_vm0, %v5814_v41  ;;  %12991 = vmatmul.mubr.msk.f32.gmra.mxu0 %vm5019_vm0, %v6246_v44  ;;  %v20460_v41 = vld [vmem:[#allocation59_spill] sm:$0xff]  ;;  %v6250_v44 = vsel %vm1326_vm3, %v6247_v14, %v6249_v39  ;;  %v6255_v31 = vrot.slane %v6176_v62, 7  ;;  %v6177_v14 = vmul.f32 %v16904_v49, %v20406_v45  ;;  %v4787_v36 = vadd.f32 1.0, %v13867_v58  ;;  %v20464_v58 = vld [vmem:[#allocation50_spill] sm:$0xff] }
 0x2e2   : > { %12993 = vmatprep.mubr.msk.f32.mxu0 %vm5019_vm0, %v6248_v13  ;;  %v5736_v17 = vmul.f32 %v17064_v55, %v20460_v41  ;;  %13095 = vmatpush3.msra.mxu0 %v6921_v29  ;;  %v5818_v6 = vsel %vm837_vm2, %v5815_v30, %v5817_v0  ;;  %v6253_v29 = vrot.slane %v6175_v12, 7  ;;  %v5737_v30 = vmul.f32 %v17061_v10, %v20461_v24  ;;  %v13869_v45 = vpop.eup %13868  ;;  %v20467_v41 = vld [vmem:[#allocation52_spill] sm:$0xff] }
 0x2e3   : > { %13200 = vmatprep.subr.mxu0 %v17348_v21  ;;  %v5820_v62 = vsel %vm837_vm2, %v5817_v0, %v5819_v3  ;;  %v5822_v12 = vsel %vm837_vm2, %v5819_v3, %v5821_v35  ;;  %v20465_v3 = vld [vmem:[#allocation66_spill] sm:$0xff] }
 0x2e4   : > { %12953 = vmatmul.mubr.msk.f32.gmra.mxu1 %vm5019_vm0, %v5816_v47  ;;  %v5823_v13 = vrot.slane %v5736_v17, 1  ;;  %v20462_v47 = vld [vmem:[#allocation63_spill] sm:$0xff]  ;;  %v6254_v39 = vsel %vm1326_vm3, %v6251_v5, %v6253_v29  ;;  %v20463_v17 = vld [vmem:[#allocation49_spill] sm:$0xff]  ;;  %v5739_v59 = vmul.f32 %v17096_v42, %v20465_v3  ;;  %v6257_v5 = vrot.slane %v6177_v14, 7 }
 0x2e5   : > { %12955 = vmatprep.mubr.msk.f32.mxu1 %vm5019_vm0, %v5818_v6  ;;  %12994 = vmatmul.mubr.msk.f32.gmra.mxu0 %vm5019_vm0, %v6250_v44  ;;  %v5738_v6 = vmul.f32 %v17090_v9, %v20462_v47  ;;  %v6256_v44 = vsel %vm1326_vm3, %v6253_v29, %v6255_v31  ;;  %v6179_v0 = vmul.f32 %v16915_v38, %v20463_v17  ;;  %v5825_v47 = vrot.slane %v5737_v30, 1 }
 0x2e6   : > { %12996 = vmatprep.mubr.msk.f32.mxu0 %vm5019_vm0, %v6252_v50  ;;  %v6259_v50 = vrot.slane %v6178_v7, 7  ;;  %v5824_v7 = vsel %vm837_vm2, %v5821_v35, %v5823_v13  ;;  %v6258_v30 = vsel %vm1326_vm3, %v6255_v31, %v6257_v5  ;;  %v6182_v14 = vmul.f32 %v17002_v15, %v20467_v41 }
 0x2e7   : > { %v5827_v29 = vrot.slane %v5738_v6, 1  ;;  %v5826_v17 = vsel %vm837_vm2, %v5823_v13, %v5825_v47  ;;  %v6261_v35 = vrot.slane %v6179_v0, 7 }
 0x2e8   : > { %12956 = vmatmul.mubr.msk.f32.gmra.mxu1 %vm5019_vm0, %v5820_v62  ;;  %v6180_v62 = vmul.f32 %v16956_v19, %v20464_v58  ;;  %v4945_v58 = vmul.f32 %v13869_v45, %v11045_v61  ;;  %v6260_v3 = vsel %vm1326_vm3, %v6257_v5, %v6259_v50  ;;  %v20469_v45 = vld [vmem:[#allocation51_spill] sm:$0xff]  ;;  %v20470_v5 = vld [vmem:[#allocation100_spill] sm:$0xff] }
 0x2e9   : > { %12958 = vmatprep.mubr.msk.f32.mxu1 %vm5019_vm0, %v5822_v12  ;;  %12997 = vmatmul.mubr.msk.f32.gmra.mxu0 %vm5019_vm0, %v6254_v39  ;;  %v20466_v12 = vld [vmem:[#allocation67_spill] sm:$0xff]  ;;  %v17388_v39 = vmul.f32 %v4787_v36, %v4787_v36  ;;  %v5829_v36 = vrot.slane %v5739_v59, 1  ;;  %v6181_v31 = vmul.f32 %v16948_v8, %v20469_v45  ;;  %v5828_v13 = vsel %vm837_vm2, %v5825_v47, %v5827_v29  ;;  %v20471_v47 = vld [vmem:[#allocation56_spill] sm:$0xff] }
 0x2ea   : > { %12999 = vmatprep.mubr.msk.f32.mxu0 %vm5019_vm0, %v6256_v44  ;;  %v5740_v24 = vmul.f32 %v17119_v40, %v20466_v12  ;;  %v6263_v6 = vrot.slane %v6180_v62, 7  ;;  %v20468_v44 = vld [vmem:[#allocation74_spill] sm:$0xff]  ;;  %v5742_v41 = vmul.f32 %v17141_v51, %v20470_v5  ;;  %v17410_v62 = vmul.f32 %v4945_v58, %v17134_v54 }
 0x2eb   : > { %v5830_v0 = vsel %vm837_vm2, %v5827_v29, %v5829_v36  ;;  %v6267_v59 = vrot.slane %v6182_v14, 7  ;;  %v20472_v29 = vld [vmem:[#allocation101_spill] sm:$0xff] }
 0x2ec   : > { %12959 = vmatmul.mubr.msk.f32.gmra.mxu1 %vm5019_vm0, %v5824_v7  ;;  %v5741_v7 = vmul.f32 %v17124_v1, %v20468_v44  ;;  %v5831_v61 = vrot.slane %v5740_v24, 1  ;;  %v6264_v24 = vsel %vm1326_vm3, %v6261_v35, %v6263_v6  ;;  %v5743_v54 = vmul.f32 %v17147_v11, %v20472_v29 }
 0x2ed   : > { %12961 = vmatprep.mubr.msk.f32.mxu1 %vm5019_vm0, %v5826_v17  ;;  %13000 = vmatmul.mubr.msk.f32.gmra.mxu0 %vm5019_vm0, %v6258_v30  ;;  %v4883_v17 = vadd.f32 1.0, %v17388_v39  ;;  %v6183_v30 = vmul.f32 %v17009_v22, %v20413_v18  ;;  %v5835_v14 = vrot.slane %v5742_v41, 1  ;;  %v20473_v18 = vld [vmem:[#allocation102_spill] sm:$0xff] }
 0x2ee   : > { %13002 = vmatprep.mubr.msk.f32.mxu0 %vm5019_vm0, %v6260_v3  ;;  %v6262_v3 = vsel %vm1326_vm3, %v6259_v50, %v6261_v35  ;;  %v5833_v45 = vrot.slane %v5741_v7, 1  ;;  %v6265_v50 = vrot.slane %v6181_v31, 7  ;;  %v5832_v58 = vsel %vm837_vm2, %v5829_v36, %v5831_v61  ;;  %v20474_v36 = vld [vmem:[#allocation61_spill] sm:$0xff] }
 0x2ef   : > { %13870 = vrcp.f32 %v4883_v17  ;;  %v6186_v41 = vmul.f32 %v17064_v55, %v20474_v36  ;;  %v20479_v36 = vld [vmem:[#allocation64_spill] sm:$0xff] }
 0x2f0   : > { %12962 = vmatmul.mubr.msk.f32.gmra.mxu1 %vm5019_vm0, %v5828_v13  ;;  %v6184_v13 = vmul.f32 %v17028_v43, %v20471_v47  ;;  %v5834_v35 = vsel %vm837_vm2, %v5831_v61, %v5833_v45  ;;  %v6268_v7 = vsel %vm1326_vm3, %v6265_v50, %v6267_v59  ;;  %v6269_v47 = vrot.slane %v6183_v30, 7  ;;  %v20476_v61 = vld [vmem:[#allocation60_spill] sm:$0xff] }
 0x2f1   : > { %12964 = vmatprep.mubr.msk.f32.mxu1 %vm5019_vm0, %v5830_v0  ;;  %13003 = vmatmul.mubr.msk.f32.gmra.mxu0 %vm5019_vm0, %v6262_v3  ;;  %v5744_v0 = vmul.f32 %v17173_v25, %v20473_v18  ;;  %v6266_v3 = vsel %vm1326_vm3, %v6263_v6, %v6265_v50  ;;  %v20475_v18 = vld [vmem:[#allocation104_spill] sm:$0xff]  ;;  %v6185_v6 = vmul.f32 %v17034_v46, %v20476_v61  ;;  %v20477_v50 = vld [vmem:[#allocation103_spill] sm:$0xff]  ;;  %v20478_v61 = vld [vmem:[#allocation65_spill] sm:$0xff] }
 0x2f2   : > { %13005 = vmatprep.mubr.msk.f32.mxu0 %vm5019_vm0, %v6264_v24  ;;  %v6271_v31 = vrot.slane %v6184_v13, 7  ;;  %v5837_v24 = vrot.slane %v5743_v54, 1  ;;  %v5836_v17 = vsel %vm837_vm2, %v5833_v45, %v5835_v14  ;;  %v6270_v54 = vsel %vm1326_vm3, %v6267_v59, %v6269_v47 }
 0x2f3   : > { %v5839_v30 = vrot.slane %v5744_v0, 1  ;;  %v6188_v45 = vmul.f32 %v17090_v9, %v20478_v61 }
 0x2f4   : > { %12965 = vmatmul.mubr.msk.f32.gmra.mxu1 %vm5019_vm0, %v5832_v58  ;;  %v5745_v58 = vmul.f32 %v17180_v57, %v20475_v18  ;;  %v5838_v13 = vsel %vm837_vm2, %v5835_v14, %v5837_v24 }
 0x2f5   : > { %12967 = vmatprep.mubr.msk.f32.mxu1 %vm5019_vm0, %v5834_v35  ;;  %13006 = vmatmul.mubr.msk.f32.gmra.mxu0 %vm5019_vm0, %v6266_v3  ;;  %v5746_v35 = vmul.f32 %v17410_v62, %v20477_v50  ;;  %v6272_v3 = vsel %vm1326_vm3, %v6269_v47, %v6271_v31  ;;  %v6273_v50 = vrot.slane %v6185_v6, 7  ;;  %v5840_v14 = vsel %vm837_vm2, %v5837_v24, %v5839_v30 }
 0x2f6   : > { %13008 = vmatprep.mubr.msk.f32.mxu0 %vm5019_vm0, %v6268_v7  ;;  %v6275_v7 = vrot.slane %v6186_v41, 7  ;;  %v5841_v0 = vrot.slane %v5745_v58, 1  ;;  %v6279_v58 = vrot.slane %v6188_v45, 7  ;;  %v6190_v6 = vmul.f32 %v17119_v40, %v20418_v26 }
 0x2f7   : > { %v5843_v59 = vrot.slane %v5746_v35, 1  ;;  %v6274_v47 = vsel %vm1326_vm3, %v6271_v31, %v6273_v50  ;;  %v20480_v35 = vld [vmem:[#allocation68_spill] sm:$0xff] }
 0x2f8   : > { %12968 = vmatmul.mubr.msk.f32.gmra.mxu1 %vm5019_vm0, %v5836_v17  ;;  %v6187_v17 = vmul.f32 %v17061_v10, %v20479_v36  ;;  %v6276_v41 = vsel %vm1326_vm3, %v6273_v50, %v6275_v7  ;;  %v6283_v50 = vrot.slane %v6190_v6, 7  ;;  %v7375_v6 = vld [vmem:[#allocation5 + $0xc8] sm:$0xff] }
 0x2f9   : > { %12970 = vmatprep.mubr.msk.f32.mxu1 %vm5019_vm0, %v5838_v13  ;;  %13009 = vmatmul.mubr.msk.f32.gmra.mxu0 %vm5019_vm0, %v6270_v54  ;;  %v5842_v13 = vsel %vm837_vm2, %v5839_v30, %v5841_v0  ;;  %v6189_v54 = vmul.f32 %v17096_v42, %v20480_v35  ;;  %v5844_v30 = vsel %vm837_vm2, %v5841_v0, %v5843_v59  ;;  %v20482_v0 = vld [vmem:[#allocation76_spill] sm:$0xff] }
 0x2fa   : > { %13011 = vmatprep.mubr.msk.f32.mxu0 %vm5019_vm0, %v6272_v3  ;;  %v6277_v24 = vrot.slane %v6187_v17, 7  ;;  %v6191_v59 = vmul.f32 %v17124_v1, %v20482_v0  ;;  %v7374_v35 = vld [vmem:[#allocation5 + $0xc0] sm:$0xff] }
 0x2fc   : > { %12971 = vmatmul.mubr.msk.f32.gmra.mxu1 %vm5019_vm0, %v5840_v14  ;;  %v6278_v31 = vsel %vm1326_vm3, %v6275_v7, %v6277_v24  ;;  %v13871_v3 = vpop.eup %13870  ;;  %v6280_v45 = vsel %vm1326_vm3, %v6277_v24, %v6279_v58  ;;  %v20481_v14 = vld [vmem:[#allocation77_spill] sm:$0xff]  ;;  %v11046_v7 = vadd.f32 -1.0, %v17388_v39  ;;  %v6285_v39 = vrot.slane %v6191_v59, 7 }
 0x2fd   : > { %12973 = vmatprep.mubr.msk.f32.mxu1 %vm5019_vm0, %v5842_v13  ;;  %13012 = vmatmul.mubr.msk.f32.gmra.mxu0 %vm5019_vm0, %v6274_v47  ;;  %v6192_v17 = vmul.f32 %v17141_v51, %v20481_v14  ;;  %v6281_v13 = vrot.slane %v6189_v54, 7  ;;  %v7376_v47 = vld [vmem:[#allocation5 + $0xd0] sm:$0xff]  ;;  %v12818_v14 = vpop.f32.mrf.mxu1 }
 0x2fe   : > { %13014 = vmatprep.mubr.msk.f32.mxu0 %vm5019_vm0, %v6276_v41 }
 0x2ff   : > { %v6282_v41 = vsel %vm1326_vm3, %v6279_v58, %v6281_v13  ;;  %v6284_v24 = vsel %vm1326_vm3, %v6281_v13, %v6283_v50  ;;  %v6287_v54 = vrot.slane %v6192_v17, 7  ;;  %v20484_v58 = vld [vmem:[#allocation81_spill] sm:$0xff]  ;;  %v6286_v13 = vsel %vm1326_vm3, %v6283_v50, %v6285_v39 }
 0x300   : > { %12974 = vmatmul.mubr.msk.f32.gmra.mxu1 %vm5019_vm0, %v5844_v30  ;;  %v20483_v30 = vld [vmem:[#allocation83_spill] sm:$0xff]  ;;  %v6193_v0 = vmul.f32 %v17147_v11, %v20484_v58 }
 0x301   : > { %13040 = vmatprep.mubr.msk.f32.mxu1 %vm5019_vm0, %v16787_v28  ;;  %13015 = vmatmul.mubr.msk.f32.gmra.mxu0 %vm5019_vm0, %v6278_v31  ;;  %v6194_v31 = vmul.f32 %v17173_v25, %v20483_v30  ;;  %v6288_v59 = vsel %vm1326_vm3, %v6285_v39, %v6287_v54 }
 0x302   : > { %13017 = vmatprep.mubr.msk.f32.mxu0 %vm5019_vm0, %v6280_v45  ;;  %v4947_v45 = vmul.f32 %v13871_v3, %v11046_v7  ;;  %v17498_v3 = vld [vmem:[#allocation5 + $0x118] sm:$0xff]  ;;  %v6196_v7 = vmul.f32 %v17410_v62, %v20434_v53  ;;  %v6289_v50 = vrot.slane %v6193_v0, 7 }
 0x303   : > { %v20487_v0 = vld [vmem:[#allocation30_spill] sm:$0xff] }
 0x304   : > { %13041 = vmatmul.mubr.msk.f32.vlgmr.msra.gmra.mxu1 %vm5019_vm0, %v16784_v33 }
 0x305   : > { %13043 = vmatprep.mubr.msk.f32.mxu1 %vm5019_vm0, %v16813_v32  ;;  %13145 = vmatpush3.msra.mxu1 %v17251_v23  ;;  %v12874_v23 = vpop.f32.mrf.mxu0 }
 0x306   : > { %13018 = vmatmul.mubr.msk.f32.gmra.mxu0 %vm5019_vm0, %v6282_v41  ;;  %13146 = vmatprep.subr.mxu1 %v7376_v47  ;;  %v17493_v17 = vadd.f32 %v12874_v23, %v12818_v14  ;;  %v17505_v14 = vmul.f32 %v4947_v45, %v17246_v4  ;;  %v20486_v41 = vld [vmem:[#allocation86_spill] sm:$0xff]  ;;  %v6295_v4 = vrot.slane %v6196_v7, 7  ;;  %v20488_v45 = vld [vmem:[#allocation29_spill] sm:$0xff]  ;;  %v20489_v23 = vld [vmem:[#allocation71_spill] sm:$0xff] }
 0x307   : > { %13020 = vmatprep.mubr.msk.f32.mxu0 %vm5019_vm0, %v6284_v24  ;;  %13147 = vmatpush3.msra.mxu1 %v7376_v47  ;;  %v6291_v47 = vrot.slane %v6194_v31, 7  ;;  %v6290_v24 = vsel %vm1326_vm3, %v6287_v54, %v6289_v50  ;;  %v6888_v31 = vmul.f32 %v16787_v28, %v20487_v0  ;;  %v6889_v54 = vmul.f32 %v16784_v33, %v20489_v23 }
 0x308   : > { %13044 = vmatmul.mubr.msk.f32.gmra.mxu1 %vm5019_vm0, %v16810_v20  ;;  %13148 = vmatprep.subr.mxu1 %v7375_v6  ;;  %20485 = vst [vmem:[#allocation117_spill] sm:$0xff] %v17493_v17  ;;  %v6197_v39 = vmul.f32 %v17505_v14, %v20488_v45 }
 0x309   : > { %13046 = vmatprep.mubr.msk.f32.mxu1 %vm5019_vm0, %v16832_v52  ;;  %13149 = vmatpush3.msra.mxu1 %v7375_v6  ;;  %v6195_v6 = vmul.f32 %v17180_v57, %v20486_v41  ;;  %v6292_v53 = vsel %vm1326_vm3, %v6289_v50, %v6291_v47  ;;  %v6957_v50 = vrot.slane %v6888_v31, 1  ;;  %v20515_v41 = vld [vmem:[#allocation35_spill] sm:$0xff] }
 0x30a   : > { %13021 = vmatmul.mubr.msk.f32.gmra.mxu0 %vm5019_vm0, %v6286_v13  ;;  %13150 = vmatprep.subr.mxu1 %v7374_v35 }
 0x30b   : > { %13023 = vmatprep.mubr.msk.f32.mxu0 %vm5019_vm0, %v6288_v59  ;;  %13151 = vmatpush3.msra.mxu1 %v7374_v35  ;;  %v6293_v35 = vrot.slane %v6195_v6, 7  ;;  %v20490_v59 = vld [vmem:[#allocation72_spill] sm:$0xff]  ;;  %v6297_v6 = vrot.slane %v6197_v39, 7 }
 0x30c   : > { %13047 = vmatmul.mubr.msk.f32.gmra.mxu1 %vm5019_vm0, %v16841_v34  ;;  %13256 = vmatprep.subr.mxu1 %v17498_v3  ;;  %v6890_v7 = vmul.f32 %v16813_v32, %v20490_v59  ;;  %v20492_v59 = vld [vmem:[#allocation82_spill] sm:$0xff]  ;;  %v20493_v39 = vld [vmem:[#allocation84_spill] sm:$0xff] }
 0x30d   : > { %13049 = vmatprep.mubr.msk.f32.mxu1 %vm5019_vm0, %v16848_v37  ;;  %v6294_v13 = vsel %vm1326_vm3, %v6291_v47, %v6293_v35  ;;  %v6296_v28 = vsel %vm1326_vm3, %v6293_v35, %v6295_v4  ;;  %v6298_v47 = vsel %vm1326_vm3, %v6295_v4, %v6297_v6  ;;  %v6892_v23 = vmul.f32 %v16832_v52, %v20492_v59  ;;  %v7795_v6 = vld [vmem:[#allocation5 + $0xf0] sm:$0xff] }
 0x30e   : > { %13024 = vmatmul.mubr.msk.f32.gmra.mxu0 %vm5019_vm0, %v6290_v24  ;;  %v6958_v24 = vrot.slane %v6889_v54, 1  ;;  %v6960_v17 = vrot.slane %v6890_v7, 1  ;;  %v6893_v54 = vmul.f32 %v16841_v34, %v20493_v39  ;;  %v20494_v7 = vld [vmem:[#allocation85_spill] sm:$0xff] }
 0x30f   : > { %13026 = vmatprep.mubr.msk.f32.mxu0 %vm5019_vm0, %v6292_v53  ;;  %v20491_v53 = vld [vmem:[#allocation80_spill] sm:$0xff]  ;;  %v20496_v39 = vld [vmem:[#allocation89_spill] sm:$0xff] }
 0x310   : > { %13050 = vmatmul.mubr.msk.f32.gmra.mxu1 %vm5019_vm0, %v16856_v56  ;;  %v6891_v45 = vmul.f32 %v16810_v20, %v20491_v53  ;;  %v6959_v31 = vsel %vm837_vm2, %v6957_v50, %v6958_v24  ;;  %v6961_v4 = vsel %vm837_vm2, %v6958_v24, %v6960_v17 }
 0x311   : > { %13052 = vmatprep.mubr.msk.f32.mxu1 %vm5019_vm0, %v16875_v48 }
 0x312   : > { %13027 = vmatmul.mubr.msk.f32.gmra.mxu0 %vm5019_vm0, %v6294_v13  ;;  %v6962_v35 = vrot.slane %v6891_v45, 1  ;;  %v6964_v13 = vrot.slane %v6892_v23, 1  ;;  %v7794_v45 = vld [vmem:[#allocation5 + $0xe8] sm:$0xff] }
 0x313   : > { %13029 = vmatprep.mubr.msk.f32.mxu0 %vm5019_vm0, %v6296_v28  ;;  %v6894_v28 = vmul.f32 %v16848_v37, %v20494_v7 }
 0x314   : > { %13053 = vmatmul.mubr.msk.f32.gmra.mxu1 %vm5019_vm0, %v16872_v63  ;;  %v6963_v50 = vsel %vm837_vm2, %v6960_v17, %v6962_v35  ;;  %v6965_v24 = vsel %vm837_vm2, %v6962_v35, %v6964_v13 }
 0x315   : > { %13055 = vmatprep.mubr.msk.f32.mxu1 %vm5019_vm0, %v16900_v2  ;;  %v6968_v7 = vrot.slane %v6894_v28, 1 }
 0x316   : > { %13030 = vmatmul.mubr.msk.f32.gmra.mxu0 %vm5019_vm0, %v6298_v47  ;;  %v6966_v47 = vrot.slane %v6893_v54, 1 }
 0x317   : > { %13096 = vmatprep.mubr.msk.f32.mxu0 %vm5019_vm0, %v6959_v31  ;;  %v20495_v31 = vld [vmem:[#allocation88_spill] sm:$0xff] }
 0x318   : > { %13056 = vmatmul.mubr.msk.f32.gmra.mxu1 %vm5019_vm0, %v16904_v49  ;;  %v6895_v23 = vmul.f32 %v16856_v56, %v20495_v31  ;;  %v6967_v17 = vsel %vm837_vm2, %v6964_v13, %v6966_v47  ;;  %v6969_v28 = vsel %vm837_vm2, %v6966_v47, %v6968_v7 }
 0x319   : > { %13058 = vmatprep.mubr.msk.f32.mxu1 %vm5019_vm0, %v16935_v27 }
 0x31a   : > { %13097 = vmatmul.mubr.msk.f32.vlgmr.msra.gmra.mxu0 %vm5019_vm0, %v6961_v4  ;;  %v6896_v4 = vmul.f32 %v16875_v48, %v20496_v39  ;;  %v6970_v54 = vrot.slane %v6895_v23, 1  ;;  %v20498_v39 = vld [vmem:[#allocation91_spill] sm:$0xff]  ;;  %v20499_v23 = vld [vmem:[#allocation92_spill] sm:$0xff] }
 0x31b   : > { %13099 = vmatprep.mubr.msk.f32.mxu0 %vm5019_vm0, %v6963_v50  ;;  %13201 = vmatpush3.msra.mxu0 %v17348_v21  ;;  %v7793_v21 = vld [vmem:[#allocation5 + $0xe0] sm:$0xff]  ;;  %v20497_v50 = vld [vmem:[#allocation90_spill] sm:$0xff] }
 0x31c   : > { %13059 = vmatmul.mubr.msk.f32.gmra.mxu1 %vm5019_vm0, %v16915_v38  ;;  %13202 = vmatprep.subr.mxu0 %v7795_v6  ;;  %v6897_v35 = vmul.f32 %v16872_v63, %v20497_v50  ;;  %v6971_v13 = vsel %vm837_vm2, %v6968_v7, %v6970_v54 }
 0x31d   : > { %13061 = vmatprep.mubr.msk.f32.mxu1 %vm5019_vm0, %v16956_v19  ;;  %13203 = vmatpush3.msra.mxu0 %v7795_v6  ;;  %v6972_v6 = vrot.slane %v6896_v4, 1 }
 0x31e   : > { %13100 = vmatmul.mubr.msk.f32.gmra.mxu0 %vm5019_vm0, %v6965_v24  ;;  %13204 = vmatprep.subr.mxu0 %v7794_v45  ;;  %v6898_v24 = vmul.f32 %v16900_v2, %v20498_v39  ;;  %v20500_v39 = vld [vmem:[#allocation93_spill] sm:$0xff] }
 0x31f   : > { %13102 = vmatprep.mubr.msk.f32.mxu0 %vm5019_vm0, %v6967_v17  ;;  %13205 = vmatpush3.msra.mxu0 %v7794_v45  ;;  %v6974_v45 = vrot.slane %v6897_v35, 1  ;;  %v6899_v17 = vmul.f32 %v16904_v49, %v20499_v23  ;;  %v6973_v47 = vsel %vm837_vm2, %v6970_v54, %v6972_v6  ;;  %v6900_v50 = vmul.f32 %v16935_v27, %v20500_v39 }
 0x320   : > { %13062 = vmatmul.mubr.msk.f32.gmra.mxu1 %vm5019_vm0, %v16948_v8  ;;  %13206 = vmatprep.subr.mxu0 %v7793_v21  ;;  %v6976_v4 = vrot.slane %v6898_v24, 1  ;;  %v6901_v35 = vmul.f32 %v16915_v38, %v20443_v60  ;;  %v20501_v24 = vld [vmem:[#allocation95_spill] sm:$0xff] }
 0x321   : > { %13064 = vmatprep.mubr.msk.f32.mxu1 %vm5019_vm0, %v17002_v15  ;;  %13207 = vmatpush3.msra.mxu0 %v7793_v21  ;;  %v6975_v7 = vsel %vm837_vm2, %v6972_v6, %v6974_v45  ;;  %v6978_v21 = vrot.slane %v6899_v17, 1 }
 0x322   : > { %13103 = vmatmul.mubr.msk.f32.gmra.mxu0 %vm5019_vm0, %v6969_v28  ;;  %v6977_v54 = vsel %vm837_vm2, %v6974_v45, %v6976_v4  ;;  %v6980_v28 = vrot.slane %v6900_v50, 1  ;;  %v6982_v17 = vrot.slane %v6901_v35, 1  ;;  %v17619_v35 = vpop.f32.mrf.mxu1 }
 0x323   : > { %13105 = vmatprep.mubr.msk.f32.mxu0 %vm5019_vm0, %v6971_v13  ;;  %v6902_v13 = vmul.f32 %v16956_v19, %v20501_v24  ;;  %v6979_v6 = vsel %vm837_vm2, %v6976_v4, %v6978_v21  ;;  %v20503_v24 = vld [vmem:[#allocation97_spill] sm:$0xff]  ;;  %20504 = vst [vmem:[#allocation120_spill] sm:$0xff] %v17619_v35 }
 0x324   : > { %13065 = vmatmul.mubr.msk.f32.gmra.mxu1 %vm5019_vm0, %v17009_v22  ;;  %v6981_v50 = vsel %vm837_vm2, %v6978_v21, %v6980_v28  ;;  %v6904_v60 = vmul.f32 %v17002_v15, %v20503_v24  ;;  %v6983_v4 = vsel %vm837_vm2, %v6980_v28, %v6982_v17  ;;  %v20506_v35 = vld [vmem:[#allocation53_spill] sm:$0xff] }
 0x325   : > { %13067 = vmatprep.mubr.msk.f32.mxu1 %vm5019_vm0, %v17028_v43  ;;  %v6984_v45 = vrot.slane %v6902_v13, 1 }
 0x326   : > { %13106 = vmatmul.mubr.msk.f32.gmra.mxu0 %vm5019_vm0, %v6973_v47  ;;  %v20502_v47 = vld [vmem:[#allocation96_spill] sm:$0xff]  ;;  %v6988_v24 = vrot.slane %v6904_v60, 1 }
 0x327   : > { %13108 = vmatprep.mubr.msk.f32.mxu0 %vm5019_vm0, %v6975_v7  ;;  %v6903_v7 = vmul.f32 %v16948_v8, %v20502_v47  ;;  %v6985_v13 = vsel %vm837_vm2, %v6982_v17, %v6984_v45  ;;  %v20505_v47 = vld [vmem:[#allocation99_spill] sm:$0xff] }
 0x328   : > { %13068 = vmatmul.mubr.msk.f32.gmra.mxu1 %vm5019_vm0, %v17034_v46 }
 0x329   : > { %13070 = vmatprep.mubr.msk.f32.mxu1 %vm5019_vm0, %v17064_v55 }
 0x32a   : > { %13109 = vmatmul.mubr.msk.f32.gmra.mxu0 %vm5019_vm0, %v6977_v54  ;;  %v6986_v54 = vrot.slane %v6903_v7, 1 }
 0x32b   : > { %13111 = vmatprep.mubr.msk.f32.mxu0 %vm5019_vm0, %v6979_v6  ;;  %v6905_v6 = vmul.f32 %v17009_v22, %v20450_v16  ;;  %v6907_v16 = vmul.f32 %v17034_v46, %v20506_v35  ;;  %v20508_v35 = vld [vmem:[#allocation58_spill] sm:$0xff] }
 0x32c   : > { %13071 = vmatmul.mubr.msk.f32.gmra.mxu1 %vm5019_vm0, %v17061_v10  ;;  %v6987_v28 = vsel %vm837_vm2, %v6984_v45, %v6986_v54  ;;  %v6989_v60 = vsel %vm837_vm2, %v6986_v54, %v6988_v24  ;;  %v6909_v54 = vmul.f32 %v17061_v10, %v20508_v35  ;;  %v20511_v35 = vld [vmem:[#allocation31_spill] sm:$0xff] }
 0x32d   : > { %13073 = vmatprep.mubr.msk.f32.mxu1 %vm5019_vm0, %v17090_v9  ;;  %v7342_v59 = vmul.f32 %v16784_v33, %v20511_v35 }
 0x32e   : > { %13112 = vmatmul.mubr.msk.f32.gmra.mxu0 %vm5019_vm0, %v6981_v50  ;;  %v6906_v50 = vmul.f32 %v17028_v43, %v20505_v47  ;;  %v20507_v47 = vld [vmem:[#allocation54_spill] sm:$0xff]  ;;  %v6998_v0 = vrot.slane %v6909_v54, 1 }
 0x32f   : > { %13114 = vmatprep.mubr.msk.f32.mxu0 %vm5019_vm0, %v6983_v4  ;;  %v6990_v4 = vrot.slane %v6905_v6, 1  ;;  %v6908_v39 = vmul.f32 %v17064_v55, %v20507_v47  ;;  %v7409_v58 = vrot.slane %v7342_v59, 7 }
 0x330   : > { %13074 = vmatmul.mubr.msk.f32.gmra.mxu1 %vm5019_vm0, %v17096_v42  ;;  %v17626_v21 = vpop.f32.mrf.mxu1  ;;  %v6992_v17 = vrot.slane %v6906_v50, 1  ;;  %v20509_v50 = vld [vmem:[#allocation32_spill] sm:$0xff] }
 0x331   : > { %13076 = vmatprep.mubr.msk.f32.mxu1 %vm5019_vm0, %v17119_v40  ;;  %v6991_v6 = vsel %vm837_vm2, %v6988_v24, %v6990_v4  ;;  %v7343_v47 = vmul.f32 %v16813_v32, %v20509_v50  ;;  %v6996_v31 = vrot.slane %v6908_v39, 1  ;;  %v20512_v50 = vld [vmem:[#allocation62_spill] sm:$0xff] }
 0x332   : > { %13115 = vmatmul.mubr.msk.f32.gmra.mxu0 %vm5019_vm0, %v6985_v13  ;;  %v17635_v7 = vpop.f32.mrf.mxu1  ;;  %v6993_v23 = vsel %vm837_vm2, %v6990_v4, %v6992_v17  ;;  %v6911_v39 = vmul.f32 %v17096_v42, %v20512_v50  ;;  %v20513_v4 = vld [vmem:[#allocation63_spill] sm:$0xff] }
 0x333   : > { %13117 = vmatprep.mubr.msk.f32.mxu0 %vm5019_vm0, %v6987_v28  ;;  %v6994_v28 = vrot.slane %v6907_v16, 1  ;;  %v6999_v54 = vsel %vm837_vm2, %v6996_v31, %v6998_v0 }
 0x334   : > { %13077 = vmatmul.mubr.msk.f32.gmra.mxu1 %vm5019_vm0, %v17124_v1  ;;  %v17647_v45 = vpop.f32.mrf.mxu1 }
 0x335   : > { %13079 = vmatprep.mubr.msk.f32.mxu1 %vm5019_vm0, %v17141_v51  ;;  %v6995_v16 = vsel %vm837_vm2, %v6992_v17, %v6994_v28  ;;  %v7345_v17 = vmul.f32 %v16832_v52, %v20515_v41  ;;  %v6997_v33 = vsel %vm837_vm2, %v6994_v28, %v6996_v31  ;;  %v20518_v28 = vld [vmem:[#allocation66_spill] sm:$0xff]  ;;  %v6914_v31 = vmul.f32 %v17141_v51, %v20466_v12 }
 0x336   : > { %13118 = vmatmul.mubr.msk.f32.gmra.mxu0 %vm5019_vm0, %v6989_v60  ;;  %v17652_v13 = vpop.f32.mrf.mxu1  ;;  %v20510_v60 = vld [vmem:[#allocation59_spill] sm:$0xff] }
 0x337   : > { %13120 = vmatprep.mubr.msk.f32.mxu0 %vm5019_vm0, %v6991_v6  ;;  %v6910_v24 = vmul.f32 %v17090_v9, %v20510_v60  ;;  %v6912_v60 = vmul.f32 %v17119_v40, %v20513_v4 }
 0x338   : > { %13080 = vmatmul.mubr.msk.f32.gmra.mxu1 %vm5019_vm0, %v17147_v11  ;;  %v17665_v6 = vpop.f32.mrf.mxu1 }
 0x339   : > { %13082 = vmatprep.mubr.msk.f32.mxu1 %vm5019_vm0, %v17173_v25  ;;  %v7000_v35 = vrot.slane %v6910_v24, 1  ;;  %v7004_v41 = vrot.slane %v6912_v60, 1  ;;  %v6913_v24 = vmul.f32 %v17124_v1, %v20518_v28 }
 0x33a   : > { %13121 = vmatmul.mubr.msk.f32.gmra.mxu0 %vm5019_vm0, %v6993_v23  ;;  %v17676_v53 = vpop.f32.mrf.mxu1  ;;  %v7410_v23 = vrot.slane %v7343_v47, 7  ;;  %v7002_v47 = vrot.slane %v6911_v39, 1  ;;  %v20520_v39 = vld [vmem:[#allocation36_spill] sm:$0xff] }
 0x33b   : > { %13123 = vmatprep.mubr.msk.f32.mxu0 %vm5019_vm0, %v6995_v16  ;;  %20514 = vst [vmem:[#allocation122_spill] sm:$0xff] %v17676_v53  ;;  %v20516_v16 = vld [vmem:[#allocation34_spill] sm:$0xff]  ;;  %v20519_v53 = vld [vmem:[#allocation37_spill] sm:$0xff]  ;;  %v7001_v59 = vsel %vm837_vm2, %v6998_v0, %v7000_v35  ;;  %v6915_v0 = vmul.f32 %v17147_v11, %v20468_v44  ;;  %v7006_v12 = vrot.slane %v6913_v24, 1 }
 0x33c   : > { %13083 = vmatmul.mubr.msk.f32.gmra.mxu1 %vm5019_vm0, %v17180_v57  ;;  %v7344_v50 = vmul.f32 %v16810_v20, %v20516_v16  ;;  %v17687_v4 = vpop.f32.mrf.mxu1  ;;  %v7411_v16 = vsel %vm1326_vm3, %v7409_v58, %v7410_v23  ;;  %v7003_v58 = vsel %vm837_vm2, %v7000_v35, %v7002_v47  ;;  %v8086_v24 = vld [vmem:[#allocation5 + $0x108] sm:$0xff] }
 0x33d   : > { %13085 = vmatprep.mubr.msk.f32.mxu1 %vm5019_vm0, %v17410_v62  ;;  %20517 = vst [vmem:[#allocation106_spill] sm:$0xff] %v17687_v4  ;;  %v7414_v4 = vrot.slane %v7345_v17, 7 }
 0x33e   : > { %13124 = vmatmul.mubr.msk.f32.gmra.mxu0 %vm5019_vm0, %v6997_v33  ;;  %v17692_v30 = vpop.f32.mrf.mxu1  ;;  %v7347_v33 = vmul.f32 %v16848_v37, %v20519_v53  ;;  %v7412_v60 = vrot.slane %v7344_v50, 7  ;;  %v7005_v53 = vsel %vm837_vm2, %v7002_v47, %v7004_v41  ;;  %v8087_v50 = vld [vmem:[#allocation5 + $0x110] sm:$0xff]  ;;  %v6916_v47 = vmul.f32 %v17173_v25, %v20470_v5 }
 0x33f   : > { %13126 = vmatprep.mubr.msk.f32.mxu0 %vm5019_vm0, %v6999_v54  ;;  %v7346_v54 = vmul.f32 %v16841_v34, %v20520_v39 }
 0x340   : > { %13086 = vmatmul.mubr.msk.f32.gmra.mxu1 %vm5019_vm0, %v17505_v14  ;;  %v7413_v17 = vsel %vm1326_vm3, %v7410_v23, %v7412_v60  ;;  %v7415_v39 = vsel %vm1326_vm3, %v7412_v60, %v7414_v4  ;;  %v20524_v23 = vld [vmem:[#allocation41_spill] sm:$0xff] }
 0x341   : > { %13152 = vmatprep.mubr.msk.f32.mxu1 %vm5019_vm0, %v7411_v16  ;;  %v17707_v28 = vpop.f32.mrf.mxu1  ;;  %v7416_v44 = vrot.slane %v7346_v54, 7 }
 0x342   : > { %20521 = vst [vmem:[#allocation108_spill] sm:$0xff] %v17707_v28  ;;  %13127 = vmatmul.mubr.msk.f32.gmra.mxu0 %vm5019_vm0, %v7001_v59  ;;  %v7418_v59 = vrot.slane %v7347_v33, 7  ;;  %v20523_v28 = vld [vmem:[#allocation42_spill] sm:$0xff]  ;;  %v7007_v33 = vsel %vm837_vm2, %v7004_v41, %v7006_v12 }
 0x343   : > { %13129 = vmatprep.mubr.msk.f32.mxu0 %vm5019_vm0, %v7003_v58  ;;  %v17716_v16 = vpop.f32.mrf.mxu1  ;;  %v7349_v35 = vmul.f32 %v16875_v48, %v20523_v28  ;;  %v7008_v58 = vrot.slane %v6914_v31, 1  ;;  %v7010_v28 = vrot.slane %v6915_v0, 1  ;;  %v6917_v31 = vmul.f32 %v17180_v57, %v20472_v29 }
 0x344   : > { %20522 = vst [vmem:[#allocation107_spill] sm:$0xff] %v17716_v16  ;;  %13153 = vmatmul.mubr.msk.f32.vlgmr.msra.gmra.mxu1 %vm5019_vm0, %v7413_v17  ;;  %v7348_v16 = vmul.f32 %v16856_v56, %v20524_v23  ;;  %v7417_v54 = vsel %vm1326_vm3, %v7414_v4, %v7416_v44  ;;  %v8085_v17 = vld [vmem:[#allocation5 + $0x100] sm:$0xff]  ;;  %v7419_v41 = vsel %vm1326_vm3, %v7416_v44, %v7418_v59 }
 0x345   : > { %13155 = vmatprep.mubr.msk.f32.mxu1 %vm5019_vm0, %v7415_v39  ;;  %13257 = vmatpush3.msra.mxu1 %v17498_v3  ;;  %v17730_v60 = vpop.f32.mrf.mxu1  ;;  %v20526_v39 = vld [vmem:[#allocation102_spill] sm:$0xff]  ;;  %v20527_v23 = vld [vmem:[#allocation44_spill] sm:$0xff]  ;;  %v7009_v0 = vsel %vm837_vm2, %v7006_v12, %v7008_v58  ;;  %v7011_v44 = vsel %vm837_vm2, %v7008_v58, %v7010_v28 }
 0x346   : > { %13130 = vmatmul.mubr.msk.f32.gmra.mxu0 %vm5019_vm0, %v7005_v53  ;;  %20525 = vst [vmem:[#allocation119_spill] sm:$0xff] %v17730_v60  ;;  %13258 = vmatprep.subr.mxu1 %v8087_v50  ;;  %v6918_v3 = vmul.f32 %v17410_v62, %v20526_v39  ;;  %v7422_v53 = vrot.slane %v7349_v35, 7  ;;  %v7351_v5 = vmul.f32 %v16900_v2, %v20527_v23  ;;  %v7420_v4 = vrot.slane %v7348_v16, 7  ;;  %v20530_v23 = vld [vmem:[#allocation45_spill] sm:$0xff] }
 0x347   : > { %13132 = vmatprep.mubr.msk.f32.mxu0 %vm5019_vm0, %v7007_v33  ;;  %13259 = vmatpush3.msra.mxu1 %v8087_v50  ;;  %v7012_v33 = vrot.slane %v6916_v47, 1  ;;  %v20528_v50 = vld [vmem:[#allocation43_spill] sm:$0xff]  ;;  %v17746_v60 = vpop.f32.mrf.mxu1  ;;  %v7014_v35 = vrot.slane %v6917_v31, 1  ;;  %v6919_v16 = vmul.f32 %v17505_v14, %v20475_v18 }
 0x348   : > { %13156 = vmatmul.mubr.msk.f32.gmra.mxu1 %vm5019_vm0, %v7417_v54  ;;  %13260 = vmatprep.subr.mxu1 %v8086_v24  ;;  %v7350_v29 = vmul.f32 %v16872_v63, %v20528_v50  ;;  %v7421_v12 = vsel %vm1326_vm3, %v7418_v59, %v7420_v4  ;;  %v7423_v47 = vsel %vm1326_vm3, %v7420_v4, %v7422_v53  ;;  %v7426_v54 = vrot.slane %v7351_v5, 7  ;;  %v17768_v4 = vpop.f32.mrf.mxu0 }
 0x349   : > { %13158 = vmatprep.mubr.msk.f32.mxu1 %vm5019_vm0, %v7419_v41  ;;  %13261 = vmatpush3.msra.mxu1 %v8086_v24  ;;  %v20529_v24 = vld [vmem:[#allocation46_spill] sm:$0xff]  ;;  %v7013_v58 = vsel %vm837_vm2, %v7010_v28, %v7012_v33  ;;  %v7016_v41 = vrot.slane %v6918_v3, 1  ;;  %v7352_v59 = vmul.f32 %v16904_v49, %v20530_v23  ;;  %v7015_v18 = vsel %vm837_vm2, %v7012_v33, %v7014_v35  ;;  %v20532_v3 = vld [vmem:[#allocation48_spill] sm:$0xff] }
 0x34a   : > { %13133 = vmatmul.mubr.msk.f32.gmra.mxu0 %vm5019_vm0, %v7009_v0  ;;  %13262 = vmatprep.subr.mxu1 %v8085_v17  ;;  %v7353_v39 = vmul.f32 %v16935_v27, %v20529_v24  ;;  %v7424_v31 = vrot.slane %v7350_v29, 7  ;;  %v7018_v0 = vrot.slane %v6919_v16, 1  ;;  %20531 = vst [vmem:[#allocation126_spill] sm:$0xff] %v17768_v4  ;;  %v7355_v50 = vmul.f32 %v16956_v19, %v20532_v3 }
 0x34b   : > { %13135 = vmatprep.mubr.msk.f32.mxu0 %vm5019_vm0, %v7011_v44  ;;  %13263 = vmatpush3.msra.mxu1 %v8085_v17  ;;  %v7428_v33 = vrot.slane %v7352_v59, 7  ;;  %v20534_v59 = vld [vmem:[#allocation50_spill] sm:$0xff]  ;;  %v20555_v4 = vld [vmem:[#allocation107_spill] sm:$0xff] }
 0x34c   : > { %13159 = vmatmul.mubr.msk.f32.gmra.mxu1 %vm5019_vm0, %v7421_v12  ;;  %v7425_v5 = vsel %vm1326_vm3, %v7422_v53, %v7424_v31  ;;  %v7427_v29 = vsel %vm1326_vm3, %v7424_v31, %v7426_v54  ;;  %v7430_v28 = vrot.slane %v7353_v39, 7  ;;  %v7017_v12 = vsel %vm837_vm2, %v7014_v35, %v7016_v41 }
 0x34d   : > { %13161 = vmatprep.mubr.msk.f32.mxu1 %vm5019_vm0, %v7423_v47  ;;  %v17762_v17 = vpop.f32.mrf.mxu1  ;;  %v20533_v47 = vld [vmem:[#allocation47_spill] sm:$0xff]  ;;  %v7019_v16 = vsel %vm837_vm2, %v7016_v41, %v7018_v0  ;;  %v7434_v23 = vrot.slane %v7355_v50, 7  ;;  %v20535_v41 = vld [vmem:[#allocation105_spill] sm:$0xff] }
 0x34e   : > { %13136 = vmatmul.mubr.msk.f32.gmra.mxu0 %vm5019_vm0, %v7013_v58  ;;  %v7354_v53 = vmul.f32 %v16915_v38, %v20533_v47  ;;  %v7429_v58 = vsel %vm1326_vm3, %v7426_v54, %v7428_v33  ;;  %v7431_v35 = vsel %vm1326_vm3, %v7428_v33, %v7430_v28  ;;  %v20536_v54 = vld [vmem:[#allocation49_spill] sm:$0xff] }
 0x34f   : > { %13138 = vmatprep.mubr.msk.f32.mxu0 %vm5019_vm0, %v7015_v18  ;;  %v17774_v44 = vpop.f32.mrf.mxu1  ;;  %v7357_v18 = vmul.f32 %v17002_v15, %v20534_v59  ;;  %v20540_v59 = vld [vmem:[#allocation56_spill] sm:$0xff] }
 0x350   : > { %13162 = vmatmul.mubr.msk.f32.gmra.mxu1 %vm5019_vm0, %v7425_v5 }
 0x351   : > { %13164 = vmatprep.mubr.msk.f32.mxu1 %vm5019_vm0, %v7427_v29  ;;  %v12877_v24 = vpop.f32.mrf.mxu0  ;;  %v17791_v5 = vpop.f32.mrf.mxu1  ;;  %v7020_v29 = vsel %vm837_vm2, %v7018_v0, %v20535_v41  ;;  %v7438_v33 = vrot.slane %v7357_v18, 7  ;;  %v7361_v18 = vmul.f32 %v17064_v55, %v20540_v59 }
 0x352   : > { %13139 = vmatmul.mubr.msk.f32.gmra.mxu0 %vm5019_vm0, %v7017_v12  ;;  %v17784_v39 = vadd.f32 %v12877_v24, %v17626_v21  ;;  %v7432_v21 = vrot.slane %v7354_v53, 7  ;;  %v7356_v12 = vmul.f32 %v16948_v8, %v20536_v54  ;;  %v20539_v24 = vld [vmem:[#allocation51_spill] sm:$0xff] }
 0x353   : > { %13141 = vmatprep.mubr.msk.f32.mxu0 %vm5019_vm0, %v7019_v16  ;;  %v5567_v31 = vpop.f32.mrf.mxu0  ;;  %v17809_v16 = vpop.f32.mrf.mxu1  ;;  %v20541_v54 = vld [vmem:[#allocation55_spill] sm:$0xff] }
 0x354   : > { %13165 = vmatmul.mubr.msk.f32.gmra.mxu1 %vm5019_vm0, %v7429_v58  ;;  %v17796_v3 = vadd.f32 %v5567_v31, %v17635_v7  ;;  %v7433_v50 = vsel %vm1326_vm3, %v7430_v28, %v7432_v21  ;;  %v7435_v0 = vsel %vm1326_vm3, %v7432_v21, %v7434_v23  ;;  %v20537_v7 = vld [vmem:[#allocation52_spill] sm:$0xff]  ;;  %20538 = vst [vmem:[#allocation129_spill] sm:$0xff] %v17809_v16  ;;  %v7436_v53 = vrot.slane %v7356_v12, 7 }
 0x355   : > { %13167 = vmatprep.mubr.msk.f32.mxu1 %vm5019_vm0, %v7431_v35  ;;  %v7359_v47 = vmul.f32 %v17028_v43, %v20537_v7  ;;  %v7358_v58 = vmul.f32 %v17009_v22, %v20539_v24  ;;  %v7360_v12 = vmul.f32 %v17034_v46, %v20541_v54  ;;  %v7446_v24 = vrot.slane %v7361_v18, 7 }
 0x356   : > { %13142 = vmatmul.mubr.msk.f32.gmra.mxu0 %vm5019_vm0, %v7020_v29  ;;  %v7437_v28 = vsel %vm1326_vm3, %v7434_v23, %v7436_v53  ;;  %v7439_v31 = vsel %vm1326_vm3, %v7436_v53, %v7438_v33 }
 0x357   : > { %13208 = vmatprep.mubr.msk.f32.mxu0 %vm5019_vm0, %v16813_v32  ;;  %v7442_v35 = vrot.slane %v7359_v47, 7  ;;  %v7440_v21 = vrot.slane %v7358_v58, 7  ;;  %v20543_v58 = vld [vmem:[#allocation61_spill] sm:$0xff] }
 0x358   : > { %13168 = vmatmul.mubr.msk.f32.gmra.mxu1 %vm5019_vm0, %v7433_v50 }
 0x359   : > { %13170 = vmatprep.mubr.msk.f32.mxu1 %vm5019_vm0, %v7435_v0  ;;  %v7441_v7 = vsel %vm1326_vm3, %v7438_v33, %v7440_v21  ;;  %v7443_v53 = vsel %vm1326_vm3, %v7440_v21, %v7442_v35  ;;  %v7365_v21 = vmul.f32 %v17119_v40, %v20478_v61 }
 0x35a   : > { %13209 = vmatmul.mubr.msk.f32.vlgmr.msra.gmra.mxu0 %vm5019_vm0, %v16810_v20 }
 0x35b   : > { %13211 = vmatprep.mubr.msk.f32.mxu0 %vm5019_vm0, %v16832_v52 }
 0x35c   : > { %13171 = vmatmul.mubr.msk.f32.gmra.mxu1 %vm5019_vm0, %v7437_v28  ;;  %v17823_v41 = vpop.f32.mrf.mxu1  ;;  %v12880_v29 = vpop.f32.mrf.mxu0  ;;  %v7444_v28 = vrot.slane %v7360_v12, 7  ;;  %v7364_v12 = vmul.f32 %v17096_v42, %v20479_v36  ;;  %v7454_v36 = vrot.slane %v7365_v21, 7 }
 0x35d   : > { %13173 = vmatprep.mubr.msk.f32.mxu1 %vm5019_vm0, %v7439_v31  ;;  %v17831_v23 = vadd.f32 %v12880_v29, %v17647_v45  ;;  %v7363_v45 = vmul.f32 %v17090_v9, %v20543_v58  ;;  %v20544_v31 = vld [vmem:[#allocation60_spill] sm:$0xff] }
 0x35e   : > { %13212 = vmatmul.mubr.msk.f32.gmra.mxu0 %vm5019_vm0, %v16841_v34  ;;  %v17833_v50 = vpop.f32.mrf.mxu1  ;;  %v5577_v0 = vpop.f32.mrf.mxu0  ;;  %v7362_v59 = vmul.f32 %v17061_v10, %v20544_v31  ;;  %v7447_v18 = vsel %vm1326_vm3, %v7444_v28, %v7446_v24 }
 0x35f   : > { %20542 = vst [vmem:[#allocation114_spill] sm:$0xff] %v17833_v50  ;;  %13214 = vmatprep.mubr.msk.f32.mxu0 %vm5019_vm0, %v16848_v37  ;;  %v17839_v47 = vadd.f32 %v5577_v0, %v17652_v13  ;;  %v7445_v13 = vsel %vm1326_vm3, %v7442_v35, %v7444_v28  ;;  %v7450_v29 = vrot.slane %v7363_v45, 7  ;;  %v7367_v45 = vmul.f32 %v17141_v51, %v20418_v26  ;;  %v20546_v28 = vld [vmem:[#allocation122_spill] sm:$0xff] }
 0x360   : > { %13174 = vmatmul.mubr.msk.f32.gmra.mxu1 %vm5019_vm0, %v7441_v7  ;;  %v7448_v54 = vrot.slane %v7362_v59, 7 }
 0x361   : > { %13176 = vmatprep.mubr.msk.f32.mxu1 %vm5019_vm0, %v7443_v53 }
 0x362   : > { %13215 = vmatmul.mubr.msk.f32.gmra.mxu0 %vm5019_vm0, %v16856_v56  ;;  %v17850_v33 = vpop.f32.mrf.mxu1  ;;  %v7449_v61 = vsel %vm1326_vm3, %v7446_v24, %v7448_v54  ;;  %v7451_v58 = vsel %vm1326_vm3, %v7448_v54, %v7450_v29  ;;  %v20548_v54 = vld [vmem:[#allocation106_spill] sm:$0xff] }
 0x363   : > { %13217 = vmatprep.mubr.msk.f32.mxu0 %vm5019_vm0, %v16875_v48 }
 0x364   : > { %13177 = vmatmul.mubr.msk.f32.gmra.mxu1 %vm5019_vm0, %v7445_v13  ;;  %v17862_v0 = vpop.f32.mrf.mxu1  ;;  %v12883_v7 = vpop.f32.mrf.mxu0  ;;  %v20547_v13 = vld [vmem:[#allocation68_spill] sm:$0xff] }
 0x365   : > { %13179 = vmatprep.mubr.msk.f32.mxu1 %vm5019_vm0, %v7447_v18  ;;  %20545 = vst [vmem:[#allocation125_spill] sm:$0xff] %v17862_v0  ;;  %v17867_v35 = vadd.f32 %v12883_v7, %v17665_v6  ;;  %v7452_v6 = vrot.slane %v7364_v12, 7  ;;  %v7366_v24 = vmul.f32 %v17124_v1, %v20547_v13 }
 0x366   : > { %13218 = vmatmul.mubr.msk.f32.gmra.mxu0 %vm5019_vm0, %v16872_v63  ;;  %v5587_v53 = vpop.f32.mrf.mxu0 }
 0x367   : > { %13220 = vmatprep.mubr.msk.f32.mxu0 %vm5019_vm0, %v16900_v2  ;;  %v17877_v31 = vadd.f32 %v5587_v53, %v20546_v28  ;;  %v7453_v26 = vsel %vm1326_vm3, %v7450_v29, %v7452_v6  ;;  %v7458_v53 = vrot.slane %v7367_v45, 7 }
 0x368   : > { %13180 = vmatmul.mubr.msk.f32.gmra.mxu1 %vm5019_vm0, %v7449_v61  ;;  %v17880_v59 = vpop.f32.mrf.mxu1  ;;  %v12886_v18 = vpop.f32.mrf.mxu0  ;;  %v7455_v61 = vsel %vm1326_vm3, %v7452_v6, %v7454_v36  ;;  %v20552_v6 = vld [vmem:[#allocation108_spill] sm:$0xff] }
 0x369   : > { %13182 = vmatprep.mubr.msk.f32.mxu1 %vm5019_vm0, %v7451_v58  ;;  %v17887_v21 = vadd.f32 %v12886_v18, %v20548_v54  ;;  %v20550_v58 = vld [vmem:[#allocation77_spill] sm:$0xff]  ;;  %v7456_v18 = vrot.slane %v7366_v24, 7  ;;  %v20551_v54 = vld [vmem:[#allocation76_spill] sm:$0xff] }
 0x36a   : > { %13221 = vmatmul.mubr.msk.f32.gmra.mxu0 %vm5019_vm0, %v16904_v49  ;;  %v17892_v7 = vpop.f32.mrf.mxu1  ;;  %v5597_v12 = vpop.f32.mrf.mxu0  ;;  %v7369_v28 = vmul.f32 %v17173_v25, %v20550_v58  ;;  %v7368_v29 = vmul.f32 %v17147_v11, %v20551_v54  ;;  %v20554_v54 = vld [vmem:[#allocation83_spill] sm:$0xff] }
 0x36b   : > { %13223 = vmatprep.mubr.msk.f32.mxu0 %vm5019_vm0, %v16935_v27  ;;  %20549 = vst [vmem:[#allocation131_spill] sm:$0xff] %v17892_v7  ;;  %v17899_v13 = vadd.f32 %v5597_v12, %v17692_v30  ;;  %v7457_v30 = vsel %vm1326_vm3, %v7454_v36, %v7456_v18  ;;  %v7459_v24 = vsel %vm1326_vm3, %v7456_v18, %v7458_v53  ;;  %v20557_v18 = vld [vmem:[#allocation119_spill] sm:$0xff] }
 0x36c   : > { %13183 = vmatmul.mubr.msk.f32.gmra.mxu1 %vm5019_vm0, %v7453_v26  ;;  %v12889_v0 = vpop.f32.mrf.mxu0  ;;  %v7371_v7 = vmul.f32 %v17410_v62, %v20554_v54  ;;  %v20558_v54 = vld [vmem:[#allocation86_spill] sm:$0xff] }
 0x36d   : > { %13185 = vmatprep.mubr.msk.f32.mxu1 %vm5019_vm0, %v7455_v61  ;;  %v17906_v26 = vpop.f32.mrf.mxu1  ;;  %v17909_v45 = vadd.f32 %v12889_v0, %v20552_v6  ;;  %v7462_v61 = vrot.slane %v7369_v28, 7  ;;  %v7460_v0 = vrot.slane %v7368_v29, 7  ;;  %v20556_v6 = vld [vmem:[#allocation81_spill] sm:$0xff] }
 0x36e   : > { %13224 = vmatmul.mubr.msk.f32.gmra.mxu0 %vm5019_vm0, %v16915_v38  ;;  %v5607_v12 = vpop.f32.mrf.mxu0  ;;  %v7370_v36 = vmul.f32 %v17180_v57, %v20556_v6  ;;  %v7372_v6 = vmul.f32 %v17505_v14, %v20558_v54 }
 0x36f   : > { %13226 = vmatprep.mubr.msk.f32.mxu0 %vm5019_vm0, %v16956_v19  ;;  %v17916_v58 = vpop.f32.mrf.mxu1  ;;  %v17921_v50 = vadd.f32 %v5607_v12, %v20555_v4  ;;  %v7463_v29 = vsel %vm1326_vm3, %v7460_v0, %v7462_v61 }
 0x370   : > { %13186 = vmatmul.mubr.msk.f32.gmra.mxu1 %vm5019_vm0, %v7457_v30  ;;  %20553 = vst [vmem:[#allocation116_spill] sm:$0xff] %v17916_v58  ;;  %v12892_v16 = vpop.f32.mrf.mxu0  ;;  %v7461_v30 = vsel %vm1326_vm3, %v7458_v53, %v7460_v0 }
 0x371   : > { %13188 = vmatprep.mubr.msk.f32.mxu1 %vm5019_vm0, %v7459_v24  ;;  %v17929_v28 = vadd.f32 %v12892_v16, %v20557_v18  ;;  %v7466_v24 = vrot.slane %v7371_v7, 7  ;;  %v7464_v16 = vrot.slane %v7370_v36, 7 }
 0x372   : > { %13227 = vmatmul.mubr.msk.f32.gmra.mxu0 %vm5019_vm0, %v16948_v8  ;;  %v5617_v12 = vpop.f32.mrf.mxu0 }
 0x373   : > { %13229 = vmatprep.mubr.msk.f32.mxu0 %vm5019_vm0, %v17002_v15  ;;  %v17934_v4 = vpop.f32.mrf.mxu1  ;;  %v17941_v58 = vadd.f32 %v5617_v12, %v17746_v60  ;;  %v7465_v7 = vsel %vm1326_vm3, %v7462_v61, %v7464_v16  ;;  %v7467_v60 = vsel %vm1326_vm3, %v7464_v16, %v7466_v24  ;;  %v7468_v12 = vrot.slane %v7372_v6, 7  ;;  %v20561_v61 = vld [vmem:[#allocation71_spill] sm:$0xff]  ;;  %v20562_v6 = vld [vmem:[#allocation72_spill] sm:$0xff] }
 0x374   : > { %13189 = vmatmul.mubr.msk.f32.gmra.mxu1 %vm5019_vm0, %v7461_v30  ;;  %v12895_v53 = vpop.f32.mrf.mxu0 }
 0x375   : > { %13191 = vmatprep.mubr.msk.f32.mxu1 %vm5019_vm0, %v7463_v29  ;;  %v17944_v18 = vpop.f32.mrf.mxu1  ;;  %v17949_v30 = vadd.f32 %v12895_v53, %v17762_v17  ;;  %v20560_v29 = vld [vmem:[#allocation30_spill] sm:$0xff]  ;;  %v8055_v53 = vmul.f32 %v16810_v20, %v20561_v61 }
 0x376   : > { %20559 = vst [vmem:[#allocation128_spill] sm:$0xff] %v17944_v18  ;;  %13230 = vmatmul.mubr.msk.f32.gmra.mxu0 %vm5019_vm0, %v17009_v22  ;;  %v5627_v0 = vpop.f32.mrf.mxu0  ;;  %v8054_v54 = vmul.f32 %v16813_v32, %v20560_v29  ;;  %v7469_v32 = vsel %vm1326_vm3, %v7466_v24, %v7468_v12 }
 0x377   : > { %13232 = vmatprep.mubr.msk.f32.mxu0 %vm5019_vm0, %v17028_v43  ;;  %v17956_v36 = vpop.f32.mrf.mxu1  ;;  %v17961_v18 = vadd.f32 %v5627_v0, %v17774_v44  ;;  %v8056_v44 = vmul.f32 %v16832_v52, %v20562_v6  ;;  %v20563_v0 = vld [vmem:[#allocation123_spill] sm:$0xff]  ;;  %v8120_v24 = vrot.slane %v8055_v53, 1 }
 0x378   : > { %13192 = vmatmul.mubr.msk.f32.gmra.mxu1 %vm5019_vm0, %v7465_v7  ;;  %v12898_v17 = vpop.f32.mrf.mxu0  ;;  %v8119_v20 = vrot.slane %v8054_v54, 1 }
 0x379   : > { %13194 = vmatprep.mubr.msk.f32.mxu1 %vm5019_vm0, %v7467_v60  ;;  %v17969_v16 = vadd.f32 %v12898_v17, %v17791_v5  ;;  %v7470_v60 = vsel %vm1326_vm3, %v7468_v12, %v20563_v0  ;;  %v17981_v29 = vpop.f32.mrf.mxu1  ;;  %v20565_v17 = vld [vmem:[#allocation80_spill] sm:$0xff]  ;;  %v8122_v12 = vrot.slane %v8056_v44, 1 }
 0x37a   : > { %13233 = vmatmul.mubr.msk.f32.gmra.mxu0 %vm5019_vm0, %v17034_v46  ;;  %v17976_v7 = vpop.f32.mrf.mxu0  ;;  %20564 = vst [vmem:[#allocation133_spill] sm:$0xff] %v17981_v29  ;;  %v8057_v52 = vmul.f32 %v16841_v34, %v20565_v17  ;;  %v8121_v53 = vsel %vm837_vm2, %v8119_v20, %v8120_v24 }
 0x37b   : > { %13235 = vmatprep.mubr.msk.f32.mxu0 %vm5019_vm0, %v17064_v55  ;;  %v8123_v20 = vsel %vm837_vm2, %v8120_v24, %v8122_v12 }
 0x37c   : > { %13195 = vmatmul.mubr.msk.f32.gmra.mxu1 %vm5019_vm0, %v7469_v32  ;;  %v12901_v5 = vpop.f32.mrf.mxu0  ;;  %v20566_v32 = vld [vmem:[#allocation82_spill] sm:$0xff]  ;;  %v8124_v44 = vrot.slane %v8057_v52, 1 }
 0x37d   : > { %13197 = vmatprep.mubr.msk.f32.mxu1 %vm5019_vm0, %v7470_v60  ;;  %v17989_v61 = vadd.f32 %v12901_v5, %v17823_v41  ;;  %v8058_v54 = vmul.f32 %v16848_v37, %v20566_v32  ;;  %v20568_v60 = vld [vmem:[#allocation124_spill] sm:$0xff] }
 0x37e   : > { %13236 = vmatmul.mubr.msk.f32.gmra.mxu0 %vm5019_vm0, %v17061_v10  ;;  %v17995_v6 = vpop.f32.mrf.mxu0  ;;  %v20570_v5 = vld [vmem:[#allocation84_spill] sm:$0xff]  ;;  %v8125_v52 = vsel %vm837_vm2, %v8122_v12, %v8124_v44 }
 0x37f   : > { %13238 = vmatprep.mubr.msk.f32.mxu0 %vm5019_vm0, %v17090_v9  ;;  %20567 = vst [vmem:[#allocation130_spill] sm:$0xff] %v17995_v6  ;;  %v8059_v37 = vmul.f32 %v16856_v56, %v20570_v5  ;;  %v8126_v32 = vrot.slane %v8058_v54, 1  ;;  %v20572_v56 = vld [vmem:[#allocation117_spill] sm:$0xff] }
 0x380   : > { %v17997_v0 = vpop.f32.mrf.mxu1  ;;  %13198 = vmatmul.mubr.msk.f32.gmra.mxu1 %vm5019_vm0, %v20568_v60  ;;  %v12904_v34 = vpop.f32.mrf.mxu0  ;;  %v20571_v60 = vld [vmem:[#allocation85_spill] sm:$0xff] }
 0x381   : > { %13264 = vmatprep.mubr.msk.f32.mxu1 %vm5019_vm0, %v8121_v53  ;;  %v18010_v17 = vadd.f32 %v12904_v34, %v17850_v33  ;;  %v8060_v53 = vmul.f32 %v16875_v48, %v20571_v60  ;;  %v8128_v54 = vrot.slane %v8059_v37, 1  ;;  %v20573_v48 = vld [vmem:[#allocation88_spill] sm:$0xff]  ;;  %v20574_v60 = vld [vmem:[#allocation89_spill] sm:$0xff] }
 0x382   : > { %13239 = vmatmul.mubr.msk.f32.gmra.mxu0 %vm5019_vm0, %v17096_v42  ;;  %v18005_v41 = vpop.f32.mrf.mxu1  ;;  %v18017_v29 = vpop.f32.mrf.mxu0  ;;  %v8061_v34 = vmul.f32 %v16872_v63, %v20573_v48 }
 0x383   : > { %20569 = vst [vmem:[#allocation132_spill] sm:$0xff] %v18005_v41  ;;  %13241 = vmatprep.mubr.msk.f32.mxu0 %vm5019_vm0, %v17119_v40  ;;  %v8129_v37 = vsel %vm837_vm2, %v8126_v32, %v8128_v54 }
 0x384   : > { %v12930_v6 = vpop.f32.mrf.mxu1  ;;  %13265 = vmatmul.mubr.msk.f32.vlgmr.msra.gmra.mxu1 %vm5019_vm0, %v8123_v20  ;;  %v12907_v33 = vpop.f32.mrf.mxu0  ;;  %v8062_v20 = vmul.f32 %v16900_v2, %v20574_v60 }
 0x385   : > { %v18022_v5 = vadd.f32 %v12930_v6, %v20572_v56  ;;  %13267 = vmatprep.mubr.msk.f32.mxu1 %vm5019_vm0, %v8125_v52  ;;  %v18034_v12 = vadd.f32 %v12907_v33, %v17880_v59  ;;  %v8127_v6 = vsel %vm837_vm2, %v8124_v44, %v8126_v32  ;;  %v8130_v52 = vrot.slane %v8060_v53, 1  ;;  %v20575_v53 = vld [vmem:[#allocation90_spill] sm:$0xff]  ;;  %v20576_v32 = vld [vmem:[#allocation91_spill] sm:$0xff] }
 0x386   : > { %13242 = vmatmul.mubr.msk.f32.gmra.mxu0 %vm5019_vm0, %v17124_v1  ;;  %v18027_v24 = vpop.f32.mrf.mxu1  ;;  %v18039_v56 = vpop.f32.mrf.mxu0  ;;  %v8132_v33 = vrot.slane %v8061_v34, 1  ;;  %v8134_v44 = vrot.slane %v8062_v20, 1  ;;  %v8063_v48 = vmul.f32 %v16904_v49, %v20575_v53 }
 0x387   : > { %13244 = vmatprep.mubr.msk.f32.mxu0 %vm5019_vm0, %v17141_v51 }
 0x388   : > { %v12933_v41 = vpop.f32.mrf.mxu1  ;;  %13268 = vmatmul.mubr.msk.f32.gmra.mxu1 %vm5019_vm0, %v8127_v6  ;;  %v12910_v2 = vpop.f32.mrf.mxu0  ;;  %v8064_v6 = vmul.f32 %v16935_v27, %v20576_v32  ;;  %v8133_v49 = vsel %vm837_vm2, %v8130_v52, %v8132_v33  ;;  %v8136_v27 = vrot.slane %v8063_v48, 1 }
 0x389   : > { %v18044_v63 = vadd.f32 %v12933_v41, %v17784_v39  ;;  %13270 = vmatprep.mubr.msk.f32.mxu1 %vm5019_vm0, %v8129_v37  ;;  %v18052_v60 = vadd.f32 %v12910_v2, %v17906_v26  ;;  %v8131_v41 = vsel %vm837_vm2, %v8128_v54, %v8130_v52  ;;  %v8135_v54 = vsel %vm837_vm2, %v8132_v33, %v8134_v44  ;;  %v20578_v2 = vld [vmem:[#allocation92_spill] sm:$0xff] }
 0x38a   : > { %13245 = vmatmul.mubr.msk.f32.gmra.mxu0 %vm5019_vm0, %v17147_v11  ;;  %v5985_v59 = vpop.f32.mrf.mxu1  ;;  %v18062_v37 = vpop.f32.mrf.mxu0  ;;  %v8138_v52 = vrot.slane %v8064_v6, 1 }
 0x38b   : > { %13247 = vmatprep.mubr.msk.f32.mxu0 %vm5019_vm0, %v17173_v25  ;;  %v18057_v39 = vadd.f32 %v5985_v59, %v17796_v3  ;;  %20577 = vst [vmem:[#allocation134_spill] sm:$0xff] %v18062_v37  ;;  %v8065_v59 = vmul.f32 %v16915_v38, %v20578_v2  ;;  %v8137_v38 = vsel %vm837_vm2, %v8134_v44, %v8136_v27  ;;  %v20583_v44 = vmov 0.0  }
 0x38c   : > { %v12936_v34 = vpop.f32.mrf.mxu1  ;;  %13271 = vmatmul.mubr.msk.f32.gmra.mxu1 %vm5019_vm0, %v8131_v41  ;;  %v20579_v41 = vld [vmem:[#allocation93_spill] sm:$0xff]  ;;  %v8139_v2 = vsel %vm837_vm2, %v8136_v27, %v8138_v52 }
 0x38d   : > { %v18067_v26 = vadd.f32 %v12936_v34, %v17831_v23  ;;  %13273 = vmatprep.mubr.msk.f32.mxu1 %vm5019_vm0, %v8133_v49  ;;  %v12913_v20 = vpop.f32.mrf.mxu0  ;;  %v8066_v32 = vmul.f32 %v16956_v19, %v20579_v41  ;;  %v8140_v6 = vrot.slane %v8065_v59, 1  ;;  %v20581_v49 = vld [vmem:[#allocation94_spill] sm:$0xff] }
 0x38e   : > { %13248 = vmatmul.mubr.msk.f32.gmra.mxu0 %vm5019_vm0, %v17180_v57  ;;  %v5995_v3 = vpop.f32.mrf.mxu1  ;;  %v18076_v53 = vadd.f32 %v12913_v20, %v17934_v4  ;;  %v8067_v19 = vmul.f32 %v16948_v8, %v20581_v49  ;;  %v20582_v20 = vld [vmem:[#allocation95_spill] sm:$0xff] }
 0x38f   : > { %13250 = vmatprep.mubr.msk.f32.mxu0 %vm5019_vm0, %v17410_v62  ;;  %v18081_v23 = vadd.f32 %v5995_v3, %v17839_v47  ;;  %v18085_v34 = vpop.f32.mrf.mxu0  ;;  %v8068_v3 = vmul.f32 %v17002_v15, %v20582_v20  ;;  %v8142_v41 = vrot.slane %v8066_v32, 1  ;;  %v8141_v8 = vsel %vm837_vm2, %v8138_v52, %v8140_v6  ;;  %v20585_v32 = vld [vmem:[#allocation97_spill] sm:$0xff] }
 0x390   : > { %20580 = vst [vmem:[#allocation135_spill] sm:$0xff] %v18085_v34  ;;  %v12939_v33 = vpop.f32.mrf.mxu1  ;;  %13274 = vmatmul.mubr.msk.f32.gmra.mxu1 %vm5019_vm0, %v8135_v54 }
 0x391   : > { %v18090_v4 = vadd.f32 %v12939_v33, %v17867_v35  ;;  %13276 = vmatprep.mubr.msk.f32.mxu1 %vm5019_vm0, %v8137_v38  ;;  %v12916_v48 = vpop.f32.mrf.mxu0  ;;  %v8144_v38 = vrot.slane %v8067_v19, 1  ;;  %v8146_v20 = vrot.slane %v8068_v3, 1 }
 0x392   : > { %13251 = vmatmul.mubr.msk.f32.gmra.mxu0 %vm5019_vm0, %v17505_v14  ;;  %v6005_v47 = vpop.f32.mrf.mxu1  ;;  %v18100_v54 = vadd.f32 %v12916_v48, %v17956_v36  ;;  %v20584_v48 = vld [vmem:[#allocation96_spill] sm:$0xff] }
 0x393   : > { %13253 = vmatprep.mubr.f32.mxu0 %v20583_v44  ;;  %v18104_v35 = vadd.f32 %v6005_v47, %v17877_v31  ;;  %v18107_v33 = vpop.f32.mrf.mxu0  ;;  %v8069_v27 = vmul.f32 %v17009_v22, %v20584_v48  ;;  %v8070_v47 = vmul.f32 %v17028_v43, %v20585_v32  ;;  %v8145_v19 = vsel %vm837_vm2, %v8142_v41, %v8144_v38  ;;  %v20587_v48 = vld [vmem:[#allocation99_spill] sm:$0xff] }
 0x394   : > { %v12942_v59 = vpop.f32.mrf.mxu1  ;;  %13277 = vmatmul.mubr.msk.f32.gmra.mxu1 %vm5019_vm0, %v8139_v2 }
 0x395   : > { %v18112_v15 = vadd.f32 %v12942_v59, %v17887_v21  ;;  %13279 = vmatprep.mubr.msk.f32.mxu1 %vm5019_vm0, %v8141_v8  ;;  %v12919_v36 = vpop.f32.mrf.mxu0  ;;  %v8143_v21 = vsel %vm837_vm2, %v8140_v6, %v8142_v41  ;;  %v8148_v8 = vrot.slane %v8069_v27, 1  ;;  %v8147_v41 = vsel %vm837_vm2, %v8144_v38, %v8146_v20 }
 0x396   : > { %13254 = vmatmul.mubr.f32.gmra.mxu0 %v20583_v44  ;;  %v6015_v31 = vpop.f32.mrf.mxu1  ;;  %v18121_v49 = vadd.f32 %v12919_v36, %v17997_v0  ;;  %v20586_v36 = vld [vmem:[#allocation98_spill] sm:$0xff] }
 0x397   : > { %v18124_v52 = vadd.f32 %v6015_v31, %v17899_v13  ;;  %v18127_v2 = vpop.f32.mrf.mxu0  ;;  %v8150_v13 = vrot.slane %v8070_v47, 1  ;;  %v8071_v6 = vmul.f32 %v17034_v46, %v20586_v36  ;;  %v8149_v27 = vsel %vm837_vm2, %v8146_v20, %v8148_v8 }
 0x398   : > { %v12945_v59 = vpop.f32.mrf.mxu1  ;;  %13280 = vmatmul.mubr.msk.f32.gmra.mxu1 %vm5019_vm0, %v8143_v21 }
 0x399   : > { %v18132_v22 = vadd.f32 %v12945_v59, %v17909_v45  ;;  %13282 = vmatprep.mubr.msk.f32.mxu1 %vm5019_vm0, %v8145_v19  ;;  %v12986_v43 = vpop.f32.mrf.mxu0  ;;  %v8072_v45 = vmul.f32 %v17064_v55, %v20587_v48  ;;  %v8151_v47 = vsel %vm837_vm2, %v8148_v8, %v8150_v13  ;;  %v8152_v38 = vrot.slane %v8071_v6, 1  ;;  %v20588_v59 = vld [vmem:[#allocation53_spill] sm:$0xff]  ;;  %v20590_v48 = vld [vmem:[#allocation58_spill] sm:$0xff] }
 0x39a   : > { %v6025_v0 = vpop.f32.mrf.mxu1  ;;  %v18138_v3 = vadd.f32 %v12986_v43, %v18022_v5  ;;  %v8073_v55 = vmul.f32 %v17061_v10, %v20588_v59 }
 0x39b   : > { %v18141_v31 = vadd.f32 %v6025_v0, %v17921_v50  ;;  %v18146_v32 = vpop.f32.mrf.mxu0  ;;  %v8154_v20 = vrot.slane %v8072_v45, 1  ;;  %v20589_v0 = vld [vmem:[#allocation54_spill] sm:$0xff]  ;;  %v8153_v8 = vsel %vm837_vm2, %v8150_v13, %v8152_v38  ;;  %v8075_v45 = vmul.f32 %v17096_v42, %v20590_v48 }
 0x39c   : > { %v12948_v21 = vpop.f32.mrf.mxu1  ;;  %13283 = vmatmul.mubr.msk.f32.gmra.mxu1 %vm5019_vm0, %v8147_v41 }
 0x39d   : > { %v18151_v46 = vadd.f32 %v12948_v21, %v17929_v28  ;;  %13285 = vmatprep.mubr.msk.f32.mxu1 %vm5019_vm0, %v8149_v27  ;;  %v12989_v5 = vpop.f32.mrf.mxu0  ;;  %v8074_v28 = vmul.f32 %v17090_v9, %v20589_v0  ;;  %v20591_v21 = vld [vmem:[#allocation59_spill] sm:$0xff] }
 0x39e   : > { %v6035_v50 = vpop.f32.mrf.mxu1  ;;  %v18158_v19 = vadd.f32 %v12989_v5, %v18044_v63  ;;  %v8076_v9 = vmul.f32 %v17119_v40, %v20591_v21 }
 0x39f   : > { %v18161_v43 = vadd.f32 %v6035_v50, %v17941_v58  ;;  %v18165_v36 = vpop.f32.mrf.mxu0  ;;  %v8156_v58 = vrot.slane %v8073_v55, 1  ;;  %v8158_v13 = vrot.slane %v8074_v28, 1  ;;  %v20592_v55 = vld [vmem:[#allocation62_spill] sm:$0xff] }
 0x3a0   : > { %v12951_v41 = vpop.f32.mrf.mxu1  ;;  %13286 = vmatmul.mubr.msk.f32.gmra.mxu1 %vm5019_vm0, %v8151_v47 }
 0x3a1   : > { %v18170_v6 = vadd.f32 %v12951_v41, %v17949_v30  ;;  %13288 = vmatprep.mubr.msk.f32.mxu1 %vm5019_vm0, %v8153_v8  ;;  %v12992_v10 = vpop.f32.mrf.mxu0  ;;  %v8155_v30 = vsel %vm837_vm2, %v8152_v38, %v8154_v20  ;;  %v8157_v59 = vsel %vm837_vm2, %v8154_v20, %v8156_v58  ;;  %v8077_v38 = vmul.f32 %v17124_v1, %v20592_v55  ;;  %v20593_v8 = vld [vmem:[#allocation63_spill] sm:$0xff] }
 0x3a2   : > { %v6045_v63 = vpop.f32.mrf.mxu1  ;;  %v18178_v27 = vadd.f32 %v12992_v10, %v18067_v26  ;;  %v8159_v28 = vsel %vm837_vm2, %v8156_v58, %v8158_v13  ;;  %v8162_v41 = vrot.slane %v8076_v9, 1  ;;  %v8078_v20 = vmul.f32 %v17141_v51, %v20593_v8 }
 0x3a3   : > { %v18181_v5 = vadd.f32 %v6045_v63, %v17961_v18  ;;  %v18184_v50 = vpop.f32.mrf.mxu0  ;;  %v8160_v18 = vrot.slane %v8075_v45, 1  ;;  %v8164_v58 = vrot.slane %v8077_v38, 1  ;;  %v20594_v45 = vld [vmem:[#allocation66_spill] sm:$0xff] }
 0x3a4   : > { %v12954_v47 = vpop.f32.mrf.mxu1  ;;  %13289 = vmatmul.mubr.msk.f32.gmra.mxu1 %vm5019_vm0, %v8155_v30  ;;  %v8079_v21 = vmul.f32 %v17147_v11, %v20594_v45  ;;  %v8166_v30 = vrot.slane %v8078_v20, 1 }
 0x3a5   : > { %v18189_v42 = vadd.f32 %v12954_v47, %v17969_v16  ;;  %13291 = vmatprep.mubr.msk.f32.mxu1 %vm5019_vm0, %v8157_v59  ;;  %v12995_v40 = vpop.f32.mrf.mxu0  ;;  %v8161_v63 = vsel %vm837_vm2, %v8158_v13, %v8160_v18  ;;  %v8163_v9 = vsel %vm837_vm2, %v8160_v18, %v8162_v41  ;;  %v20595_v47 = vld [vmem:[#allocation67_spill] sm:$0xff]  ;;  %v20596_v18 = vld [vmem:[#allocation74_spill] sm:$0xff] }
 0x3a6   : > { %v18192_v26 = vpop.f32.mrf.mxu1  ;;  %v18197_v0 = vadd.f32 %v12995_v40, %v18090_v4  ;;  %v8080_v13 = vmul.f32 %v17173_v25, %v20595_v47  ;;  %v8165_v40 = vsel %vm837_vm2, %v8162_v41, %v8164_v58  ;;  %v8168_v38 = vrot.slane %v8079_v21, 1 }
 0x3a7   : > { %v18202_v16 = vpop.f32.mrf.mxu0  ;;  %v8167_v8 = vsel %vm837_vm2, %v8164_v58, %v8166_v30  ;;  %v20599_v58 = vld [vmem:[#allocation101_spill] sm:$0xff] }
 0x3a8   : > { %v12957_v10 = vpop.f32.mrf.mxu1  ;;  %13292 = vmatmul.mubr.msk.f32.gmra.mxu1 %vm5019_vm0, %v8159_v28  ;;  %v8081_v28 = vmul.f32 %v17180_v57, %v20596_v18  ;;  %v8170_v20 = vrot.slane %v8080_v13, 1 }
 0x3a9   : > { %v18207_v48 = vadd.f32 %v12957_v10, %v17989_v61  ;;  %13294 = vmatprep.mubr.msk.f32.mxu1 %vm5019_vm0, %v8161_v63  ;;  %v12998_v1 = vpop.f32.mrf.mxu0  ;;  %v20597_v10 = vld [vmem:[#allocation100_spill] sm:$0xff] }
 0x3aa   : > { %v18210_v4 = vpop.f32.mrf.mxu1  ;;  %v18215_v51 = vadd.f32 %v12998_v1, %v18112_v15  ;;  %v8082_v41 = vmul.f32 %v17410_v62, %v20597_v10  ;;  %v8169_v1 = vsel %vm837_vm2, %v8166_v30, %v8168_v38  ;;  %v8172_v21 = vrot.slane %v8081_v28, 1 }
 0x3ab   : > { %v18220_v61 = vpop.f32.mrf.mxu0  ;;  %v8171_v47 = vsel %vm837_vm2, %v8168_v38, %v8170_v20 }
 0x3ac   : > { %v12960_v59 = vpop.f32.mrf.mxu1  ;;  %13295 = vmatmul.mubr.msk.f32.gmra.mxu1 %vm5019_vm0, %v8163_v9  ;;  %v8083_v9 = vmul.f32 %v17505_v14, %v20599_v58  ;;  %v8174_v13 = vrot.slane %v8082_v41, 1 }
 0x3ad   : > { %v6155_v55 = vadd.f32 %v12960_v59, %v18010_v17  ;;  %13297 = vmatprep.mubr.msk.f32.mxu1 %vm5019_vm0, %v8165_v40  ;;  %v13001_v11 = vpop.f32.mrf.mxu0 }
 0x3ae   : > { %v18226_v15 = vpop.f32.mrf.mxu1  ;;  %v18231_v25 = vadd.f32 %v13001_v11, %v18132_v22  ;;  %v8176_v14 = vrot.slane %v8083_v9, 1  ;;  %v8175_v38 = vsel %vm837_vm2, %v8172_v21, %v8174_v13  ;;  %v20603_v9 = vld [vmem:[#allocation110_spill] sm:$0xff] }
 0x3af   : > { %v18236_v63 = vpop.f32.mrf.mxu0 }
 0x3b0   : > { %v12963_v17 = vpop.f32.mrf.mxu1  ;;  %13298 = vmatmul.mubr.msk.f32.gmra.mxu1 %vm5019_vm0, %v8167_v8 }
 0x3b1   : > { %v6157_v45 = vadd.f32 %v12963_v17, %v18034_v12  ;;  %13300 = vmatprep.mubr.msk.f32.mxu1 %vm5019_vm0, %v8169_v1  ;;  %v13004_v57 = vpop.f32.mrf.mxu0  ;;  %v8173_v12 = vsel %vm837_vm2, %v8170_v20, %v8172_v21  ;;  %v8177_v20 = vsel %vm837_vm2, %v8174_v13, %v8176_v14 }
 0x3b2   : > { %v18242_v22 = vpop.f32.mrf.mxu1  ;;  %v18247_v62 = vadd.f32 %v13004_v57, %v18151_v46 }
 0x3b3   : > { %20598 = vst [vmem:[#allocation137_spill] sm:$0xff] %v18242_v22  ;;  %v18250_v59 = vpop.f32.mrf.mxu0 }
 0x3b4   : > { %v12966_v30 = vpop.f32.mrf.mxu1  ;;  %13301 = vmatmul.mubr.msk.f32.gmra.mxu1 %vm5019_vm0, %v8171_v47 }
 0x3b5   : > { %v6159_v40 = vadd.f32 %v12966_v30, %v18052_v60  ;;  %13303 = vmatprep.mubr.msk.f32.mxu1 %vm5019_vm0, %v8173_v12  ;;  %v13007_v11 = vpop.f32.mrf.mxu0  ;;  %v20604_v12 = vld [vmem:[#allocation111_spill] sm:$0xff] }
 0x3b6   : > { %v18256_v18 = vpop.f32.mrf.mxu1  ;;  %v18259_v46 = vadd.f32 %v13007_v11, %v18170_v6  ;;  %v20602_v6 = vld [vmem:[#allocation109_spill] sm:$0xff] }
 0x3b7   : > { %20600 = vst [vmem:[#allocation139_spill] sm:$0xff] %v18256_v18  ;;  %v18262_v28 = vpop.f32.mrf.mxu0  ;;  %v8178_v1 = vsel %vm837_vm2, %v8176_v14, %v20602_v6 }
 0x3b8   : > { %v12969_v8 = vpop.f32.mrf.mxu1  ;;  %13304 = vmatmul.mubr.msk.f32.gmra.mxu1 %vm5019_vm0, %v8175_v38 }
 0x3b9   : > { %v6161_v60 = vadd.f32 %v12969_v8, %v18076_v53  ;;  %13306 = vmatprep.mubr.msk.f32.mxu1 %vm5019_vm0, %v8177_v20  ;;  %v13010_v10 = vpop.f32.mrf.mxu0 }
 0x3ba   : > { %v18268_v41 = vpop.f32.mrf.mxu1  ;;  %v18271_v17 = vadd.f32 %v13010_v10, %v18189_v42 }
 0x3bb   : > { %20601 = vst [vmem:[#allocation136_spill] sm:$0xff] %v18268_v41  ;;  %v18275_v57 = vpop.f32.mrf.mxu0 }
 0x3bc   : > { %v12972_v21 = vpop.f32.mrf.mxu1  ;;  %13307 = vmatmul.mubr.msk.f32.gmra.mxu1 %vm5019_vm0, %v8178_v1 }
 0x3bd   : > { %v6163_v58 = vadd.f32 %v12972_v21, %v18100_v54  ;;  %13309 = vmatprep.mubr.msk.f32.mxu1 %vm5019_vm0, %v20603_v9  ;;  %v13013_v53 = vpop.f32.mrf.mxu0 }
 0x3be   : > { %v18281_v47 = vpop.f32.mrf.mxu1  ;;  %v18284_v13 = vadd.f32 %v13013_v53, %v18207_v48 }
 0x3bf   : > { %v18286_v42 = vpop.f32.mrf.mxu0 }
 0x3c0   : > { %v12975_v30 = vpop.f32.mrf.mxu1  ;;  %13310 = vmatmul.mubr.msk.f32.gmra.mxu1 %vm5019_vm0, %v20604_v12 }
 0x3c1   : > { %v6165_v11 = vadd.f32 %v12975_v30, %v18121_v49  ;;  %13328 = vmatprep.mubr.f32.mxu1 %v20583_v44  ;;  %v13016_v54 = vpop.f32.mrf.mxu0 }
 0x3c2   : > { %v18292_v14 = vpop.f32.mrf.mxu1  ;;  %v18294_v38 = vadd.f32 %v13016_v54, %v6155_v55 }
 0x3c3   : > { %v18296_v8 = vpop.f32.mrf.mxu0 }
 0x3c4   : > { %v13042_v20 = vpop.f32.mrf.mxu1 }
 0x3c5   : > { %v6857_v48 = vadd.f32 %v13042_v20, %v18138_v3 }
 0x3c6   : > { %v13019_v10 = vpop.f32.mrf.mxu0  ;;  %v18299_v6 = vpop.f32.mrf.mxu1 }
 0x3c7   : > { %20605 = vst [vmem:[#allocation141_spill] sm:$0xff] %v18299_v6  ;;  %v18301_v1 = vadd.f32 %v13019_v10, %v6157_v45  ;;  %v6590_v6 = vadd.f32 %v18165_v36, %v18057_v39 }
 0x3c8   : > { %v18303_v21 = vpop.f32.mrf.mxu0  ;;  %v13045_v49 = vpop.f32.mrf.mxu1 }
 0x3c9   : > { %20606 = vst [vmem:[#allocation138_spill] sm:$0xff] %v18303_v21  ;;  %v6859_v9 = vadd.f32 %v13045_v49, %v18158_v19 }
 0x3ca   : > { %v13022_v53 = vpop.f32.mrf.mxu0  ;;  %v6707_v30 = vpop.f32.mrf.mxu1 }
 0x3cb   : > { %v18306_v12 = vadd.f32 %v13022_v53, %v6159_v40 }
 0x3cc   : > { %v18308_v55 = vpop.f32.mrf.mxu0  ;;  %v13048_v54 = vpop.f32.mrf.mxu1 }
 0x3cd   : > { %20607 = vst [vmem:[#allocation143_spill] sm:$0xff] %v18308_v55  ;;  %v6861_v44 = vadd.f32 %v13048_v54, %v18178_v27 }
 0x3ce   : > { %v13025_v3 = vpop.f32.mrf.mxu0  ;;  %v6717_v20 = vpop.f32.mrf.mxu1 }
 0x3cf   : > { %v18311_v41 = vadd.f32 %v13025_v3, %v6161_v60 }
 0x3d0   : > { %v18313_v45 = vpop.f32.mrf.mxu0  ;;  %v13051_v10 = vpop.f32.mrf.mxu1 }
 0x3d1   : > { %20608 = vst [vmem:[#allocation140_spill] sm:$0xff] %v18313_v45  ;;  %v6863_v34 = vadd.f32 %v13051_v10, %v18197_v0 }
 0x3d2   : > { %v13028_v18 = vpop.f32.mrf.mxu0  ;;  %v6727_v19 = vpop.f32.mrf.mxu1 }
 0x3d3   : > { %v18316_v49 = vadd.f32 %v13028_v18, %v6163_v58 }
 0x3d4   : > { %v18318_v40 = vpop.f32.mrf.mxu0  ;;  %v13054_v53 = vpop.f32.mrf.mxu1 }
 0x3d5   : > { %v6865_v55 = vadd.f32 %v13054_v53, %v18215_v51 }
 0x3d6   : > { %v13031_v21 = vpop.f32.mrf.mxu0  ;;  %v6737_v27 = vpop.f32.mrf.mxu1 }
 0x3d7   : > { %v18321_v54 = vadd.f32 %v13031_v21, %v6165_v11  ;;  %v6858_v21 = vadd.f32 %v6707_v30, %v6590_v6  ;;  %v6594_v6 = vadd.f32 %v18202_v16, %v18104_v35 }
 0x3d8   : > { %v18323_v60 = vpop.f32.mrf.mxu0  ;;  %v13057_v3 = vpop.f32.mrf.mxu1 }
 0x3d9   : > { %20609 = vst [vmem:[#allocation142_spill] sm:$0xff] %v18321_v54  ;;  %20610 = vst [vmem:[#allocation144_spill] sm:$0xff] %v18323_v60  ;;  %v6867_v45 = vadd.f32 %v13057_v3, %v18231_v25  ;;  %v6592_v25 = vadd.f32 %v18184_v50, %v18081_v23  ;;  %v6862_v50 = vadd.f32 %v6727_v19, %v6594_v6 }
 0x3da   : > { %v13098_v37 = vpop.f32.mrf.mxu0  ;;  %v6747_v0 = vpop.f32.mrf.mxu1 }
 0x3db   : > { %v18326_v10 = vadd.f32 %v13098_v37, %v6857_v48 }
 0x3dc   : > { %v18328_v18 = vpop.f32.mrf.mxu0  ;;  %v13060_v58 = vpop.f32.mrf.mxu1 }
 0x3dd   : > { %20611 = vst [vmem:[#allocation145_spill] sm:$0xff] %v18326_v10  ;;  %20612 = vst [vmem:[#allocation146_spill] sm:$0xff] %v18328_v18  ;;  %v6869_v51 = vadd.f32 %v13060_v58, %v18247_v62  ;;  %v6860_v18 = vadd.f32 %v6717_v20, %v6592_v25 }
 0x3de   : > { %v13101_v53 = vpop.f32.mrf.mxu0  ;;  %v6757_v11 = vpop.f32.mrf.mxu1 }
 0x3df   : > { %v18333_v22 = vadd.f32 %v13101_v53, %v6859_v9 }
 0x3e0   : > { %v7161_v54 = vpop.f32.mrf.mxu0  ;;  %v13063_v60 = vpop.f32.mrf.mxu1 }
 0x3e1   : > { %v18337_v37 = vadd.f32 %v7161_v54, %v6858_v21  ;;  %v6871_v48 = vadd.f32 %v13063_v60, %v18259_v46 }
 0x3e2   : > { %v13104_v3 = vpop.f32.mrf.mxu0  ;;  %v6767_v10 = vpop.f32.mrf.mxu1 }
 0x3e3   : > { %v18340_v39 = vadd.f32 %v13104_v3, %v6861_v44  ;;  %v6596_v44 = vadd.f32 %v18220_v61, %v18124_v52 }
 0x3e4   : > { %v7171_v36 = vpop.f32.mrf.mxu0  ;;  %v13066_v62 = vpop.f32.mrf.mxu1 }
 0x3e5   : > { %v18344_v9 = vadd.f32 %v7171_v36, %v6860_v18  ;;  %v6873_v30 = vadd.f32 %v13066_v62, %v18271_v17  ;;  %v6864_v16 = vadd.f32 %v6737_v27, %v6596_v44  ;;  %v6602_v44 = vadd.f32 %v18262_v28, %v18181_v5 }
 0x3e6   : > { %v13107_v58 = vpop.f32.mrf.mxu0  ;;  %v6777_v23 = vpop.f32.mrf.mxu1 }
 0x3e7   : > { %v18347_v54 = vadd.f32 %v13107_v58, %v6863_v34  ;;  %v6598_v34 = vadd.f32 %v18236_v63, %v18141_v31 }
 0x3e8   : > { %v7181_v46 = vpop.f32.mrf.mxu0  ;;  %v13069_v60 = vpop.f32.mrf.mxu1 }
 0x3e9   : > { %v18351_v20 = vadd.f32 %v7181_v46, %v6862_v50  ;;  %v6875_v53 = vadd.f32 %v13069_v60, %v18284_v13  ;;  %v6866_v36 = vadd.f32 %v6747_v0, %v6598_v34 }
 0x3ea   : > { %v13110_v21 = vpop.f32.mrf.mxu0  ;;  %v6787_v35 = vpop.f32.mrf.mxu1 }
 0x3eb   : > { %v18354_v18 = vadd.f32 %v13110_v21, %v6865_v55  ;;  %v6600_v55 = vadd.f32 %v18250_v59, %v18161_v43 }
 0x3ec   : > { %v7191_v17 = vpop.f32.mrf.mxu0  ;;  %v13072_v25 = vpop.f32.mrf.mxu1 }
 0x3ed   : > { %v18358_v19 = vadd.f32 %v7191_v17, %v6864_v16  ;;  %v18361_v3 = vadd.f32 %v13072_v25, %v18294_v38  ;;  %v6868_v38 = vadd.f32 %v6757_v11, %v6600_v55  ;;  %v20614_v17 = vld [vmem:[#allocation114_spill] sm:$0xff] }
 0x3ee   : > { %v13113_v52 = vpop.f32.mrf.mxu0  ;;  %v18363_v61 = vpop.f32.mrf.mxu1  ;;  %v20615_v25 = vld [vmem:[#allocation130_spill] sm:$0xff] }
 0x3ef   : > { %v18365_v13 = vadd.f32 %v13113_v52, %v6867_v45  ;;  %v20613_v45 = vld [vmem:[#allocation129_spill] sm:$0xff]  ;;  %v5648_v34 = vadd.f32 %v20615_v25, %v20614_v17 }
 0x3f0   : > { %v7201_v62 = vpop.f32.mrf.mxu0  ;;  %v13075_v27 = vpop.f32.mrf.mxu1  ;;  %v5638_v60 = vadd.f32 %v17976_v7, %v20613_v45  ;;  %v20620_v45 = vld [vmem:[#allocation132_spill] sm:$0xff] }
 0x3f1   : > { %v18369_v6 = vadd.f32 %v7201_v62, %v6866_v36  ;;  %v18372_v31 = vadd.f32 %v13075_v27, %v18301_v1  ;;  %v20616_v36 = vld [vmem:[#allocation133_spill] sm:$0xff] }
 0x3f2   : > { %v13116_v63 = vpop.f32.mrf.mxu0  ;;  %v18374_v58 = vpop.f32.mrf.mxu1  ;;  %v6150_v11 = vadd.f32 %v18192_v26, %v5638_v60  ;;  %v5698_v5 = vadd.f32 %v18107_v33, %v20616_v36 }
 0x3f3   : > { %v18376_v50 = vadd.f32 %v13116_v63, %v6869_v51  ;;  %v6870_v51 = vadd.f32 %v6767_v10, %v6602_v44  ;;  %v6152_v10 = vadd.f32 %v18210_v4, %v5648_v34 }
 0x3f4   : > { %v7211_v46 = vpop.f32.mrf.mxu0  ;;  %v13078_v0 = vpop.f32.mrf.mxu1  ;;  %v6604_v28 = vadd.f32 %v18275_v57, %v6150_v11 }
 0x3f5   : > { %v18382_v43 = vadd.f32 %v7211_v46, %v6868_v38  ;;  %v18385_v59 = vadd.f32 %v13078_v0, %v18306_v12  ;;  %v20617_v38 = vld [vmem:[#allocation120_spill] sm:$0xff]  ;;  %v20618_v46 = vld [vmem:[#allocation126_spill] sm:$0xff]  ;;  %v20619_v0 = vld [vmem:[#allocation125_spill] sm:$0xff] }
 0x3f6   : > { %v13119_v1 = vpop.f32.mrf.mxu0  ;;  %v18387_v21 = vpop.f32.mrf.mxu1  ;;  %v6872_v55 = vadd.f32 %v6777_v23, %v6604_v28  ;;  %v5558_v33 = vadd.f32 %v20618_v46, %v20617_v38  ;;  %v5658_v57 = vadd.f32 %v18017_v29, %v20619_v0  ;;  %v20623_v28 = vld [vmem:[#allocation142_spill] sm:$0xff] }
 0x3f7   : > { %v18390_v16 = vadd.f32 %v13119_v1, %v6871_v48  ;;  %v6162_v48 = vadd.f32 %v18281_v47, %v5698_v5  ;;  %v6606_v1 = vadd.f32 %v18286_v42, %v6152_v10  ;;  %v20621_v42 = vld [vmem:[#allocation131_spill] sm:$0xff]  ;;  %v20627_v46 = vld [vmem:[#allocation134_spill] sm:$0xff] }
 0x3f8   : > { %v7221_v7 = vpop.f32.mrf.mxu0  ;;  %v13081_v52 = vpop.f32.mrf.mxu1  ;;  %v6154_v23 = vadd.f32 %v18226_v15, %v5658_v57 }
 0x3f9   : > { %v18397_v12 = vadd.f32 %v7221_v7, %v6870_v51  ;;  %v18400_v62 = vadd.f32 %v13081_v52, %v18311_v41  ;;  %v5708_v41 = vadd.f32 %v18127_v2, %v20620_v45  ;;  %v6616_v4 = vadd.f32 %v18318_v40, %v6162_v48  ;;  %v20625_v48 = vld [vmem:[#allocation141_spill] sm:$0xff]  ;;  %v20628_v45 = vld [vmem:[#allocation138_spill] sm:$0xff] }
 0x3fa   : > { %v13122_v27 = vpop.f32.mrf.mxu0  ;;  %v18402_v26 = vpop.f32.mrf.mxu1  ;;  %v6874_v2 = vadd.f32 %v6787_v35, %v6606_v1  ;;  %v5668_v40 = vadd.f32 %v18039_v56, %v20621_v42  ;;  %v6608_v36 = vadd.f32 %v18296_v8, %v6154_v23  ;;  %v20626_v8 = vld [vmem:[#allocation116_spill] sm:$0xff] }
 0x3fb   : > { %v18406_v63 = vadd.f32 %v13122_v27, %v6873_v30  ;;  %v6134_v30 = vadd.f32 %v18027_v24, %v5558_v33  ;;  %v6164_v17 = vadd.f32 %v18292_v14, %v5708_v41  ;;  %v20622_v24 = vld [vmem:[#allocation144_spill] sm:$0xff]  ;;  %v20624_v14 = vld [vmem:[#allocation137_spill] sm:$0xff]  ;;  %v5678_v33 = vadd.f32 %v20627_v46, %v20626_v8 }
 0x3fc   : > { %v7231_v60 = vpop.f32.mrf.mxu0  ;;  %v13084_v44 = vpop.f32.mrf.mxu1  ;;  %v6876_v56 = vadd.f32 %v18363_v61, %v6608_v36  ;;  %v20634_v36 = vld [vmem:[#allocation143_spill] sm:$0xff]  ;;  %v20636_v8 = vld [vmem:[#allocation140_spill] sm:$0xff] }
 0x3fd   : > { %v18416_v11 = vadd.f32 %v7231_v60, %v6872_v55  ;;  %v18419_v47 = vadd.f32 %v13084_v44, %v18316_v49  ;;  %v6588_v7 = vadd.f32 %v18146_v32, %v6134_v30  ;;  %v6618_v5 = vadd.f32 %v20622_v24, %v6164_v17  ;;  %v20629_v60 = vld [vmem:[#allocation146_spill] sm:$0xff] }
 0x3fe   : > { %v13125_v51 = vpop.f32.mrf.mxu0  ;;  %v6837_v29 = vpop.f32.mrf.mxu1 }
 0x3ff   : > { %v18424_v25 = vadd.f32 %v13125_v51, %v6875_v53  ;;  %v6884_v34 = vadd.f32 %v6837_v29, %v6616_v4  ;;  %v6156_v53 = vadd.f32 %v20624_v14, %v5668_v40  ;;  %v6856_v55 = vadd.f32 %v20625_v48, %v6588_v7  ;;  %v20630_v4 = vld [vmem:[#allocation145_spill] sm:$0xff]  ;;  %v20631_v51 = vld [vmem:[#allocation139_spill] sm:$0xff]  ;;  %v20632_v7 = vld [vmem:[#allocation128_spill] sm:$0xff] }
 0x400   : > { %v7241_v52 = vpop.f32.mrf.mxu0  ;;  %v13087_v49 = vpop.f32.mrf.mxu1 }
 0x401   : > { %v18431_v15 = vadd.f32 %v7241_v52, %v6874_v2  ;;  %v18434_v27 = vadd.f32 %v13087_v49, %v20623_v28  ;;  %v6610_v41 = vadd.f32 %v20628_v45, %v6156_v53  ;;  %v7310_v44 = vadd.f32 %v20629_v60, %v6856_v55  ;;  %v20633_v52 = vld [vmem:[#allocation135_spill] sm:$0xff] }
 0x402   : > { %v13128_v35 = vpop.f32.mrf.mxu0  ;;  %v6847_v10 = vpop.f32.mrf.mxu1  ;;  %v5688_v49 = vadd.f32 %v20633_v52, %v20632_v7 }
 0x403   : > { %v18440_v32 = vadd.f32 %v13128_v35, %v18361_v3  ;;  %v18442_v38 = vadd.f32 %v6847_v10, %v6618_v5  ;;  %v6158_v3 = vadd.f32 %v20631_v51, %v5678_v33  ;;  %v6878_v29 = vadd.f32 %v18374_v58, %v6610_v41  ;;  %v20635_v35 = vld [vmem:[#allocation136_spill] sm:$0xff] }
 0x404   : > { %v7251_v0 = vpop.f32.mrf.mxu0  ;;  %v13154_v57 = vpop.f32.mrf.mxu1  ;;  %v6160_v10 = vadd.f32 %v20635_v35, %v5688_v49 }
 0x405   : > { %v18448_v1 = vadd.f32 %v7251_v0, %v6876_v56  ;;  %v7761_v30 = vadd.f32 %v13154_v57, %v20630_v4  ;;  %v6612_v24 = vadd.f32 %v20634_v36, %v6158_v3 }
 0x406   : > { %v13131_v23 = vpop.f32.mrf.mxu0  ;;  %v7601_v61 = vpop.f32.mrf.mxu1  ;;  %v6614_v46 = vadd.f32 %v20636_v8, %v6160_v10 }
 0x407   : > { %v18454_v17 = vadd.f32 %v13131_v23, %v18372_v31  ;;  %v7760_v2 = vadd.f32 %v7601_v61, %v7310_v44  ;;  %v6880_v58 = vadd.f32 %v18387_v21, %v6612_v24 }
 0x408   : > { %v7261_v42 = vpop.f32.mrf.mxu0  ;;  %v13157_v40 = vpop.f32.mrf.mxu1  ;;  %v6882_v45 = vadd.f32 %v18402_v26, %v6614_v46 }
 0x409   : > { %v18459_v5 = vadd.f32 %v7261_v42, %v6878_v29  ;;  %v7763_v28 = vadd.f32 %v13157_v40, %v18333_v22 }
 0x40a   : > { %v13134_v14 = vpop.f32.mrf.mxu0  ;;  %v7611_v53 = vpop.f32.mrf.mxu1 }
 0x40b   : > { %v18465_v31 = vadd.f32 %v13134_v14, %v18385_v59  ;;  %v7762_v48 = vadd.f32 %v7611_v53, %v18337_v37 }
 0x40c   : > { %v7271_v55 = vpop.f32.mrf.mxu0  ;;  %v13160_v56 = vpop.f32.mrf.mxu1 }
 0x40d   : > { %v18469_v33 = vadd.f32 %v7271_v55, %v6880_v58  ;;  %v7765_v0 = vadd.f32 %v13160_v56, %v18340_v39 }
 0x40e   : > { %v13137_v22 = vpop.f32.mrf.mxu0  ;;  %v7621_v57 = vpop.f32.mrf.mxu1 }
 0x40f   : > { %v18474_v41 = vadd.f32 %v13137_v22, %v18400_v62  ;;  %v7764_v59 = vadd.f32 %v7621_v57, %v18344_v9 }
 0x410   : > { %v7281_v21 = vpop.f32.mrf.mxu0  ;;  %v13163_v60 = vpop.f32.mrf.mxu1 }
 0x411   : > { %v18477_v37 = vadd.f32 %v7281_v21, %v6882_v45  ;;  %v7767_v44 = vadd.f32 %v13163_v60, %v18347_v54 }
 0x412   : > { %v13140_v4 = vpop.f32.mrf.mxu0  ;;  %v7631_v23 = vpop.f32.mrf.mxu1 }
 0x413   : > { %v18481_v61 = vadd.f32 %v13140_v4, %v18419_v47  ;;  %v7766_v39 = vadd.f32 %v7631_v23, %v18351_v20 }
 0x414   : > { %v7291_v51 = vpop.f32.mrf.mxu0  ;;  %v13166_v26 = vpop.f32.mrf.mxu1 }
 0x415   : > { %v18484_v3 = vadd.f32 %v7291_v51, %v6884_v34  ;;  %v18487_v62 = vadd.f32 %v13166_v26, %v18354_v18 }
 0x416   : > { %v18489_v9 = vpop.f32.mrf.mxu0  ;;  %v7641_v29 = vpop.f32.mrf.mxu1 }
 0x417   : > { %v18492_v42 = vadd.f32 %v7641_v29, %v18358_v19 }
 0x418   : > { %v18494_v54 = vpop.f32.mrf.mxu0  ;;  %v13169_v40 = vpop.f32.mrf.mxu1 }
 0x419   : > { %v18497_v47 = vadd.f32 %v13169_v40, %v18365_v13 }
 0x41a   : > { %v13210_v20 = vpop.f32.mrf.mxu0  ;;  %v7651_v7 = vpop.f32.mrf.mxu1 }
 0x41b   : > { %v18499_v52 = vadd.f32 %v13210_v20, %v7761_v30  ;;  %v18502_v34 = vadd.f32 %v7651_v7, %v18369_v6 }
 0x41c   : > { %v7863_v18 = vpop.f32.mrf.mxu0  ;;  %v13172_v49 = vpop.f32.mrf.mxu1 }
 0x41d   : > { %v18504_v36 = vadd.f32 %v7863_v18, %v7760_v2  ;;  %v18507_v19 = vadd.f32 %v13172_v49, %v18376_v50  ;;  %v8501_v50 = vld [vmem:[%s19792_s7 + $0x8] sm:$0xff] }
 0x41e   : > { %v13213_v24 = vpop.f32.mrf.mxu0  ;;  %v7661_v14 = vpop.f32.mrf.mxu1  ;;  %8587 = vmatprep.mubr.f32.mxu0 %v8501_v50 }
 0x41f   : > { %v18509_v53 = vadd.f32 %v13213_v24, %v7763_v28  ;;  %v18512_v13 = vadd.f32 %v7661_v14, %v18382_v43 }
 0x420   : > { %v7873_v35 = vpop.f32.mrf.mxu0  ;;  %v13175_v30 = vpop.f32.mrf.mxu1 }
 0x421   : > { %v8024_v10 = vadd.f32 %v7873_v35, %v7762_v48  ;;  %v18515_v6 = vadd.f32 %v13175_v30, %v18390_v16 }
 0x422   : > { %v13216_v58 = vpop.f32.mrf.mxu0  ;;  %v7671_v55 = vpop.f32.mrf.mxu1 }
 0x423   : > { %v8027_v2 = vadd.f32 %v13216_v58, %v7765_v0  ;;  %v18521_v56 = vadd.f32 %v7671_v55, %v18397_v12 }
 0x424   : > { %v7883_v28 = vpop.f32.mrf.mxu0  ;;  %v13178_v43 = vpop.f32.mrf.mxu1 }
 0x425   : > { %v8026_v8 = vadd.f32 %v7883_v28, %v7764_v59  ;;  %v18524_v46 = vadd.f32 %v13178_v43, %v18406_v63 }
 0x426   : > { %v13219_v48 = vpop.f32.mrf.mxu0  ;;  %v7681_v16 = vpop.f32.mrf.mxu1 }
 0x427   : > { %20637 = vst [vmem:[#allocation147_spill] sm:$0xff] %v18524_v46  ;;  %v8029_v22 = vadd.f32 %v13219_v48, %v7767_v44  ;;  %v18527_v57 = vadd.f32 %v7681_v16, %v18416_v11 }
 0x428   : > { %v7893_v45 = vpop.f32.mrf.mxu0  ;;  %v13181_v21 = vpop.f32.mrf.mxu1 }
 0x429   : > { %20638 = vst [vmem:[#allocation149_spill] sm:$0xff] %v18527_v57  ;;  %v8028_v60 = vadd.f32 %v7893_v45, %v7766_v39  ;;  %v18530_v0 = vadd.f32 %v13181_v21, %v18424_v25 }
 0x42a   : > { %v18532_v12 = vpop.f32.mrf.mxu0  ;;  %v7691_v4 = vpop.f32.mrf.mxu1 }
 0x42b   : > { %20639 = vst [vmem:[#allocation148_spill] sm:$0xff] %v18530_v0  ;;  %v18535_v59 = vadd.f32 %v7691_v4, %v18431_v15  ;;  %v7340_v0 = vadd.f32 %v18494_v54, %v18442_v38 }
 0x42c   : > { %v18537_v63 = vpop.f32.mrf.mxu0  ;;  %v13184_v23 = vpop.f32.mrf.mxu1 }
 0x42d   : > { %20640 = vst [vmem:[#allocation152_spill] sm:$0xff] %v18535_v59  ;;  %v18540_v44 = vadd.f32 %v13184_v23, %v18440_v32 }
 0x42e   : > { %v18542_v11 = vpop.f32.mrf.mxu0  ;;  %v7701_v51 = vpop.f32.mrf.mxu1 }
 0x42f   : > { %20641 = vst [vmem:[#allocation150_spill] sm:$0xff] %v18540_v44  ;;  %v18545_v39 = vadd.f32 %v7701_v51, %v18448_v1 }
 0x430   : > { %v18547_v25 = vpop.f32.mrf.mxu0  ;;  %v13187_v26 = vpop.f32.mrf.mxu1 }
 0x431   : > { %20642 = vst [vmem:[#allocation151_spill] sm:$0xff] %v18545_v39  ;;  %v18550_v29 = vadd.f32 %v13187_v26, %v18454_v17 }
 0x432   : > { %v18552_v15 = vpop.f32.mrf.mxu0  ;;  %v7711_v40 = vpop.f32.mrf.mxu1 }
 0x433   : > { %v18555_v20 = vadd.f32 %v7711_v40, %v18459_v5  ;;  %v8035_v38 = vadd.f32 %v18552_v15, %v18507_v19 }
 0x434   : > { %v13190_v32 = vpop.f32.mrf.mxu1  ;;  %v18560_v18 = vpop.f32.mrf.mxu0 }
 0x435   : > { %20643 = vst [vmem:[#allocation153_spill] sm:$0xff] %v18555_v20  ;;  %v18558_v7 = vadd.f32 %v13190_v32, %v18465_v31 }
 0x436   : > { %v7721_v1 = vpop.f32.mrf.mxu1  ;;  %v18568_v14 = vpop.f32.mrf.mxu0 }
 0x437   : > { %v18563_v49 = vadd.f32 %v7721_v1, %v18469_v33 }
 0x438   : > { %v13193_v24 = vpop.f32.mrf.mxu1  ;;  %v18576_v58 = vpop.f32.mrf.mxu0 }
 0x439   : > { %v18566_v17 = vadd.f32 %v13193_v24, %v18474_v41 }
 0x43a   : > { %v7731_v35 = vpop.f32.mrf.mxu1  ;;  %v18581_v28 = vpop.f32.mrf.mxu0 }
 0x43b   : > { %v18571_v5 = vadd.f32 %v7731_v35, %v18477_v37  ;;  %20644 = vst [vmem:[#allocation40_spill] sm:$0xff] %v18581_v28 }
 0x43c   : > { %v13196_v30 = vpop.f32.mrf.mxu1  ;;  %v18586_v37 = vpop.f32.mrf.mxu0 }
 0x43d   : > { %v18574_v31 = vadd.f32 %v13196_v30, %v18481_v61  ;;  %20646 = vst [vmem:[#allocation155_spill] sm:$0xff] %v18586_v37 }
 0x43e   : > { %v7741_v55 = vpop.f32.mrf.mxu1 }
 0x43f   : > { %v18579_v33 = vadd.f32 %v7741_v55, %v18484_v3  ;;  %v18594_v3 = vpop.f32.mrf.mxu0 }
 0x440   : > { %v13199_v50 = vpop.f32.mrf.mxu1  ;;  %20649 = vst [vmem:[#allocation161_spill] sm:$0xff] %v18594_v3 }
 0x442   : > { %v7751_v41 = vpop.f32.mrf.mxu1 }
 0x444   : > { %v13266_v43 = vpop.f32.mrf.mxu1 }
 0x445   : > { %v18584_v48 = vadd.f32 %v13266_v43, %v18499_v52  ;;  %v18600_v52 = vpop.f32.mrf.mxu0 }
 0x446   : > { %v8309_v16 = vpop.f32.mrf.mxu1  ;;  %20652 = vst [vmem:[#allocation164_spill] sm:$0xff] %v18600_v52 }
 0x447   : > { %20645 = vst [vmem:[#allocation154_spill] sm:$0xff] %v18584_v48  ;;  %v18589_v61 = vadd.f32 %v8309_v16, %v18504_v36  ;;  %v18606_v24 = vpop.f32.mrf.mxu0 }
 0x448   : > { %v13269_v45 = vpop.f32.mrf.mxu1  ;;  %20655 = vst [vmem:[#allocation167_spill] sm:$0xff] %v18606_v24 }
 0x449   : > { %20647 = vst [vmem:[#allocation158_spill] sm:$0xff] %v18589_v61  ;;  %v18592_v21 = vadd.f32 %v13269_v45, %v18509_v53 }
 0x44a   : > { %v8319_v4 = vpop.f32.mrf.mxu1 }
 0x44b   : > { %20648 = vst [vmem:[#allocation160_spill] sm:$0xff] %v18592_v21  ;;  %v18596_v23 = vadd.f32 %v8319_v4, %v8024_v10  ;;  %v18612_v10 = vpop.f32.mrf.mxu0 }
 0x44c   : > { %v13272_v51 = vpop.f32.mrf.mxu1  ;;  %20657 = vst [vmem:[#allocation169_spill] sm:$0xff] %v18612_v10  ;;  %v7790_v10 = vadd.f32 %v7751_v41, %v7340_v0  ;;  %v20670_v41 = vld [vmem:[#allocation150_spill] sm:$0xff] }
 0x44d   : > { %20650 = vst [vmem:[#allocation157_spill] sm:$0xff] %v18596_v23  ;;  %v18598_v26 = vadd.f32 %v13272_v51, %v8027_v2  ;;  %v18618_v43 = vpop.f32.mrf.mxu0 }
 0x44e   : > { %v8329_v40 = vpop.f32.mrf.mxu1 }
 0x44f   : > { %20651 = vst [vmem:[#allocation163_spill] sm:$0xff] %v18598_v26  ;;  %v18602_v32 = vadd.f32 %v8329_v40, %v8026_v8 }
 0x450   : > { %v13275_v1 = vpop.f32.mrf.mxu1 }
 0x451   : > { %20653 = vst [vmem:[#allocation159_spill] sm:$0xff] %v18602_v32  ;;  %v18604_v36 = vadd.f32 %v13275_v1, %v8029_v22  ;;  %v18622_v22 = vpop.f32.mrf.mxu0 }
 0x452   : > { %v8339_v53 = vpop.f32.mrf.mxu1  ;;  %20658 = vst [vmem:[#allocation170_spill] sm:$0xff] %v18622_v22 }
 0x453   : > { %20654 = vst [vmem:[#allocation166_spill] sm:$0xff] %v18604_v36  ;;  %v18608_v35 = vadd.f32 %v8339_v53, %v8028_v60  ;;  %v13246_v51 = vpop.f32.mrf.mxu0  ;;  %v8037_v36 = vadd.f32 %v18568_v14, %v18515_v6 }
 0x454   : > { %v18610_v30 = vpop.f32.mrf.mxu1 }
 0x455   : > { %20656 = vst [vmem:[#allocation162_spill] sm:$0xff] %v18608_v35  ;;  %v7983_v1 = vpop.f32.mrf.mxu0 }
 0x456   : > { %v18614_v55 = vpop.f32.mrf.mxu1 }
 0x457   : > { %v13249_v48 = vpop.f32.mrf.mxu0 }
 0x458   : > { %v18616_v2 = vpop.f32.mrf.mxu1 }
 0x459   : > { %v7993_v57 = vpop.f32.mrf.mxu0 }
 0x45a   : > { %v18620_v8 = vpop.f32.mrf.mxu1  ;;  %v8048_v19 = vadd.f32 %v7993_v57, %v18571_v5  ;;  %v8046_v57 = vadd.f32 %v7983_v1, %v18563_v49  ;;  %v20690_v1 = vld [vmem:[#allocation149_spill] sm:$0xff] }
 0x45b   : > { %v13252_v46 = vpop.f32.mrf.mxu0 }
 0x45c   : > { %v13284_v16 = vpop.f32.mrf.mxu1 }
 0x45d   : > { %v8481_v14 = vadd.f32 %v13284_v16, %v8035_v38  ;;  %v20685_v16 = vld [vmem:[#allocation159_spill] sm:$0xff] }
 0x45e   : > { %v8369_v45 = vpop.f32.mrf.mxu1 }
 0x460   : > { %v13287_v4 = vpop.f32.mrf.mxu1 }
 0x461   : > { %v8483_v22 = vadd.f32 %v13287_v4, %v8037_v36 }
 0x462   : > { %v8379_v60 = vpop.f32.mrf.mxu1 }
 0x464   : > { %v18624_v40 = vpop.f32.mrf.mxu1 }
 0x465   : > { %20659 = vst [vmem:[#allocation165_spill] sm:$0xff] %v18624_v40  ;;  %v8003_v40 = vpop.f32.mrf.mxu0 }
 0x466   : > { %v18626_v53 = vpop.f32.mrf.mxu1  ;;  %v8050_v0 = vadd.f32 %v8003_v40, %v18579_v33  ;;  %v20668_v33 = vld [vmem:[#allocation170_spill] sm:$0xff]  ;;  %v20689_v40 = vld [vmem:[#allocation160_spill] sm:$0xff] }
 0x467   : > { %20660 = vst [vmem:[#allocation172_spill] sm:$0xff] %v18626_v53  ;;  %v13255_v53 = vpop.f32.mrf.mxu0 }
 0x468   : > { %v18628_v61 = vpop.f32.mrf.mxu1 }
 0x469   : > { %20661 = vst [vmem:[#allocation173_spill] sm:$0xff] %v18628_v61  ;;  %v7341_v61 = vadd.f32 %v18489_v9, %v18434_v27  ;;  %v8051_v9 = vadd.f32 %v13252_v46, %v18574_v31  ;;  %v8033_v46 = vadd.f32 %v18542_v11, %v18497_v47  ;;  %v8031_v31 = vadd.f32 %v18532_v12, %v18487_v62  ;;  %v20667_v12 = vld [vmem:[#allocation153_spill] sm:$0xff] }
 0x46a   : > { %v18630_v23 = vpop.f32.mrf.mxu1 }
 0x46b   : > { %20662 = vst [vmem:[#allocation174_spill] sm:$0xff] %v18630_v23  ;;  %v7791_v35 = vadd.f32 %v13199_v50, %v7341_v61  ;;  %v8044_v50 = vadd.f32 %v20668_v33, %v20667_v12  ;;  %v20673_v61 = vld [vmem:[#allocation166_spill] sm:$0xff]  ;;  %v11360_v12 = vld [vmem:[%s19790_s5 + $0x60] sm:$0xff] }
 0x46c   : > { %v18632_v37 = vpop.f32.mrf.mxu1  ;;  %v11385_v33 = vld [vmem:[%s19790_s5 + $0xb0] sm:$0xff] }
 0x46d   : > { %20663 = vst [vmem:[#allocation168_spill] sm:$0xff] %v18632_v37  ;;  %v8053_v39 = vadd.f32 %v13255_v53, %v7791_v35  ;;  %v20691_v53 = vld [vmem:[#allocation155_spill] sm:$0xff] }
 0x46e   : > { %v18634_v21 = vpop.f32.mrf.mxu1 }
 0x46f   : > { %20664 = vst [vmem:[#allocation176_spill] sm:$0xff] %v18634_v21  ;;  %v8013_v21 = vpop.f32.mrf.mxu0 }
 0x470   : > { %v18636_v28 = vpop.f32.mrf.mxu1  ;;  %v8052_v24 = vadd.f32 %v8013_v21, %v7790_v10  ;;  %v20682_v10 = vld [vmem:[#allocation152_spill] sm:$0xff] }
 0x471   : > { %20665 = vst [vmem:[#allocation177_spill] sm:$0xff] %v18636_v28  ;;  %v8036_v28 = vadd.f32 %v18576_v58, %v18521_v56  ;;  %v8049_v56 = vadd.f32 %v13249_v48, %v18566_v17 }
 0x472   : > { %v18638_v32 = vpop.f32.mrf.mxu1 }
 0x473   : > { %20666 = vst [vmem:[#allocation178_spill] sm:$0xff] %v18638_v32  ;;  %v8482_v54 = vadd.f32 %v8379_v60, %v8036_v28 }
 0x474   : > { %v13302_v52 = vpop.f32.mrf.mxu1 }
 0x476   : > { %v8429_v59 = vpop.f32.mrf.mxu1 }
 0x477   : > { %v8492_v5 = vadd.f32 %v8429_v59, %v8046_v57  ;;  %v20674_v59 = vld [vmem:[#allocation151_spill] sm:$0xff] }
 0x478   : > { %v13305_v26 = vpop.f32.mrf.mxu1  ;;  %v20669_v49 = vld [vmem:[#allocation177_spill] sm:$0xff]  ;;  %v8512_v57 = vld [vmem:[%s19792_s7 + $0x60] sm:$0xff] }
 0x479   : > { %v8495_v15 = vadd.f32 %v13305_v26, %v8049_v56  ;;  %v20677_v26 = vld [vmem:[#allocation162_spill] sm:$0xff] }
 0x47a   : > { %v8439_v3 = vpop.f32.mrf.mxu1  ;;  %v20672_v48 = vld [vmem:[#allocation178_spill] sm:$0xff] }
 0x47b   : > { %v8494_v17 = vadd.f32 %v8439_v3, %v8048_v19  ;;  %v20676_v3 = vld [vmem:[#allocation168_spill] sm:$0xff]  ;;  %v8503_v56 = vld [vmem:[%s19792_s7 + $0x18] sm:$0xff] }
 0x47c   : > { %v13308_v23 = vpop.f32.mrf.mxu1  ;;  %v8504_v19 = vld [vmem:[%s19792_s7 + $0x20] sm:$0xff] }
 0x47d   : > { %v8497_v6 = vadd.f32 %v13308_v23, %v8051_v9  ;;  %v20692_v9 = vld [vmem:[#allocation165_spill] sm:$0xff] }
 0x47e   : > { %v8449_v37 = vpop.f32.mrf.mxu1 }
 0x47f   : > { %v8496_v58 = vadd.f32 %v8449_v37, %v8050_v0  ;;  %v8490_v37 = vadd.f32 %v20672_v48, %v8044_v50  ;;  %v20694_v0 = vld [vmem:[#allocation172_spill] sm:$0xff]  ;;  %v11381_v48 = vld [vmem:[%s19790_s5 + $0x90] sm:$0xff] }
 0x480   : > { %v13311_v32 = vpop.f32.mrf.mxu1  ;;  %v11384_v50 = vld [vmem:[%s19790_s5 + $0xa8] sm:$0xff] }
 0x481   : > { %v8499_v44 = vadd.f32 %v13311_v32, %v8053_v39  ;;  %v8034_v39 = vadd.f32 %v18560_v18, %v18512_v13  ;;  %v8479_v13 = vadd.f32 %v18616_v2, %v8033_v46  ;;  %v8047_v18 = vadd.f32 %v13246_v51, %v18558_v7  ;;  %v20679_v32 = vld [vmem:[#allocation161_spill] sm:$0xff]  ;;  %v20688_v51 = vld [vmem:[#allocation174_spill] sm:$0xff] }
 0x482   : > { %v8459_v27 = vpop.f32.mrf.mxu1  ;;  %v8045_v7 = vadd.f32 %v18618_v43, %v18550_v29  ;;  %v20675_v29 = vld [vmem:[#allocation169_spill] sm:$0xff] }
 0x483   : > { %v8498_v20 = vadd.f32 %v8459_v27, %v8052_v24  ;;  %12122 = vmatprep.subr.mxu0 %v8499_v44  ;;  %v8480_v44 = vadd.f32 %v8369_v45, %v8034_v39  ;;  %v8493_v11 = vadd.f32 %v13302_v52, %v8047_v18  ;;  %v8042_v21 = vadd.f32 %v20675_v29, %v20674_v59  ;;  %v20678_v52 = vld [vmem:[#allocation148_spill] sm:$0xff]  ;;  %v20684_v43 = vld [vmem:[#allocation173_spill] sm:$0xff]  ;;  %v20695_v39 = vld [vmem:[#allocation154_spill] sm:$0xff] }
 0x484   : > { %12123 = vmatpush3.msra.mxu0 %v8483_v22  ;;  %v8491_v28 = vadd.f32 %v20669_v49, %v8045_v7  ;;  %v8041_v36 = vadd.f32 %v20679_v32, %v20678_v52  ;;  %v20680_v24 = vld [vmem:[#allocation176_spill] sm:$0xff]  ;;  %v20686_v22 = vld [vmem:[#allocation147_spill] sm:$0xff]  ;;  %v8038_v27 = vadd.f32 %v20691_v53, %v20690_v1  ;;  %v8502_v46 = vld [vmem:[%s19792_s7 + $0x10] sm:$0xff] }
 0x485   : > { %12124 = vmatprep.subr.mxu0 %v8498_v20  ;;  %v8032_v20 = vadd.f32 %v18547_v25, %v18502_v34  ;;  %v8030_v34 = vadd.f32 %v18537_v63, %v18492_v42  ;;  %v8477_v25 = vadd.f32 %v18610_v30, %v8031_v31  ;;  %v20671_v42 = vld [vmem:[#allocation167_spill] sm:$0xff]  ;;  %v8488_v35 = vadd.f32 %v20680_v24, %v8042_v21  ;;  %v20687_v45 = vld [vmem:[#allocation40_spill] sm:$0xff]  ;;  %v8510_v31 = vld [vmem:[%s19792_s7 + $0x50] sm:$0xff] }
 0x486   : > { %12125 = vmatpush3.msra.mxu0 %v8482_v54  ;;  %v8043_v63 = vadd.f32 %v20671_v42, %v20670_v41  ;;  %v20681_v30 = vld [vmem:[#allocation163_spill] sm:$0xff]  ;;  %v8039_v4 = vadd.f32 %v20687_v45, %v20686_v22  ;;  %v20693_v54 = vld [vmem:[#allocation157_spill] sm:$0xff] }
 0x487   : > { %12126 = vmatprep.subr.mxu0 %v8497_v6  ;;  %v8478_v47 = vadd.f32 %v18620_v8, %v8032_v20  ;;  %v8476_v62 = vadd.f32 %v18614_v55, %v8030_v34  ;;  %v20683_v55 = vld [vmem:[#allocation164_spill] sm:$0xff]  ;;  %v8487_v8 = vadd.f32 %v20684_v43, %v8041_v36  ;;  %v8484_v6 = vadd.f32 %v20694_v0, %v8038_v27  ;;  %v8506_v20 = vld [vmem:[%s19792_s7 + $0x30] sm:$0xff]  ;;  %v11359_v49 = vld [vmem:[%s19790_s5 + $0x58] sm:$0xff] }
 0x488   : > { %12127 = vmatpush3.msra.mxu0 %v8481_v14  ;;  %v8489_v23 = vadd.f32 %v20676_v3, %v8043_v63  ;;  %v8040_v2 = vadd.f32 %v20683_v55, %v20682_v10  ;;  %v8485_v38 = vadd.f32 %v20692_v9, %v8039_v4  ;;  %v8500_v14 = vld [vmem:[%s19792_s7] sm:$0xff]  ;;  %v8514_v34 = vld [vmem:[%s19792_s7 + $0x70] sm:$0xff]  ;;  %v11382_v42 = vld [vmem:[%s19790_s5 + $0x98] sm:$0xff] }
 0x489   : > { %12128 = vmatprep.subr.mxu0 %v8496_v58  ;;  %v20696_v58 = vld [vmem:[#allocation158_spill] sm:$0xff]  ;;  %v8508_v18 = vld [vmem:[%s19792_s7 + $0x40] sm:$0xff]  ;;  %v11357_v63 = vld [vmem:[%s19790_s5 + $0x48] sm:$0xff] }
 0x48a   : > { %12129 = vmatpush3.msra.mxu0 %v8480_v44  ;;  %v8486_v60 = vadd.f32 %v20688_v51, %v8040_v2  ;;  %v8505_v44 = vld [vmem:[%s19792_s7 + $0x28] sm:$0xff]  ;;  %v11362_v7 = vld [vmem:[%s19790_s5 + $0x70] sm:$0xff]  ;;  %v18795_v59 = vld [vmem:[%s19790_s5 + $0x38] sm:$0xff] }
 0x48b   : > { %12130 = vmatprep.subr.mxu0 %v8495_v15  ;;  %v8507_v15 = vld [vmem:[%s19792_s7 + $0x38] sm:$0xff]  ;;  %v11358_v41 = vld [vmem:[%s19790_s5 + $0x50] sm:$0xff]  ;;  %v11379_v29 = vld [vmem:[%s19790_s5 + $0x80] sm:$0xff] }
 0x48c   : > { %12131 = vmatpush3.msra.mxu0 %v8479_v13  ;;  %v8509_v13 = vld [vmem:[%s19792_s7 + $0x48] sm:$0xff]  ;;  %v18804_v21 = vld [vmem:[%s19790_s5 + $0x138] sm:$0xff] }
 0x48d   : > { %12132 = vmatprep.subr.mxu0 %v8494_v17  ;;  %v8511_v17 = vld [vmem:[%s19792_s7 + $0x58] sm:$0xff] }
 0x48e   : > { %12133 = vmatpush3.msra.mxu0 %v8478_v47  ;;  %v8513_v47 = vld [vmem:[%s19792_s7 + $0x68] sm:$0xff] }
 0x48f   : > { %12134 = vmatprep.subr.mxu0 %v8493_v11  ;;  %v8515_v11 = vld [vmem:[%s19792_s7 + $0x78] sm:$0xff] }
 0x490   : > { %12135 = vmatpush3.msra.mxu0 %v8477_v25  ;;  %v11363_v25 = vld [vmem:[%s19790_s5 + $0x78] sm:$0xff] }
 0x491   : > { %12136 = vmatprep.subr.mxu0 %v8492_v5  ;;  %13312 = vmatprep.subr.mxu1 %v11363_v25  ;;  %v11361_v5 = vld [vmem:[%s19790_s5 + $0x68] sm:$0xff] }
 0x492   : > { %12137 = vmatpush3.msra.mxu0 %v8476_v62  ;;  %13313 = vmatpush3.msra.mxu1 %v11363_v25  ;;  %v11386_v62 = vld [vmem:[%s19790_s5 + $0xb8] sm:$0xff] }
 0x493   : > { %12138 = vmatprep.subr.mxu0 %v8491_v28  ;;  %13314 = vmatprep.subr.mxu1 %v11362_v7  ;;  %v11383_v28 = vld [vmem:[%s19790_s5 + $0xa0] sm:$0xff] }
 0x494   : > { %12139 = vmatpush3.msra.mxu0 %v20673_v61  ;;  %13315 = vmatpush3.msra.mxu1 %v11362_v7  ;;  %v11380_v61 = vld [vmem:[%s19790_s5 + $0x88] sm:$0xff] }
 0x495   : > { %12140 = vmatprep.subr.mxu0 %v8490_v37  ;;  %13316 = vmatprep.subr.mxu1 %v11361_v5  ;;  %v11356_v37 = vld [vmem:[%s19790_s5 + $0x40] sm:$0xff] }
 0x496   : > { %12141 = vmatpush3.msra.mxu0 %v20677_v26  ;;  %13317 = vmatpush3.msra.mxu1 %v11361_v5 }
 0x497   : > { %12142 = vmatprep.subr.mxu0 %v8489_v23  ;;  %13318 = vmatprep.subr.mxu1 %v11360_v12  ;;  %v18807_v23 = vld [vmem:[#allocation7] ss:$0 sm:$0xff] }
 0x498   : > { %12143 = vmatpush3.msra.mxu0 %v20681_v30  ;;  %13319 = vmatpush3.msra.mxu1 %v11360_v12 }
 0x499   : > { %12144 = vmatprep.subr.mxu0 %v8488_v35  ;;  %13320 = vmatprep.subr.mxu1 %v11359_v49 }
 0x49a   : > { %12145 = vmatpush3.msra.mxu0 %v20685_v16  ;;  %13321 = vmatpush3.msra.mxu1 %v11359_v49 }
 0x49b   : > { %12146 = vmatprep.subr.mxu0 %v8487_v8  ;;  %13322 = vmatprep.subr.mxu1 %v11358_v41 }
 0x49c   : > { %12147 = vmatpush3.msra.mxu0 %v20689_v40  ;;  %13323 = vmatpush3.msra.mxu1 %v11358_v41 }
 0x49d   : > { %12148 = vmatprep.subr.mxu0 %v8486_v60  ;;  %13324 = vmatprep.subr.mxu1 %v11357_v63 }
 0x49e   : > { %12149 = vmatpush3.msra.mxu0 %v20693_v54  ;;  %13325 = vmatpush3.msra.mxu1 %v11357_v63 }
 0x49f   : > { %12150 = vmatprep.subr.mxu0 %v8485_v38  ;;  %13326 = vmatprep.subr.mxu1 %v11356_v37 }
 0x4a0   : > { %12151 = vmatpush3.msra.mxu0 %v20695_v39  ;;  %13327 = vmatpush3.msra.mxu1 %v11356_v37 }
 0x4a1   : > { %12152 = vmatprep.subr.mxu0 %v8484_v6  ;;  %13340 = vmatprep.subr.mxu1 %v18795_v59 }
 0x4a2   : > { %12153 = vmatpush3.msra.mxu0 %v20696_v58 }
 0x4a3   : > { %8588 = vmatmul.mubr.f32.vlgmr.msra.gmra.mxu0 %v8500_v14  ;;  %13368 = vmatprep.subr.mxu0 %v11386_v62 }
 0x4a4   : > { %8592 = vmatprep.mubr.f32.mxu0 %v8503_v56  ;;  %13369 = vmatpush3.msra.mxu0 %v11386_v62 }
 0x4a5   : > { %13370 = vmatprep.subr.mxu0 %v11385_v33 }
 0x4a6   : > { %13371 = vmatpush3.msra.mxu0 %v11385_v33  ;;  %v20698_v33 = vld [vmem:[#allocation57_spill] sm:$0xff] }
 0x4a7   : > { %8593 = vmatmul.mubr.f32.gmra.mxu0 %v8502_v46  ;;  %13372 = vmatprep.subr.mxu0 %v11384_v50 }
 0x4a8   : > { %8597 = vmatprep.mubr.f32.mxu0 %v8505_v44  ;;  %13373 = vmatpush3.msra.mxu0 %v11384_v50  ;;  %v8709_v50 = vand.u32 7, %v20698_v33 }
 0x4a9   : > { %13374 = vmatprep.subr.mxu0 %v11383_v28 }
 0x4aa   : > { %13375 = vmatpush3.msra.mxu0 %v11383_v28  ;;  %vm8741_vm12 = vcmp.lt.s32.totalorder %v8709_v50, 7  ;;  %vm18890_vm7 = vcmp.gt.s32.totalorder %v8709_v50, 0  ;;  %v20708_v50 = vld [vmem:[#allocation28_spill] sm:$0xff] }
 0x4ab   : > { %8598 = vmatmul.mubr.f32.gmra.mxu0 %v8504_v19  ;;  %13376 = vmatprep.subr.mxu0 %v11382_v42 }
 0x4ac   : > { %8602 = vmatprep.mubr.f32.mxu0 %v8507_v15  ;;  %13377 = vmatpush3.msra.mxu0 %v11382_v42 }
 0x4ad   : > { %13378 = vmatprep.subr.mxu0 %v11381_v48 }
 0x4ae   : > { %13379 = vmatpush3.msra.mxu0 %v11381_v48 }
 0x4af   : > { %8603 = vmatmul.mubr.f32.gmra.mxu0 %v8506_v20  ;;  %13380 = vmatprep.subr.mxu0 %v11380_v61 }
 0x4b0   : > { %8607 = vmatprep.mubr.f32.mxu0 %v8509_v13  ;;  %13381 = vmatpush3.msra.mxu0 %v11380_v61  ;;  %v20699_v61 = vld [vmem:[#allocation26_spill] sm:$0xff] }
 0x4b1   : > { %13382 = vmatprep.subr.mxu0 %v11379_v29 }
 0x4b2   : > { %13383 = vmatpush3.msra.mxu0 %v11379_v29  ;;  %v8710_v29 = vand.u32 7, %v20699_v61 }
 0x4b3   : > { %8608 = vmatmul.mubr.f32.gmra.mxu0 %v8508_v18  ;;  %13424 = vmatprep.subr.mxu0 %v18804_v21  ;;  %v20697_v18 = vld [vmem:[#allocation25_spill] sm:$0xff] }
 0x4b4   : > { %8612 = vmatprep.mubr.f32.mxu0 %v8511_v17  ;;  %v8708_v17 = vand.u32 7, %v20697_v18  ;;  %vm8742_vm13 = vcmp.lt.s32.totalorder %v8710_v29, 7  ;;  %v8811_v18 = vld [vmem:[%s19790_s5 + $0x30] sm:$0xff]  ;;  %vm18943_vm9 = vcmp.gt.s32.totalorder %v8710_v29, 0 }
 0x4b6   : > { %vm8740_vm1 = vcmp.lt.s32.totalorder %v8708_v17, 7  ;;  %vm18886_vm6 = vcmp.gt.s32.totalorder %v8708_v17, 0 }
 0x4b7   : > { %8613 = vmatmul.mubr.f32.gmra.mxu0 %v8510_v31 }
 0x4b8   : > { %8617 = vmatprep.mubr.f32.mxu0 %v8513_v47 }
 0x4bb   : > { %8618 = vmatmul.mubr.f32.gmra.mxu0 %v8512_v57 }
 0x4bc   : > { %8622 = vmatprep.mubr.f32.mxu0 %v8515_v11 }
 0x4bf   : > { %8623 = vmatmul.mubr.f32.gmra.mxu0 %v8514_v34 }
 0x563   : > { %v12154_v3 = vpop.f32.mrf.mxu0 }
 0x565   : > { %v12155_v26 = vpop.f32.mrf.mxu0 }
 0x566   : > { %v12156_v52 = vadd.f32 %v12155_v26, %v12154_v3  ;;  %v20700_v26 = vmov 0.0  }
 0x567   : > { %v12157_v32 = vpop.f32.mrf.mxu0 }
 0x568   : > { %v18810_v36 = vadd.f32 %v12156_v52, %v18807_v23  ;;  %v11348_v52 = vsel %vm8740_vm1, 1.0, %v20700_v26 }
 0x569   : > { %v12158_v24 = vpop.f32.mrf.mxu0 }
 0x56a   : > { %v8628_v35 = vmin.f32 %v18810_v36, 20.0  ;;  %v12159_v30 = vadd.f32 %v12158_v24, %v12157_v32 }
 0x56b   : > { %v12160_v10 = vpop.f32.mrf.mxu0 }
 0x56c   : > { %v8636_v55 = vmul.f32 1.442695, %v8628_v35  ;;  %v18814_v2 = vadd.f32 %v12159_v30, %v18807_v23  ;;  %v20701_v30 = vld [vmem:[#allocation70_spill] sm:$0xff] }
 0x56d   : > { %v12161_v43 = vpop.f32.mrf.mxu0 }
 0x56e   : > { %13872 = vpow2.f32 %v8636_v55  ;;  %v8629_v8 = vmin.f32 %v18814_v2, 20.0  ;;  %v12162_v16 = vadd.f32 %v12161_v43, %v12160_v10  ;;  %v8711_v10 = vand.u32 7, %v20701_v30 }
 0x56f   : > { %v12163_v22 = vpop.f32.mrf.mxu0 }
 0x570   : > { %v8638_v45 = vmul.f32 1.442695, %v8629_v8  ;;  %v18818_v4 = vadd.f32 %v12162_v16, %v18807_v23  ;;  %v11349_v8 = vsel %vm8741_vm12, 1.0, %v20700_v26  ;;  %v18854_v16 = vrot.slane %v11348_v52, 7 }
 0x571   : > { %v12164_v51 = vpop.f32.mrf.mxu0  ;;  %vm8743_vm14 = vcmp.lt.s32.totalorder %v8711_v10, 7  ;;  %v18919_v52 = vsel %vm18890_vm7, 1.0, %v20700_v26  ;;  %vm18982_vm10 = vcmp.gt.s32.totalorder %v8711_v10, 0 }
 0x572   : > { %13874 = vpow2.f32 %v8638_v45  ;;  %v8630_v60 = vmin.f32 %v18818_v4, 20.0  ;;  %v12165_v40 = vadd.f32 %v12164_v51, %v12163_v22  ;;  %v11350_v22 = vsel %vm8742_vm13, 1.0, %v20700_v26  ;;  %v20702_v45 = vld [vmem:[#allocation27_spill] sm:$0xff] }
 0x573   : > { %v12166_v1 = vpop.f32.mrf.mxu0  ;;  %v8712_v51 = vand.u32 7, %v20702_v45 }
 0x574   : > { %v8640_v53 = vmul.f32 1.442695, %v8630_v60  ;;  %v18822_v27 = vadd.f32 %v12165_v40, %v18807_v23 }
 0x575   : > { %v12167_v9 = vpop.f32.mrf.mxu0  ;;  %vm8744_vm15 = vcmp.lt.s32.totalorder %v8712_v51, 7  ;;  %vm19028_vm11 = vcmp.gt.s32.totalorder %v8712_v51, 0 }
 0x576   : > { %13876 = vpow2.f32 %v8640_v53  ;;  %v8631_v38 = vmin.f32 %v18822_v27, 20.0  ;;  %v12168_v54 = vadd.f32 %v12167_v9, %v12166_v1  ;;  %v9107_v1 = vrot.slane %v11349_v8, 7 }
 0x577   : > { %v12169_v0 = vpop.f32.mrf.mxu0 }
 0x578   : > { %v8642_v6 = vmul.f32 1.442695, %v8631_v38  ;;  %v18826_v39 = vadd.f32 %v12168_v54, %v18807_v23  ;;  %v9109_v38 = vrot.slane %v11350_v22, 7  ;;  %v11351_v54 = vsel %vm8743_vm14, 1.0, %v20700_v26 }
 0x579   : > { %v12170_v14 = vpop.f32.mrf.mxu0 }
 0x57a   : > { %13878 = vpow2.f32 %v8642_v6  ;;  %v8632_v56 = vmin.f32 %v18826_v39, 20.0  ;;  %v12171_v58 = vadd.f32 %v12170_v14, %v12169_v0  ;;  %v9130_v0 = vmul.f32 0.0, %v18854_v16  ;;  %v20703_v6 = vld [vmem:[#allocation73_spill] sm:$0xff] }
 0x57b   : > { %v13873_v46 = vpop.eup %13872  ;;  %v12172_v44 = vpop.f32.mrf.mxu0  ;;  %v8713_v14 = vand.u32 7, %v20703_v6 }
 0x57c   : > { %v8652_v19 = vadd.f32 1.0, %v13873_v46  ;;  %v8644_v15 = vmul.f32 1.442695, %v8632_v56  ;;  %v18830_v20 = vadd.f32 %v12171_v58, %v18807_v23  ;;  %v18871_v46 = vsel %vm8744_vm15, 1.0, %v20700_v26 }
 0x57d   : > { %v12173_v13 = vpop.f32.mrf.mxu0  ;;  %vm8745_vm5 = vcmp.lt.s32.totalorder %v8713_v14, 7  ;;  %v9157_v33 = vrot.slane %v9130_v0, 1  ;;  %vm19057_vm1 = vcmp.gt.s32.totalorder %v8713_v14, 0  ;;  %v11344_v14 = vsel %vm19028_vm11, 1.0, %v20700_v26 }
 0x57e   : > { %v8660_v31 = vmul.f32 %v8652_v19, %v8652_v19  ;;  %13880 = vpow2.f32 %v8644_v15  ;;  %v8633_v47 = vmin.f32 %v18830_v20, 20.0  ;;  %v12174_v57 = vadd.f32 %v12173_v13, %v12172_v44 }
 0x57f   : > { %v13875_v11 = vpop.eup %13874  ;;  %v12175_v34 = vpop.f32.mrf.mxu0  ;;  %v18875_v19 = vsel %vm1326_vm3, %v18854_v16, %v9107_v1  ;;  %v9111_v15 = vrot.slane %v11351_v54, 7  ;;  %v18906_v17 = vsel %vm8745_vm5, 1.0, %v20700_v26 }
 0x580   : > { %v8676_v25 = vadd.f32 1.0, %v8660_v31  ;;  %v8653_v7 = vadd.f32 1.0, %v13875_v11  ;;  %v8646_v5 = vmul.f32 1.442695, %v8633_v47  ;;  %v18835_v62 = vadd.f32 %v12174_v57, %v18807_v23 }
 0x581   : > { %v12176_v12 = vpop.f32.mrf.mxu0  ;;  %v11332_v56 = vadd.f32 -1.0, %v8660_v31  ;;  %v18879_v11 = vsel %vm1326_vm3, %v9107_v1, %v9109_v38 }
 0x582   : > { %13882 = vrcp.f32 %v8676_v25  ;;  %v8661_v49 = vmul.f32 %v8653_v7, %v8653_v7  ;;  %v12177_v28 = vadd.f32 %v12176_v12, %v12175_v34  ;;  %v8634_v42 = vmin.f32 %v18835_v62, 20.0 }
 0x583   : > { %v13877_v41 = vpop.eup %13876  ;;  %13884 = vpow2.f32 %v8646_v5  ;;  %v9113_v34 = vrot.slane %v18871_v46, 7 }
 0x584   : > { %v8677_v63 = vadd.f32 1.0, %v8661_v49  ;;  %v8654_v48 = vadd.f32 1.0, %v13877_v41  ;;  %v18842_v37 = vadd.f32 %v12177_v28, %v18807_v23  ;;  %v8648_v3 = vmul.f32 1.442695, %v8634_v42 }
 0x585   : > { %v11333_v12 = vadd.f32 -1.0, %v8661_v49  ;;  %v18900_v42 = vsel %vm1326_vm3, %v9109_v38, %v9111_v15 }
 0x586   : > { %13886 = vrcp.f32 %v8677_v63  ;;  %v18846_v32 = vmul.f32 %v8654_v48, %v8654_v48  ;;  %v8635_v24 = vmin.f32 %v18842_v37, 20.0  ;;  %v8714_v63 = vand.u32 7, %v20708_v50 }
 0x587   : > { %v13879_v35 = vpop.eup %13878  ;;  %13888 = vpow2.f32 %v8648_v3  ;;  %v11340_v3 = vsel %vm18886_vm6, 1.0, %v20700_v26 }
 0x588   : > { %v8678_v23 = vadd.f32 1.0, %v18846_v32  ;;  %v8655_v55 = vadd.f32 1.0, %v13879_v35  ;;  %v8650_v43 = vmul.f32 1.442695, %v8635_v24  ;;  %vm18933_vm8 = vcmp.lt.s32.totalorder %v8714_v63, 7 }
 0x589   : > { %v18963_v0 = vsel %vm18933_vm8, 1.0, %v20700_v26  ;;  %vm19100_vm12 = vcmp.gt.s32.totalorder %v8714_v63, 0 }
 0x58a   : > { %13890 = vrcp.f32 %v8678_v23  ;;  %v18860_v60 = vmul.f32 %v8655_v55, %v8655_v55  ;;  %v8810_v23 = vld [vmem:[%s19790_s5 + $0x28] sm:$0xff]  ;;  %v18929_v55 = vsel %vm1326_vm3, %v9111_v15, %v9113_v34  ;;  %v8808_v15 = vld [vmem:[%s19790_s5 + $0x18] sm:$0xff] }
 0x58b   : > { %v13881_v40 = vpop.eup %13880  ;;  %13892 = vpow2.f32 %v8650_v43 }
 0x58c   : > { %v8679_v53 = vadd.f32 1.0, %v18860_v60  ;;  %v8656_v9 = vadd.f32 1.0, %v13881_v40 }
 0x58e   : > { %13894 = vrcp.f32 %v8679_v53  ;;  %v18868_v58 = vmul.f32 %v8656_v9, %v8656_v9  ;;  %v18952_v9 = vrot.slane %v11340_v3, 1  ;;  %v8806_v3 = vld [vmem:[%s19790_s5 + $0x8] sm:$0xff] }
 0x58f   : > { %v13883_v44 = vpop.eup %13882 }
 0x590   : > { %v13885_v13 = vpop.eup %13884  ;;  %v8685_v47 = vmul.f32 %v13883_v44, %v11332_v56  ;;  %v8680_v57 = vadd.f32 1.0, %v18868_v58 }
 0x591   : > { %v8657_v31 = vadd.f32 1.0, %v13885_v13  ;;  %v9115_v13 = vrot.slane %v18906_v17, 7  ;;  %v11417_v17 = vld [vmem:[%s19790_s5 + $0x130] sm:$0xff] }
 0x592   : > { %v18895_v5 = vmul.f32 %v8685_v47, %v18810_v36  ;;  %13896 = vrcp.f32 %v8680_v57  ;;  %v18974_v47 = vsel %vm18943_vm9, 1.0, %v20700_v26 }
 0x593   : > { %v13887_v28 = vpop.eup %13886  ;;  %v18897_v41 = vmul.f32 %v8657_v31, %v8657_v31  ;;  %v11335_v31 = vadd.f32 -1.0, %v18860_v60 }
 0x594   : > { %v13889_v36 = vpop.eup %13888  ;;  %v8687_v48 = vmul.f32 %v13887_v28, %v11333_v12  ;;  %13329 = vmatmul.mubr.msk.f32.vlgmr.msra.gmra.mxu1 %vm8822_vm4, %v18895_v5  ;;  %v9131_v49 = vmul.f32 %v18875_v19, %v18895_v5  ;;  %v9117_v28 = vrot.slane %v18963_v0, 7 }
 0x595   : > { %v8681_v24 = vadd.f32 1.0, %v18897_v41  ;;  %v8658_v35 = vadd.f32 1.0, %v13889_v36  ;;  %13341 = vmatpush3.msra.mxu1 %v18795_v59  ;;  %v11334_v59 = vadd.f32 -1.0, %v18846_v32  ;;  %v8773_v32 = vrot.slane %v18919_v52, 1  ;;  %v20715_v36 = vld [vmem:[#allocation79_spill] sm:$0xff] }
 0x596   : > { %v18938_v8 = vmul.f32 %v8687_v48, %v18814_v2  ;;  %v9158_v22 = vrot.slane %v9131_v49, 1  ;;  %13342 = vmatprep.subr.mxu1 %v8811_v18  ;;  %v8809_v2 = vld [vmem:[%s19790_s5 + $0x20] sm:$0xff]  ;;  %v8715_v48 = vand.u32 7, %v20715_v36  ;;  %v19096_v52 = vsel %vm19057_vm1, 1.0, %v20700_v26 }
 0x597   : > { %v13891_v1 = vpop.eup %13890  ;;  %13898 = vrcp.f32 %v8681_v24  ;;  %v18947_v53 = vmul.f32 %v8658_v35, %v8658_v35  ;;  %13343 = vmatpush3.msra.mxu1 %v8811_v18  ;;  %v18996_v30 = vsel %vm837_vm2, %v18952_v9, %v8773_v32  ;;  %v19013_v24 = vmul.f32 0.0, %v18952_v9 }
 0x598   : > { %v13893_v38 = vpop.eup %13892  ;;  %v8689_v54 = vmul.f32 %v13891_v1, %v11334_v59  ;;  %13331 = vmatprep.mubr.msk.f32.mxu1 %vm8822_vm4, %v18938_v8  ;;  %v9159_v61 = vsel %vm837_vm2, %v9157_v33, %v9158_v22  ;;  %v9132_v29 = vmul.f32 %v18879_v11, %v18938_v8  ;;  %13344 = vmatprep.subr.mxu1 %v8810_v23  ;;  %v8775_v35 = vrot.slane %v18974_v47, 1 }
 0x599   : > { %v8682_v56 = vadd.f32 1.0, %v18947_v53  ;;  %v8659_v44 = vadd.f32 1.0, %v13893_v38  ;;  %13384 = vmatprep.mubr.msk.f32.mxu0 %vm8822_vm4, %v9159_v61  ;;  %13345 = vmatpush3.msra.mxu1 %v8810_v23  ;;  %v19019_v23 = vsel %vm18982_vm10, 1.0, %v20700_v26  ;;  %v11336_v59 = vadd.f32 -1.0, %v18868_v58 }
 0x59a   : > { %v18977_v57 = vmul.f32 %v8689_v54, %v18818_v4  ;;  %v9160_v25 = vrot.slane %v9132_v29, 1  ;;  %13346 = vmatprep.subr.mxu1 %v8809_v2  ;;  %v8807_v4 = vld [vmem:[%s19790_s5 + $0x10] sm:$0xff]  ;;  %vm19043_vm0 = vcmp.lt.s32.totalorder %v8715_v48, 7  ;;  %v19065_v54 = vsel %vm1326_vm3, %v9115_v13, %v9117_v28  ;;  %v11415_v29 = vld [vmem:[%s19790_s5 + $0x120] sm:$0xff] }
 0x59b   : > { %v13895_v12 = vpop.eup %13894  ;;  %13900 = vrcp.f32 %v8682_v56  ;;  %v18986_v33 = vmul.f32 %v8659_v44, %v8659_v44  ;;  %13347 = vmatpush3.msra.mxu1 %v8809_v2  ;;  %v19035_v2 = vsel %vm1326_vm3, %v9113_v34, %v9115_v13  ;;  %v8805_v34 = vld [vmem:[%s19790_s5] sm:$0xff]  ;;  %v8960_v61 = vrot.slane %v19013_v24, 7 }
 0x59c   : > { %v8691_v10 = vmul.f32 %v13895_v12, %v11335_v31  ;;  %13332 = vmatmul.mubr.msk.f32.gmra.mxu1 %vm8822_vm4, %v18977_v57  ;;  %v9161_v60 = vsel %vm837_vm2, %v9158_v22, %v9160_v25  ;;  %v9133_v18 = vmul.f32 %v18900_v42, %v18977_v57  ;;  %13348 = vmatprep.subr.mxu1 %v8808_v15  ;;  %v8777_v6 = vrot.slane %v19019_v23, 1  ;;  %v11414_v12 = vld [vmem:[%s19790_s5 + $0x118] sm:$0xff]  ;;  %v11413_v23 = vld [vmem:[%s19790_s5 + $0x110] sm:$0xff] }
 0x59d   : > { %v8683_v49 = vadd.f32 1.0, %v18986_v33  ;;  %13385 = vmatmul.mubr.msk.f32.vlgmr.msra.gmra.mxu0 %vm8822_vm4, %v9161_v60  ;;  %13349 = vmatpush3.msra.mxu1 %v8808_v15  ;;  %v19081_v15 = vsel %vm837_vm2, %v8773_v32, %v8775_v35  ;;  %v11355_v13 = vsel %vm19043_vm0, 1.0, %v20700_v26  ;;  %v11337_v47 = vadd.f32 -1.0, %v18897_v41 }
 0x59e   : > { %v19022_v43 = vmul.f32 %v8691_v10, %v18822_v27  ;;  %v9162_v22 = vrot.slane %v9133_v18, 1  ;;  %13350 = vmatprep.subr.mxu1 %v8807_v4  ;;  %13425 = vmatpush3.msra.mxu0 %v18804_v21  ;;  %v11416_v27 = vld [vmem:[%s19790_s5 + $0x128] sm:$0xff]  ;;  %v19041_v21 = vmul.f32 0.0, %v18996_v30  ;;  %vm19112_vm13 = vcmp.gt.s32.totalorder %v8715_v48, 0 }
 0x59f   : > { %v13897_v1 = vpop.eup %13896  ;;  %13902 = vrcp.f32 %v8683_v49  ;;  %13351 = vmatpush3.msra.mxu1 %v8807_v4  ;;  %13426 = vmatprep.subr.mxu0 %v11417_v17  ;;  %v8779_v4 = vrot.slane %v11344_v14, 1  ;;  %v19118_v10 = vsel %vm837_vm2, %v8775_v35, %v8777_v6  ;;  %v19120_v60 = vrot.slane %v11355_v13, 7 }
 0x5a0   : > { %v8693_v51 = vmul.f32 %v13897_v1, %v11336_v59  ;;  %13334 = vmatprep.mubr.msk.f32.mxu1 %vm8822_vm4, %v19022_v43  ;;  %v9163_v58 = vsel %vm837_vm2, %v9160_v25, %v9162_v22  ;;  %v9134_v46 = vmul.f32 %v18929_v55, %v19022_v43  ;;  %13352 = vmatprep.subr.mxu1 %v8806_v3  ;;  %v8961_v31 = vrot.slane %v19041_v21, 7  ;;  %v11401_v21 = vld [vmem:[%s19790_s5 + $0xf0] sm:$0xff] }
 0x5a1   : > { %13387 = vmatprep.mubr.msk.f32.mxu0 %vm8822_vm4, %v9163_v58  ;;  %13427 = vmatpush3.msra.mxu0 %v11417_v17  ;;  %v9598_v18 = vmul.f32 %v18854_v16, %v18895_v5  ;;  %v8781_v48 = vrot.slane %v19096_v52, 1  ;;  %v11346_v49 = vsel %vm19100_vm12, 1.0, %v20700_v26  ;;  %v11338_v35 = vadd.f32 -1.0, %v18947_v53  ;;  %v11412_v58 = vld [vmem:[%s19790_s5 + $0x108] sm:$0xff] }
 0x5a2   : > { %v19076_v56 = vmul.f32 %v8693_v51, %v18826_v39  ;;  %v9164_v44 = vrot.slane %v9134_v46, 1  ;;  %13353 = vmatpush3.msra.mxu1 %v8806_v3  ;;  %13428 = vmatprep.subr.mxu0 %v11416_v27  ;;  %v19091_v39 = vld [vmem:[%s19790_s5 + $0xf8] sm:$0xff]  ;;  %v8962_v36 = vsel %vm1326_vm3, %v8960_v61, %v8961_v31  ;;  %v11347_v59 = vsel %vm19112_vm13, 1.0, %v20700_v26 }
 0x5a3   : > { %13354 = vmatprep.subr.mxu1 %v8805_v34  ;;  %13429 = vmatpush3.msra.mxu0 %v11416_v27  ;;  %v19151_v53 = vmul.f32 %v19118_v10, %v18938_v8  ;;  %v19154_v27 = vsel %vm837_vm2, %v8777_v6, %v8779_v4  ;;  %v9625_v46 = vrot.slane %v9598_v18, 1  ;;  %v19168_v38 = vsel %vm1326_vm3, %v9117_v28, %v19120_v60 }
 0x5a4   : > { %v13899_v41 = vpop.eup %13898  ;;  %13335 = vmatmul.mubr.msk.f32.gmra.mxu1 %vm8822_vm4, %v19076_v56  ;;  %v9165_v25 = vsel %vm837_vm2, %v9162_v22, %v9164_v44  ;;  %v9135_v7 = vmul.f32 %v19035_v2, %v19076_v56  ;;  %13430 = vmatprep.subr.mxu0 %v11415_v29  ;;  %v9599_v22 = vmul.f32 %v18875_v19, %v18938_v8  ;;  %v8783_v6 = vrot.slane %v11346_v49, 1 }
 0x5a5   : > { %v8695_v63 = vmul.f32 %v13899_v41, %v11337_v47  ;;  %13388 = vmatmul.mubr.msk.f32.gmra.mxu0 %vm8822_vm4, %v9165_v25  ;;  %13355 = vmatpush3.msra.mxu1 %v8805_v34  ;;  %v19173_v14 = vrot.slane %v11347_v59, 1  ;;  %v11339_v13 = vadd.f32 -1.0, %v18986_v33  ;;  %v8965_v32 = vrot.slane %v19151_v53, 7 }
 0x5a6   : > { %v9166_v17 = vrot.slane %v9135_v7, 1  ;;  %13396 = vmatprep.subr.mxu1 %v19091_v39  ;;  %13431 = vmatpush3.msra.mxu0 %v11415_v29  ;;  %v9626_v34 = vrot.slane %v9599_v22, 1  ;;  %v19171_v29 = vsel %vm837_vm2, %v8779_v4, %v8781_v48  ;;  %v8800_v41 = vmul.f32 %v19154_v27, %v18977_v57 }
 0x5a7   : > { %v19135_v3 = vmul.f32 %v8695_v63, %v18830_v20  ;;  %13432 = vmatprep.subr.mxu0 %v11414_v12  ;;  %v8798_v20 = vmul.f32 %v19081_v15, %v18895_v5  ;;  %v19190_v33 = vmul.f32 %v18879_v11, %v18977_v57  ;;  %v8801_v4 = vmul.f32 %v19171_v29, %v19022_v43  ;;  %v19207_v63 = vld [vmem:[%s19790_s5 + $0x1b8] sm:$0xff] }
 0x5a8   : > { %v13901_v40 = vpop.eup %13900  ;;  %v9167_v1 = vsel %vm837_vm2, %v9164_v44, %v9166_v17  ;;  %13433 = vmatpush3.msra.mxu0 %v11414_v12  ;;  %v19180_v52 = vsel %vm837_vm2, %v9625_v46, %v9626_v34  ;;  %v19202_v50 = vsel %vm837_vm2, %v8781_v48, %v8783_v6  ;;  %v19219_v48 = vsel %vm837_vm2, %v8783_v6, %v19173_v14  ;;  %v11399_v46 = vld [vmem:[%s19790_s5 + $0xe0] sm:$0xff] }
 0x5a9   : > { %v8697_v45 = vmul.f32 %v13901_v40, %v11338_v35  ;;  %13337 = vmatprep.mubr.msk.f32.mxu1 %vm8822_vm4, %v19135_v3  ;;  %13390 = vmatprep.mubr.msk.f32.mxu0 %vm8822_vm4, %v9167_v1  ;;  %v9136_v51 = vmul.f32 %v19065_v54, %v19135_v3  ;;  %v8963_v28 = vrot.slane %v8798_v20, 7  ;;  %v9628_v18 = vrot.slane %v19190_v33, 1  ;;  %v11400_v1 = vld [vmem:[%s19790_s5 + $0xe8] sm:$0xff] }
 0x5aa   : > { %13434 = vmatprep.subr.mxu0 %v11413_v23  ;;  %v8802_v22 = vmul.f32 %v19202_v50, %v19076_v56  ;;  %v8969_v40 = vrot.slane %v8801_v4, 7  ;;  %v8803_v53 = vmul.f32 %v19219_v48, %v19135_v3  ;;  %v9306_v24 = vmul.f32 %v19154_v27, %v19022_v43 }
 0x5ab   : > { %v19176_v44 = vmul.f32 %v8697_v45, %v18835_v62  ;;  %v9168_v47 = vrot.slane %v9136_v51, 1  ;;  %13435 = vmatpush3.msra.mxu0 %v11413_v23  ;;  %v11411_v62 = vld [vmem:[%s19790_s5 + $0x100] sm:$0xff]  ;;  %v8966_v35 = vsel %vm1326_vm3, %v8963_v28, %v8965_v32  ;;  %v19224_v23 = vsel %vm837_vm2, %v9626_v34, %v9628_v18 }
 0x5ac   : > { %v13903_v0 = vpop.eup %13902  ;;  %13436 = vmatprep.subr.mxu0 %v11412_v58  ;;  %v19253_v34 = vmul.f32 %v18875_v19, %v18977_v57  ;;  %v8973_v6 = vrot.slane %v8803_v53, 7  ;;  %v10068_v19 = vmul.f32 %v18879_v11, %v19022_v43  ;;  %v11397_v11 = vld [vmem:[%s19790_s5 + $0xd0] sm:$0xff] }
 0x5ad   : > { %v8699_v25 = vmul.f32 %v13903_v0, %v11339_v13  ;;  %13338 = vmatmul.mubr.msk.f32.gmra.mxu1 %vm8822_vm4, %v19176_v44  ;;  %v9169_v7 = vsel %vm837_vm2, %v9166_v17, %v9168_v47  ;;  %v9137_v12 = vmul.f32 %v19168_v38, %v19176_v44  ;;  %13437 = vmatpush3.msra.mxu0 %v11412_v58  ;;  %v8971_v58 = vrot.slane %v8802_v22, 7 }
 0x5ae   : > { %13391 = vmatmul.mubr.msk.f32.gmra.mxu0 %vm8822_vm4, %v9169_v7  ;;  %13356 = vmatprep.mubr.msk.f32.mxu1 %vm8822_vm4, %v8962_v36  ;;  %v8964_v36 = vsel %vm1326_vm3, %v8961_v31, %v8963_v28  ;;  %v8967_v31 = vrot.slane %v8800_v41, 7  ;;  %v8804_v13 = vmul.f32 %v19173_v14, %v19176_v44  ;;  %v10069_v0 = vmul.f32 %v18900_v42, %v19076_v56 }
 0x5af   : > { %v19211_v17 = vmul.f32 %v8699_v25, %v18842_v37  ;;  %v9170_v49 = vrot.slane %v9137_v12, 1  ;;  %13438 = vmatprep.subr.mxu0 %v11411_v62  ;;  %v8972_v28 = vsel %vm1326_vm3, %v8969_v40, %v8971_v58  ;;  %v10070_v41 = vmul.f32 %v18929_v55, %v19135_v3 }
 0x5b0   : > { %13439 = vmatpush3.msra.mxu0 %v11411_v62  ;;  %v8968_v45 = vsel %vm1326_vm3, %v8965_v32, %v8967_v31  ;;  %v9303_v32 = vmul.f32 %v18996_v30, %v18895_v5  ;;  %v10071_v62 = vmul.f32 %v19035_v2, %v19176_v44  ;;  %v10092_v25 = vrot.slane %v19253_v34, 1  ;;  %v11461_v34 = vld [vmem:[%s19790_s5 + $0x1d0] sm:$0xff] }
 0x5b1   : > { %13357 = vmatmul.mubr.msk.f32.vlgmr.msra.gmra.mxu1 %vm8822_vm4, %v8964_v36  ;;  %v9171_v37 = vsel %vm837_vm2, %v9168_v47, %v9170_v49  ;;  %v9138_v59 = vmul.f32 %v19120_v60, %v19211_v17  ;;  %13480 = vmatprep.subr.mxu0 %v19207_v63  ;;  %v11398_v47 = vld [vmem:[%s19790_s5 + $0xd8] sm:$0xff]  ;;  %v10094_v7 = vrot.slane %v10068_v19, 1  ;;  %v10096_v12 = vrot.slane %v10069_v0, 1 }
 0x5b2   : > { %13359 = vmatprep.mubr.msk.f32.mxu1 %vm8822_vm4, %v8966_v35  ;;  %13393 = vmatprep.mubr.msk.f32.mxu0 %vm8822_vm4, %v9171_v37  ;;  %v19281_v4 = vmul.f32 %v19065_v54, %v19211_v17  ;;  %v8975_v36 = vrot.slane %v8804_v13, 7  ;;  %v10098_v35 = vrot.slane %v10070_v41, 1  ;;  %v11449_v37 = vld [vmem:[%s19790_s5 + $0x1b0] sm:$0xff]  ;;  %v11434_v0 = vld [vmem:[%s19790_s5 + $0x178] sm:$0xff] }
 0x5b3   : > { %13397 = vmatpush3.msra.mxu1 %v19091_v39  ;;  %v9172_v20 = vrot.slane %v9138_v59, 1  ;;  %v8970_v39 = vsel %vm1326_vm3, %v8967_v31, %v8969_v40  ;;  %v19295_v31 = vsel %vm837_vm2, %v10094_v7, %v10096_v12  ;;  %v10100_v59 = vrot.slane %v10071_v62, 1  ;;  %v11396_v40 = vld [vmem:[%s19790_s5 + $0xc8] sm:$0xff]  ;;  %v11446_v41 = vld [vmem:[%s19790_s5 + $0x198] sm:$0xff]  ;;  %v11433_v62 = vld [vmem:[%s19790_s5 + $0x170] sm:$0xff] }
 0x5b4   : > { %13398 = vmatprep.subr.mxu1 %v11401_v21  ;;  %v10102_v22 = vrot.slane %v19281_v4, 1  ;;  %v19306_v53 = vsel %vm837_vm2, %v10096_v12, %v10098_v35  ;;  %v11445_v12 = vld [vmem:[%s19790_s5 + $0x190] sm:$0xff] }
 0x5b5   : > { %13399 = vmatpush3.msra.mxu1 %v11401_v21  ;;  %v9173_v51 = vsel %vm837_vm2, %v9170_v49, %v9172_v20  ;;  %v8974_v49 = vsel %vm1326_vm3, %v8971_v58, %v8973_v6  ;;  %v19292_v21 = vsel %vm837_vm2, %v10092_v25, %v10094_v7  ;;  %v9304_v20 = vmul.f32 %v19081_v15, %v18938_v8 }
 0x5b6   : > { %13360 = vmatmul.mubr.msk.f32.gmra.mxu1 %vm8822_vm4, %v8968_v45  ;;  %13400 = vmatprep.subr.mxu1 %v11400_v1  ;;  %v9305_v45 = vmul.f32 %v19118_v10, %v18977_v57  ;;  %v19319_v58 = vsel %vm837_vm2, %v10100_v59, %v10102_v22  ;;  %v9772_v7 = vmul.f32 %v18996_v30, %v18938_v8 }
 0x5b7   : > { %13362 = vmatprep.mubr.msk.f32.mxu1 %vm8822_vm4, %v8970_v39  ;;  %13394 = vmatmul.mubr.msk.f32.gmra.mxu0 %vm8822_vm4, %v9173_v51  ;;  %v19314_v51 = vsel %vm837_vm2, %v10098_v35, %v10100_v59  ;;  %v8976_v39 = vsel %vm1326_vm3, %v8973_v6, %v8975_v36  ;;  %v11447_v6 = vld [vmem:[%s19790_s5 + $0x1a0] sm:$0xff]  ;;  %v11432_v36 = vld [vmem:[%s19790_s5 + $0x168] sm:$0xff]  ;;  %v9771_v30 = vmul.f32 %v18952_v9, %v18895_v5 }
 0x5b8   : > { %13401 = vmatpush3.msra.mxu1 %v11400_v1  ;;  %13440 = vmatprep.mubr.msk.f32.mxu0 %vm8822_vm4, %v18895_v5  ;;  %v9328_v1 = vrot.slane %v9303_v32, 7  ;;  %v9332_v19 = vrot.slane %v9305_v45, 7  ;;  %v9308_v35 = vmul.f32 %v19202_v50, %v19135_v3  ;;  %v11444_v9 = vld [vmem:[%s19790_s5 + $0x188] sm:$0xff] }
 0x5b9   : > { %13402 = vmatprep.subr.mxu1 %v11399_v46  ;;  %v9798_v45 = vrot.slane %v9771_v30, 7 }
 0x5ba   : > { %13403 = vmatpush3.msra.mxu1 %v11399_v46  ;;  %v11395_v46 = vld [vmem:[%s19790_s5 + $0xc0] sm:$0xff]  ;;  %v9329_v13 = vsel %vm1326_vm3, %v8960_v61, %v9328_v1  ;;  %v9307_v61 = vmul.f32 %v19171_v29, %v19076_v56 }
 0x5bb   : > { %13363 = vmatmul.mubr.msk.f32.gmra.mxu1 %vm8822_vm4, %v8972_v28  ;;  %13404 = vmatprep.subr.mxu1 %v11398_v47 }
 0x5bc   : > { %13365 = vmatprep.mubr.msk.f32.mxu1 %vm8822_vm4, %v8974_v49  ;;  %13405 = vmatpush3.msra.mxu1 %v11398_v47  ;;  %v9330_v47 = vrot.slane %v9304_v20, 7  ;;  %v9336_v49 = vrot.slane %v9307_v61, 7  ;;  %v11431_v20 = vld [vmem:[%s19790_s5 + $0x160] sm:$0xff] }
 0x5bd   : > { %13441 = vmatmul.mubr.msk.f32.vlgmr.msra.gmra.mxu0 %vm8822_vm4, %v18938_v8  ;;  %13406 = vmatprep.subr.mxu1 %v11397_v11 }
 0x5be   : > { %13443 = vmatprep.mubr.msk.f32.mxu0 %vm8822_vm4, %v18977_v57  ;;  %13481 = vmatpush3.msra.mxu0 %v19207_v63  ;;  %v11448_v63 = vld [vmem:[%s19790_s5 + $0x1a8] sm:$0xff]  ;;  %v9331_v28 = vsel %vm1326_vm3, %v9328_v1, %v9330_v47  ;;  %v9333_v32 = vsel %vm1326_vm3, %v9330_v47, %v9332_v19  ;;  %v9773_v1 = vmul.f32 %v19081_v15, %v18977_v57  ;;  %v11430_v47 = vld [vmem:[%s19790_s5 + $0x158] sm:$0xff] }
 0x5bf   : > { %13407 = vmatpush3.msra.mxu1 %v11397_v11  ;;  %13482 = vmatprep.subr.mxu0 %v11449_v37  ;;  %v9334_v11 = vrot.slane %v9306_v24, 7  ;;  %v9774_v15 = vmul.f32 %v19118_v10, %v19022_v43  ;;  %v9310_v10 = vmul.f32 %v19173_v14, %v19211_v17  ;;  %v9775_v24 = vmul.f32 %v19154_v27, %v19076_v56 }
 0x5c0   : > { %13366 = vmatmul.mubr.msk.f32.gmra.mxu1 %vm8822_vm4, %v8976_v39  ;;  %13408 = vmatprep.subr.mxu1 %v11396_v40  ;;  %v9338_v39 = vrot.slane %v9308_v35, 7  ;;  %v9776_v27 = vmul.f32 %v19171_v29, %v19135_v3  ;;  %v9601_v29 = vmul.f32 %v18900_v42, %v19022_v43  ;;  %v9777_v35 = vmul.f32 %v19202_v50, %v19176_v44  ;;  %v11478_v50 = vld [vmem:[%s19790_s5 + $0x220] sm:$0xff] }
 0x5c1   : > { %13483 = vmatpush3.msra.mxu0 %v11449_v37  ;;  %13409 = vmatpush3.msra.mxu1 %v11396_v40  ;;  %v9309_v37 = vmul.f32 %v19219_v48, %v19176_v44  ;;  %v9335_v59 = vsel %vm1326_vm3, %v9332_v19, %v9334_v11  ;;  %v9799_v40 = vrot.slane %v9772_v7, 7  ;;  %v9337_v5 = vsel %vm1326_vm3, %v9334_v11, %v9336_v49  ;;  %v11480_v11 = vld [vmem:[%s19790_s5 + $0x230] sm:$0xff] }
 0x5c2   : > { %13412 = vmatprep.mubr.msk.f32.mxu1 %vm8822_vm4, %v9329_v13  ;;  %13444 = vmatmul.mubr.msk.f32.gmra.mxu0 %vm8822_vm4, %v19022_v43  ;;  %v9339_v19 = vsel %vm1326_vm3, %v9336_v49, %v9338_v39  ;;  %v9805_v49 = vrot.slane %v9775_v24, 7  ;;  %v9807_v30 = vrot.slane %v9776_v27, 7  ;;  %v9778_v42 = vmul.f32 %v19219_v48, %v19211_v17  ;;  %v11466_v48 = vld [vmem:[%s19790_s5 + $0x1f8] sm:$0xff] }
 0x5c3   : > { %13484 = vmatprep.subr.mxu0 %v11448_v63  ;;  %13410 = vmatprep.subr.mxu1 %v11395_v46  ;;  %v9800_v13 = vsel %vm1326_vm3, %v9798_v45, %v9799_v40  ;;  %v9603_v45 = vmul.f32 %v19035_v2, %v19135_v3 }
 0x5c4   : > { %13446 = vmatprep.mubr.msk.f32.mxu0 %vm8822_vm4, %v19076_v56  ;;  %13485 = vmatpush3.msra.mxu0 %v11448_v63  ;;  %v11443_v63 = vld [vmem:[%s19790_s5 + $0x180] sm:$0xff] }
 0x5c5   : > { %13411 = vmatpush3.msra.mxu1 %v11395_v46  ;;  %13486 = vmatprep.subr.mxu0 %v11447_v6  ;;  %v9340_v46 = vrot.slane %v9309_v37, 7  ;;  %v11479_v37 = vld [vmem:[%s19790_s5 + $0x228] sm:$0xff] }
 0x5c6   : > { %13413 = vmatmul.mubr.msk.f32.vlgmr.msra.gmra.mxu1 %vm8822_vm4, %v9331_v28  ;;  %13452 = vmatprep.subr.mxu1 %v11434_v0  ;;  %v11481_v28 = vld [vmem:[%s19790_s5 + $0x238] sm:$0xff] }
 0x5c7   : > { %13487 = vmatpush3.msra.mxu0 %v11447_v6  ;;  %13415 = vmatprep.mubr.msk.f32.mxu1 %vm8822_vm4, %v9333_v32  ;;  %v9801_v6 = vrot.slane %v9773_v1, 7  ;;  %v9341_v61 = vsel %vm1326_vm3, %v9338_v39, %v9340_v46  ;;  %v11429_v32 = vld [vmem:[%s19790_s5 + $0x150] sm:$0xff]  ;;  %v9630_v1 = vrot.slane %v9601_v29, 1  ;;  %v9779_v39 = vmul.f32 0.0, %v19173_v14 }
 0x5c8   : > { %13447 = vmatmul.mubr.msk.f32.gmra.mxu0 %vm8822_vm4, %v19135_v3  ;;  %13453 = vmatpush3.msra.mxu1 %v11434_v0  ;;  %v9803_v0 = vrot.slane %v9774_v15, 7  ;;  %v11465_v14 = vld [vmem:[%s19790_s5 + $0x1f0] sm:$0xff] }
 0x5c9   : > { %13488 = vmatprep.subr.mxu0 %v11446_v41  ;;  %13449 = vmatprep.mubr.msk.f32.mxu0 %vm8822_vm4, %v19176_v44  ;;  %v9631_v15 = vsel %vm837_vm2, %v9628_v18, %v9630_v1  ;;  %v11476_v18 = vld [vmem:[%s19790_s5 + $0x210] sm:$0xff] }
 0x5ca   : > { %13454 = vmatprep.subr.mxu1 %v11433_v62  ;;  %13489 = vmatpush3.msra.mxu0 %v11446_v41  ;;  %v9802_v41 = vsel %vm1326_vm3, %v9799_v40, %v9801_v6  ;;  %v9804_v7 = vsel %vm1326_vm3, %v9801_v6, %v9803_v0  ;;  %v9806_v40 = vsel %vm1326_vm3, %v9803_v0, %v9805_v49 }
 0x5cb   : > { %13455 = vmatpush3.msra.mxu1 %v11433_v62  ;;  %13490 = vmatprep.subr.mxu0 %v11445_v12  ;;  %v9342_v62 = vrot.slane %v9310_v10, 7  ;;  %v9604_v6 = vmul.f32 %v19065_v54, %v19176_v44  ;;  %v9605_v10 = vmul.f32 %v19168_v38, %v19211_v17  ;;  %v11463_v54 = vld [vmem:[%s19790_s5 + $0x1e0] sm:$0xff] }
 0x5cc   : > { %13416 = vmatmul.mubr.msk.f32.gmra.mxu1 %vm8822_vm4, %v9335_v59  ;;  %13456 = vmatprep.subr.mxu1 %v11432_v36  ;;  %v11427_v59 = vld [vmem:[%s19790_s5 + $0x140] sm:$0xff] }
 0x5cd   : > { %13491 = vmatpush3.msra.mxu0 %v11445_v12  ;;  %13418 = vmatprep.mubr.msk.f32.mxu1 %vm8822_vm4, %v9337_v5  ;;  %v11428_v12 = vld [vmem:[%s19790_s5 + $0x148] sm:$0xff]  ;;  %v9808_v5 = vsel %vm1326_vm3, %v9805_v49, %v9807_v30  ;;  %v10073_v49 = vmul.f32 0.0, %v19168_v38 }
 0x5ce   : > { %13450 = vmatmul.mubr.msk.f32.gmra.mxu0 %vm8822_vm4, %v19211_v17  ;;  %13457 = vmatpush3.msra.mxu1 %v11432_v36  ;;  %v9343_v36 = vsel %vm1326_vm3, %v9340_v46, %v9342_v62  ;;  %v11464_v46 = vld [vmem:[%s19790_s5 + $0x1e8] sm:$0xff]  ;;  %v9606_v62 = vmul.f32 0.0, %v19120_v60 }
 0x5cf   : > { %13492 = vmatprep.subr.mxu0 %v11444_v9  ;;  %13458 = vmatprep.subr.mxu1 %v11431_v20  ;;  %v10104_v38 = vrot.slane %v10073_v49, 1 }
 0x5d0   : > { %13493 = vmatpush3.msra.mxu0 %v11444_v9  ;;  %13496 = vmatprep.mubr.msk.f32.mxu0 %vm8822_vm4, %v9800_v13  ;;  %v9809_v9 = vrot.slane %v9777_v35, 7  ;;  %v9813_v13 = vrot.slane %v9779_v39, 7 }
 0x5d1   : > { %13459 = vmatpush3.msra.mxu1 %v11431_v20  ;;  %13494 = vmatprep.subr.mxu0 %v11443_v63  ;;  %v9602_v20 = vmul.f32 %v18929_v55, %v19076_v56  ;;  %v11477_v55 = vld [vmem:[%s19790_s5 + $0x218] sm:$0xff] }
 0x5d2   : > { %13419 = vmatmul.mubr.msk.f32.gmra.mxu1 %vm8822_vm4, %v9339_v19  ;;  %13460 = vmatprep.subr.mxu1 %v11430_v47  ;;  %v9810_v2 = vsel %vm1326_vm3, %v9807_v30, %v9809_v9 }
 0x5d3   : > { %13495 = vmatpush3.msra.mxu0 %v11443_v63  ;;  %13421 = vmatprep.mubr.msk.f32.mxu1 %vm8822_vm4, %v9341_v61  ;;  %v9632_v63 = vrot.slane %v9602_v20, 1 }
 0x5d4   : > { %13461 = vmatpush3.msra.mxu1 %v11430_v47  ;;  %13497 = vmatmul.mubr.msk.f32.vlgmr.msra.gmra.mxu0 %vm8822_vm4, %v9802_v41  ;;  %v10066_v47 = vmul.f32 %v18854_v16, %v18938_v8  ;;  %v11475_v16 = vld [vmem:[%s19790_s5 + $0x208] sm:$0xff]  ;;  %v9638_v41 = vrot.slane %v9605_v10, 1 }
 0x5d5   : > { %13536 = vmatprep.subr.mxu0 %v11481_v28  ;;  %13462 = vmatprep.subr.mxu1 %v11429_v32  ;;  %v9633_v19 = vsel %vm837_vm2, %v9630_v1, %v9632_v63 }
 0x5d6   : > { %13499 = vmatprep.mubr.msk.f32.mxu0 %vm8822_vm4, %v9804_v7  ;;  %13537 = vmatpush3.msra.mxu0 %v11481_v28  ;;  %v10091_v61 = vrot.slane %v10066_v47, 1  ;;  %v9636_v28 = vrot.slane %v9604_v6, 1 }
 0x5d7   : > { %13463 = vmatpush3.msra.mxu1 %v11429_v32  ;;  %13538 = vmatprep.subr.mxu0 %v11480_v11  ;;  %v11474_v32 = vld [vmem:[%s19790_s5 + $0x200] sm:$0xff] }
 0x5d8   : > { %13422 = vmatmul.mubr.msk.f32.gmra.mxu1 %vm8822_vm4, %v9343_v36  ;;  %13464 = vmatprep.subr.mxu1 %v11428_v12  ;;  %v10093_v27 = vsel %vm837_vm2, %v10091_v61, %v10092_v25  ;;  %v9639_v60 = vsel %vm837_vm2, %v9636_v28, %v9638_v41  ;;  %v9640_v25 = vrot.slane %v9606_v62, 1  ;;  %v11459_v36 = vld [vmem:[%s19790_s5 + $0x1c0] sm:$0xff] }
 0x5d9   : > { %13539 = vmatpush3.msra.mxu0 %v11480_v11  ;;  %13465 = vmatpush3.msra.mxu1 %v11428_v12  ;;  %v11462_v11 = vld [vmem:[%s19790_s5 + $0x1d8] sm:$0xff]  ;;  %v11460_v12 = vld [vmem:[%s19790_s5 + $0x1c8] sm:$0xff] }
 0x5da   : > { %13468 = vmatprep.mubr.msk.f32.mxu1 %vm8822_vm4, %v19180_v52  ;;  %13500 = vmatmul.mubr.msk.f32.gmra.mxu0 %vm8822_vm4, %v9806_v40  ;;  %v9811_v52 = vrot.slane %v9778_v42, 7  ;;  %v9641_v29 = vsel %vm837_vm2, %v9638_v41, %v9640_v25 }
 0x5db   : > { %13540 = vmatprep.subr.mxu0 %v11479_v37  ;;  %13466 = vmatprep.subr.mxu1 %v11427_v59 }
 0x5dc   : > { %13502 = vmatprep.mubr.msk.f32.mxu0 %vm8822_vm4, %v9808_v5  ;;  %13541 = vmatpush3.msra.mxu0 %v11479_v37  ;;  %v9812_v33 = vsel %vm1326_vm3, %v9809_v9, %v9811_v52  ;;  %v9814_v24 = vsel %vm1326_vm3, %v9811_v52, %v9813_v13 }
 0x5dd   : > { %13467 = vmatpush3.msra.mxu1 %v11427_v59  ;;  %13542 = vmatprep.subr.mxu0 %v11478_v50 }
 0x5de   : > { %13469 = vmatmul.mubr.msk.f32.vlgmr.msra.gmra.mxu1 %vm8822_vm4, %v19224_v23  ;;  %13508 = vmatprep.subr.mxu1 %v11466_v48  ;;  %v9634_v23 = vrot.slane %v9603_v45, 1 }
 0x5df   : > { %13543 = vmatpush3.msra.mxu0 %v11478_v50  ;;  %13471 = vmatprep.mubr.msk.f32.mxu1 %vm8822_vm4, %v9631_v15 }
 0x5e0   : > { %13503 = vmatmul.mubr.msk.f32.gmra.mxu0 %vm8822_vm4, %v9810_v2  ;;  %13509 = vmatpush3.msra.mxu1 %v11466_v48  ;;  %v9635_v0 = vsel %vm837_vm2, %v9632_v63, %v9634_v23  ;;  %v9637_v7 = vsel %vm837_vm2, %v9634_v23, %v9636_v28 }
 0x5e1   : > { %13544 = vmatprep.subr.mxu0 %v11477_v55  ;;  %13505 = vmatprep.mubr.msk.f32.mxu0 %vm8822_vm4, %v9812_v33 }
 0x5e2   : > { %13510 = vmatprep.subr.mxu1 %v11465_v14  ;;  %13545 = vmatpush3.msra.mxu0 %v11477_v55 }
 0x5e3   : > { %13511 = vmatpush3.msra.mxu1 %v11465_v14  ;;  %13546 = vmatprep.subr.mxu0 %v11476_v18 }
 0x5e4   : > { %13472 = vmatmul.mubr.msk.f32.gmra.mxu1 %vm8822_vm4, %v9633_v19  ;;  %13512 = vmatprep.subr.mxu1 %v11464_v46 }
 0x5e5   : > { %13547 = vmatpush3.msra.mxu0 %v11476_v18  ;;  %13474 = vmatprep.mubr.msk.f32.mxu1 %vm8822_vm4, %v9635_v0 }
 0x5e6   : > { %13506 = vmatmul.mubr.msk.f32.gmra.mxu0 %vm8822_vm4, %v9814_v24  ;;  %13513 = vmatpush3.msra.mxu1 %v11464_v46 }
 0x5e7   : > { %13548 = vmatprep.subr.mxu0 %v11475_v16  ;;  %13514 = vmatprep.subr.mxu1 %v11463_v54 }
 0x5e8   : > { %13549 = vmatpush3.msra.mxu0 %v11475_v16  ;;  %13552 = vmatprep.mubr.msk.f32.mxu0 %vm8822_vm4, %v10093_v27 }
 0x5e9   : > { %13515 = vmatpush3.msra.mxu1 %v11463_v54  ;;  %13550 = vmatprep.subr.mxu0 %v11474_v32 }
 0x5ea   : > { %13475 = vmatmul.mubr.msk.f32.gmra.mxu1 %vm8822_vm4, %v9637_v7  ;;  %13516 = vmatprep.subr.mxu1 %v11462_v11 }
 0x5eb   : > { %13551 = vmatpush3.msra.mxu0 %v11474_v32  ;;  %13477 = vmatprep.mubr.msk.f32.mxu1 %vm8822_vm4, %v9639_v60 }
 0x5ec   : > { %13517 = vmatpush3.msra.mxu1 %v11462_v11  ;;  %13553 = vmatmul.mubr.msk.f32.vlgmr.msra.gmra.mxu0 %vm8822_vm4, %v19292_v21  ;;  %v10106_v21 = vsel %vm837_vm2, %v10104_v38, %v9640_v25 }
 0x5ed   : > { %13518 = vmatprep.subr.mxu1 %v11461_v34  ;;  %13555 = vmatprep.mubr.msk.f32.mxu0 %vm8822_vm4, %v19295_v31 }
 0x5ee   : > { %13519 = vmatpush3.msra.mxu1 %v11461_v34  ;;  %13583 = vmatprep.subr.mxu0 %v20700_v26 }
 0x5ef   : > { %13478 = vmatmul.mubr.msk.f32.gmra.mxu1 %vm8822_vm4, %v9641_v29  ;;  %13520 = vmatprep.subr.mxu1 %v11460_v12 }
 0x5f0   : > { %13521 = vmatpush3.msra.mxu1 %v11460_v12  ;;  %13524 = vmatprep.mubr.msk.f32.mxu1 %vm8822_vm4, %v18938_v8  ;;  %v10105_v8 = vsel %vm837_vm2, %v10102_v22, %v10104_v38  ;;  %vm14197_vm2 = vmmov 0  }
 0x5f1   : > { %13556 = vmatmul.mubr.msk.f32.gmra.mxu0 %vm8822_vm4, %v19306_v53  ;;  %13522 = vmatprep.subr.mxu1 %v11459_v36 }
 0x5f2   : > { %13558 = vmatprep.mubr.msk.f32.mxu0 %vm8822_vm4, %v19314_v51  ;;  %13523 = vmatpush3.msra.mxu1 %v11459_v36 }
 0x5f3   : > { %13525 = vmatmul.mubr.msk.f32.vlgmr.msra.gmra.mxu1 %vm8822_vm4, %v18977_v57  ;;  %v10236_v57 = vld [vmem:[%s19793_s8] sm:$0xff] }
 0x5f4   : > { %13527 = vmatprep.mubr.msk.f32.mxu1 %vm8822_vm4, %v19022_v43 }
 0x5f5   : > { %13559 = vmatmul.mubr.msk.f32.gmra.mxu0 %vm8822_vm4, %v19319_v58 }
 0x5f6   : > { %13561 = vmatprep.mubr.msk.f32.mxu0 %vm8822_vm4, %v10105_v8 }
 0x5f7   : > { %13528 = vmatmul.mubr.msk.f32.gmra.mxu1 %vm8822_vm4, %v19076_v56 }
 0x5f8   : > { %13530 = vmatprep.mubr.msk.f32.mxu1 %vm8822_vm4, %v19135_v3 }
 0x5f9   : > { %13562 = vmatmul.mubr.msk.f32.gmra.mxu0 %vm8822_vm4, %v10106_v21 }
 0x5fb   : > { %13531 = vmatmul.mubr.msk.f32.gmra.mxu1 %vm8822_vm4, %v19176_v44 }
 0x5fc   : > { %13533 = vmatprep.mubr.msk.f32.mxu1 %vm8822_vm4, %v19211_v17 }
 0x5ff   : > { %13534 = vmatmul.mubr.f32.gmra.mxu1 %v20700_v26 }
 0x600   : > { %13580 = vmatprep.mubr.msk.f32.mxu1 %vm8822_vm4, %v10236_v57 }
 0x654   : > { %v19559_v43 = vpop.f32.mrf.mxu1 }
 0x656   : > { %v19561_v56 = vpop.f32.mrf.mxu1 }
 0x65c   : > { %v19563_v3 = vpop.f32.mrf.mxu1 }
 0x65d   : > { %v19565_v4 = vpop.f32.mrf.mxu0 }
 0x65e   : > { %v19567_v44 = vpop.f32.mrf.mxu1 }
 0x65f   : > { %v19569_v17 = vpop.f32.mrf.mxu0 }
 0x664   : > { %v13336_v31 = vpop.f32.mrf.mxu1 }
 0x665   : > { %v19571_v22 = vpop.f32.mrf.mxu0 }
 0x666   : > { %v8932_v53 = vpop.f32.mrf.mxu1 }
 0x667   : > { %v19573_v58 = vpop.f32.mrf.mxu0 }
 0x66d   : > { %v13339_v51 = vpop.f32.mrf.mxu1 }
 0x66e   : > { %v13392_v35 = vpop.f32.mrf.mxu0 }
 0x66f   : > { %v8942_v30 = vpop.f32.mrf.mxu1 }
 0x670   : > { %v9276_v42 = vpop.f32.mrf.mxu0 }
 0x671   : > { %v13358_v37 = vpop.f32.mrf.mxu1 }
 0x673   : > { %v19575_v59 = vpop.f32.mrf.mxu1 }
 0x676   : > { %v13361_v40 = vpop.f32.mrf.mxu1 }
 0x677   : > { %v13395_v50 = vpop.f32.mrf.mxu0 }
 0x678   : > { %v9069_v1 = vpop.f32.mrf.mxu1 }
 0x679   : > { %v9286_v5 = vpop.f32.mrf.mxu0 }
 0x67b   : > { %v13364_v48 = vpop.f32.mrf.mxu1 }
 0x67c   : > { %v9085_v36 = vadd.f32 %v13364_v48, %v13336_v31 }
 0x67d   : > { %v19577_v9 = vpop.f32.mrf.mxu0  ;;  %v9079_v20 = vpop.f32.mrf.mxu1 }
 0x67e   : > { %v9080_v57 = vadd.f32 %v9079_v20, %v8932_v53 }
 0x67f   : > { %v19579_v52 = vpop.f32.mrf.mxu0 }
 0x680   : > { %v13367_v45 = vpop.f32.mrf.mxu1 }
 0x681   : > { %v9095_v12 = vadd.f32 %v13367_v45, %v13339_v51 }
 0x682   : > { %v19581_v39 = vpop.f32.mrf.mxu0  ;;  %v9089_v15 = vpop.f32.mrf.mxu1 }
 0x683   : > { %v9090_v38 = vadd.f32 %v9089_v15, %v8942_v30  ;;  %v9302_v26 = vadd.f32 %v13395_v50, %v9095_v12  ;;  %v9299_v30 = vadd.f32 %v9276_v42, %v9080_v57  ;;  %v9065_v15 = vadd.f32 %v13358_v37, %v19559_v43 }
 0x684   : > { %v19583_v55 = vpop.f32.mrf.mxu0 }
 0x685   : > { %v9296_v42 = vadd.f32 %v19565_v4, %v9065_v15 }
 0x686   : > { %v19585_v2 = vpop.f32.mrf.mxu1 }
 0x688   : > { %v13448_v14 = vpop.f32.mrf.mxu0  ;;  %v19587_v63 = vpop.f32.mrf.mxu1 }
 0x68a   : > { %v9571_v33 = vpop.f32.mrf.mxu0 }
 0x68c   : > { %v13417_v18 = vpop.f32.mrf.mxu1 }
 0x68e   : > { %v13451_v23 = vpop.f32.mrf.mxu0  ;;  %v9436_v46 = vpop.f32.mrf.mxu1 }
 0x690   : > { %v9581_v13 = vpop.f32.mrf.mxu0 }
 0x692   : > { %v13420_v47 = vpop.f32.mrf.mxu1 }
 0x694   : > { %v19589_v6 = vpop.f32.mrf.mxu0  ;;  %v9446_v10 = vpop.f32.mrf.mxu1 }
 0x695   : > { %20726 = vst [vmem:[#allocation171_spill] sm:$0xff] %v19589_v6  ;;  %v9075_v6 = vadd.f32 %v13361_v40, %v19563_v3  ;;  %v9469_v20 = vadd.f32 %v9446_v10, %v9299_v30 }
 0x696   : > { %v19591_v19 = vpop.f32.mrf.mxu0 }
 0x697   : > { %20727 = vst [vmem:[#allocation180_spill] sm:$0xff] %v19591_v19  ;;  %v9298_v50 = vadd.f32 %v19571_v22, %v9075_v6 }
 0x698   : > { %v13423_v0 = vpop.f32.mrf.mxu1 }
 0x699   : > { %v9468_v40 = vadd.f32 %v13417_v18, %v9298_v50 }
 0x69a   : > { %v19593_v16 = vpop.f32.mrf.mxu0  ;;  %v9456_v54 = vpop.f32.mrf.mxu1 }
 0x69b   : > { %20728 = vst [vmem:[#allocation181_spill] sm:$0xff] %v19593_v16  ;;  %v9301_v16 = vadd.f32 %v9286_v5, %v9090_v38 }
 0x69c   : > { %v19595_v24 = vpop.f32.mrf.mxu0 }
 0x69d   : > { %20729 = vst [vmem:[#allocation182_spill] sm:$0xff] %v19595_v24  ;;  %v9300_v24 = vadd.f32 %v13392_v35, %v9085_v36  ;;  %v9471_v48 = vadd.f32 %v9456_v54, %v9301_v16  ;;  %v9594_v16 = vadd.f32 %v9571_v33, %v9469_v20 }
 0x69e   : > { %v19597_v61 = vpop.f32.mrf.mxu1  ;;  %v20736_v15 = vld [vmem:[#allocation180_spill] sm:$0xff] }
 0x69f   : > { %v9470_v31 = vadd.f32 %v13420_v47, %v9300_v24  ;;  %v9596_v47 = vadd.f32 %v9581_v13, %v9471_v48 }
 0x6a0   : > { %v13504_v28 = vpop.f32.mrf.mxu0  ;;  %v19599_v32 = vpop.f32.mrf.mxu1 }
 0x6a1   : > { %20730 = vst [vmem:[#allocation175_spill] sm:$0xff] %v19599_v32  ;;  %v9472_v32 = vadd.f32 %v13423_v0, %v9302_v26  ;;  %v9060_v26 = vadd.f32 %v19575_v59, %v19561_v56 }
 0x6a2   : > { %v19601_v41 = vpop.f32.mrf.mxu0  ;;  %v20732_v36 = vld [vmem:[#allocation181_spill] sm:$0xff] }
 0x6a3   : > { %v9597_v12 = vadd.f32 %v13451_v23, %v9472_v32  ;;  %v9466_v23 = vadd.f32 %v19585_v2, %v9296_v42  ;;  %v9295_v6 = vadd.f32 %v19569_v17, %v9060_v26  ;;  %v10362_v42 = vld [vmem:[%s19794_s9 + $0x38] sm:$0xff] }
 0x6a4   : > { %v13473_v62 = vpop.f32.mrf.mxu1 }
 0x6a5   : > { %v9591_v2 = vadd.f32 %v19577_v9, %v9466_v23  ;;  %v10356_v23 = vld [vmem:[%s19794_s9 + $0x8] sm:$0xff] }
 0x6a6   : > { %v13507_v27 = vpop.f32.mrf.mxu0  ;;  %v9734_v11 = vpop.f32.mrf.mxu1 }
 0x6a8   : > { %v9927_v7 = vpop.f32.mrf.mxu0 }
 0x6aa   : > { %v13476_v60 = vpop.f32.mrf.mxu1 }
 0x6ac   : > { %v19603_v34 = vpop.f32.mrf.mxu0  ;;  %v9744_v25 = vpop.f32.mrf.mxu1 }
 0x6ad   : > { %20731 = vst [vmem:[#allocation185_spill] sm:$0xff] %v19603_v34  ;;  %v9070_v34 = vadd.f32 %v9069_v1, %v19567_v44  ;;  %v9595_v1 = vadd.f32 %v13448_v14, %v9470_v31  ;;  %v9767_v10 = vadd.f32 %v9744_v25, %v9594_v16  ;;  %v9465_v14 = vadd.f32 %v19587_v63, %v9295_v6  ;;  %v10358_v16 = vld [vmem:[%s19794_s9 + $0x18] sm:$0xff]  ;;  %v10355_v6 = vld [vmem:[%s19794_s9] sm:$0xff] }
 0x6ae   : > { %v19605_v49 = vpop.f32.mrf.mxu0 }
 0x6af   : > { %v13479_v29 = vpop.f32.mrf.mxu1  ;;  %v9297_v3 = vadd.f32 %v19573_v58, %v9070_v34  ;;  %v9768_v37 = vadd.f32 %v13476_v60, %v9595_v1  ;;  %v9593_v58 = vadd.f32 %v19581_v39, %v9468_v40  ;;  %v10366_v40 = vld [vmem:[%s19794_s9 + $0x58] sm:$0xff]  ;;  %v10365_v1 = vld [vmem:[%s19794_s9 + $0x50] sm:$0xff] }
 0x6b0   : > { %v9770_v5 = vadd.f32 %v13479_v29, %v9597_v12  ;;  %v9940_v29 = vadd.f32 %v19601_v41, %v9767_v10  ;;  %v20735_v41 = vld [vmem:[#allocation171_spill] sm:$0xff] }
 0x6b1   : > { %v19607_v8 = vpop.f32.mrf.mxu0  ;;  %v9754_v21 = vpop.f32.mrf.mxu1  ;;  %v9467_v0 = vadd.f32 %v9436_v46, %v9297_v3  ;;  %v9766_v54 = vadd.f32 %v13473_v62, %v9593_v58  ;;  %v9941_v24 = vadd.f32 %v13504_v28, %v9768_v37  ;;  %v10359_v37 = vld [vmem:[%s19794_s9 + $0x20] sm:$0xff] }
 0x6b2   : > { %v9769_v22 = vadd.f32 %v9754_v21, %v9596_v47  ;;  %v9943_v18 = vadd.f32 %v13507_v27, %v9770_v5  ;;  %v9590_v27 = vadd.f32 %v19579_v52, %v9465_v14  ;;  %v20734_v21 = vld [vmem:[#allocation182_spill] sm:$0xff]  ;;  %v10364_v5 = vld [vmem:[%s19794_s9 + $0x48] sm:$0xff]  ;;  %v10363_v47 = vld [vmem:[%s19794_s9 + $0x40] sm:$0xff] }
 0x6b3   : > { %v19609_v19 = vpop.f32.mrf.mxu1  ;;  %v19613_v51 = vpop.f32.mrf.mxu0  ;;  %v9592_v13 = vadd.f32 %v19583_v55, %v9467_v0  ;;  %v9764_v55 = vadd.f32 %v19597_v61, %v9591_v2  ;;  %v9939_v38 = vadd.f32 %v20732_v36, %v9766_v54  ;;  %v10361_v0 = vld [vmem:[%s19794_s9 + $0x30] sm:$0xff] }
 0x6b4   : > { %v9942_v32 = vadd.f32 %v9927_v7, %v9769_v22  ;;  %v20733_v7 = vld [vmem:[#allocation175_spill] sm:$0xff]  ;;  %v20737_v26 = vld [vmem:[#allocation185_spill] sm:$0xff] }
 0x6b5   : > { %v19615_v45 = vpop.f32.mrf.mxu1  ;;  %v13560_v44 = vpop.f32.mrf.mxu0  ;;  %v9765_v60 = vadd.f32 %v9734_v11, %v9592_v13  ;;  %v9763_v9 = vadd.f32 %v20733_v7, %v9590_v27  ;;  %v9937_v30 = vadd.f32 %v20735_v41, %v9764_v55  ;;  %v10357_v22 = vld [vmem:[%s19794_s9 + $0x10] sm:$0xff]  ;;  %v10459_v41 = vld [vmem:[%s19796_s11 + $0x38] sm:$0xff] }
 0x6b7   : > { %v13529_v53 = vpop.f32.mrf.mxu1  ;;  %v10209_v56 = vpop.f32.mrf.mxu0  ;;  %v9938_v57 = vadd.f32 %v20734_v21, %v9765_v60  ;;  %v10059_v61 = vadd.f32 %v19609_v19, %v9937_v30  ;;  %v9936_v50 = vadd.f32 %v20736_v15, %v9763_v9  ;;  %v10237_v19 = vld [vmem:[%s19793_s8 + $0x8] sm:$0xff]  ;;  %v10458_v30 = vld [vmem:[%s19796_s11 + $0x30] sm:$0xff] }
 0x6b8   : > { %v10061_v11 = vadd.f32 %v13529_v53, %v9939_v38  ;;  %v10454_v15 = vld [vmem:[%s19796_s11 + $0x10] sm:$0xff] }
 0x6b9   : > { %v10029_v35 = vpop.f32.mrf.mxu1  ;;  %v13563_v46 = vpop.f32.mrf.mxu0  ;;  %v10058_v53 = vadd.f32 %v19615_v45, %v9936_v50  ;;  %v10229_v3 = vadd.f32 %v20737_v26, %v10059_v61  ;;  %v10368_v45 = vld [vmem:[%s19794_s9 + $0x68] sm:$0xff]  ;;  %v10455_v61 = vld [vmem:[%s19796_s11 + $0x18] sm:$0xff] }
 0x6ba   : > { %v10060_v52 = vadd.f32 %v10029_v35, %v9938_v57  ;;  %v10231_v20 = vadd.f32 %v19607_v8, %v10061_v11  ;;  %v20738_v8 = vmov 0.0   ;;  %v10367_v35 = vld [vmem:[%s19794_s9 + $0x60] sm:$0xff]  ;;  %v10453_v50 = vld [vmem:[%s19796_s11 + $0x8] sm:$0xff] }
 0x6bb   : > { %v13532_v43 = vpop.f32.mrf.mxu1  ;;  %v10219_v63 = vpop.f32.mrf.mxu0  ;;  %13615 = vmatprep.mubr.msk.f32.mxu0 %vm14197_vm2, %v20738_v8 }
 0x6bc   : > { %v10063_v34 = vadd.f32 %v13532_v43, %v9941_v24  ;;  %v10230_v12 = vadd.f32 %v19613_v51, %v10060_v52  ;;  %v10370_v51 = vld [vmem:[%s19794_s9 + $0x78] sm:$0xff]  ;;  %v10360_v43 = vld [vmem:[%s19794_s9 + $0x28] sm:$0xff] }
 0x6bd   : > { %v10039_v59 = vpop.f32.mrf.mxu1  ;;  %13584 = vmatpush3.msra.mxu0 %v10370_v51  ;;  %v10457_v52 = vld [vmem:[%s19796_s11 + $0x28] sm:$0xff] }
 0x6be   : > { %v10062_v62 = vadd.f32 %v10039_v59, %v9940_v29  ;;  %v10233_v31 = vadd.f32 %v13560_v44, %v10063_v34  ;;  %v10228_v44 = vadd.f32 %v19605_v49, %v10058_v53  ;;  %v10369_v49 = vld [vmem:[%s19794_s9 + $0x70] sm:$0xff]  ;;  %13585 = vmatprep.subr.mxu0 %v20738_v8  ;;  %v10371_v53 = vld [vmem:[#allocation10] sm:$0x1] }
 0x6bf   : > { %v13535_v4 = vpop.f32.mrf.mxu1  ;;  %13586 = vmatpush3.msra.mxu0 %v10369_v49 }
 0x6c0   : > { %v10065_v33 = vadd.f32 %v13535_v4, %v9943_v18  ;;  %v10232_v48 = vadd.f32 %v10209_v56, %v10062_v62  ;;  %13587 = vmatprep.subr.mxu0 %v20738_v8  ;;  %v11490_v56 = vld [vmem:[#allocation8] ss:$0 sm:$0xff] }
 0x6c1   : > { %v10049_v17 = vpop.f32.mrf.mxu1  ;;  %13588 = vmatpush3.msra.mxu0 %v10368_v45 }
 0x6c2   : > { %v10064_v39 = vadd.f32 %v10049_v17, %v9942_v32  ;;  %v10235_v25 = vadd.f32 %v13563_v46, %v10065_v33  ;;  %13589 = vmatprep.subr.mxu0 %v20738_v8 }
 0x6c3   : > { %13590 = vmatpush3.msra.mxu0 %v10367_v35 }
 0x6c4   : > { %v10234_v28 = vadd.f32 %v10219_v63, %v10064_v39  ;;  %13564 = vmatprep.subr.mxu1 %v10235_v25  ;;  %13591 = vmatprep.subr.mxu0 %v20738_v8 }
 0x6c5   : > { %13565 = vmatpush3.msra.mxu1 %v10235_v25  ;;  %13592 = vmatpush3.msra.mxu0 %v10366_v40 }
 0x6c6   : > { %13566 = vmatprep.subr.mxu1 %v10234_v28  ;;  %13593 = vmatprep.subr.mxu0 %v20738_v8 }
 0x6c7   : > { %13567 = vmatpush3.msra.mxu1 %v10234_v28  ;;  %13594 = vmatpush3.msra.mxu0 %v10365_v1 }
 0x6c8   : > { %13568 = vmatprep.subr.mxu1 %v10233_v31  ;;  %13595 = vmatprep.subr.mxu0 %v20738_v8 }
 0x6c9   : > { %13569 = vmatpush3.msra.mxu1 %v10233_v31  ;;  %13596 = vmatpush3.msra.mxu0 %v10364_v5 }
 0x6ca   : > { %13570 = vmatprep.subr.mxu1 %v10232_v48  ;;  %13597 = vmatprep.subr.mxu0 %v20738_v8 }
 0x6cb   : > { %13571 = vmatpush3.msra.mxu1 %v10232_v48  ;;  %13598 = vmatpush3.msra.mxu0 %v10363_v47  ;;  %v10456_v48 = vld [vmem:[%s19796_s11 + $0x20] sm:$0xff] }
 0x6cc   : > { %13572 = vmatprep.subr.mxu1 %v10231_v20  ;;  %13599 = vmatprep.subr.mxu0 %v20738_v8 }
 0x6cd   : > { %13573 = vmatpush3.msra.mxu1 %v10231_v20  ;;  %13600 = vmatpush3.msra.mxu0 %v10362_v42  ;;  %v10452_v20 = vld [vmem:[%s19796_s11] sm:$0xff] }
 0x6ce   : > { %13574 = vmatprep.subr.mxu1 %v10230_v12  ;;  %13601 = vmatprep.subr.mxu0 %v20738_v8 }
 0x6cf   : > { %13575 = vmatpush3.msra.mxu1 %v10230_v12  ;;  %13602 = vmatpush3.msra.mxu0 %v10361_v0 }
 0x6d0   : > { %13576 = vmatprep.subr.mxu1 %v10229_v3  ;;  %13603 = vmatprep.subr.mxu0 %v20738_v8 }
 0x6d1   : > { %13577 = vmatpush3.msra.mxu1 %v10229_v3  ;;  %13604 = vmatpush3.msra.mxu0 %v10360_v43 }
 0x6d2   : > { %13578 = vmatprep.subr.mxu1 %v10228_v44  ;;  %13605 = vmatprep.subr.mxu0 %v20738_v8 }
 0x6d3   : > { %13579 = vmatpush3.msra.mxu1 %v10228_v44  ;;  %13606 = vmatpush3.msra.mxu0 %v10359_v37 }
 0x6d4   : > { %13581 = vmatmul.mubr.msk.f32.vlgmr.msra.gmra.mxu1 %vm8822_vm4, %v10237_v19  ;;  %13618 = vmatprep.subr.mxu1 %v20738_v8 }
 0x6d5   : > { %13634 = vmatprep.mubr.msk.f32.mxu1 %vm14197_vm2, %v20738_v8  ;;  %13607 = vmatprep.subr.mxu0 %v20738_v8 }
 0x6d6   : > { %13608 = vmatpush3.msra.mxu0 %v10358_v16  ;;  %13619 = vmatpush3.msra.mxu1 %v10459_v41 }
 0x6d7   : > { %13609 = vmatprep.subr.mxu0 %v20738_v8  ;;  %13620 = vmatprep.subr.mxu1 %v20738_v8 }
 0x6d8   : > { %13610 = vmatpush3.msra.mxu0 %v10357_v22  ;;  %13621 = vmatpush3.msra.mxu1 %v10458_v30 }
 0x6d9   : > { %13611 = vmatprep.subr.mxu0 %v20738_v8  ;;  %13622 = vmatprep.subr.mxu1 %v20738_v8 }
 0x6da   : > { %13612 = vmatpush3.msra.mxu0 %v10356_v23  ;;  %13623 = vmatpush3.msra.mxu1 %v10457_v52 }
 0x6db   : > { %13613 = vmatprep.subr.mxu0 %v20738_v8  ;;  %13624 = vmatprep.subr.mxu1 %v20738_v8 }
 0x6dc   : > { %13614 = vmatpush3.msra.mxu0 %v10355_v6  ;;  %13625 = vmatpush3.msra.mxu1 %v10456_v48 }
 0x6dd   : > { %13626 = vmatprep.subr.mxu1 %v20738_v8 }
 0x6de   : > { %13627 = vmatpush3.msra.mxu1 %v10455_v61 }
 0x6df   : > { %13628 = vmatprep.subr.mxu1 %v20738_v8 }
 0x6e0   : > { %13629 = vmatpush3.msra.mxu1 %v10454_v15 }
 0x6e1   : > { %13630 = vmatprep.subr.mxu1 %v20738_v8 }
 0x6e2   : > { %13631 = vmatpush3.msra.mxu1 %v10453_v50 }
 0x6e3   : > { %13632 = vmatprep.subr.mxu1 %v20738_v8  ;;  %v10460_v8 = vld [vmem:[#allocation11] sm:$0x1] }
 0x6e4   : > { %13633 = vmatpush3.msra.mxu1 %v10452_v20 }
 0x794   : > { %v13582_v59 = vpop.f32.mrf.mxu1 }
 0x795   : > { %v10323_v58 = vadd.f32 %v13582_v59, %v11490_v56 }
 0x796   : > { %v10317_v10 = vpop.f32.mrf.mxu1 }
 0x797   : > { %v10327_v18 = vmin.f32 %v10323_v58, 20.0  ;;  %v10318_v14 = vadd.f32 %v11490_v56, %v10317_v10 }
 0x799   : > { %v10330_v13 = vmul.f32 1.442695, %v10327_v18  ;;  %v10326_v4 = vmin.f32 %v10318_v14, 20.0 }
 0x79b   : > { %13904 = vpow2.f32 %v10330_v13  ;;  %v10328_v46 = vmul.f32 1.442695, %v10326_v4 }
 0x79d   : > { %13906 = vpow2.f32 %v10328_v46 }
 0x7a8   : > { %v13905_v54 = vpop.eup %13904 }
 0x7a9   : > { %v10333_v24 = vadd.f32 1.0, %v13905_v54 }
 0x7aa   : > { %v13907_v33 = vpop.eup %13906 }
 0x7ab   : > { %v10335_v32 = vmul.f32 %v10333_v24, %v10333_v24  ;;  %v10332_v2 = vadd.f32 1.0, %v13907_v33 }
 0x7ad   : > { %v10339_v60 = vadd.f32 1.0, %v10335_v32  ;;  %v10334_v17 = vmul.f32 %v10332_v2, %v10332_v2  ;;  %v11494_v29 = vadd.f32 -1.0, %v10335_v32 }
 0x7af   : > { %13908 = vrcp.f32 %v10339_v60  ;;  %v10338_v34 = vadd.f32 1.0, %v10334_v17  ;;  %v11493_v27 = vadd.f32 -1.0, %v10334_v17 }
 0x7b1   : > { %13910 = vrcp.f32 %v10338_v34 }
 0x7bc   : > { %v13909_v39 = vpop.eup %13908 }
 0x7bd   : > { %v10343_v25 = vmul.f32 %v13909_v39, %v11494_v29 }
 0x7be   : > { %v13911_v63 = vpop.eup %13910 }
 0x7bf   : > { %v10341_v55 = vmul.f32 %v13911_v63, %v11493_v27  ;;  %v10345_v36 = vmul.f32 %v10343_v25, %v10323_v58 }
 0x7c1   : > { %v10344_v38 = vmul.f32 %v10341_v55, %v10318_v14 }
 0x7c3   : > { %v10346_v62 = vadd.f32 %v10345_v36, %v10344_v38 }
 0x7c5   : > { %v10347_v28 = vrot.slane %v10346_v62, 4 }
 0x7c7   : > { %v10348_v7 = vadd.f32 %v10347_v28, %v10346_v62 }
 0x7c9   : > { %v10349_v9 = vrot.slane %v10348_v7, 2 }
 0x7cb   : > { %v10350_v11 = vadd.f32 %v10349_v9, %v10348_v7 }
 0x7cd   : > { %v10351_v21 = vrot.slane %v10350_v11, 1 }
 0x7cf   : > { %v10352_v57 = vadd.f32 %v10351_v21, %v10350_v11 }
 0x7d1   : > { %v10354_v31 = vmul.f32 0.0625, %v10352_v57 }
 0x7d3   : > { %13616 = vmatmul.mubr.f32.vlgmr.msra.gmra.mxu0 %v10354_v31 }
 0x893   : > { %v10438_v12 = vpop.f32.mrf.mxu0 }
 0x894   : > { %v10439_v26 = vadd.f32 %v10438_v12, %v10371_v53 }
 0x895   : > { %v13617_v3 = vpop.f32.mrf.mxu0 }
 0x896   : > { %v10442_v44 = vmin.f32 %v10439_v26, 20.0 }
 0x898   : > { %v10443_v19 = vmul.f32 1.442695, %v10442_v44 }
 0x89a   : > { %13912 = vpow2.f32 %v10443_v19 }
 0x8a7   : > { %v13913_v51 = vpop.eup %13912 }
 0x8a8   : > { %v10445_v49 = vadd.f32 1.0, %v13913_v51 }
 0x8aa   : > { %v10446_v45 = vmul.f32 %v10445_v49, %v10445_v49 }
 0x8ac   : > { %v10448_v35 = vadd.f32 1.0, %v10446_v45  ;;  %v11495_v40 = vadd.f32 -1.0, %v10446_v45 }
 0x8ae   : > { %13914 = vrcp.f32 %v10448_v35 }
 0x8bb   : > { %v13915_v1 = vpop.eup %13914 }
 0x8bc   : > { %v10450_v5 = vmul.f32 %v13915_v1, %v11495_v40 }
 0x8be   : > { %v10451_v47 = vmul.f32 %v10450_v5, %v10439_v26 }
 0x8c0   : > { %13635 = vmatmul.mubr.msk.f32.vlgmr.msra.gmra.mxu1 %vm8822_vm4, %v10451_v47 }
 0x980   : > { %v10530_v42 = vpop.f32.mrf.mxu1 }
 0x981   : > { %v10531_v0 = vadd.f32 %v10530_v42, %v10460_v8 }
 0x982   : > { %v13636_v43 = vpop.f32.mrf.mxu1 }
 0x983   : > { %10534 = vst [vmem:[%s510_s20] sm:$0x1] %v10531_v0 }
 0x984   : > { %14122 = shalt.err (!%p14119_p0)
}
 0x985   : > { %s14123_s15 = scalar_lea.hbm %s19750_s19, 16  ;;  %s14127_s16 = scalar_lea.hbm %s19798_s13, 32 }
 0x986   : > { %p14124_p1 = scmp.ne.s32.totalorder %s19750_s19, %s14123_s15  ;;  %p14128_p10 = scmp.lt.s32.totalorder %s19750_s19, %s19798_s13 }
 0x987   : > { %p14129_p3 = scmp.lt.s32.totalorder %s14127_s16, %s14123_s15 }
 0x988   : > { %p14125_p5 = pnand %p14124_p1, %p20739_p7 }
 0x989   : > { %p14130_p2 = por %p14129_p3, %p14128_p10 }
 0x98a   : > { %p14126_p12 = pneg %p14125_p5 }
 0x98c   : > { %p14131_p4 = pnand %p14130_p2, %p14126_p12 }
 0x98e   : > { %14134 = shalt.err (!%p14131_p4)
}
 0x98f   : > { %13663 = dma.vmem_to_hbm [thread:$0]  (%p20739_p7), %s10549_s23, 16, %s19750_s19, %s10536_s28  }
 0x990 PF: > { %s20740_s24 = sld [smem:[#allocation21_spill]] }
 0x991   : > { %s20741_s25 = sld [smem:[#allocation19_spill]] }
 0x992   : > { %s20742_s22 = sld [smem:[#allocation24_spill]] }
 0x996   : > { %p13700_p8 = scmp.ge.s32.totalorder %s20740_s24, 2 }
 0x997   : > { %s10560_s30 = sand.u32 1, %s20741_s25  }
 0x998   : > { %p20743_p9 = scmp.ne.s32.totalorder %s20742_s22, 0  ;;  %s10561_s29 = scalar_lea.sflag [#allocation4], %s10560_s30 }
 0x99a   : > { %p13685_p11 = pnand %p13700_p8, %p20743_p9 }
 0x99c   : > { %p13686_p6 = pneg %p13685_p11 }
 0x99e   : > { %14168 = dma.done.wait (%p13686_p6), %s10561_s29, 16  }
 0x99f   : > { %14170 = vsyncadd (%p13686_p6), %s10561_s29, 4294967280  ;;  %s20744_s28 = sld [smem:[#allocation22_spill]]  ;;  %s20747_s25 = smov %s14177_s26 }
 0x9a0   : > { %s20745_s14 = sld [smem:[#allocation20_spill]] }
 0x9a1   : > { %s20746_s27 = sld [smem:[#allocation23_spill]] }
 0x9a5   : > { %p27_p13 = scmp.ge.s32.totalorder %s20744_s28, 4  }
 0x9a6   : > { %s20748_s26 = smov %s20745_s14 }
 0x9a7   :  { %29 = sbr.rel (!%p27_p13) target bundleno = 7 (0x7), region = 156 }
 0x9ac   :  { %10565 = vsyncpa [#allocation3], 1 }
 0x9ad   :  { %10567 = vsyncpa [#allocation3 + $0x1], 1 }
 0x9ae   :  { %10568 = vsyncpa [#allocation6], 1 }
 0x9af   :  { %10569 = vsyncpa [#allocation9], 1 }
 0x9b0   :  { %10570 = vsyncpa [#allocation12], 1 }
 0x9b1   :  { %10571 = vsyncpa [#allocation4], 1 }
 0x9b2   :  { %10573 = vsyncpa [#allocation4 + $0x1], 1 }

</bundles_post_ra>
